<compile_context>
chip_gen: v5e
topology: v5e:2x2
jax: 0.10.0
libtpu: 0.0.40
codegen_flags: <defaults>
</compile_context>

<pallas_src>
import math

import jax
import jax.numpy as jnp
import numpy as np
from jax.experimental import pallas as pl
from jax.experimental.pallas import tpu as pltpu

_EPS = 1e-5


# ------------------------------ Pallas kernel -------------------------------

def _upsample_fused_kernel(x_ref, shm_ref,
                           w1_ref, sc1_ref, of1_ref,
                           wc1_ref, sc2_ref, of2_ref,
                           w2_ref, sc3_ref, of3_ref,
                           wc2_ref, sc4_ref, of4_ref,
                           o_ref):
    f32 = jnp.float32

    def shift(img, sh, sw):
        # zero-padded spatial shift on the coarse grid as an MXU matmul with a
        # precomputed 0/1 operator:  out[c, hW+w] = img[c, (h+sh)W + (w+sw)] or 0
        if sh == 0 and sw == 0:
            return img
        m = shm_ref[(sh + 1) * 3 + (sw + 1)]           # (HW, HW)
        return jnp.dot(img, m, preferred_element_type=f32)

    def convt(y, w_r, sc_r, of_r):
        # stacked 2x2-transposed-conv: one (4*Cout, Cin) @ (Cin, HW) matmul,
        # fused BN affine + ReLU; returns the 4 tap images, tap t = di*2 + dj.
        t = jnp.dot(w_r[...], y, preferred_element_type=f32)
        t = jnp.maximum(t * sc_r[...] + of_r[...], 0.0)
        co = w_r.shape[0] // 4
        return [t[k * co:(k + 1) * co, :] for k in range(4)]

    def conv3(sub, S, w_r, sc_r, of_r):
        # 3x3 / pad 1 conv on an image held as S x S sub-lattices of the coarse
        # grid.  Output sub-lattice (r, s), tap (ky, kx) reads sub-lattice
        # ((r+ky-1) mod S, (s+kx-1) mod S) shifted by the carry, so each output
        # sub-lattice is one K-stacked (Cout, 9*Cin) @ (9*Cin, HW) matmul.
        cache = {}

        def shifted(rp, sp, sh, sw):
            key = (rp, sp, sh, sw)
            if key not in cache:
                cache[key] = shift(sub[rp][sp], sh, sw)
            return cache[key]

        out = []
        for r in range(S):
            row = []
            for s in range(S):
                cols = []
                for ky in range(3):
                    sh, rp = divmod(r + ky - 1, S)      # floor semantics
                    for kx in range(3):
                        sw, sp = divmod(s + kx - 1, S)
                        cols.append(shifted(rp, sp, sh, sw))
                xk = jnp.concatenate(cols, axis=0)      # (9*Cin, HW)
                o = jnp.dot(w_r[...], xk, preferred_element_type=f32)
                row.append(jnp.maximum(o * sc_r[...] + of_r[...], 0.0))
            out.append(row)
        return out

    x = x_ref[0]                                        # (Cin, HW)

    # ConvT1 + BN + ReLU : 1 image -> 2x2 sub-lattices (factor-2 grid)
    t1 = convt(x, w1_ref, sc1_ref, of1_ref)
    sub = [[t1[0], t1[1]], [t1[2], t1[3]]]

    # Conv3x3 + BN + ReLU on the factor-2 grid
    sub = conv3(sub, 2, wc1_ref, sc2_ref, of2_ref)

    # ConvT2 + BN + ReLU : factor-2 -> factor-4 sub-lattices (pointwise per px)
    sub4 = [[None] * 4 for _ in range(4)]
    for r in range(2):
        for s in range(2):
            taps = convt(sub[r][s], w2_ref, sc3_ref, of3_ref)
            for di in range(2):
                for dj in range(2):
                    sub4[2 * r + di][2 * s + dj] = taps[di * 2 + dj]

    # Conv3x3 + BN + ReLU on the factor-4 grid
    out = conv3(sub4, 4, wc2_ref, sc4_ref, of4_ref)

    for r in range(4):
        for s in range(4):
            o_ref[0, r * 4 + s, :, :] = out[r][s]       # lane-dense (C2, HW)


# ------------------------------ JAX wrapper ----------------------------------

def _fold_bn(conv_bias, gamma, beta, mean, var, eps=_EPS):
    scale = gamma / jnp.sqrt(var + eps)
    shift = beta + (conv_bias - mean) * scale
    return scale, shift


def _shift_operators(H, W):
    # dense 0/1 shift operators for (sh, sw) in {-1,0,1}^2, index (sh+1)*3+(sw+1)
    HW = H * W
    m = np.zeros((9, HW, HW), np.float32)
    for sh in (-1, 0, 1):
        for sw in (-1, 0, 1):
            k = (sh + 1) * 3 + (sw + 1)
            for h in range(H):
                hh = h + sh
                if not (0 <= hh < H):
                    continue
                for w in range(W):
                    ww = w + sw
                    if 0 <= ww < W:
                        m[k, hh * W + ww, h * W + w] = 1.0
    return m


def upsample_forward(p, x_nchw):
    """Fused UpSample forward; x is NCHW, returns NCHW (N, Cout, 4H, 4W)."""
    N, Cin, H, W = x_nchw.shape
    C1 = p['c1_w'].shape[0]            # hidden channels
    C2 = p['c2_w'].shape[0]            # out channels
    HW = H * W

    sc1, of1 = _fold_bn(p['ct1_b'], p['bn1_g'], p['bn1_b'], p['bn1_m'], p['bn1_v'])
    sc2, of2 = _fold_bn(p['c1_b'],  p['bn2_g'], p['bn2_b'], p['bn2_m'], p['bn2_v'])
    sc3, of3 = _fold_bn(p['ct2_b'], p['bn3_g'], p['bn3_b'], p['bn3_m'], p['bn3_v'])
    sc4, of4 = _fold_bn(p['c2_b'],  p['bn4_g'], p['bn4_b'], p['bn4_m'], p['bn4_v'])

    # ConvT weights (Cin, Cout, 2, 2) -> (4*Cout, Cin), taps stacked on rows
    w1s = jnp.transpose(p['ct1_w'], (2, 3, 1, 0)).reshape(4 * C1, Cin)
    w2s = jnp.transpose(p['ct2_w'], (2, 3, 1, 0)).reshape(4 * C2, C1)
    # Conv3x3 weights (Cout, Cin, 3, 3) -> (Cout, 9*Cin), taps stacked on K
    wc1 = jnp.transpose(p['c1_w'], (0, 2, 3, 1)).reshape(C1, 9 * C1)
    wc2 = jnp.transpose(p['c2_w'], (0, 2, 3, 1)).reshape(C2, 9 * C2)

    col = lambda v: v.reshape(-1, 1)
    sc1s, of1s = col(jnp.tile(sc1, 4)), col(jnp.tile(of1, 4))
    sc3s, of3s = col(jnp.tile(sc3, 4)), col(jnp.tile(of3, 4))
    sc2c, of2c = col(sc2), col(of2)
    sc4c, of4c = col(sc4), col(of4)

    shm = jnp.asarray(_shift_operators(H, W))
    x_flat = x_nchw.reshape(N, Cin, HW)

    def full(shape):                   # VMEM-resident constant blocks
        return pl.BlockSpec(shape, lambda n, _s=shape: (0,) * len(_s))

    out = pl.pallas_call(
        _upsample_fused_kernel,
        out_shape=jax.ShapeDtypeStruct((N, 16, C2, HW), jnp.float32),
        grid=(N,),
        in_specs=[
            pl.BlockSpec((1, Cin, HW), lambda n: (n, 0, 0)),
            full((9, HW, HW)),
            full((4 * C1, Cin)), full((4 * C1, 1)), full((4 * C1, 1)),
            full((C1, 9 * C1)), full((C1, 1)), full((C1, 1)),
            full((4 * C2, C1)), full((4 * C2, 1)), full((4 * C2, 1)),
            full((C2, 9 * C2)), full((C2, 1)), full((C2, 1)),
        ],
        out_specs=pl.BlockSpec((1, 16, C2, HW), lambda n: (n, 0, 0, 0)),
        compiler_params=pltpu.CompilerParams(
            dimension_semantics=("parallel",)),
    )(x_flat, shm,
      w1s, sc1s, of1s, wc1, sc2c, of2c,
      w2s, sc3s, of3s, wc2, sc4c, of4c)

    # single tiny final interleave: out[n, r*4+s, c, h*W+w] -> y[n, c, 4h+r, 4w+s]
    out = out.reshape(N, 4, 4, C2, H, W)
    return jnp.transpose(out, (0, 3, 4, 1, 5, 2)).reshape(N, C2, 4 * H, 4 * W)


# ---------------------------- parameters (init) -------------------------------

def init_upsample_params(key, in_channels, out_channels, ratio=1):
    hidden = in_channels // ratio
    ks = jax.random.split(key, 8)

    def kaiming(k, shape):
        fan_in = shape[1] * shape[2] * shape[3]
        return math.sqrt(2.0 / fan_in) * jax.random.normal(k, shape, jnp.float32)

    def bias(k, n):
        return 0.01 * jax.random.normal(k, (n,), jnp.float32)

    p = {}
    p['ct1_w'] = kaiming(ks[0], (in_channels, hidden, 2, 2));       p['ct1_b'] = bias(ks[1], hidden)
    p['c1_w']  = kaiming(ks[2], (hidden, hidden, 3, 3));            p['c1_b']  = bias(ks[3], hidden)
    p['ct2_w'] = kaiming(ks[4], (hidden, out_channels, 2, 2));      p['ct2_b'] = bias(ks[5], out_channels)
    p['c2_w']  = kaiming(ks[6], (out_channels, out_channels, 3, 3)); p['c2_b'] = bias(ks[7], out_channels)
    for i, c in zip((1, 2, 3, 4), (hidden, hidden, out_channels, out_channels)):
        p[f'bn{i}_g'] = jnp.ones((c,), jnp.float32)
        p[f'bn{i}_b'] = jnp.zeros((c,), jnp.float32)
        p[f'bn{i}_m'] = jnp.zeros((c,), jnp.float32)
        p[f'bn{i}_v'] = jnp.ones((c,), jnp.float32)
    return p


# ---------------------------- pure-JAX reference ------------------------------

def _ref_convt(x, w, b):
    N, H, W, Cin = x.shape
    Cout = w.shape[1]
    y = jnp.einsum('nhwc,cokl->nhkwlo', x, w)
    return y.reshape(N, 2 * H, 2 * W, Cout) + b


def _ref_conv3(x, w, b):
    N, H, W, Cin = x.shape
    Cout = w.shape[0]
    xp = jnp.pad(x, ((0, 0), (1, 1), (1, 1), (0, 0)))
    out = jnp.zeros((N, H, W, Cout), jnp.float32)
    for ky in range(3):
        for kx in range(3):
            out = out + jnp.einsum('nhwc,co->nhwo',
                                   xp[:, ky:ky + H, kx:kx + W, :],
                                   w[:, :, ky, kx].T)
    return out + b


def _ref_upsample(p, x):
    def bn_relu(y, g, b, m, v):
        return jax.nn.relu((y - m) / jnp.sqrt(v + _EPS) * g + b)
    y = bn_relu(_ref_convt(x, p['ct1_w'], p['ct1_b']),
                p['bn1_g'], p['bn1_b'], p['bn1_m'], p['bn1_v'])
    y = bn_relu(_ref_conv3(y, p['c1_w'], p['c1_b']),
                p['bn2_g'], p['bn2_b'], p['bn2_m'], p['bn2_v'])
    y = bn_relu(_ref_convt(y, p['ct2_w'], p['ct2_b']),
                p['bn3_g'], p['bn3_b'], p['bn3_m'], p['bn3_v'])
    y = bn_relu(_ref_conv3(y, p['c2_w'], p['c2_b']),
                p['bn4_g'], p['bn4_b'], p['bn4_m'], p['bn4_v'])
    return y


# ----------------------------------- main -------------------------------------

if __name__ == "__main__":
    key = jax.random.PRNGKey(0)
    N, Cin, H, W = 2, 16, 16, 16         # small shapes (module defaults 768->128)
    Cout = 8

    kx, kp = jax.random.split(key)
    x = jax.random.normal(kx, (N, Cin, H, W), jnp.float32)
    params = init_upsample_params(kp, Cin, Cout, ratio=1)

    y = jax.block_until_ready(jax.jit(upsample_forward)(params, x))
    assert y.shape == (N, Cout, 4 * H, 4 * W), y.shape

    ref = jnp.transpose(
        _ref_upsample(params, jnp.transpose(x, (0, 2, 3, 1))), (0, 3, 1, 2))
    np.testing.assert_allclose(np.asarray(y), np.asarray(ref),
                               rtol=1e-4, atol=1e-4)
    print("KERNEL_OK")
</pallas_src>

<mosaic_0001>
module attributes {stable_mosaic.version = 11 : i64} {
  func.func @_upsample_fused_kernel(%arg0: i32, %arg1: memref<1x16x256xf32, #tpu.memory_space<vmem>>, %arg2: memref<9x256x256xf32, #tpu.memory_space<vmem>>, %arg3: memref<64x16xf32, #tpu.memory_space<vmem>>, %arg4: memref<64x1xf32, #tpu.memory_space<vmem>>, %arg5: memref<64x1xf32, #tpu.memory_space<vmem>>, %arg6: memref<16x144xf32, #tpu.memory_space<vmem>>, %arg7: memref<16x1xf32, #tpu.memory_space<vmem>>, %arg8: memref<16x1xf32, #tpu.memory_space<vmem>>, %arg9: memref<32x16xf32, #tpu.memory_space<vmem>>, %arg10: memref<32x1xf32, #tpu.memory_space<vmem>>, %arg11: memref<32x1xf32, #tpu.memory_space<vmem>>, %arg12: memref<8x72xf32, #tpu.memory_space<vmem>>, %arg13: memref<8x1xf32, #tpu.memory_space<vmem>>, %arg14: memref<8x1xf32, #tpu.memory_space<vmem>>, %arg15: memref<1x16x8x256xf32, #tpu.memory_space<vmem>>) attributes {dimension_semantics = [#tpu.dimension_semantics<parallel>], iteration_bounds = array<i64: 2>, scalar_prefetch = 0 : i64, scratch_operands = 0 : i64, tpu.core_type = #tpu.core_type<tc>, window_params = [{transform_indices = @transform_0, window_bounds = array<i64: 1, 16, 256>}, {pipeline_mode = #tpu.pipeline_mode<synchronous>, transform_indices = @transform_1, window_bounds = array<i64: 9, 256, 256>}, {pipeline_mode = #tpu.pipeline_mode<synchronous>, transform_indices = @transform_2, window_bounds = array<i64: 64, 16>}, {pipeline_mode = #tpu.pipeline_mode<synchronous>, transform_indices = @transform_3, window_bounds = array<i64: 64, 1>}, {pipeline_mode = #tpu.pipeline_mode<synchronous>, transform_indices = @transform_4, window_bounds = array<i64: 64, 1>}, {pipeline_mode = #tpu.pipeline_mode<synchronous>, transform_indices = @transform_5, window_bounds = array<i64: 16, 144>}, {pipeline_mode = #tpu.pipeline_mode<synchronous>, transform_indices = @transform_6, window_bounds = array<i64: 16, 1>}, {pipeline_mode = #tpu.pipeline_mode<synchronous>, transform_indices = @transform_7, window_bounds = array<i64: 16, 1>}, {pipeline_mode = #tpu.pipeline_mode<synchronous>, transform_indices = @transform_8, window_bounds = array<i64: 32, 16>}, {pipeline_mode = #tpu.pipeline_mode<synchronous>, transform_indices = @transform_9, window_bounds = array<i64: 32, 1>}, {pipeline_mode = #tpu.pipeline_mode<synchronous>, transform_indices = @transform_10, window_bounds = array<i64: 32, 1>}, {pipeline_mode = #tpu.pipeline_mode<synchronous>, transform_indices = @transform_11, window_bounds = array<i64: 8, 72>}, {pipeline_mode = #tpu.pipeline_mode<synchronous>, transform_indices = @transform_12, window_bounds = array<i64: 8, 1>}, {pipeline_mode = #tpu.pipeline_mode<synchronous>, transform_indices = @transform_13, window_bounds = array<i64: 8, 1>}, {transform_indices = @transform_14, window_bounds = array<i64: 1, 16, 8, 256>}]} {
    %c0 = arith.constant 0 : index
    %c0_0 = arith.constant 0 : index
    %c0_1 = arith.constant 0 : index
    %0 = vector.load %arg1[%c0, %c0_0, %c0_1] : memref<1x16x256xf32, #tpu.memory_space<vmem>>, vector<1x16x256xf32>
    %1 = vector.shape_cast %0 : vector<1x16x256xf32> to vector<16x256xf32>
    %c0_2 = arith.constant 0 : index
    %c0_3 = arith.constant 0 : index
    %2 = vector.load %arg3[%c0_2, %c0_3] : memref<64x16xf32, #tpu.memory_space<vmem>>, vector<64x16xf32>
    %cst = arith.constant dense<0.000000e+00> : vector<64x256xf32>
    %3 = tpu.matmul %2, %1, %cst {dimension_numbers = #tpu.dot_dimension_numbers<[1], [0], [0], [1], [0, 0, 1, 1], [], []>} : vector<64x16xf32>, vector<16x256xf32>, vector<64x256xf32> -> vector<64x256xf32>
    %c0_4 = arith.constant 0 : index
    %c0_5 = arith.constant 0 : index
    %4 = vector.load %arg4[%c0_4, %c0_5] : memref<64x1xf32, #tpu.memory_space<vmem>>, vector<64x1xf32>
    %5 = vector.broadcast %4 : vector<64x1xf32> to vector<64x256xf32>
    %6 = arith.mulf %3, %5 : vector<64x256xf32>
    %c0_6 = arith.constant 0 : index
    %c0_7 = arith.constant 0 : index
    %7 = vector.load %arg5[%c0_6, %c0_7] : memref<64x1xf32, #tpu.memory_space<vmem>>, vector<64x1xf32>
    %8 = vector.broadcast %7 : vector<64x1xf32> to vector<64x256xf32>
    %9 = arith.addf %6, %8 : vector<64x256xf32>
    %cst_8 = arith.constant 0.000000e+00 : f32
    %10 = vector.broadcast %cst_8 : f32 to vector<64x256xf32>
    %11 = arith.maximumf %9, %10 : vector<64x256xf32>
    %12 = vector.extract_strided_slice %11 {offsets = [0, 0], sizes = [16, 256], strides = [1, 1]} : vector<64x256xf32> to vector<16x256xf32>
    %13 = vector.extract_strided_slice %11 {offsets = [16, 0], sizes = [16, 256], strides = [1, 1]} : vector<64x256xf32> to vector<16x256xf32>
    %14 = vector.extract_strided_slice %11 {offsets = [32, 0], sizes = [16, 256], strides = [1, 1]} : vector<64x256xf32> to vector<16x256xf32>
    %15 = vector.extract_strided_slice %11 {offsets = [48, 0], sizes = [16, 256], strides = [1, 1]} : vector<64x256xf32> to vector<16x256xf32>
    %c0_9 = arith.constant 0 : index
    %c0_10 = arith.constant 0 : index
    %c0_11 = arith.constant 0 : index
    %16 = vector.load %arg2[%c0_9, %c0_10, %c0_11] : memref<9x256x256xf32, #tpu.memory_space<vmem>>, vector<1x256x256xf32>
    %17 = vector.shape_cast %16 : vector<1x256x256xf32> to vector<256x256xf32>
    %cst_12 = arith.constant dense<0.000000e+00> : vector<16x256xf32>
    %18 = tpu.matmul %15, %17, %cst_12 {dimension_numbers = #tpu.dot_dimension_numbers<[1], [0], [0], [1], [0, 0, 1, 1], [], []>} : vector<16x256xf32>, vector<256x256xf32>, vector<16x256xf32> -> vector<16x256xf32>
    %c1 = arith.constant 1 : index
    %c0_13 = arith.constant 0 : index
    %c0_14 = arith.constant 0 : index
    %19 = vector.load %arg2[%c1, %c0_13, %c0_14] : memref<9x256x256xf32, #tpu.memory_space<vmem>>, vector<1x256x256xf32>
    %20 = vector.shape_cast %19 : vector<1x256x256xf32> to vector<256x256xf32>
    %cst_15 = arith.constant dense<0.000000e+00> : vector<16x256xf32>
    %21 = tpu.matmul %14, %20, %cst_15 {dimension_numbers = #tpu.dot_dimension_numbers<[1], [0], [0], [1], [0, 0, 1, 1], [], []>} : vector<16x256xf32>, vector<256x256xf32>, vector<16x256xf32> -> vector<16x256xf32>
    %c1_16 = arith.constant 1 : index
    %c0_17 = arith.constant 0 : index
    %c0_18 = arith.constant 0 : index
    %22 = vector.load %arg2[%c1_16, %c0_17, %c0_18] : memref<9x256x256xf32, #tpu.memory_space<vmem>>, vector<1x256x256xf32>
    %23 = vector.shape_cast %22 : vector<1x256x256xf32> to vector<256x256xf32>
    %cst_19 = arith.constant dense<0.000000e+00> : vector<16x256xf32>
    %24 = tpu.matmul %15, %23, %cst_19 {dimension_numbers = #tpu.dot_dimension_numbers<[1], [0], [0], [1], [0, 0, 1, 1], [], []>} : vector<16x256xf32>, vector<256x256xf32>, vector<16x256xf32> -> vector<16x256xf32>
    %c3 = arith.constant 3 : index
    %c0_20 = arith.constant 0 : index
    %c0_21 = arith.constant 0 : index
    %25 = vector.load %arg2[%c3, %c0_20, %c0_21] : memref<9x256x256xf32, #tpu.memory_space<vmem>>, vector<1x256x256xf32>
    %26 = vector.shape_cast %25 : vector<1x256x256xf32> to vector<256x256xf32>
    %cst_22 = arith.constant dense<0.000000e+00> : vector<16x256xf32>
    %27 = tpu.matmul %13, %26, %cst_22 {dimension_numbers = #tpu.dot_dimension_numbers<[1], [0], [0], [1], [0, 0, 1, 1], [], []>} : vector<16x256xf32>, vector<256x256xf32>, vector<16x256xf32> -> vector<16x256xf32>
    %c3_23 = arith.constant 3 : index
    %c0_24 = arith.constant 0 : index
    %c0_25 = arith.constant 0 : index
    %28 = vector.load %arg2[%c3_23, %c0_24, %c0_25] : memref<9x256x256xf32, #tpu.memory_space<vmem>>, vector<1x256x256xf32>
    %29 = vector.shape_cast %28 : vector<1x256x256xf32> to vector<256x256xf32>
    %cst_26 = arith.constant dense<0.000000e+00> : vector<16x256xf32>
    %30 = tpu.matmul %15, %29, %cst_26 {dimension_numbers = #tpu.dot_dimension_numbers<[1], [0], [0], [1], [0, 0, 1, 1], [], []>} : vector<16x256xf32>, vector<256x256xf32>, vector<16x256xf32> -> vector<16x256xf32>
    %31 = tpu.concatenate %18, %21, %24, %27, %12, %13, %30, %14, %15 in 0 : vector<16x256xf32>, vector<16x256xf32>, vector<16x256xf32>, vector<16x256xf32>, vector<16x256xf32>, vector<16x256xf32>, vector<16x256xf32>, vector<16x256xf32>, vector<16x256xf32> -> vector<144x256xf32>
    %c0_27 = arith.constant 0 : index
    %c0_28 = arith.constant 0 : index
    %32 = vector.load %arg6[%c0_27, %c0_28] : memref<16x144xf32, #tpu.memory_space<vmem>>, vector<16x144xf32>
    %cst_29 = arith.constant dense<0.000000e+00> : vector<16x256xf32>
    %33 = tpu.matmul %32, %31, %cst_29 {dimension_numbers = #tpu.dot_dimension_numbers<[1], [0], [0], [1], [0, 0, 1, 1], [], []>} : vector<16x144xf32>, vector<144x256xf32>, vector<16x256xf32> -> vector<16x256xf32>
    %c0_30 = arith.constant 0 : index
    %c0_31 = arith.constant 0 : index
    %34 = vector.load %arg7[%c0_30, %c0_31] : memref<16x1xf32, #tpu.memory_space<vmem>>, vector<16x1xf32>
    %35 = vector.broadcast %34 : vector<16x1xf32> to vector<16x256xf32>
    %36 = arith.mulf %33, %35 : vector<16x256xf32>
    %c0_32 = arith.constant 0 : index
    %c0_33 = arith.constant 0 : index
    %37 = vector.load %arg8[%c0_32, %c0_33] : memref<16x1xf32, #tpu.memory_space<vmem>>, vector<16x1xf32>
    %38 = vector.broadcast %37 : vector<16x1xf32> to vector<16x256xf32>
    %39 = arith.addf %36, %38 : vector<16x256xf32>
    %cst_34 = arith.constant 0.000000e+00 : f32
    %40 = vector.broadcast %cst_34 : f32 to vector<16x256xf32>
    %41 = arith.maximumf %39, %40 : vector<16x256xf32>
    %c2 = arith.constant 2 : index
    %c0_35 = arith.constant 0 : index
    %c0_36 = arith.constant 0 : index
    %42 = vector.load %arg2[%c2, %c0_35, %c0_36] : memref<9x256x256xf32, #tpu.memory_space<vmem>>, vector<1x256x256xf32>
    %43 = vector.shape_cast %42 : vector<1x256x256xf32> to vector<256x256xf32>
    %cst_37 = arith.constant dense<0.000000e+00> : vector<16x256xf32>
    %44 = tpu.matmul %14, %43, %cst_37 {dimension_numbers = #tpu.dot_dimension_numbers<[1], [0], [0], [1], [0, 0, 1, 1], [], []>} : vector<16x256xf32>, vector<256x256xf32>, vector<16x256xf32> -> vector<16x256xf32>
    %c5 = arith.constant 5 : index
    %c0_38 = arith.constant 0 : index
    %c0_39 = arith.constant 0 : index
    %45 = vector.load %arg2[%c5, %c0_38, %c0_39] : memref<9x256x256xf32, #tpu.memory_space<vmem>>, vector<1x256x256xf32>
    %46 = vector.shape_cast %45 : vector<1x256x256xf32> to vector<256x256xf32>
    %cst_40 = arith.constant dense<0.000000e+00> : vector<16x256xf32>
    %47 = tpu.matmul %12, %46, %cst_40 {dimension_numbers = #tpu.dot_dimension_numbers<[1], [0], [0], [1], [0, 0, 1, 1], [], []>} : vector<16x256xf32>, vector<256x256xf32>, vector<16x256xf32> -> vector<16x256xf32>
    %c5_41 = arith.constant 5 : index
    %c0_42 = arith.constant 0 : index
    %c0_43 = arith.constant 0 : index
    %48 = vector.load %arg2[%c5_41, %c0_42, %c0_43] : memref<9x256x256xf32, #tpu.memory_space<vmem>>, vector<1x256x256xf32>
    %49 = vector.shape_cast %48 : vector<1x256x256xf32> to vector<256x256xf32>
    %cst_44 = arith.constant dense<0.000000e+00> : vector<16x256xf32>
    %50 = tpu.matmul %14, %49, %cst_44 {dimension_numbers = #tpu.dot_dimension_numbers<[1], [0], [0], [1], [0, 0, 1, 1], [], []>} : vector<16x256xf32>, vector<256x256xf32>, vector<16x256xf32> -> vector<16x256xf32>
    %51 = tpu.concatenate %21, %24, %44, %12, %13, %47, %14, %15, %50 in 0 : vector<16x256xf32>, vector<16x256xf32>, vector<16x256xf32>, vector<16x256xf32>, vector<16x256xf32>, vector<16x256xf32>, vector<16x256xf32>, vector<16x256xf32>, vector<16x256xf32> -> vector<144x256xf32>
    %c0_45 = arith.constant 0 : index
    %c0_46 = arith.constant 0 : index
    %52 = vector.load %arg6[%c0_45, %c0_46] : memref<16x144xf32, #tpu.memory_space<vmem>>, vector<16x144xf32>
    %cst_47 = arith.constant dense<0.000000e+00> : vector<16x256xf32>
    %53 = tpu.matmul %52, %51, %cst_47 {dimension_numbers = #tpu.dot_dimension_numbers<[1], [0], [0], [1], [0, 0, 1, 1], [], []>} : vector<16x144xf32>, vector<144x256xf32>, vector<16x256xf32> -> vector<16x256xf32>
    %c0_48 = arith.constant 0 : index
    %c0_49 = arith.constant 0 : index
    %54 = vector.load %arg7[%c0_48, %c0_49] : memref<16x1xf32, #tpu.memory_space<vmem>>, vector<16x1xf32>
    %55 = vector.broadcast %54 : vector<16x1xf32> to vector<16x256xf32>
    %56 = arith.mulf %53, %55 : vector<16x256xf32>
    %c0_50 = arith.constant 0 : index
    %c0_51 = arith.constant 0 : index
    %57 = vector.load %arg8[%c0_50, %c0_51] : memref<16x1xf32, #tpu.memory_space<vmem>>, vector<16x1xf32>
    %58 = vector.broadcast %57 : vector<16x1xf32> to vector<16x256xf32>
    %59 = arith.addf %56, %58 : vector<16x256xf32>
    %cst_52 = arith.constant 0.000000e+00 : f32
    %60 = vector.broadcast %cst_52 : f32 to vector<16x256xf32>
    %61 = arith.maximumf %59, %60 : vector<16x256xf32>
    %c6 = arith.constant 6 : index
    %c0_53 = arith.constant 0 : index
    %c0_54 = arith.constant 0 : index
    %62 = vector.load %arg2[%c6, %c0_53, %c0_54] : memref<9x256x256xf32, #tpu.memory_space<vmem>>, vector<1x256x256xf32>
    %63 = vector.shape_cast %62 : vector<1x256x256xf32> to vector<256x256xf32>
    %cst_55 = arith.constant dense<0.000000e+00> : vector<16x256xf32>
    %64 = tpu.matmul %13, %63, %cst_55 {dimension_numbers = #tpu.dot_dimension_numbers<[1], [0], [0], [1], [0, 0, 1, 1], [], []>} : vector<16x256xf32>, vector<256x256xf32>, vector<16x256xf32> -> vector<16x256xf32>
    %c7 = arith.constant 7 : index
    %c0_56 = arith.constant 0 : index
    %c0_57 = arith.constant 0 : index
    %65 = vector.load %arg2[%c7, %c0_56, %c0_57] : memref<9x256x256xf32, #tpu.memory_space<vmem>>, vector<1x256x256xf32>
    %66 = vector.shape_cast %65 : vector<1x256x256xf32> to vector<256x256xf32>
    %cst_58 = arith.constant dense<0.000000e+00> : vector<16x256xf32>
    %67 = tpu.matmul %12, %66, %cst_58 {dimension_numbers = #tpu.dot_dimension_numbers<[1], [0], [0], [1], [0, 0, 1, 1], [], []>} : vector<16x256xf32>, vector<256x256xf32>, vector<16x256xf32> -> vector<16x256xf32>
    %c7_59 = arith.constant 7 : index
    %c0_60 = arith.constant 0 : index
    %c0_61 = arith.constant 0 : index
    %68 = vector.load %arg2[%c7_59, %c0_60, %c0_61] : memref<9x256x256xf32, #tpu.memory_space<vmem>>, vector<1x256x256xf32>
    %69 = vector.shape_cast %68 : vector<1x256x256xf32> to vector<256x256xf32>
    %cst_62 = arith.constant dense<0.000000e+00> : vector<16x256xf32>
    %70 = tpu.matmul %13, %69, %cst_62 {dimension_numbers = #tpu.dot_dimension_numbers<[1], [0], [0], [1], [0, 0, 1, 1], [], []>} : vector<16x256xf32>, vector<256x256xf32>, vector<16x256xf32> -> vector<16x256xf32>
    %71 = tpu.concatenate %27, %12, %13, %30, %14, %15, %64, %67, %70 in 0 : vector<16x256xf32>, vector<16x256xf32>, vector<16x256xf32>, vector<16x256xf32>, vector<16x256xf32>, vector<16x256xf32>, vector<16x256xf32>, vector<16x256xf32>, vector<16x256xf32> -> vector<144x256xf32>
    %c0_63 = arith.constant 0 : index
    %c0_64 = arith.constant 0 : index
    %72 = vector.load %arg6[%c0_63, %c0_64] : memref<16x144xf32, #tpu.memory_space<vmem>>, vector<16x144xf32>
    %cst_65 = arith.constant dense<0.000000e+00> : vector<16x256xf32>
    %73 = tpu.matmul %72, %71, %cst_65 {dimension_numbers = #tpu.dot_dimension_numbers<[1], [0], [0], [1], [0, 0, 1, 1], [], []>} : vector<16x144xf32>, vector<144x256xf32>, vector<16x256xf32> -> vector<16x256xf32>
    %c0_66 = arith.constant 0 : index
    %c0_67 = arith.constant 0 : index
    %74 = vector.load %arg7[%c0_66, %c0_67] : memref<16x1xf32, #tpu.memory_space<vmem>>, vector<16x1xf32>
    %75 = vector.broadcast %74 : vector<16x1xf32> to vector<16x256xf32>
    %76 = arith.mulf %73, %75 : vector<16x256xf32>
    %c0_68 = arith.constant 0 : index
    %c0_69 = arith.constant 0 : index
    %77 = vector.load %arg8[%c0_68, %c0_69] : memref<16x1xf32, #tpu.memory_space<vmem>>, vector<16x1xf32>
    %78 = vector.broadcast %77 : vector<16x1xf32> to vector<16x256xf32>
    %79 = arith.addf %76, %78 : vector<16x256xf32>
    %cst_70 = arith.constant 0.000000e+00 : f32
    %80 = vector.broadcast %cst_70 : f32 to vector<16x256xf32>
    %81 = arith.maximumf %79, %80 : vector<16x256xf32>
    %c8 = arith.constant 8 : index
    %c0_71 = arith.constant 0 : index
    %c0_72 = arith.constant 0 : index
    %82 = vector.load %arg2[%c8, %c0_71, %c0_72] : memref<9x256x256xf32, #tpu.memory_space<vmem>>, vector<1x256x256xf32>
    %83 = vector.shape_cast %82 : vector<1x256x256xf32> to vector<256x256xf32>
    %cst_73 = arith.constant dense<0.000000e+00> : vector<16x256xf32>
    %84 = tpu.matmul %12, %83, %cst_73 {dimension_numbers = #tpu.dot_dimension_numbers<[1], [0], [0], [1], [0, 0, 1, 1], [], []>} : vector<16x256xf32>, vector<256x256xf32>, vector<16x256xf32> -> vector<16x256xf32>
    %85 = tpu.concatenate %12, %13, %47, %14, %15, %50, %67, %70, %84 in 0 : vector<16x256xf32>, vector<16x256xf32>, vector<16x256xf32>, vector<16x256xf32>, vector<16x256xf32>, vector<16x256xf32>, vector<16x256xf32>, vector<16x256xf32>, vector<16x256xf32> -> vector<144x256xf32>
    %c0_74 = arith.constant 0 : index
    %c0_75 = arith.constant 0 : index
    %86 = vector.load %arg6[%c0_74, %c0_75] : memref<16x144xf32, #tpu.memory_space<vmem>>, vector<16x144xf32>
    %cst_76 = arith.constant dense<0.000000e+00> : vector<16x256xf32>
    %87 = tpu.matmul %86, %85, %cst_76 {dimension_numbers = #tpu.dot_dimension_numbers<[1], [0], [0], [1], [0, 0, 1, 1], [], []>} : vector<16x144xf32>, vector<144x256xf32>, vector<16x256xf32> -> vector<16x256xf32>
    %c0_77 = arith.constant 0 : index
    %c0_78 = arith.constant 0 : index
    %88 = vector.load %arg7[%c0_77, %c0_78] : memref<16x1xf32, #tpu.memory_space<vmem>>, vector<16x1xf32>
    %89 = vector.broadcast %88 : vector<16x1xf32> to vector<16x256xf32>
    %90 = arith.mulf %87, %89 : vector<16x256xf32>
    %c0_79 = arith.constant 0 : index
    %c0_80 = arith.constant 0 : index
    %91 = vector.load %arg8[%c0_79, %c0_80] : memref<16x1xf32, #tpu.memory_space<vmem>>, vector<16x1xf32>
    %92 = vector.broadcast %91 : vector<16x1xf32> to vector<16x256xf32>
    %93 = arith.addf %90, %92 : vector<16x256xf32>
    %cst_81 = arith.constant 0.000000e+00 : f32
    %94 = vector.broadcast %cst_81 : f32 to vector<16x256xf32>
    %95 = arith.maximumf %93, %94 : vector<16x256xf32>
    %c0_82 = arith.constant 0 : index
    %c0_83 = arith.constant 0 : index
    %96 = vector.load %arg9[%c0_82, %c0_83] : memref<32x16xf32, #tpu.memory_space<vmem>>, vector<32x16xf32>
    %cst_84 = arith.constant dense<0.000000e+00> : vector<32x256xf32>
    %97 = tpu.matmul %96, %41, %cst_84 {dimension_numbers = #tpu.dot_dimension_numbers<[1], [0], [0], [1], [0, 0, 1, 1], [], []>} : vector<32x16xf32>, vector<16x256xf32>, vector<32x256xf32> -> vector<32x256xf32>
    %c0_85 = arith.constant 0 : index
    %c0_86 = arith.constant 0 : index
    %98 = vector.load %arg10[%c0_85, %c0_86] : memref<32x1xf32, #tpu.memory_space<vmem>>, vector<32x1xf32>
    %99 = vector.broadcast %98 : vector<32x1xf32> to vector<32x256xf32>
    %100 = arith.mulf %97, %99 : vector<32x256xf32>
    %c0_87 = arith.constant 0 : index
    %c0_88 = arith.constant 0 : index
    %101 = vector.load %arg11[%c0_87, %c0_88] : memref<32x1xf32, #tpu.memory_space<vmem>>, vector<32x1xf32>
    %102 = vector.broadcast %101 : vector<32x1xf32> to vector<32x256xf32>
    %103 = arith.addf %100, %102 : vector<32x256xf32>
    %cst_89 = arith.constant 0.000000e+00 : f32
    %104 = vector.broadcast %cst_89 : f32 to vector<32x256xf32>
    %105 = arith.maximumf %103, %104 : vector<32x256xf32>
    %106 = vector.extract_strided_slice %105 {offsets = [0, 0], sizes = [8, 256], strides = [1, 1]} : vector<32x256xf32> to vector<8x256xf32>
    %107 = vector.extract_strided_slice %105 {offsets = [8, 0], sizes = [8, 256], strides = [1, 1]} : vector<32x256xf32> to vector<8x256xf32>
    %108 = vector.extract_strided_slice %105 {offsets = [16, 0], sizes = [8, 256], strides = [1, 1]} : vector<32x256xf32> to vector<8x256xf32>
    %109 = vector.extract_strided_slice %105 {offsets = [24, 0], sizes = [8, 256], strides = [1, 1]} : vector<32x256xf32> to vector<8x256xf32>
    %c0_90 = arith.constant 0 : index
    %c0_91 = arith.constant 0 : index
    %110 = vector.load %arg9[%c0_90, %c0_91] : memref<32x16xf32, #tpu.memory_space<vmem>>, vector<32x16xf32>
    %cst_92 = arith.constant dense<0.000000e+00> : vector<32x256xf32>
    %111 = tpu.matmul %110, %61, %cst_92 {dimension_numbers = #tpu.dot_dimension_numbers<[1], [0], [0], [1], [0, 0, 1, 1], [], []>} : vector<32x16xf32>, vector<16x256xf32>, vector<32x256xf32> -> vector<32x256xf32>
    %c0_93 = arith.constant 0 : index
    %c0_94 = arith.constant 0 : index
    %112 = vector.load %arg10[%c0_93, %c0_94] : memref<32x1xf32, #tpu.memory_space<vmem>>, vector<32x1xf32>
    %113 = vector.broadcast %112 : vector<32x1xf32> to vector<32x256xf32>
    %114 = arith.mulf %111, %113 : vector<32x256xf32>
    %c0_95 = arith.constant 0 : index
    %c0_96 = arith.constant 0 : index
    %115 = vector.load %arg11[%c0_95, %c0_96] : memref<32x1xf32, #tpu.memory_space<vmem>>, vector<32x1xf32>
    %116 = vector.broadcast %115 : vector<32x1xf32> to vector<32x256xf32>
    %117 = arith.addf %114, %116 : vector<32x256xf32>
    %cst_97 = arith.constant 0.000000e+00 : f32
    %118 = vector.broadcast %cst_97 : f32 to vector<32x256xf32>
    %119 = arith.maximumf %117, %118 : vector<32x256xf32>
    %120 = vector.extract_strided_slice %119 {offsets = [0, 0], sizes = [8, 256], strides = [1, 1]} : vector<32x256xf32> to vector<8x256xf32>
    %121 = vector.extract_strided_slice %119 {offsets = [8, 0], sizes = [8, 256], strides = [1, 1]} : vector<32x256xf32> to vector<8x256xf32>
    %122 = vector.extract_strided_slice %119 {offsets = [16, 0], sizes = [8, 256], strides = [1, 1]} : vector<32x256xf32> to vector<8x256xf32>
    %123 = vector.extract_strided_slice %119 {offsets = [24, 0], sizes = [8, 256], strides = [1, 1]} : vector<32x256xf32> to vector<8x256xf32>
    %c0_98 = arith.constant 0 : index
    %c0_99 = arith.constant 0 : index
    %124 = vector.load %arg9[%c0_98, %c0_99] : memref<32x16xf32, #tpu.memory_space<vmem>>, vector<32x16xf32>
    %cst_100 = arith.constant dense<0.000000e+00> : vector<32x256xf32>
    %125 = tpu.matmul %124, %81, %cst_100 {dimension_numbers = #tpu.dot_dimension_numbers<[1], [0], [0], [1], [0, 0, 1, 1], [], []>} : vector<32x16xf32>, vector<16x256xf32>, vector<32x256xf32> -> vector<32x256xf32>
    %c0_101 = arith.constant 0 : index
    %c0_102 = arith.constant 0 : index
    %126 = vector.load %arg10[%c0_101, %c0_102] : memref<32x1xf32, #tpu.memory_space<vmem>>, vector<32x1xf32>
    %127 = vector.broadcast %126 : vector<32x1xf32> to vector<32x256xf32>
    %128 = arith.mulf %125, %127 : vector<32x256xf32>
    %c0_103 = arith.constant 0 : index
    %c0_104 = arith.constant 0 : index
    %129 = vector.load %arg11[%c0_103, %c0_104] : memref<32x1xf32, #tpu.memory_space<vmem>>, vector<32x1xf32>
    %130 = vector.broadcast %129 : vector<32x1xf32> to vector<32x256xf32>
    %131 = arith.addf %128, %130 : vector<32x256xf32>
    %cst_105 = arith.constant 0.000000e+00 : f32
    %132 = vector.broadcast %cst_105 : f32 to vector<32x256xf32>
    %133 = arith.maximumf %131, %132 : vector<32x256xf32>
    %134 = vector.extract_strided_slice %133 {offsets = [0, 0], sizes = [8, 256], strides = [1, 1]} : vector<32x256xf32> to vector<8x256xf32>
    %135 = vector.extract_strided_slice %133 {offsets = [8, 0], sizes = [8, 256], strides = [1, 1]} : vector<32x256xf32> to vector<8x256xf32>
    %136 = vector.extract_strided_slice %133 {offsets = [16, 0], sizes = [8, 256], strides = [1, 1]} : vector<32x256xf32> to vector<8x256xf32>
    %137 = vector.extract_strided_slice %133 {offsets = [24, 0], sizes = [8, 256], strides = [1, 1]} : vector<32x256xf32> to vector<8x256xf32>
    %c0_106 = arith.constant 0 : index
    %c0_107 = arith.constant 0 : index
    %138 = vector.load %arg9[%c0_106, %c0_107] : memref<32x16xf32, #tpu.memory_space<vmem>>, vector<32x16xf32>
    %cst_108 = arith.constant dense<0.000000e+00> : vector<32x256xf32>
    %139 = tpu.matmul %138, %95, %cst_108 {dimension_numbers = #tpu.dot_dimension_numbers<[1], [0], [0], [1], [0, 0, 1, 1], [], []>} : vector<32x16xf32>, vector<16x256xf32>, vector<32x256xf32> -> vector<32x256xf32>
    %c0_109 = arith.constant 0 : index
    %c0_110 = arith.constant 0 : index
    %140 = vector.load %arg10[%c0_109, %c0_110] : memref<32x1xf32, #tpu.memory_space<vmem>>, vector<32x1xf32>
    %141 = vector.broadcast %140 : vector<32x1xf32> to vector<32x256xf32>
    %142 = arith.mulf %139, %141 : vector<32x256xf32>
    %c0_111 = arith.constant 0 : index
    %c0_112 = arith.constant 0 : index
    %143 = vector.load %arg11[%c0_111, %c0_112] : memref<32x1xf32, #tpu.memory_space<vmem>>, vector<32x1xf32>
    %144 = vector.broadcast %143 : vector<32x1xf32> to vector<32x256xf32>
    %145 = arith.addf %142, %144 : vector<32x256xf32>
    %cst_113 = arith.constant 0.000000e+00 : f32
    %146 = vector.broadcast %cst_113 : f32 to vector<32x256xf32>
    %147 = arith.maximumf %145, %146 : vector<32x256xf32>
    %148 = vector.extract_strided_slice %147 {offsets = [0, 0], sizes = [8, 256], strides = [1, 1]} : vector<32x256xf32> to vector<8x256xf32>
    %149 = vector.extract_strided_slice %147 {offsets = [8, 0], sizes = [8, 256], strides = [1, 1]} : vector<32x256xf32> to vector<8x256xf32>
    %150 = vector.extract_strided_slice %147 {offsets = [16, 0], sizes = [8, 256], strides = [1, 1]} : vector<32x256xf32> to vector<8x256xf32>
    %151 = vector.extract_strided_slice %147 {offsets = [24, 0], sizes = [8, 256], strides = [1, 1]} : vector<32x256xf32> to vector<8x256xf32>
    %c0_114 = arith.constant 0 : index
    %c0_115 = arith.constant 0 : index
    %c0_116 = arith.constant 0 : index
    %152 = vector.load %arg2[%c0_114, %c0_115, %c0_116] : memref<9x256x256xf32, #tpu.memory_space<vmem>>, vector<1x256x256xf32>
    %153 = vector.shape_cast %152 : vector<1x256x256xf32> to vector<256x256xf32>
    %cst_117 = arith.constant dense<0.000000e+00> : vector<8x256xf32>
    %154 = tpu.matmul %151, %153, %cst_117 {dimension_numbers = #tpu.dot_dimension_numbers<[1], [0], [0], [1], [0, 0, 1, 1], [], []>} : vector<8x256xf32>, vector<256x256xf32>, vector<8x256xf32> -> vector<8x256xf32>
    %c1_118 = arith.constant 1 : index
    %c0_119 = arith.constant 0 : index
    %c0_120 = arith.constant 0 : index
    %155 = vector.load %arg2[%c1_118, %c0_119, %c0_120] : memref<9x256x256xf32, #tpu.memory_space<vmem>>, vector<1x256x256xf32>
    %156 = vector.shape_cast %155 : vector<1x256x256xf32> to vector<256x256xf32>
    %cst_121 = arith.constant dense<0.000000e+00> : vector<8x256xf32>
    %157 = tpu.matmul %136, %156, %cst_121 {dimension_numbers = #tpu.dot_dimension_numbers<[1], [0], [0], [1], [0, 0, 1, 1], [], []>} : vector<8x256xf32>, vector<256x256xf32>, vector<8x256xf32> -> vector<8x256xf32>
    %c1_122 = arith.constant 1 : index
    %c0_123 = arith.constant 0 : index
    %c0_124 = arith.constant 0 : index
    %158 = vector.load %arg2[%c1_122, %c0_123, %c0_124] : memref<9x256x256xf32, #tpu.memory_space<vmem>>, vector<1x256x256xf32>
    %159 = vector.shape_cast %158 : vector<1x256x256xf32> to vector<256x256xf32>
    %cst_125 = arith.constant dense<0.000000e+00> : vector<8x256xf32>
    %160 = tpu.matmul %137, %159, %cst_125 {dimension_numbers = #tpu.dot_dimension_numbers<[1], [0], [0], [1], [0, 0, 1, 1], [], []>} : vector<8x256xf32>, vector<256x256xf32>, vector<8x256xf32> -> vector<8x256xf32>
    %c3_126 = arith.constant 3 : index
    %c0_127 = arith.constant 0 : index
    %c0_128 = arith.constant 0 : index
    %161 = vector.load %arg2[%c3_126, %c0_127, %c0_128] : memref<9x256x256xf32, #tpu.memory_space<vmem>>, vector<1x256x256xf32>
    %162 = vector.shape_cast %161 : vector<1x256x256xf32> to vector<256x256xf32>
    %cst_129 = arith.constant dense<0.000000e+00> : vector<8x256xf32>
    %163 = tpu.matmul %121, %162, %cst_129 {dimension_numbers = #tpu.dot_dimension_numbers<[1], [0], [0], [1], [0, 0, 1, 1], [], []>} : vector<8x256xf32>, vector<256x256xf32>, vector<8x256xf32> -> vector<8x256xf32>
    %c3_130 = arith.constant 3 : index
    %c0_131 = arith.constant 0 : index
    %c0_132 = arith.constant 0 : index
    %164 = vector.load %arg2[%c3_130, %c0_131, %c0_132] : memref<9x256x256xf32, #tpu.memory_space<vmem>>, vector<1x256x256xf32>
    %165 = vector.shape_cast %164 : vector<1x256x256xf32> to vector<256x256xf32>
    %cst_133 = arith.constant dense<0.000000e+00> : vector<8x256xf32>
    %166 = tpu.matmul %123, %165, %cst_133 {dimension_numbers = #tpu.dot_dimension_numbers<[1], [0], [0], [1], [0, 0, 1, 1], [], []>} : vector<8x256xf32>, vector<256x256xf32>, vector<8x256xf32> -> vector<8x256xf32>
    %167 = tpu.concatenate %154, %157, %160, %163, %106, %107, %166, %108, %109 in 0 : vector<8x256xf32>, vector<8x256xf32>, vector<8x256xf32>, vector<8x256xf32>, vector<8x256xf32>, vector<8x256xf32>, vector<8x256xf32>, vector<8x256xf32>, vector<8x256xf32> -> vector<72x256xf32>
    %c0_134 = arith.constant 0 : index
    %c0_135 = arith.constant 0 : index
    %168 = vector.load %arg12[%c0_134, %c0_135] : memref<8x72xf32, #tpu.memory_space<vmem>>, vector<8x72xf32>
    %cst_136 = arith.constant dense<0.000000e+00> : vector<8x256xf32>
    %169 = tpu.matmul %168, %167, %cst_136 {dimension_numbers = #tpu.dot_dimension_numbers<[1], [0], [0], [1], [0, 0, 1, 1], [], []>} : vector<8x72xf32>, vector<72x256xf32>, vector<8x256xf32> -> vector<8x256xf32>
    %c0_137 = arith.constant 0 : index
    %c0_138 = arith.constant 0 : index
    %170 = vector.load %arg13[%c0_137, %c0_138] : memref<8x1xf32, #tpu.memory_space<vmem>>, vector<8x1xf32>
    %171 = vector.broadcast %170 : vector<8x1xf32> to vector<8x256xf32>
    %172 = arith.mulf %169, %171 : vector<8x256xf32>
    %c0_139 = arith.constant 0 : index
    %c0_140 = arith.constant 0 : index
    %173 = vector.load %arg14[%c0_139, %c0_140] : memref<8x1xf32, #tpu.memory_space<vmem>>, vector<8x1xf32>
    %174 = vector.broadcast %173 : vector<8x1xf32> to vector<8x256xf32>
    %175 = arith.addf %172, %174 : vector<8x256xf32>
    %cst_141 = arith.constant 0.000000e+00 : f32
    %176 = vector.broadcast %cst_141 : f32 to vector<8x256xf32>
    %177 = arith.maximumf %175, %176 : vector<8x256xf32>
    %c1_142 = arith.constant 1 : index
    %c0_143 = arith.constant 0 : index
    %c0_144 = arith.constant 0 : index
    %178 = vector.load %arg2[%c1_142, %c0_143, %c0_144] : memref<9x256x256xf32, #tpu.memory_space<vmem>>, vector<1x256x256xf32>
    %179 = vector.shape_cast %178 : vector<1x256x256xf32> to vector<256x256xf32>
    %cst_145 = arith.constant dense<0.000000e+00> : vector<8x256xf32>
    %180 = tpu.matmul %150, %179, %cst_145 {dimension_numbers = #tpu.dot_dimension_numbers<[1], [0], [0], [1], [0, 0, 1, 1], [], []>} : vector<8x256xf32>, vector<256x256xf32>, vector<8x256xf32> -> vector<8x256xf32>
    %181 = tpu.concatenate %157, %160, %180, %106, %107, %120, %108, %109, %122 in 0 : vector<8x256xf32>, vector<8x256xf32>, vector<8x256xf32>, vector<8x256xf32>, vector<8x256xf32>, vector<8x256xf32>, vector<8x256xf32>, vector<8x256xf32>, vector<8x256xf32> -> vector<72x256xf32>
    %c0_146 = arith.constant 0 : index
    %c0_147 = arith.constant 0 : index
    %182 = vector.load %arg12[%c0_146, %c0_147] : memref<8x72xf32, #tpu.memory_space<vmem>>, vector<8x72xf32>
    %cst_148 = arith.constant dense<0.000000e+00> : vector<8x256xf32>
    %183 = tpu.matmul %182, %181, %cst_148 {dimension_numbers = #tpu.dot_dimension_numbers<[1], [0], [0], [1], [0, 0, 1, 1], [], []>} : vector<8x72xf32>, vector<72x256xf32>, vector<8x256xf32> -> vector<8x256xf32>
    %c0_149 = arith.constant 0 : index
    %c0_150 = arith.constant 0 : index
    %184 = vector.load %arg13[%c0_149, %c0_150] : memref<8x1xf32, #tpu.memory_space<vmem>>, vector<8x1xf32>
    %185 = vector.broadcast %184 : vector<8x1xf32> to vector<8x256xf32>
    %186 = arith.mulf %183, %185 : vector<8x256xf32>
    %c0_151 = arith.constant 0 : index
    %c0_152 = arith.constant 0 : index
    %187 = vector.load %arg14[%c0_151, %c0_152] : memref<8x1xf32, #tpu.memory_space<vmem>>, vector<8x1xf32>
    %188 = vector.broadcast %187 : vector<8x1xf32> to vector<8x256xf32>
    %189 = arith.addf %186, %188 : vector<8x256xf32>
    %cst_153 = arith.constant 0.000000e+00 : f32
    %190 = vector.broadcast %cst_153 : f32 to vector<8x256xf32>
    %191 = arith.maximumf %189, %190 : vector<8x256xf32>
    %c1_154 = arith.constant 1 : index
    %c0_155 = arith.constant 0 : index
    %c0_156 = arith.constant 0 : index
    %192 = vector.load %arg2[%c1_154, %c0_155, %c0_156] : memref<9x256x256xf32, #tpu.memory_space<vmem>>, vector<1x256x256xf32>
    %193 = vector.shape_cast %192 : vector<1x256x256xf32> to vector<256x256xf32>
    %cst_157 = arith.constant dense<0.000000e+00> : vector<8x256xf32>
    %194 = tpu.matmul %151, %193, %cst_157 {dimension_numbers = #tpu.dot_dimension_numbers<[1], [0], [0], [1], [0, 0, 1, 1], [], []>} : vector<8x256xf32>, vector<256x256xf32>, vector<8x256xf32> -> vector<8x256xf32>
    %195 = tpu.concatenate %160, %180, %194, %107, %120, %121, %109, %122, %123 in 0 : vector<8x256xf32>, vector<8x256xf32>, vector<8x256xf32>, vector<8x256xf32>, vector<8x256xf32>, vector<8x256xf32>, vector<8x256xf32>, vector<8x256xf32>, vector<8x256xf32> -> vector<72x256xf32>
    %c0_158 = arith.constant 0 : index
    %c0_159 = arith.constant 0 : index
    %196 = vector.load %arg12[%c0_158, %c0_159] : memref<8x72xf32, #tpu.memory_space<vmem>>, vector<8x72xf32>
    %cst_160 = arith.constant dense<0.000000e+00> : vector<8x256xf32>
    %197 = tpu.matmul %196, %195, %cst_160 {dimension_numbers = #tpu.dot_dimension_numbers<[1], [0], [0], [1], [0, 0, 1, 1], [], []>} : vector<8x72xf32>, vector<72x256xf32>, vector<8x256xf32> -> vector<8x256xf32>
    %c0_161 = arith.constant 0 : index
    %c0_162 = arith.constant 0 : index
    %198 = vector.load %arg13[%c0_161, %c0_162] : memref<8x1xf32, #tpu.memory_space<vmem>>, vector<8x1xf32>
    %199 = vector.broadcast %198 : vector<8x1xf32> to vector<8x256xf32>
    %200 = arith.mulf %197, %199 : vector<8x256xf32>
    %c0_163 = arith.constant 0 : index
    %c0_164 = arith.constant 0 : index
    %201 = vector.load %arg14[%c0_163, %c0_164] : memref<8x1xf32, #tpu.memory_space<vmem>>, vector<8x1xf32>
    %202 = vector.broadcast %201 : vector<8x1xf32> to vector<8x256xf32>
    %203 = arith.addf %200, %202 : vector<8x256xf32>
    %cst_165 = arith.constant 0.000000e+00 : f32
    %204 = vector.broadcast %cst_165 : f32 to vector<8x256xf32>
    %205 = arith.maximumf %203, %204 : vector<8x256xf32>
    %c2_166 = arith.constant 2 : index
    %c0_167 = arith.constant 0 : index
    %c0_168 = arith.constant 0 : index
    %206 = vector.load %arg2[%c2_166, %c0_167, %c0_168] : memref<9x256x256xf32, #tpu.memory_space<vmem>>, vector<1x256x256xf32>
    %207 = vector.shape_cast %206 : vector<1x256x256xf32> to vector<256x256xf32>
    %cst_169 = arith.constant dense<0.000000e+00> : vector<8x256xf32>
    %208 = tpu.matmul %136, %207, %cst_169 {dimension_numbers = #tpu.dot_dimension_numbers<[1], [0], [0], [1], [0, 0, 1, 1], [], []>} : vector<8x256xf32>, vector<256x256xf32>, vector<8x256xf32> -> vector<8x256xf32>
    %c5_170 = arith.constant 5 : index
    %c0_171 = arith.constant 0 : index
    %c0_172 = arith.constant 0 : index
    %209 = vector.load %arg2[%c5_170, %c0_171, %c0_172] : memref<9x256x256xf32, #tpu.memory_space<vmem>>, vector<1x256x256xf32>
    %210 = vector.shape_cast %209 : vector<1x256x256xf32> to vector<256x256xf32>
    %cst_173 = arith.constant dense<0.000000e+00> : vector<8x256xf32>
    %211 = tpu.matmul %106, %210, %cst_173 {dimension_numbers = #tpu.dot_dimension_numbers<[1], [0], [0], [1], [0, 0, 1, 1], [], []>} : vector<8x256xf32>, vector<256x256xf32>, vector<8x256xf32> -> vector<8x256xf32>
    %c5_174 = arith.constant 5 : index
    %c0_175 = arith.constant 0 : index
    %c0_176 = arith.constant 0 : index
    %212 = vector.load %arg2[%c5_174, %c0_175, %c0_176] : memref<9x256x256xf32, #tpu.memory_space<vmem>>, vector<1x256x256xf32>
    %213 = vector.shape_cast %212 : vector<1x256x256xf32> to vector<256x256xf32>
    %cst_177 = arith.constant dense<0.000000e+00> : vector<8x256xf32>
    %214 = tpu.matmul %108, %213, %cst_177 {dimension_numbers = #tpu.dot_dimension_numbers<[1], [0], [0], [1], [0, 0, 1, 1], [], []>} : vector<8x256xf32>, vector<256x256xf32>, vector<8x256xf32> -> vector<8x256xf32>
    %215 = tpu.concatenate %180, %194, %208, %120, %121, %211, %122, %123, %214 in 0 : vector<8x256xf32>, vector<8x256xf32>, vector<8x256xf32>, vector<8x256xf32>, vector<8x256xf32>, vector<8x256xf32>, vector<8x256xf32>, vector<8x256xf32>, vector<8x256xf32> -> vector<72x256xf32>
    %c0_178 = arith.constant 0 : index
    %c0_179 = arith.constant 0 : index
    %216 = vector.load %arg12[%c0_178, %c0_179] : memref<8x72xf32, #tpu.memory_space<vmem>>, vector<8x72xf32>
    %cst_180 = arith.constant dense<0.000000e+00> : vector<8x256xf32>
    %217 = tpu.matmul %216, %215, %cst_180 {dimension_numbers = #tpu.dot_dimension_numbers<[1], [0], [0], [1], [0, 0, 1, 1], [], []>} : vector<8x72xf32>, vector<72x256xf32>, vector<8x256xf32> -> vector<8x256xf32>
    %c0_181 = arith.constant 0 : index
    %c0_182 = arith.constant 0 : index
    %218 = vector.load %arg13[%c0_181, %c0_182] : memref<8x1xf32, #tpu.memory_space<vmem>>, vector<8x1xf32>
    %219 = vector.broadcast %218 : vector<8x1xf32> to vector<8x256xf32>
    %220 = arith.mulf %217, %219 : vector<8x256xf32>
    %c0_183 = arith.constant 0 : index
    %c0_184 = arith.constant 0 : index
    %221 = vector.load %arg14[%c0_183, %c0_184] : memref<8x1xf32, #tpu.memory_space<vmem>>, vector<8x1xf32>
    %222 = vector.broadcast %221 : vector<8x1xf32> to vector<8x256xf32>
    %223 = arith.addf %220, %222 : vector<8x256xf32>
    %cst_185 = arith.constant 0.000000e+00 : f32
    %224 = vector.broadcast %cst_185 : f32 to vector<8x256xf32>
    %225 = arith.maximumf %223, %224 : vector<8x256xf32>
    %c3_186 = arith.constant 3 : index
    %c0_187 = arith.constant 0 : index
    %c0_188 = arith.constant 0 : index
    %226 = vector.load %arg2[%c3_186, %c0_187, %c0_188] : memref<9x256x256xf32, #tpu.memory_space<vmem>>, vector<1x256x256xf32>
    %227 = vector.shape_cast %226 : vector<1x256x256xf32> to vector<256x256xf32>
    %cst_189 = arith.constant dense<0.000000e+00> : vector<8x256xf32>
    %228 = tpu.matmul %149, %227, %cst_189 {dimension_numbers = #tpu.dot_dimension_numbers<[1], [0], [0], [1], [0, 0, 1, 1], [], []>} : vector<8x256xf32>, vector<256x256xf32>, vector<8x256xf32> -> vector<8x256xf32>
    %229 = tpu.concatenate %163, %106, %107, %166, %108, %109, %228, %134, %135 in 0 : vector<8x256xf32>, vector<8x256xf32>, vector<8x256xf32>, vector<8x256xf32>, vector<8x256xf32>, vector<8x256xf32>, vector<8x256xf32>, vector<8x256xf32>, vector<8x256xf32> -> vector<72x256xf32>
    %c0_190 = arith.constant 0 : index
    %c0_191 = arith.constant 0 : index
    %230 = vector.load %arg12[%c0_190, %c0_191] : memref<8x72xf32, #tpu.memory_space<vmem>>, vector<8x72xf32>
    %cst_192 = arith.constant dense<0.000000e+00> : vector<8x256xf32>
    %231 = tpu.matmul %230, %229, %cst_192 {dimension_numbers = #tpu.dot_dimension_numbers<[1], [0], [0], [1], [0, 0, 1, 1], [], []>} : vector<8x72xf32>, vector<72x256xf32>, vector<8x256xf32> -> vector<8x256xf32>
    %c0_193 = arith.constant 0 : index
    %c0_194 = arith.constant 0 : index
    %232 = vector.load %arg13[%c0_193, %c0_194] : memref<8x1xf32, #tpu.memory_space<vmem>>, vector<8x1xf32>
    %233 = vector.broadcast %232 : vector<8x1xf32> to vector<8x256xf32>
    %234 = arith.mulf %231, %233 : vector<8x256xf32>
    %c0_195 = arith.constant 0 : index
    %c0_196 = arith.constant 0 : index
    %235 = vector.load %arg14[%c0_195, %c0_196] : memref<8x1xf32, #tpu.memory_space<vmem>>, vector<8x1xf32>
    %236 = vector.broadcast %235 : vector<8x1xf32> to vector<8x256xf32>
    %237 = arith.addf %234, %236 : vector<8x256xf32>
    %cst_197 = arith.constant 0.000000e+00 : f32
    %238 = vector.broadcast %cst_197 : f32 to vector<8x256xf32>
    %239 = arith.maximumf %237, %238 : vector<8x256xf32>
    %240 = tpu.concatenate %106, %107, %120, %108, %109, %122, %134, %135, %148 in 0 : vector<8x256xf32>, vector<8x256xf32>, vector<8x256xf32>, vector<8x256xf32>, vector<8x256xf32>, vector<8x256xf32>, vector<8x256xf32>, vector<8x256xf32>, vector<8x256xf32> -> vector<72x256xf32>
    %c0_198 = arith.constant 0 : index
    %c0_199 = arith.constant 0 : index
    %241 = vector.load %arg12[%c0_198, %c0_199] : memref<8x72xf32, #tpu.memory_space<vmem>>, vector<8x72xf32>
    %cst_200 = arith.constant dense<0.000000e+00> : vector<8x256xf32>
    %242 = tpu.matmul %241, %240, %cst_200 {dimension_numbers = #tpu.dot_dimension_numbers<[1], [0], [0], [1], [0, 0, 1, 1], [], []>} : vector<8x72xf32>, vector<72x256xf32>, vector<8x256xf32> -> vector<8x256xf32>
    %c0_201 = arith.constant 0 : index
    %c0_202 = arith.constant 0 : index
    %243 = vector.load %arg13[%c0_201, %c0_202] : memref<8x1xf32, #tpu.memory_space<vmem>>, vector<8x1xf32>
    %244 = vector.broadcast %243 : vector<8x1xf32> to vector<8x256xf32>
    %245 = arith.mulf %242, %244 : vector<8x256xf32>
    %c0_203 = arith.constant 0 : index
    %c0_204 = arith.constant 0 : index
    %246 = vector.load %arg14[%c0_203, %c0_204] : memref<8x1xf32, #tpu.memory_space<vmem>>, vector<8x1xf32>
    %247 = vector.broadcast %246 : vector<8x1xf32> to vector<8x256xf32>
    %248 = arith.addf %245, %247 : vector<8x256xf32>
    %cst_205 = arith.constant 0.000000e+00 : f32
    %249 = vector.broadcast %cst_205 : f32 to vector<8x256xf32>
    %250 = arith.maximumf %248, %249 : vector<8x256xf32>
    %251 = tpu.concatenate %107, %120, %121, %109, %122, %123, %135, %148, %149 in 0 : vector<8x256xf32>, vector<8x256xf32>, vector<8x256xf32>, vector<8x256xf32>, vector<8x256xf32>, vector<8x256xf32>, vector<8x256xf32>, vector<8x256xf32>, vector<8x256xf32> -> vector<72x256xf32>
    %c0_206 = arith.constant 0 : index
    %c0_207 = arith.constant 0 : index
    %252 = vector.load %arg12[%c0_206, %c0_207] : memref<8x72xf32, #tpu.memory_space<vmem>>, vector<8x72xf32>
    %cst_208 = arith.constant dense<0.000000e+00> : vector<8x256xf32>
    %253 = tpu.matmul %252, %251, %cst_208 {dimension_numbers = #tpu.dot_dimension_numbers<[1], [0], [0], [1], [0, 0, 1, 1], [], []>} : vector<8x72xf32>, vector<72x256xf32>, vector<8x256xf32> -> vector<8x256xf32>
    %c0_209 = arith.constant 0 : index
    %c0_210 = arith.constant 0 : index
    %254 = vector.load %arg13[%c0_209, %c0_210] : memref<8x1xf32, #tpu.memory_space<vmem>>, vector<8x1xf32>
    %255 = vector.broadcast %254 : vector<8x1xf32> to vector<8x256xf32>
    %256 = arith.mulf %253, %255 : vector<8x256xf32>
    %c0_211 = arith.constant 0 : index
    %c0_212 = arith.constant 0 : index
    %257 = vector.load %arg14[%c0_211, %c0_212] : memref<8x1xf32, #tpu.memory_space<vmem>>, vector<8x1xf32>
    %258 = vector.broadcast %257 : vector<8x1xf32> to vector<8x256xf32>
    %259 = arith.addf %256, %258 : vector<8x256xf32>
    %cst_213 = arith.constant 0.000000e+00 : f32
    %260 = vector.broadcast %cst_213 : f32 to vector<8x256xf32>
    %261 = arith.maximumf %259, %260 : vector<8x256xf32>
    %c5_214 = arith.constant 5 : index
    %c0_215 = arith.constant 0 : index
    %c0_216 = arith.constant 0 : index
    %262 = vector.load %arg2[%c5_214, %c0_215, %c0_216] : memref<9x256x256xf32, #tpu.memory_space<vmem>>, vector<1x256x256xf32>
    %263 = vector.shape_cast %262 : vector<1x256x256xf32> to vector<256x256xf32>
    %cst_217 = arith.constant dense<0.000000e+00> : vector<8x256xf32>
    %264 = tpu.matmul %134, %263, %cst_217 {dimension_numbers = #tpu.dot_dimension_numbers<[1], [0], [0], [1], [0, 0, 1, 1], [], []>} : vector<8x256xf32>, vector<256x256xf32>, vector<8x256xf32> -> vector<8x256xf32>
    %265 = tpu.concatenate %120, %121, %211, %122, %123, %214, %148, %149, %264 in 0 : vector<8x256xf32>, vector<8x256xf32>, vector<8x256xf32>, vector<8x256xf32>, vector<8x256xf32>, vector<8x256xf32>, vector<8x256xf32>, vector<8x256xf32>, vector<8x256xf32> -> vector<72x256xf32>
    %c0_218 = arith.constant 0 : index
    %c0_219 = arith.constant 0 : index
    %266 = vector.load %arg12[%c0_218, %c0_219] : memref<8x72xf32, #tpu.memory_space<vmem>>, vector<8x72xf32>
    %cst_220 = arith.constant dense<0.000000e+00> : vector<8x256xf32>
    %267 = tpu.matmul %266, %265, %cst_220 {dimension_numbers = #tpu.dot_dimension_numbers<[1], [0], [0], [1], [0, 0, 1, 1], [], []>} : vector<8x72xf32>, vector<72x256xf32>, vector<8x256xf32> -> vector<8x256xf32>
    %c0_221 = arith.constant 0 : index
    %c0_222 = arith.constant 0 : index
    %268 = vector.load %arg13[%c0_221, %c0_222] : memref<8x1xf32, #tpu.memory_space<vmem>>, vector<8x1xf32>
    %269 = vector.broadcast %268 : vector<8x1xf32> to vector<8x256xf32>
    %270 = arith.mulf %267, %269 : vector<8x256xf32>
    %c0_223 = arith.constant 0 : index
    %c0_224 = arith.constant 0 : index
    %271 = vector.load %arg14[%c0_223, %c0_224] : memref<8x1xf32, #tpu.memory_space<vmem>>, vector<8x1xf32>
    %272 = vector.broadcast %271 : vector<8x1xf32> to vector<8x256xf32>
    %273 = arith.addf %270, %272 : vector<8x256xf32>
    %cst_225 = arith.constant 0.000000e+00 : f32
    %274 = vector.broadcast %cst_225 : f32 to vector<8x256xf32>
    %275 = arith.maximumf %273, %274 : vector<8x256xf32>
    %c3_226 = arith.constant 3 : index
    %c0_227 = arith.constant 0 : index
    %c0_228 = arith.constant 0 : index
    %276 = vector.load %arg2[%c3_226, %c0_227, %c0_228] : memref<9x256x256xf32, #tpu.memory_space<vmem>>, vector<1x256x256xf32>
    %277 = vector.shape_cast %276 : vector<1x256x256xf32> to vector<256x256xf32>
    %cst_229 = arith.constant dense<0.000000e+00> : vector<8x256xf32>
    %278 = tpu.matmul %151, %277, %cst_229 {dimension_numbers = #tpu.dot_dimension_numbers<[1], [0], [0], [1], [0, 0, 1, 1], [], []>} : vector<8x256xf32>, vector<256x256xf32>, vector<8x256xf32> -> vector<8x256xf32>
    %279 = tpu.concatenate %166, %108, %109, %228, %134, %135, %278, %136, %137 in 0 : vector<8x256xf32>, vector<8x256xf32>, vector<8x256xf32>, vector<8x256xf32>, vector<8x256xf32>, vector<8x256xf32>, vector<8x256xf32>, vector<8x256xf32>, vector<8x256xf32> -> vector<72x256xf32>
    %c0_230 = arith.constant 0 : index
    %c0_231 = arith.constant 0 : index
    %280 = vector.load %arg12[%c0_230, %c0_231] : memref<8x72xf32, #tpu.memory_space<vmem>>, vector<8x72xf32>
    %cst_232 = arith.constant dense<0.000000e+00> : vector<8x256xf32>
    %281 = tpu.matmul %280, %279, %cst_232 {dimension_numbers = #tpu.dot_dimension_numbers<[1], [0], [0], [1], [0, 0, 1, 1], [], []>} : vector<8x72xf32>, vector<72x256xf32>, vector<8x256xf32> -> vector<8x256xf32>
    %c0_233 = arith.constant 0 : index
    %c0_234 = arith.constant 0 : index
    %282 = vector.load %arg13[%c0_233, %c0_234] : memref<8x1xf32, #tpu.memory_space<vmem>>, vector<8x1xf32>
    %283 = vector.broadcast %282 : vector<8x1xf32> to vector<8x256xf32>
    %284 = arith.mulf %281, %283 : vector<8x256xf32>
    %c0_235 = arith.constant 0 : index
    %c0_236 = arith.constant 0 : index
    %285 = vector.load %arg14[%c0_235, %c0_236] : memref<8x1xf32, #tpu.memory_space<vmem>>, vector<8x1xf32>
    %286 = vector.broadcast %285 : vector<8x1xf32> to vector<8x256xf32>
    %287 = arith.addf %284, %286 : vector<8x256xf32>
    %cst_237 = arith.constant 0.000000e+00 : f32
    %288 = vector.broadcast %cst_237 : f32 to vector<8x256xf32>
    %289 = arith.maximumf %287, %288 : vector<8x256xf32>
    %290 = tpu.concatenate %108, %109, %122, %134, %135, %148, %136, %137, %150 in 0 : vector<8x256xf32>, vector<8x256xf32>, vector<8x256xf32>, vector<8x256xf32>, vector<8x256xf32>, vector<8x256xf32>, vector<8x256xf32>, vector<8x256xf32>, vector<8x256xf32> -> vector<72x256xf32>
    %c0_238 = arith.constant 0 : index
    %c0_239 = arith.constant 0 : index
    %291 = vector.load %arg12[%c0_238, %c0_239] : memref<8x72xf32, #tpu.memory_space<vmem>>, vector<8x72xf32>
    %cst_240 = arith.constant dense<0.000000e+00> : vector<8x256xf32>
    %292 = tpu.matmul %291, %290, %cst_240 {dimension_numbers = #tpu.dot_dimension_numbers<[1], [0], [0], [1], [0, 0, 1, 1], [], []>} : vector<8x72xf32>, vector<72x256xf32>, vector<8x256xf32> -> vector<8x256xf32>
    %c0_241 = arith.constant 0 : index
    %c0_242 = arith.constant 0 : index
    %293 = vector.load %arg13[%c0_241, %c0_242] : memref<8x1xf32, #tpu.memory_space<vmem>>, vector<8x1xf32>
    %294 = vector.broadcast %293 : vector<8x1xf32> to vector<8x256xf32>
    %295 = arith.mulf %292, %294 : vector<8x256xf32>
    %c0_243 = arith.constant 0 : index
    %c0_244 = arith.constant 0 : index
    %296 = vector.load %arg14[%c0_243, %c0_244] : memref<8x1xf32, #tpu.memory_space<vmem>>, vector<8x1xf32>
    %297 = vector.broadcast %296 : vector<8x1xf32> to vector<8x256xf32>
    %298 = arith.addf %295, %297 : vector<8x256xf32>
    %cst_245 = arith.constant 0.000000e+00 : f32
    %299 = vector.broadcast %cst_245 : f32 to vector<8x256xf32>
    %300 = arith.maximumf %298, %299 : vector<8x256xf32>
    %301 = tpu.concatenate %109, %122, %123, %135, %148, %149, %137, %150, %151 in 0 : vector<8x256xf32>, vector<8x256xf32>, vector<8x256xf32>, vector<8x256xf32>, vector<8x256xf32>, vector<8x256xf32>, vector<8x256xf32>, vector<8x256xf32>, vector<8x256xf32> -> vector<72x256xf32>
    %c0_246 = arith.constant 0 : index
    %c0_247 = arith.constant 0 : index
    %302 = vector.load %arg12[%c0_246, %c0_247] : memref<8x72xf32, #tpu.memory_space<vmem>>, vector<8x72xf32>
    %cst_248 = arith.constant dense<0.000000e+00> : vector<8x256xf32>
    %303 = tpu.matmul %302, %301, %cst_248 {dimension_numbers = #tpu.dot_dimension_numbers<[1], [0], [0], [1], [0, 0, 1, 1], [], []>} : vector<8x72xf32>, vector<72x256xf32>, vector<8x256xf32> -> vector<8x256xf32>
    %c0_249 = arith.constant 0 : index
    %c0_250 = arith.constant 0 : index
    %304 = vector.load %arg13[%c0_249, %c0_250] : memref<8x1xf32, #tpu.memory_space<vmem>>, vector<8x1xf32>
    %305 = vector.broadcast %304 : vector<8x1xf32> to vector<8x256xf32>
    %306 = arith.mulf %303, %305 : vector<8x256xf32>
    %c0_251 = arith.constant 0 : index
    %c0_252 = arith.constant 0 : index
    %307 = vector.load %arg14[%c0_251, %c0_252] : memref<8x1xf32, #tpu.memory_space<vmem>>, vector<8x1xf32>
    %308 = vector.broadcast %307 : vector<8x1xf32> to vector<8x256xf32>
    %309 = arith.addf %306, %308 : vector<8x256xf32>
    %cst_253 = arith.constant 0.000000e+00 : f32
    %310 = vector.broadcast %cst_253 : f32 to vector<8x256xf32>
    %311 = arith.maximumf %309, %310 : vector<8x256xf32>
    %c5_254 = arith.constant 5 : index
    %c0_255 = arith.constant 0 : index
    %c0_256 = arith.constant 0 : index
    %312 = vector.load %arg2[%c5_254, %c0_255, %c0_256] : memref<9x256x256xf32, #tpu.memory_space<vmem>>, vector<1x256x256xf32>
    %313 = vector.shape_cast %312 : vector<1x256x256xf32> to vector<256x256xf32>
    %cst_257 = arith.constant dense<0.000000e+00> : vector<8x256xf32>
    %314 = tpu.matmul %136, %313, %cst_257 {dimension_numbers = #tpu.dot_dimension_numbers<[1], [0], [0], [1], [0, 0, 1, 1], [], []>} : vector<8x256xf32>, vector<256x256xf32>, vector<8x256xf32> -> vector<8x256xf32>
    %315 = tpu.concatenate %122, %123, %214, %148, %149, %264, %150, %151, %314 in 0 : vector<8x256xf32>, vector<8x256xf32>, vector<8x256xf32>, vector<8x256xf32>, vector<8x256xf32>, vector<8x256xf32>, vector<8x256xf32>, vector<8x256xf32>, vector<8x256xf32> -> vector<72x256xf32>
    %c0_258 = arith.constant 0 : index
    %c0_259 = arith.constant 0 : index
    %316 = vector.load %arg12[%c0_258, %c0_259] : memref<8x72xf32, #tpu.memory_space<vmem>>, vector<8x72xf32>
    %cst_260 = arith.constant dense<0.000000e+00> : vector<8x256xf32>
    %317 = tpu.matmul %316, %315, %cst_260 {dimension_numbers = #tpu.dot_dimension_numbers<[1], [0], [0], [1], [0, 0, 1, 1], [], []>} : vector<8x72xf32>, vector<72x256xf32>, vector<8x256xf32> -> vector<8x256xf32>
    %c0_261 = arith.constant 0 : index
    %c0_262 = arith.constant 0 : index
    %318 = vector.load %arg13[%c0_261, %c0_262] : memref<8x1xf32, #tpu.memory_space<vmem>>, vector<8x1xf32>
    %319 = vector.broadcast %318 : vector<8x1xf32> to vector<8x256xf32>
    %320 = arith.mulf %317, %319 : vector<8x256xf32>
    %c0_263 = arith.constant 0 : index
    %c0_264 = arith.constant 0 : index
    %321 = vector.load %arg14[%c0_263, %c0_264] : memref<8x1xf32, #tpu.memory_space<vmem>>, vector<8x1xf32>
    %322 = vector.broadcast %321 : vector<8x1xf32> to vector<8x256xf32>
    %323 = arith.addf %320, %322 : vector<8x256xf32>
    %cst_265 = arith.constant 0.000000e+00 : f32
    %324 = vector.broadcast %cst_265 : f32 to vector<8x256xf32>
    %325 = arith.maximumf %323, %324 : vector<8x256xf32>
    %c6_266 = arith.constant 6 : index
    %c0_267 = arith.constant 0 : index
    %c0_268 = arith.constant 0 : index
    %326 = vector.load %arg2[%c6_266, %c0_267, %c0_268] : memref<9x256x256xf32, #tpu.memory_space<vmem>>, vector<1x256x256xf32>
    %327 = vector.shape_cast %326 : vector<1x256x256xf32> to vector<256x256xf32>
    %cst_269 = arith.constant dense<0.000000e+00> : vector<8x256xf32>
    %328 = tpu.matmul %121, %327, %cst_269 {dimension_numbers = #tpu.dot_dimension_numbers<[1], [0], [0], [1], [0, 0, 1, 1], [], []>} : vector<8x256xf32>, vector<256x256xf32>, vector<8x256xf32> -> vector<8x256xf32>
    %c7_270 = arith.constant 7 : index
    %c0_271 = arith.constant 0 : index
    %c0_272 = arith.constant 0 : index
    %329 = vector.load %arg2[%c7_270, %c0_271, %c0_272] : memref<9x256x256xf32, #tpu.memory_space<vmem>>, vector<1x256x256xf32>
    %330 = vector.shape_cast %329 : vector<1x256x256xf32> to vector<256x256xf32>
    %cst_273 = arith.constant dense<0.000000e+00> : vector<8x256xf32>
    %331 = tpu.matmul %106, %330, %cst_273 {dimension_numbers = #tpu.dot_dimension_numbers<[1], [0], [0], [1], [0, 0, 1, 1], [], []>} : vector<8x256xf32>, vector<256x256xf32>, vector<8x256xf32> -> vector<8x256xf32>
    %c7_274 = arith.constant 7 : index
    %c0_275 = arith.constant 0 : index
    %c0_276 = arith.constant 0 : index
    %332 = vector.load %arg2[%c7_274, %c0_275, %c0_276] : memref<9x256x256xf32, #tpu.memory_space<vmem>>, vector<1x256x256xf32>
    %333 = vector.shape_cast %332 : vector<1x256x256xf32> to vector<256x256xf32>
    %cst_277 = arith.constant dense<0.000000e+00> : vector<8x256xf32>
    %334 = tpu.matmul %107, %333, %cst_277 {dimension_numbers = #tpu.dot_dimension_numbers<[1], [0], [0], [1], [0, 0, 1, 1], [], []>} : vector<8x256xf32>, vector<256x256xf32>, vector<8x256xf32> -> vector<8x256xf32>
    %335 = tpu.concatenate %228, %134, %135, %278, %136, %137, %328, %331, %334 in 0 : vector<8x256xf32>, vector<8x256xf32>, vector<8x256xf32>, vector<8x256xf32>, vector<8x256xf32>, vector<8x256xf32>, vector<8x256xf32>, vector<8x256xf32>, vector<8x256xf32> -> vector<72x256xf32>
    %c0_278 = arith.constant 0 : index
    %c0_279 = arith.constant 0 : index
    %336 = vector.load %arg12[%c0_278, %c0_279] : memref<8x72xf32, #tpu.memory_space<vmem>>, vector<8x72xf32>
    %cst_280 = arith.constant dense<0.000000e+00> : vector<8x256xf32>
    %337 = tpu.matmul %336, %335, %cst_280 {dimension_numbers = #tpu.dot_dimension_numbers<[1], [0], [0], [1], [0, 0, 1, 1], [], []>} : vector<8x72xf32>, vector<72x256xf32>, vector<8x256xf32> -> vector<8x256xf32>
    %c0_281 = arith.constant 0 : index
    %c0_282 = arith.constant 0 : index
    %338 = vector.load %arg13[%c0_281, %c0_282] : memref<8x1xf32, #tpu.memory_space<vmem>>, vector<8x1xf32>
    %339 = vector.broadcast %338 : vector<8x1xf32> to vector<8x256xf32>
    %340 = arith.mulf %337, %339 : vector<8x256xf32>
    %c0_283 = arith.constant 0 : index
    %c0_284 = arith.constant 0 : index
    %341 = vector.load %arg14[%c0_283, %c0_284] : memref<8x1xf32, #tpu.memory_space<vmem>>, vector<8x1xf32>
    %342 = vector.broadcast %341 : vector<8x1xf32> to vector<8x256xf32>
    %343 = arith.addf %340, %342 : vector<8x256xf32>
    %cst_285 = arith.constant 0.000000e+00 : f32
    %344 = vector.broadcast %cst_285 : f32 to vector<8x256xf32>
    %345 = arith.maximumf %343, %344 : vector<8x256xf32>
    %c7_286 = arith.constant 7 : index
    %c0_287 = arith.constant 0 : index
    %c0_288 = arith.constant 0 : index
    %346 = vector.load %arg2[%c7_286, %c0_287, %c0_288] : memref<9x256x256xf32, #tpu.memory_space<vmem>>, vector<1x256x256xf32>
    %347 = vector.shape_cast %346 : vector<1x256x256xf32> to vector<256x256xf32>
    %cst_289 = arith.constant dense<0.000000e+00> : vector<8x256xf32>
    %348 = tpu.matmul %120, %347, %cst_289 {dimension_numbers = #tpu.dot_dimension_numbers<[1], [0], [0], [1], [0, 0, 1, 1], [], []>} : vector<8x256xf32>, vector<256x256xf32>, vector<8x256xf32> -> vector<8x256xf32>
    %349 = tpu.concatenate %134, %135, %148, %136, %137, %150, %331, %334, %348 in 0 : vector<8x256xf32>, vector<8x256xf32>, vector<8x256xf32>, vector<8x256xf32>, vector<8x256xf32>, vector<8x256xf32>, vector<8x256xf32>, vector<8x256xf32>, vector<8x256xf32> -> vector<72x256xf32>
    %c0_290 = arith.constant 0 : index
    %c0_291 = arith.constant 0 : index
    %350 = vector.load %arg12[%c0_290, %c0_291] : memref<8x72xf32, #tpu.memory_space<vmem>>, vector<8x72xf32>
    %cst_292 = arith.constant dense<0.000000e+00> : vector<8x256xf32>
    %351 = tpu.matmul %350, %349, %cst_292 {dimension_numbers = #tpu.dot_dimension_numbers<[1], [0], [0], [1], [0, 0, 1, 1], [], []>} : vector<8x72xf32>, vector<72x256xf32>, vector<8x256xf32> -> vector<8x256xf32>
    %c0_293 = arith.constant 0 : index
    %c0_294 = arith.constant 0 : index
    %352 = vector.load %arg13[%c0_293, %c0_294] : memref<8x1xf32, #tpu.memory_space<vmem>>, vector<8x1xf32>
    %353 = vector.broadcast %352 : vector<8x1xf32> to vector<8x256xf32>
    %354 = arith.mulf %351, %353 : vector<8x256xf32>
    %c0_295 = arith.constant 0 : index
    %c0_296 = arith.constant 0 : index
    %355 = vector.load %arg14[%c0_295, %c0_296] : memref<8x1xf32, #tpu.memory_space<vmem>>, vector<8x1xf32>
    %356 = vector.broadcast %355 : vector<8x1xf32> to vector<8x256xf32>
    %357 = arith.addf %354, %356 : vector<8x256xf32>
    %cst_297 = arith.constant 0.000000e+00 : f32
    %358 = vector.broadcast %cst_297 : f32 to vector<8x256xf32>
    %359 = arith.maximumf %357, %358 : vector<8x256xf32>
    %c7_298 = arith.constant 7 : index
    %c0_299 = arith.constant 0 : index
    %c0_300 = arith.constant 0 : index
    %360 = vector.load %arg2[%c7_298, %c0_299, %c0_300] : memref<9x256x256xf32, #tpu.memory_space<vmem>>, vector<1x256x256xf32>
    %361 = vector.shape_cast %360 : vector<1x256x256xf32> to vector<256x256xf32>
    %cst_301 = arith.constant dense<0.000000e+00> : vector<8x256xf32>
    %362 = tpu.matmul %121, %361, %cst_301 {dimension_numbers = #tpu.dot_dimension_numbers<[1], [0], [0], [1], [0, 0, 1, 1], [], []>} : vector<8x256xf32>, vector<256x256xf32>, vector<8x256xf32> -> vector<8x256xf32>
    %363 = tpu.concatenate %135, %148, %149, %137, %150, %151, %334, %348, %362 in 0 : vector<8x256xf32>, vector<8x256xf32>, vector<8x256xf32>, vector<8x256xf32>, vector<8x256xf32>, vector<8x256xf32>, vector<8x256xf32>, vector<8x256xf32>, vector<8x256xf32> -> vector<72x256xf32>
    %c0_302 = arith.constant 0 : index
    %c0_303 = arith.constant 0 : index
    %364 = vector.load %arg12[%c0_302, %c0_303] : memref<8x72xf32, #tpu.memory_space<vmem>>, vector<8x72xf32>
    %cst_304 = arith.constant dense<0.000000e+00> : vector<8x256xf32>
    %365 = tpu.matmul %364, %363, %cst_304 {dimension_numbers = #tpu.dot_dimension_numbers<[1], [0], [0], [1], [0, 0, 1, 1], [], []>} : vector<8x72xf32>, vector<72x256xf32>, vector<8x256xf32> -> vector<8x256xf32>
    %c0_305 = arith.constant 0 : index
    %c0_306 = arith.constant 0 : index
    %366 = vector.load %arg13[%c0_305, %c0_306] : memref<8x1xf32, #tpu.memory_space<vmem>>, vector<8x1xf32>
    %367 = vector.broadcast %366 : vector<8x1xf32> to vector<8x256xf32>
    %368 = arith.mulf %365, %367 : vector<8x256xf32>
    %c0_307 = arith.constant 0 : index
    %c0_308 = arith.constant 0 : index
    %369 = vector.load %arg14[%c0_307, %c0_308] : memref<8x1xf32, #tpu.memory_space<vmem>>, vector<8x1xf32>
    %370 = vector.broadcast %369 : vector<8x1xf32> to vector<8x256xf32>
    %371 = arith.addf %368, %370 : vector<8x256xf32>
    %cst_309 = arith.constant 0.000000e+00 : f32
    %372 = vector.broadcast %cst_309 : f32 to vector<8x256xf32>
    %373 = arith.maximumf %371, %372 : vector<8x256xf32>
    %c8_310 = arith.constant 8 : index
    %c0_311 = arith.constant 0 : index
    %c0_312 = arith.constant 0 : index
    %374 = vector.load %arg2[%c8_310, %c0_311, %c0_312] : memref<9x256x256xf32, #tpu.memory_space<vmem>>, vector<1x256x256xf32>
    %375 = vector.shape_cast %374 : vector<1x256x256xf32> to vector<256x256xf32>
    %cst_313 = arith.constant dense<0.000000e+00> : vector<8x256xf32>
    %376 = tpu.matmul %106, %375, %cst_313 {dimension_numbers = #tpu.dot_dimension_numbers<[1], [0], [0], [1], [0, 0, 1, 1], [], []>} : vector<8x256xf32>, vector<256x256xf32>, vector<8x256xf32> -> vector<8x256xf32>
    %377 = tpu.concatenate %148, %149, %264, %150, %151, %314, %348, %362, %376 in 0 : vector<8x256xf32>, vector<8x256xf32>, vector<8x256xf32>, vector<8x256xf32>, vector<8x256xf32>, vector<8x256xf32>, vector<8x256xf32>, vector<8x256xf32>, vector<8x256xf32> -> vector<72x256xf32>
    %c0_314 = arith.constant 0 : index
    %c0_315 = arith.constant 0 : index
    %378 = vector.load %arg12[%c0_314, %c0_315] : memref<8x72xf32, #tpu.memory_space<vmem>>, vector<8x72xf32>
    %cst_316 = arith.constant dense<0.000000e+00> : vector<8x256xf32>
    %379 = tpu.matmul %378, %377, %cst_316 {dimension_numbers = #tpu.dot_dimension_numbers<[1], [0], [0], [1], [0, 0, 1, 1], [], []>} : vector<8x72xf32>, vector<72x256xf32>, vector<8x256xf32> -> vector<8x256xf32>
    %c0_317 = arith.constant 0 : index
    %c0_318 = arith.constant 0 : index
    %380 = vector.load %arg13[%c0_317, %c0_318] : memref<8x1xf32, #tpu.memory_space<vmem>>, vector<8x1xf32>
    %381 = vector.broadcast %380 : vector<8x1xf32> to vector<8x256xf32>
    %382 = arith.mulf %379, %381 : vector<8x256xf32>
    %c0_319 = arith.constant 0 : index
    %c0_320 = arith.constant 0 : index
    %383 = vector.load %arg14[%c0_319, %c0_320] : memref<8x1xf32, #tpu.memory_space<vmem>>, vector<8x1xf32>
    %384 = vector.broadcast %383 : vector<8x1xf32> to vector<8x256xf32>
    %385 = arith.addf %382, %384 : vector<8x256xf32>
    %cst_321 = arith.constant 0.000000e+00 : f32
    %386 = vector.broadcast %cst_321 : f32 to vector<8x256xf32>
    %387 = arith.maximumf %385, %386 : vector<8x256xf32>
    %c0_322 = arith.constant 0 : index
    %c0_323 = arith.constant 0 : index
    %c0_324 = arith.constant 0 : index
    %c0_325 = arith.constant 0 : index
    %388 = vector.load %arg15[%c0_322, %c0_323, %c0_324, %c0_325] : memref<1x16x8x256xf32, #tpu.memory_space<vmem>>, vector<1x1x8x256xf32>
    %389 = vector.shape_cast %388 : vector<1x1x8x256xf32> to vector<8x256xf32>
    %390 = vector.shape_cast %177 : vector<8x256xf32> to vector<1x1x8x256xf32>
    tpu.vector_store %arg15[%c0_322, %c0_323, %c0_324, %c0_325], %390 {strides = array<i32>} : memref<1x16x8x256xf32, #tpu.memory_space<vmem>>, vector<1x1x8x256xf32>,
    %c0_326 = arith.constant 0 : index
    %c1_327 = arith.constant 1 : index
    %c0_328 = arith.constant 0 : index
    %c0_329 = arith.constant 0 : index
    %391 = vector.load %arg15[%c0_326, %c1_327, %c0_328, %c0_329] : memref<1x16x8x256xf32, #tpu.memory_space<vmem>>, vector<1x1x8x256xf32>
    %392 = vector.shape_cast %391 : vector<1x1x8x256xf32> to vector<8x256xf32>
    %393 = vector.shape_cast %191 : vector<8x256xf32> to vector<1x1x8x256xf32>
    tpu.vector_store %arg15[%c0_326, %c1_327, %c0_328, %c0_329], %393 {strides = array<i32>} : memref<1x16x8x256xf32, #tpu.memory_space<vmem>>, vector<1x1x8x256xf32>,
    %c0_330 = arith.constant 0 : index
    %c2_331 = arith.constant 2 : index
    %c0_332 = arith.constant 0 : index
    %c0_333 = arith.constant 0 : index
    %394 = vector.load %arg15[%c0_330, %c2_331, %c0_332, %c0_333] : memref<1x16x8x256xf32, #tpu.memory_space<vmem>>, vector<1x1x8x256xf32>
    %395 = vector.shape_cast %394 : vector<1x1x8x256xf32> to vector<8x256xf32>
    %396 = vector.shape_cast %205 : vector<8x256xf32> to vector<1x1x8x256xf32>
    tpu.vector_store %arg15[%c0_330, %c2_331, %c0_332, %c0_333], %396 {strides = array<i32>} : memref<1x16x8x256xf32, #tpu.memory_space<vmem>>, vector<1x1x8x256xf32>,
    %c0_334 = arith.constant 0 : index
    %c3_335 = arith.constant 3 : index
    %c0_336 = arith.constant 0 : index
    %c0_337 = arith.constant 0 : index
    %397 = vector.load %arg15[%c0_334, %c3_335, %c0_336, %c0_337] : memref<1x16x8x256xf32, #tpu.memory_space<vmem>>, vector<1x1x8x256xf32>
    %398 = vector.shape_cast %397 : vector<1x1x8x256xf32> to vector<8x256xf32>
    %399 = vector.shape_cast %225 : vector<8x256xf32> to vector<1x1x8x256xf32>
    tpu.vector_store %arg15[%c0_334, %c3_335, %c0_336, %c0_337], %399 {strides = array<i32>} : memref<1x16x8x256xf32, #tpu.memory_space<vmem>>, vector<1x1x8x256xf32>,
    %c0_338 = arith.constant 0 : index
    %c4 = arith.constant 4 : index
    %c0_339 = arith.constant 0 : index
    %c0_340 = arith.constant 0 : index
    %400 = vector.load %arg15[%c0_338, %c4, %c0_339, %c0_340] : memref<1x16x8x256xf32, #tpu.memory_space<vmem>>, vector<1x1x8x256xf32>
    %401 = vector.shape_cast %400 : vector<1x1x8x256xf32> to vector<8x256xf32>
    %402 = vector.shape_cast %239 : vector<8x256xf32> to vector<1x1x8x256xf32>
    tpu.vector_store %arg15[%c0_338, %c4, %c0_339, %c0_340], %402 {strides = array<i32>} : memref<1x16x8x256xf32, #tpu.memory_space<vmem>>, vector<1x1x8x256xf32>,
    %c0_341 = arith.constant 0 : index
    %c5_342 = arith.constant 5 : index
    %c0_343 = arith.constant 0 : index
    %c0_344 = arith.constant 0 : index
    %403 = vector.load %arg15[%c0_341, %c5_342, %c0_343, %c0_344] : memref<1x16x8x256xf32, #tpu.memory_space<vmem>>, vector<1x1x8x256xf32>
    %404 = vector.shape_cast %403 : vector<1x1x8x256xf32> to vector<8x256xf32>
    %405 = vector.shape_cast %250 : vector<8x256xf32> to vector<1x1x8x256xf32>
    tpu.vector_store %arg15[%c0_341, %c5_342, %c0_343, %c0_344], %405 {strides = array<i32>} : memref<1x16x8x256xf32, #tpu.memory_space<vmem>>, vector<1x1x8x256xf32>,
    %c0_345 = arith.constant 0 : index
    %c6_346 = arith.constant 6 : index
    %c0_347 = arith.constant 0 : index
    %c0_348 = arith.constant 0 : index
    %406 = vector.load %arg15[%c0_345, %c6_346, %c0_347, %c0_348] : memref<1x16x8x256xf32, #tpu.memory_space<vmem>>, vector<1x1x8x256xf32>
    %407 = vector.shape_cast %406 : vector<1x1x8x256xf32> to vector<8x256xf32>
    %408 = vector.shape_cast %261 : vector<8x256xf32> to vector<1x1x8x256xf32>
    tpu.vector_store %arg15[%c0_345, %c6_346, %c0_347, %c0_348], %408 {strides = array<i32>} : memref<1x16x8x256xf32, #tpu.memory_space<vmem>>, vector<1x1x8x256xf32>,
    %c0_349 = arith.constant 0 : index
    %c7_350 = arith.constant 7 : index
    %c0_351 = arith.constant 0 : index
    %c0_352 = arith.constant 0 : index
    %409 = vector.load %arg15[%c0_349, %c7_350, %c0_351, %c0_352] : memref<1x16x8x256xf32, #tpu.memory_space<vmem>>, vector<1x1x8x256xf32>
    %410 = vector.shape_cast %409 : vector<1x1x8x256xf32> to vector<8x256xf32>
    %411 = vector.shape_cast %275 : vector<8x256xf32> to vector<1x1x8x256xf32>
    tpu.vector_store %arg15[%c0_349, %c7_350, %c0_351, %c0_352], %411 {strides = array<i32>} : memref<1x16x8x256xf32, #tpu.memory_space<vmem>>, vector<1x1x8x256xf32>,
    %c0_353 = arith.constant 0 : index
    %c8_354 = arith.constant 8 : index
    %c0_355 = arith.constant 0 : index
    %c0_356 = arith.constant 0 : index
    %412 = vector.load %arg15[%c0_353, %c8_354, %c0_355, %c0_356] : memref<1x16x8x256xf32, #tpu.memory_space<vmem>>, vector<1x1x8x256xf32>
    %413 = vector.shape_cast %412 : vector<1x1x8x256xf32> to vector<8x256xf32>
    %414 = vector.shape_cast %289 : vector<8x256xf32> to vector<1x1x8x256xf32>
    tpu.vector_store %arg15[%c0_353, %c8_354, %c0_355, %c0_356], %414 {strides = array<i32>} : memref<1x16x8x256xf32, #tpu.memory_space<vmem>>, vector<1x1x8x256xf32>,
    %c0_357 = arith.constant 0 : index
    %c9 = arith.constant 9 : index
    %c0_358 = arith.constant 0 : index
    %c0_359 = arith.constant 0 : index
    %415 = vector.load %arg15[%c0_357, %c9, %c0_358, %c0_359] : memref<1x16x8x256xf32, #tpu.memory_space<vmem>>, vector<1x1x8x256xf32>
    %416 = vector.shape_cast %415 : vector<1x1x8x256xf32> to vector<8x256xf32>
    %417 = vector.shape_cast %300 : vector<8x256xf32> to vector<1x1x8x256xf32>
    tpu.vector_store %arg15[%c0_357, %c9, %c0_358, %c0_359], %417 {strides = array<i32>} : memref<1x16x8x256xf32, #tpu.memory_space<vmem>>, vector<1x1x8x256xf32>,
    %c0_360 = arith.constant 0 : index
    %c10 = arith.constant 10 : index
    %c0_361 = arith.constant 0 : index
    %c0_362 = arith.constant 0 : index
    %418 = vector.load %arg15[%c0_360, %c10, %c0_361, %c0_362] : memref<1x16x8x256xf32, #tpu.memory_space<vmem>>, vector<1x1x8x256xf32>
    %419 = vector.shape_cast %418 : vector<1x1x8x256xf32> to vector<8x256xf32>
    %420 = vector.shape_cast %311 : vector<8x256xf32> to vector<1x1x8x256xf32>
    tpu.vector_store %arg15[%c0_360, %c10, %c0_361, %c0_362], %420 {strides = array<i32>} : memref<1x16x8x256xf32, #tpu.memory_space<vmem>>, vector<1x1x8x256xf32>,
    %c0_363 = arith.constant 0 : index
    %c11 = arith.constant 11 : index
    %c0_364 = arith.constant 0 : index
    %c0_365 = arith.constant 0 : index
    %421 = vector.load %arg15[%c0_363, %c11, %c0_364, %c0_365] : memref<1x16x8x256xf32, #tpu.memory_space<vmem>>, vector<1x1x8x256xf32>
    %422 = vector.shape_cast %421 : vector<1x1x8x256xf32> to vector<8x256xf32>
    %423 = vector.shape_cast %325 : vector<8x256xf32> to vector<1x1x8x256xf32>
    tpu.vector_store %arg15[%c0_363, %c11, %c0_364, %c0_365], %423 {strides = array<i32>} : memref<1x16x8x256xf32, #tpu.memory_space<vmem>>, vector<1x1x8x256xf32>,
    %c0_366 = arith.constant 0 : index
    %c12 = arith.constant 12 : index
    %c0_367 = arith.constant 0 : index
    %c0_368 = arith.constant 0 : index
    %424 = vector.load %arg15[%c0_366, %c12, %c0_367, %c0_368] : memref<1x16x8x256xf32, #tpu.memory_space<vmem>>, vector<1x1x8x256xf32>
    %425 = vector.shape_cast %424 : vector<1x1x8x256xf32> to vector<8x256xf32>
    %426 = vector.shape_cast %345 : vector<8x256xf32> to vector<1x1x8x256xf32>
    tpu.vector_store %arg15[%c0_366, %c12, %c0_367, %c0_368], %426 {strides = array<i32>} : memref<1x16x8x256xf32, #tpu.memory_space<vmem>>, vector<1x1x8x256xf32>,
    %c0_369 = arith.constant 0 : index
    %c13 = arith.constant 13 : index
    %c0_370 = arith.constant 0 : index
    %c0_371 = arith.constant 0 : index
    %427 = vector.load %arg15[%c0_369, %c13, %c0_370, %c0_371] : memref<1x16x8x256xf32, #tpu.memory_space<vmem>>, vector<1x1x8x256xf32>
    %428 = vector.shape_cast %427 : vector<1x1x8x256xf32> to vector<8x256xf32>
    %429 = vector.shape_cast %359 : vector<8x256xf32> to vector<1x1x8x256xf32>
    tpu.vector_store %arg15[%c0_369, %c13, %c0_370, %c0_371], %429 {strides = array<i32>} : memref<1x16x8x256xf32, #tpu.memory_space<vmem>>, vector<1x1x8x256xf32>,
    %c0_372 = arith.constant 0 : index
    %c14 = arith.constant 14 : index
    %c0_373 = arith.constant 0 : index
    %c0_374 = arith.constant 0 : index
    %430 = vector.load %arg15[%c0_372, %c14, %c0_373, %c0_374] : memref<1x16x8x256xf32, #tpu.memory_space<vmem>>, vector<1x1x8x256xf32>
    %431 = vector.shape_cast %430 : vector<1x1x8x256xf32> to vector<8x256xf32>
    %432 = vector.shape_cast %373 : vector<8x256xf32> to vector<1x1x8x256xf32>
    tpu.vector_store %arg15[%c0_372, %c14, %c0_373, %c0_374], %432 {strides = array<i32>} : memref<1x16x8x256xf32, #tpu.memory_space<vmem>>, vector<1x1x8x256xf32>,
    %c0_375 = arith.constant 0 : index
    %c15 = arith.constant 15 : index
    %c0_376 = arith.constant 0 : index
    %c0_377 = arith.constant 0 : index
    %433 = vector.load %arg15[%c0_375, %c15, %c0_376, %c0_377] : memref<1x16x8x256xf32, #tpu.memory_space<vmem>>, vector<1x1x8x256xf32>
    %434 = vector.shape_cast %433 : vector<1x1x8x256xf32> to vector<8x256xf32>
    %435 = vector.shape_cast %387 : vector<8x256xf32> to vector<1x1x8x256xf32>
    tpu.vector_store %arg15[%c0_375, %c15, %c0_376, %c0_377], %435 {strides = array<i32>} : memref<1x16x8x256xf32, #tpu.memory_space<vmem>>, vector<1x1x8x256xf32>,
    return
  }
  func.func @transform_0(%arg0: i32) -> (i32, i32, i32) {
    %c0_i32 = arith.constant 0 : i32
    %c0_i32_0 = arith.constant 0 : i32
    %c0_i32_1 = arith.constant 0 : i32
    return %arg0, %c0_i32, %c0_i32_0 : i32, i32, i32
  }
  func.func @transform_1(%arg0: i32) -> (i32, i32, i32) {
    %c0_i32 = arith.constant 0 : i32
    %c0_i32_0 = arith.constant 0 : i32
    %c0_i32_1 = arith.constant 0 : i32
    %c0_i32_2 = arith.constant 0 : i32
    return %c0_i32, %c0_i32_0, %c0_i32_1 : i32, i32, i32
  }
  func.func @transform_2(%arg0: i32) -> (i32, i32) {
    %c0_i32 = arith.constant 0 : i32
    %c0_i32_0 = arith.constant 0 : i32
    %c0_i32_1 = arith.constant 0 : i32
    return %c0_i32, %c0_i32_0 : i32, i32
  }
  func.func @transform_3(%arg0: i32) -> (i32, i32) {
    %c0_i32 = arith.constant 0 : i32
    %c0_i32_0 = arith.constant 0 : i32
    %c0_i32_1 = arith.constant 0 : i32
    return %c0_i32, %c0_i32_0 : i32, i32
  }
  func.func @transform_4(%arg0: i32) -> (i32, i32) {
    %c0_i32 = arith.constant 0 : i32
    %c0_i32_0 = arith.constant 0 : i32
    %c0_i32_1 = arith.constant 0 : i32
    return %c0_i32, %c0_i32_0 : i32, i32
  }
  func.func @transform_5(%arg0: i32) -> (i32, i32) {
    %c0_i32 = arith.constant 0 : i32
    %c0_i32_0 = arith.constant 0 : i32
    %c0_i32_1 = arith.constant 0 : i32
    return %c0_i32, %c0_i32_0 : i32, i32
  }
  func.func @transform_6(%arg0: i32) -> (i32, i32) {
    %c0_i32 = arith.constant 0 : i32
    %c0_i32_0 = arith.constant 0 : i32
    %c0_i32_1 = arith.constant 0 : i32
    return %c0_i32, %c0_i32_0 : i32, i32
  }
  func.func @transform_7(%arg0: i32) -> (i32, i32) {
    %c0_i32 = arith.constant 0 : i32
    %c0_i32_0 = arith.constant 0 : i32
    %c0_i32_1 = arith.constant 0 : i32
    return %c0_i32, %c0_i32_0 : i32, i32
  }
  func.func @transform_8(%arg0: i32) -> (i32, i32) {
    %c0_i32 = arith.constant 0 : i32
    %c0_i32_0 = arith.constant 0 : i32
    %c0_i32_1 = arith.constant 0 : i32
    return %c0_i32, %c0_i32_0 : i32, i32
  }
  func.func @transform_9(%arg0: i32) -> (i32, i32) {
    %c0_i32 = arith.constant 0 : i32
    %c0_i32_0 = arith.constant 0 : i32
    %c0_i32_1 = arith.constant 0 : i32
    return %c0_i32, %c0_i32_0 : i32, i32
  }
  func.func @transform_10(%arg0: i32) -> (i32, i32) {
    %c0_i32 = arith.constant 0 : i32
    %c0_i32_0 = arith.constant 0 : i32
    %c0_i32_1 = arith.constant 0 : i32
    return %c0_i32, %c0_i32_0 : i32, i32
  }
  func.func @transform_11(%arg0: i32) -> (i32, i32) {
    %c0_i32 = arith.constant 0 : i32
    %c0_i32_0 = arith.constant 0 : i32
    %c0_i32_1 = arith.constant 0 : i32
    return %c0_i32, %c0_i32_0 : i32, i32
  }
  func.func @transform_12(%arg0: i32) -> (i32, i32) {
    %c0_i32 = arith.constant 0 : i32
    %c0_i32_0 = arith.constant 0 : i32
    %c0_i32_1 = arith.constant 0 : i32
    return %c0_i32, %c0_i32_0 : i32, i32
  }
  func.func @transform_13(%arg0: i32) -> (i32, i32) {
    %c0_i32 = arith.constant 0 : i32
    %c0_i32_0 = arith.constant 0 : i32
    %c0_i32_1 = arith.constant 0 : i32
    return %c0_i32, %c0_i32_0 : i32, i32
  }
  func.func @transform_14(%arg0: i32) -> (i32, i32, i32, i32) {
    %c0_i32 = arith.constant 0 : i32
    %c0_i32_0 = arith.constant 0 : i32
    %c0_i32_1 = arith.constant 0 : i32
    %c0_i32_2 = arith.constant 0 : i32
    return %arg0, %c0_i32, %c0_i32_0, %c0_i32_1 : i32, i32, i32, i32
  }
}

</mosaic_0001>

<bundles_post_ra>
// kernel: tile.28
= control target key start
LH: loop header
LB: loop body
LE: loop exit
PB: predicated region body
PF: predicated region fallthrough
CT: control target
= control target key end

     0   :  { %s22_s0 = inlined_call_operand.vmem [shape: f32[16], index: 0, kind: input, shape index: {}]   ;;  %s23_s1 = inlined_call_operand.vmem [shape: f32[4,16], index: 1, kind: output, shape index: {}]  }
   0x1   :  { %v4_v0 = vld [vmem:[%s22_s0] ss:$0 sm:$0xff] }
   0x2   :  { %5 = vst [vmem:[%s23_s1] sm:$0xf] %v4_v0 }

// kernel: tile.38
= control target key start
LH: loop header
LB: loop body
LE: loop exit
PB: predicated region body
PF: predicated region fallthrough
CT: control target
= control target key end

     0   :  { %s22_s0 = inlined_call_operand.vmem [shape: f32[8], index: 0, kind: input, shape index: {}]   ;;  %s23_s1 = inlined_call_operand.vmem [shape: f32[4,8], index: 1, kind: output, shape index: {}]  }
   0x1   :  { %v4_v0 = vld [vmem:[%s22_s0] ss:$0 sm:$0xff] }
   0x2   :  { %5 = vst [vmem:[%s23_s1] sm:$0xf] %v4_v0 }

// kernel: tile.2
= control target key start
LH: loop header
LB: loop body
LE: loop exit
PB: predicated region body
PF: predicated region fallthrough
CT: control target
= control target key end

     0   :  { %s66_s8 = smov 125   ;;  %s67_s9 = smov 123   ;;  %vm7_vm0 = vcmask 7168   ;;  %s117_s0 = inlined_call_operand.vmem [shape: f32[4,8], index: 0, kind: input, shape index: {}]   ;;  %s118_s1 = inlined_call_operand.vmem [shape: f32[32,1], index: 1, kind: output, shape index: {}]  }
   0x1   :  { %v4_v0 = vld [vmem:[%s117_s0] sm:$0xf]  ;;  %s65_s0 = smov 127   ;;  %s68_s10 = smov 126  }
   0x2   :  { %5 = vst [vmem:[#allocation0] sm:$0xf] %v4_v0  ;;  %s69_s11 = smov 124   ;;  %s70_s12 = smov 122  }
   0x3   :  { %s71_s13 = smov 121  }
   0x9   :  { %v9_v1 = vld [vmem:[#allocation0] sm:$0xf]  }
   0xa   :  { %v21_v2 = vld [vmem:[#allocation0] sm:$0xf]   ;;  %10 = vrot.lane.b32.xlu0 %v9_v1, %s65_s0 }
   0xb   :  { %22 = vrot.lane.b32.xlu1 %v21_v2, %s66_s8  ;;  %v33_v3 = vld [vmem:[#allocation0] sm:$0xf]  }
   0xc   :  { %34 = vrot.lane.b32.xlu2 %v33_v3, %s67_s9  ;;  %v15_v4 = vld [vmem:[#allocation0] sm:$0xf]  }
   0xd   :  { %v27_v5 = vld [vmem:[#allocation0] sm:$0xf]  }
   0xe   :  { %v39_v6 = vld [vmem:[#allocation0] sm:$0xf]  }
   0xf   :  { %v45_v7 = vld [vmem:[#allocation0] sm:$0xf]  }
  0x10   :  { %v6_v8 = vld [vmem:[#allocation0] sm:$0xf]  }
  0x11   :  { %8 = vst.msk [vmem:[%s118_s1] ss:$8 sm:$0xf] %vm7_vm0, %v6_v8  }
  0x12   :  { %16 = vrot.lane.b32.xlu0 %v15_v4, %s68_s10 }
  0x13   :  { %28 = vrot.lane.b32.xlu1 %v27_v5, %s69_s11 }
  0x14   :  { %40 = vrot.lane.b32.xlu2 %v39_v6, %s70_s12 }
  0x1a   :  { %46 = vrot.lane.b32.xlu0 %v45_v7, %s71_s13 }
  0x66   :  { %v35_v9 = vpop.permute.xlu2 %34  }
  0x67   :  { %55 = vst.msk [vmem:[%s118_s1 + $0x5] ss:$8 sm:$0xf] %vm7_vm0, %v35_v9  }
  0x6e   :  { %v41_v10 = vpop.permute.xlu2 %40  }
  0x6f   :  { %56 = vst.msk [vmem:[%s118_s1 + $0x6] ss:$8 sm:$0xf] %vm7_vm0, %v41_v10  }
  0x7c   :  { %v11_v11 = vpop.permute.xlu0 %10  }
  0x7d   :  { %v23_v12 = vpop.permute.xlu1 %22   ;;  %51 = vst.msk [vmem:[%s118_s1 + $0x1] ss:$8 sm:$0xf] %vm7_vm0, %v11_v11  }
  0x7e   :  { %53 = vst.msk [vmem:[%s118_s1 + $0x3] ss:$8 sm:$0xf] %vm7_vm0, %v23_v12  }
  0x84   :  { %v17_v13 = vpop.permute.xlu0 %16  }
  0x85   :  { %v29_v14 = vpop.permute.xlu1 %28   ;;  %52 = vst.msk [vmem:[%s118_s1 + $0x2] ss:$8 sm:$0xf] %vm7_vm0, %v17_v13  }
  0x86   :  { %54 = vst.msk [vmem:[%s118_s1 + $0x4] ss:$8 sm:$0xf] %vm7_vm0, %v29_v14  }
  0x8c   :  { %v47_v15 = vpop.permute.xlu0 %46  }
  0x8d   :  { %57 = vst.msk [vmem:[%s118_s1 + $0x7] ss:$8 sm:$0xf] %vm7_vm0, %v47_v15  }

// kernel: tile.0
= control target key start
LH: loop header
LB: loop body
LE: loop exit
PB: predicated region body
PF: predicated region fallthrough
CT: control target
= control target key end

     0   :  { %s176_s8 = smov 127   ;;  %s177_s9 = smov 123   ;;  %vm7_vm0 = vcmask 7168   ;;  %s331_s0 = inlined_call_operand.vmem [shape: f32[4,16], index: 0, kind: input, shape index: {}]   ;;  %s332_s1 = inlined_call_operand.vmem [shape: f32[64,1], index: 1, kind: output, shape index: {}]  }
   0x1   :  { %v4_v0 = vld [vmem:[%s331_s0] sm:$0xf]  ;;  %s175_s0 = smov 125   ;;  %s178_s10 = smov 124  }
   0x2   :  { %5 = vst [vmem:[#allocation0] sm:$0xf] %v4_v0  ;;  %s179_s11 = smov 126   ;;  %s180_s12 = smov 122  }
   0x3   :  { %s181_s13 = smov 120   ;;  %s182_s14 = smov 121  }
   0x4   :  { %s183_s15 = smov 119   ;;  %s184_s16 = smov 117  }
   0x5   :  { %s185_s17 = smov 118   ;;  %s186_s18 = smov 116  }
   0x6   :  { %s187_s19 = smov 114   ;;  %s188_s20 = smov 115  }
   0x7   :  { %s189_s21 = smov 113  }
   0x9   :  { %v26_v1 = vld [vmem:[#allocation0] sm:$0xf]  }
   0xa   :  { %v10_v2 = vld [vmem:[#allocation0] sm:$0xf]   ;;  %27 = vrot.lane.b32.xlu1 %v26_v1, %s175_s0 }
   0xb   :  { %11 = vrot.lane.b32.xlu0 %v10_v2, %s176_s8  ;;  %v42_v3 = vld [vmem:[#allocation0] sm:$0xf]  }
   0xc   :  { %43 = vrot.lane.b32.xlu2 %v42_v3, %s177_s9  ;;  %v34_v4 = vld [vmem:[#allocation0] sm:$0xf]  }
   0xd   :  { %v18_v5 = vld [vmem:[#allocation0] sm:$0xf]  }
   0xe   :  { %v50_v6 = vld [vmem:[#allocation0] sm:$0xf]  }
   0xf   :  { %v66_v7 = vld [vmem:[#allocation0] sm:$0xf]  }
  0x10   :  { %v58_v8 = vld [vmem:[#allocation0] sm:$0xf]  }
  0x11   :  { %v74_v9 = vld [vmem:[#allocation0] sm:$0xf]  }
  0x12   :  { %35 = vrot.lane.b32.xlu1 %v34_v4, %s178_s10  ;;  %v90_v10 = vld [vmem:[#allocation0] sm:$0xf]  }
  0x13   :  { %19 = vrot.lane.b32.xlu0 %v18_v5, %s179_s11  ;;  %v82_v11 = vld [vmem:[#allocation0] sm:$0xf]  }
  0x14   :  { %51 = vrot.lane.b32.xlu2 %v50_v6, %s180_s12  ;;  %v98_v12 = vld [vmem:[#allocation0] sm:$0xf]  }
  0x15   :  { %v114_v13 = vld [vmem:[#allocation0] sm:$0xf]  }
  0x16   :  { %v106_v14 = vld [vmem:[#allocation0] sm:$0xf]  }
  0x17   :  { %v122_v15 = vld [vmem:[#allocation0] sm:$0xf]  }
  0x18   :  { %v6_v22 = vld [vmem:[#allocation0] sm:$0xf]  }
  0x19   :  { %8 = vst.msk [vmem:[%s332_s1] ss:$16 sm:$0x3] %vm7_vm0, %v6_v22  }
  0x1a   :  { %67 = vrot.lane.b32.xlu1 %v66_v7, %s181_s13  ;;  %9 = vst.msk [vmem:[%s332_s1] ss:$16 sm:$0xc] %vm7_vm0, %v6_v22  }
  0x1b   :  { %59 = vrot.lane.b32.xlu0 %v58_v8, %s182_s14 }
  0x1c   :  { %75 = vrot.lane.b32.xlu2 %v74_v9, %s183_s15 }
  0x22   :  { %91 = vrot.lane.b32.xlu1 %v90_v10, %s184_s16 }
  0x23   :  { %83 = vrot.lane.b32.xlu0 %v82_v11, %s185_s17 }
  0x24   :  { %99 = vrot.lane.b32.xlu2 %v98_v12, %s186_s18 }
  0x2a   :  { %115 = vrot.lane.b32.xlu1 %v114_v13, %s187_s19 }
  0x2b   :  { %107 = vrot.lane.b32.xlu0 %v106_v14, %s188_s20 }
  0x2c   :  { %123 = vrot.lane.b32.xlu2 %v122_v15, %s189_s21 }
  0x66   :  { %v44_v16 = vpop.permute.xlu2 %43  }
  0x67   :  { %138 = vst.msk [vmem:[%s332_s1 + $0x5] ss:$16 sm:$0x3] %vm7_vm0, %v44_v16  }
  0x68   :  { %139 = vst.msk [vmem:[%s332_s1 + $0x5] ss:$16 sm:$0xc] %vm7_vm0, %v44_v16  }
  0x6e   :  { %v52_v17 = vpop.permute.xlu2 %51  }
  0x6f   :  { %140 = vst.msk [vmem:[%s332_s1 + $0x6] ss:$16 sm:$0x3] %vm7_vm0, %v52_v17  }
  0x70   :  { %141 = vst.msk [vmem:[%s332_s1 + $0x6] ss:$16 sm:$0xc] %vm7_vm0, %v52_v17  }
  0x76   :  { %v76_v18 = vpop.permute.xlu2 %75  }
  0x77   :  { %146 = vst.msk [vmem:[%s332_s1 + $0x9] ss:$16 sm:$0x3] %vm7_vm0, %v76_v18  }
  0x78   :  { %147 = vst.msk [vmem:[%s332_s1 + $0x9] ss:$16 sm:$0xc] %vm7_vm0, %v76_v18  }
  0x7c   :  { %v28_v19 = vpop.permute.xlu1 %27  }
  0x7d   :  { %v12_v20 = vpop.permute.xlu0 %11   ;;  %134 = vst.msk [vmem:[%s332_s1 + $0x3] ss:$16 sm:$0x3] %vm7_vm0, %v28_v19  }
  0x7e   :  { %135 = vst.msk [vmem:[%s332_s1 + $0x3] ss:$16 sm:$0xc] %vm7_vm0, %v28_v19   ;;  %v100_v21 = vpop.permute.xlu2 %99  }
  0x7f   :  { %130 = vst.msk [vmem:[%s332_s1 + $0x1] ss:$16 sm:$0x3] %vm7_vm0, %v12_v20  }
  0x80   :  { %131 = vst.msk [vmem:[%s332_s1 + $0x1] ss:$16 sm:$0xc] %vm7_vm0, %v12_v20  }
  0x81   :  { %152 = vst.msk [vmem:[%s332_s1 + $0xc] ss:$16 sm:$0x3] %vm7_vm0, %v100_v21  }
  0x82   :  { %153 = vst.msk [vmem:[%s332_s1 + $0xc] ss:$16 sm:$0xc] %vm7_vm0, %v100_v21  }
  0x84   :  { %v36_v23 = vpop.permute.xlu1 %35  }
  0x85   :  { %v20_v24 = vpop.permute.xlu0 %19   ;;  %136 = vst.msk [vmem:[%s332_s1 + $0x4] ss:$16 sm:$0x3] %vm7_vm0, %v36_v23  }
  0x86   :  { %137 = vst.msk [vmem:[%s332_s1 + $0x4] ss:$16 sm:$0xc] %vm7_vm0, %v36_v23   ;;  %v124_v25 = vpop.permute.xlu2 %123  }
  0x87   :  { %132 = vst.msk [vmem:[%s332_s1 + $0x2] ss:$16 sm:$0x3] %vm7_vm0, %v20_v24  }
  0x88   :  { %133 = vst.msk [vmem:[%s332_s1 + $0x2] ss:$16 sm:$0xc] %vm7_vm0, %v20_v24  }
  0x89   :  { %158 = vst.msk [vmem:[%s332_s1 + $0xf] ss:$16 sm:$0x3] %vm7_vm0, %v124_v25  }
  0x8a   :  { %159 = vst.msk [vmem:[%s332_s1 + $0xf] ss:$16 sm:$0xc] %vm7_vm0, %v124_v25  }
  0x8c   :  { %v68_v26 = vpop.permute.xlu1 %67  }
  0x8d   :  { %v60_v27 = vpop.permute.xlu0 %59   ;;  %144 = vst.msk [vmem:[%s332_s1 + $0x8] ss:$16 sm:$0x3] %vm7_vm0, %v68_v26  }
  0x8e   :  { %145 = vst.msk [vmem:[%s332_s1 + $0x8] ss:$16 sm:$0xc] %vm7_vm0, %v68_v26  }
  0x8f   :  { %142 = vst.msk [vmem:[%s332_s1 + $0x7] ss:$16 sm:$0x3] %vm7_vm0, %v60_v27  }
  0x90   :  { %143 = vst.msk [vmem:[%s332_s1 + $0x7] ss:$16 sm:$0xc] %vm7_vm0, %v60_v27  }
  0x94   :  { %v92_v28 = vpop.permute.xlu1 %91  }
  0x95   :  { %v84_v29 = vpop.permute.xlu0 %83   ;;  %150 = vst.msk [vmem:[%s332_s1 + $0xb] ss:$16 sm:$0x3] %vm7_vm0, %v92_v28  }
  0x96   :  { %151 = vst.msk [vmem:[%s332_s1 + $0xb] ss:$16 sm:$0xc] %vm7_vm0, %v92_v28  }
  0x97   :  { %148 = vst.msk [vmem:[%s332_s1 + $0xa] ss:$16 sm:$0x3] %vm7_vm0, %v84_v29  }
  0x98   :  { %149 = vst.msk [vmem:[%s332_s1 + $0xa] ss:$16 sm:$0xc] %vm7_vm0, %v84_v29  }
  0x9c   :  { %v116_v30 = vpop.permute.xlu1 %115  }
  0x9d   :  { %v108_v31 = vpop.permute.xlu0 %107   ;;  %156 = vst.msk [vmem:[%s332_s1 + $0xe] ss:$16 sm:$0x3] %vm7_vm0, %v116_v30  }
  0x9e   :  { %157 = vst.msk [vmem:[%s332_s1 + $0xe] ss:$16 sm:$0xc] %vm7_vm0, %v116_v30  }
  0x9f   :  { %154 = vst.msk [vmem:[%s332_s1 + $0xd] ss:$16 sm:$0x3] %vm7_vm0, %v108_v31  }
  0xa0   :  { %155 = vst.msk [vmem:[%s332_s1 + $0xd] ss:$16 sm:$0xc] %vm7_vm0, %v108_v31  }

// kernel: upsample_forward.1
= control target key start
LH: loop header
LB: loop body
LE: loop exit
PB: predicated region body
PF: predicated region fallthrough
CT: control target
= control target key end

     0   :  { %19 = vsyncpa [#allocation3], 0  ;;  %s6680_s29 = smov 0   ;;  %s10509_s0 = inlined_call_operand.vmem [shape: f32[2,16,256], index: 0, kind: input, shape index: {}]   ;;  %s10510_s1 = inlined_call_operand.hbm [shape: f32[9,256,256], index: 1, kind: input, shape index: {}]   ;;  %s10511_s2 = inlined_call_operand.vmem [shape: f32[64,16], index: 2, kind: input, shape index: {}]   ;;  %s10512_s3 = inlined_call_operand.vmem [shape: f32[64,1], index: 3, kind: input, shape index: {}]   ;;  %s10513_s4 = inlined_call_operand.vmem [shape: f32[64,1], index: 4, kind: input, shape index: {}]   ;;  %s10514_s5 = inlined_call_operand.vmem [shape: f32[16,144], index: 5, kind: input, shape index: {}]   ;;  %s10515_s6 = inlined_call_operand.vmem [shape: f32[16,1], index: 6, kind: input, shape index: {}]   ;;  %s10516_s7 = inlined_call_operand.vmem [shape: f32[16,1], index: 7, kind: input, shape index: {}]   ;;  %s10517_s8 = inlined_call_operand.vmem [shape: f32[32,16], index: 8, kind: input, shape index: {}]   ;;  %s10518_s9 = inlined_call_operand.vmem [shape: f32[32,1], index: 9, kind: input, shape index: {}]   ;;  %s10519_s10 = inlined_call_operand.vmem [shape: f32[32,1], index: 10, kind: input, shape index: {}]   ;;  %s10520_s11 = inlined_call_operand.vmem [shape: f32[8,72], index: 11, kind: input, shape index: {}]   ;;  %s10521_s12 = inlined_call_operand.vmem [shape: f32[8,1], index: 12, kind: input, shape index: {}]   ;;  %s10522_s13 = inlined_call_operand.vmem [shape: f32[8,1], index: 13, kind: input, shape index: {}]   ;;  %s10523_s14 = inlined_call_operand.vmem [shape: f32[2,16,8,256], index: 14, kind: output, shape index: {}]  }
   0x1 LB: > { %s366_s16 = sshll.u32 %s10510_s1, 4  ;;  %s5680_s17 = sadd.s32 4294967295, %s6599_s29   ;;  %s6599_s29 = sphi %s6680_s29, %s25_s29   ;;  %s367_s16 = int_to_ptr.hbm [resolvable:$true] %s366_s16 }
   0x2   : > { %p5682_p0 = scmp.ge.s32.totalorder %s6599_s29, 1  ;;  %p355_p1 = scmp.lt.s32.totalorder %s6599_s29, 3 }
   0x3   : > { %p5831_p2 = scmp.eq.s32.totalorder %s5680_s17, 0  ;;  %s6601_s18 = smov [#allocation2]  }
   0x4   : > { %p356_p3 = pnand %p5682_p0, %p355_p1  ;;  %s368_s19 = sshll.u32 %s6601_s18, 4  ;;  %s369_s19 = int_to_ptr.vmem [resolvable:$true] %s368_s19 }
   0x5   : > { %s6602_s20 = smov 256   ;;  %s6603_s21 = smov 16  }
   0x6   : > { %p5827_p4 = pneg %p356_p3  ;;  %428 = sbr.rel (%p356_p3) target bundleno = 3958 (0xf76), region = 76 }
   0x8   : > { %p5828_p5 = pnand %p5831_p2, %p5827_p4 }
   0xa   : > { %5830 = dma.hbm_to_vmem [thread:$0]  (!%p5828_p5), %s367_s16, 73728, %s369_s19, [#allocation3], %s6602_s20, %s6602_s20, %s6603_s21  }
   0xb   : > { %6594 = dma.done.wait (%p5831_p2), [#allocation3], 73728  }
   0xc   : > { %6596 = vsyncadd (%p5831_p2), [#allocation3], 4294893568  ;;  %p475_p6 = scmp.lt.s32.totalorder %s5680_s17, 1  ;;  %v6604_v0 = vmov 0   ;;  %v611_v1 = vld [vmem:[%s10512_s3 + $0x38] sm:$0xff]  ;;  %v610_v2 = vld [vmem:[%s10512_s3 + $0x30] sm:$0xff] }
   0xd   : > { %5846 = vset.pattern.permute.xlu1 %v6604_v0  ;;  %5845 = vset.pattern.permute.xlu0 %v6604_v0  ;;  %v489_v7 = vld [vmem:[%s10511_s2] sm:$0xff]  ;;  %vm497_vm0 = vcmask 130048   ;;  %v675_v9 = vld [vmem:[%s10513_s4 + $0x38] sm:$0xff]  ;;  %v674_v10 = vld [vmem:[%s10513_s4 + $0x30] sm:$0xff]  ;;  %vm3614_vm1 = vcmask 588800  }
   0xe   : > { %s11287_s17 = smov (!%p475_p6, %s5680_s17), 1  ;;  %5847 = vset.pattern.permute.xlu2 %v6604_v0  ;;  %649 = vperm.xlu1 %5846, %v611_v1   ;;  %v493_v8 = vld [vmem:[%s10511_s2 + $0x20] sm:$0xff]  ;;  %v490_v12 = vld [vmem:[%s10511_s2 + $0x8] sm:$0xff]  ;;  %v491_v17 = vld [vmem:[%s10511_s2 + $0x10] sm:$0xff] }
   0xf   : > { %s5819_s22 = sshll.u32 %s11287_s17, 5  ;;  %644 = vperm.xlu0 %5845, %v610_v2   ;;  %v608_v11 = vld [vmem:[%s10512_s3 + $0x20] sm:$0xff]  ;;  %v494_v13 = vld [vmem:[%s10511_s2 + $0x28] sm:$0xff]  ;;  %v495_v18 = vld [vmem:[%s10511_s2 + $0x30] sm:$0xff]  ;;  %s5820_s20 = sshll.u32 %s11287_s17, 8 }
  0x10   : > { %s479_s25 = scalar_lea.vmem %s10509_s0, %s5819_s22  ;;  %634 = vperm.xlu2 %5847, %v608_v11   ;;  %v672_v14 = vld [vmem:[%s10513_s4 + $0x20] sm:$0xff]  ;;  %v673_v15 = vld [vmem:[%s10513_s4 + $0x28] sm:$0xff]  ;;  %v606_v19 = vld [vmem:[%s10512_s3 + $0x10] sm:$0xff]  ;;  %s8992_s23 = scalar_lea.vmem %s10523_s14, %s5820_s20 }
  0x11   : > { %v487_v3 = vld [vmem:[%s479_s25 + $0x10] sm:$0xff]  ;;  %v488_v4 = vld [vmem:[%s479_s25 + $0x18] sm:$0xff]  ;;  %v485_v5 = vld [vmem:[%s479_s25] sm:$0xff] }
  0x12   : > { %v486_v6 = vld [vmem:[%s479_s25 + $0x8] sm:$0xff]  ;;  %536 = vmatpush.msra.mxu0 %v487_v3  ;;  %5821 = vmatpush.msra.mxu2 %v488_v4  ;;  %v670_v20 = vld [vmem:[%s10513_s4 + $0x10] sm:$0xff]  ;;  %v607_v21 = vld [vmem:[%s10512_s3 + $0x18] sm:$0xff] }
  0x13   : > { %577 = vmatpush.msra.mxu1 %v488_v4  ;;  %v609_v16 = vld [vmem:[%s10512_s3 + $0x28] sm:$0xff]  ;;  %v492_v22 = vld [vmem:[%s10511_s2 + $0x18] sm:$0xff]  ;;  %v604_v26 = vld [vmem:[%s10512_s3] sm:$0xff] }
  0x14   : > { %537 = vmatpush.msra.mxu0 %v485_v5  ;;  %5822 = vmatpush.msra.mxu2 %v486_v6  ;;  %v6763_v23 = vld [vmem:[%s10511_s2 + $0x38] sm:$0xff]  ;;  %v605_v25 = vld [vmem:[%s10512_s3 + $0x8] sm:$0xff]  ;;  %v668_v28 = vld [vmem:[%s10513_s4] sm:$0xff] }
  0x15   : > { %5691 = vmatmul.msk.f32.vlgmr.msra.gmra.mxu0 %vm497_vm0, %v489_v7  ;;  %5703 = vmatmul.msk.f32.vlgmr.msra.gmra.mxu2 %vm497_vm0, %v493_v8  ;;  %v671_v24 = vld [vmem:[%s10513_s4 + $0x18] sm:$0xff]  ;;  %v669_v27 = vld [vmem:[%s10513_s4 + $0x8] sm:$0xff]  ;;  %v6788_v30 = vld [vmem:[#allocation2 + $0x3f0] sm:$0xff] }
  0x16   : > { %578 = vmatpush.msra.mxu1 %v486_v6  ;;  %713 = vperm.xlu1 %5846, %v675_v9   ;;  %v1505_v29 = vld [vmem:[%s10515_s6 + $0x8] sm:$0xff]  ;;  %v6790_v31 = vld [vmem:[#allocation2 + $0x3e0] sm:$0xff]  ;;  %v6793_v32 = vld [vmem:[#allocation2 + $0x3d0] sm:$0xff] }
  0x17   : > { %5699 = vmatmul.msk.f32.vlgmr.msra.gmra.mxu1 %vm497_vm0, %v489_v7  ;;  %708 = vperm.xlu0 %5845, %v674_v10   ;;  %v810_v33 = vld [vmem:[#allocation2 + $0x1f0] sm:$0xff]  ;;  %v808_v34 = vld [vmem:[#allocation2 + $0x1e0] sm:$0xff]  ;;  %v1521_v36 = vld [vmem:[%s10516_s7 + $0x8] sm:$0xff] }
  0x18   : > { %698 = vperm.xlu2 %5847, %v672_v14   ;;  %992 = vmatpush.msrb.mxu1 %v6788_v30  ;;  %v6797_v35 = vld [vmem:[#allocation2 + $0x3c0] sm:$0xff]  ;;  %v6806_v38 = vld [vmem:[#allocation2 + $0x3b0] sm:$0xff]  ;;  %v2930_v50 = vld [vmem:[%s10519_s10 + $0x18] sm:$0xff] }
  0x19   : > { %835 = vmatpush.msra.mxu3 %v810_v33  ;;  %v1520_v37 = vld [vmem:[%s10516_s7] sm:$0xff]  ;;  %v806_v39 = vld [vmem:[#allocation2 + $0x1d0] sm:$0xff]  ;;  %v2896_v62 = vld [vmem:[%s10518_s9 + $0x8] sm:$0xff] }
  0x1a   : > { %993 = vmatpush.msrb.mxu1 %v6790_v31  ;;  %v6808_v40 = vld [vmem:[#allocation2 + $0x2f0] sm:$0xff]  ;;  %v6812_v41 = vld [vmem:[#allocation2 + $0x2e0] sm:$0xff]  ;;  %v2928_v63 = vld [vmem:[%s10519_s10 + $0x8] sm:$0xff] }
  0x1b   : > { %836 = vmatpush.msra.mxu3 %v808_v34  ;;  %969 = vmatpush.msrb.mxu0 %v6808_v40  ;;  %v6814_v42 = vld [vmem:[#allocation2 + $0x3a0] sm:$0xff]  ;;  %v6820_v45 = vld [vmem:[#allocation2 + $0x390] sm:$0xff]  ;;  %v2898_v10 = vld [vmem:[%s10518_s9 + $0x18] sm:$0xff] }
  0x1c   : > { %994 = vmatpush.msrb.mxu1 %v6793_v32  ;;  %v804_v43 = vld [vmem:[#allocation2 + $0x1c0] sm:$0xff]  ;;  %v802_v46 = vld [vmem:[#allocation2 + $0x1b0] sm:$0xff] }
  0x1d   : > { %5692 = vmatmul.msk.f32.gmra.mxu0 %vm497_vm0, %v490_v12  ;;  %5704 = vmatmul.msk.f32.gmra.mxu2 %vm497_vm0, %v494_v13  ;;  %v1504_v44 = vld [vmem:[%s10515_s6] sm:$0xff]  ;;  %v6824_v47 = vld [vmem:[#allocation2 + $0x2d0] sm:$0xff] }
  0x1e   : > { %703 = vperm.xlu1 %5846, %v673_v15   ;;  %995 = vmatpush.msrb.mxu1 %v6797_v35  ;;  %v6827_v48 = vld [vmem:[#allocation2 + $0x380] sm:$0xff]  ;;  %v2897_v51 = vld [vmem:[%s10518_s9 + $0x10] sm:$0xff] }
  0x1f   : > { %5700 = vmatmul.msk.f32.gmra.mxu1 %vm497_vm0, %v490_v12  ;;  %639 = vperm.xlu0 %5845, %v609_v16   ;;  %v800_v49 = vld [vmem:[#allocation2 + $0x1a0] sm:$0xff]  ;;  %v6836_v52 = vld [vmem:[#allocation2 + $0x370] sm:$0xff] }
  0x20   : > { %624 = vperm.xlu2 %5847, %v606_v19   ;;  %996 = vmatpush.msrb.mxu1 %v6806_v38  ;;  %v798_v53 = vld [vmem:[#allocation2 + $0x190] sm:$0xff]  ;;  %v6840_v54 = vld [vmem:[#allocation2 + $0x2c0] sm:$0xff] }
  0x21   : > { %837 = vmatpush.msra.mxu3 %v806_v39  ;;  %970 = vmatpush.msrb.mxu0 %v6812_v41  ;;  %v6842_v55 = vld [vmem:[#allocation2 + $0x360] sm:$0xff]  ;;  %v6845_v57 = vld [vmem:[#allocation2 + $0x350] sm:$0xff]  ;;  %v801_v39 = vld [vmem:[#allocation2 + $0x1a8] sm:$0xff] }
  0x22   : > { %997 = vmatpush.msrb.mxu1 %v6814_v42  ;;  %v796_v56 = vld [vmem:[#allocation2 + $0x180] sm:$0xff]  ;;  %v794_v58 = vld [vmem:[#allocation2 + $0x170] sm:$0xff] }
  0x23   : > { %838 = vmatpush.msra.mxu3 %v804_v43  ;;  %971 = vmatpush.msrb.mxu0 %v6824_v47  ;;  %v6849_v59 = vld [vmem:[#allocation2 + $0x2b0] sm:$0xff]  ;;  %v6853_v60 = vld [vmem:[#allocation2 + $0x340] sm:$0xff]  ;;  %v799_v43 = vld [vmem:[#allocation2 + $0x198] sm:$0xff] }
  0x24   : > { %998 = vmatpush.msrb.mxu1 %v6820_v45  ;;  %v792_v61 = vld [vmem:[#allocation2 + $0x160] sm:$0xff]  ;;  %v6862_v0 = vld [vmem:[#allocation2 + $0x330] sm:$0xff] }
  0x25   : > { %5693 = vmatmul.msk.f32.gmra.mxu0 %vm497_vm0, %v491_v17  ;;  %5705 = vmatmul.msk.f32.gmra.mxu2 %vm497_vm0, %v495_v18  ;;  %v6866_v1 = vld [vmem:[#allocation2 + $0x320] sm:$0xff]  ;;  %v6869_v2 = vld [vmem:[#allocation2 + $0x310] sm:$0xff] }
  0x26   : > { %629 = vperm.xlu1 %5846, %v607_v21   ;;  %839 = vmatpush.msra.mxu3 %v802_v46  ;;  %v6872_v3 = vld [vmem:[#allocation2 + $0x300] sm:$0xff]  ;;  %v790_v6 = vld [vmem:[#allocation2 + $0x150] sm:$0xff]  ;;  %v797_v46 = vld [vmem:[#allocation2 + $0x188] sm:$0xff] }
  0x27   : > { %5701 = vmatmul.msk.f32.gmra.mxu1 %vm497_vm0, %v491_v17  ;;  %688 = vperm.xlu0 %5845, %v670_v20   ;;  %v2927_v4 = vld [vmem:[%s10519_s10] sm:$0xff]  ;;  %v6890_v9 = vld [vmem:[#allocation2 + $0x290] sm:$0xff] }
  0x28   : > { %693 = vperm.xlu2 %5847, %v671_v24   ;;  %999 = vmatpush.msrb.mxu1 %v6827_v48  ;;  %v3658_v5 = vld [vmem:[%s10521_s12] sm:$0xff]  ;;  %v786_v11 = vld [vmem:[#allocation2 + $0x130] sm:$0xff] }
  0x29   : > { %840 = vmatpush.msra.mxu3 %v800_v49  ;;  %972 = vmatpush.msrb.mxu0 %v6840_v54  ;;  %v6887_v7 = vld [vmem:[#allocation2 + $0x2a0] sm:$0xff]  ;;  %v6899_v15 = vld [vmem:[#allocation2 + $0x270] sm:$0xff] }
  0x2a   : > { %1000 = vmatpush.msrb.mxu1 %v6836_v52  ;;  %v6895_v12 = vld [vmem:[#allocation2 + $0x280] sm:$0xff]  ;;  %v782_v17 = vld [vmem:[#allocation2 + $0x110] sm:$0xff] }
  0x2b   : > { %841 = vmatpush.msra.mxu3 %v798_v53  ;;  %973 = vmatpush.msrb.mxu0 %v6849_v59  ;;  %v784_v14 = vld [vmem:[#allocation2 + $0x120] sm:$0xff]  ;;  %v774_v19 = vld [vmem:[#allocation2 + $0xd0] sm:$0xff]  ;;  %v791_v53 = vld [vmem:[#allocation2 + $0x158] sm:$0xff] }
  0x2c   : > { %1001 = vmatpush.msrb.mxu1 %v6842_v55  ;;  %v776_v16 = vld [vmem:[#allocation2 + $0xe0] sm:$0xff]  ;;  %v6908_v21 = vld [vmem:[#allocation2 + $0x250] sm:$0xff] }
  0x2d   : > { %5694 = vmatmul.msk.f32.gmra.mxu0 %vm497_vm0, %v492_v22  ;;  %5706 = vmatmul.msk.f32.gmra.mxu2 %vm497_vm0, %v6763_v23  ;;  %v780_v20 = vld [vmem:[#allocation2 + $0x100] sm:$0xff]  ;;  %v766_v33 = vld [vmem:[#allocation2 + $0x90] sm:$0xff] }
  0x2e   : > { %614 = vperm.xlu1 %5846, %v604_v26   ;;  %842 = vmatpush.msra.mxu3 %v796_v56  ;;  %v772_v24 = vld [vmem:[#allocation2 + $0xc0] sm:$0xff]  ;;  %v809_v26 = vld [vmem:[#allocation2 + $0x1e8] sm:$0xff]  ;;  %v6926_v34 = vld [vmem:[#allocation2 + $0x210] sm:$0xff] }
  0x2f   : > { %5702 = vmatmul.msk.f32.gmra.mxu1 %vm497_vm0, %v492_v22  ;;  %619 = vperm.xlu0 %5845, %v605_v25   ;;  %v811_v22 = vld [vmem:[#allocation2 + $0x1f8] sm:$0xff]  ;;  %v6915_v25 = vld [vmem:[#allocation2 + $0x240] sm:$0xff] }
  0x30   : > { %683 = vperm.xlu2 %5847, %v669_v27   ;;  %1002 = vmatpush.msrb.mxu1 %v6845_v57  ;;  %v770_v27 = vld [vmem:[#allocation2 + $0xb0] sm:$0xff]  ;;  %v3666_v49 = vld [vmem:[%s10522_s13] sm:$0xff] }
  0x31   : > { %843 = vmatpush.msra.mxu3 %v794_v58  ;;  %974 = vmatpush.msrb.mxu0 %v6887_v7  ;;  %v787_v58 = vld [vmem:[#allocation2 + $0x138] sm:$0xff] }
  0x32   : > { %1003 = vmatpush.msrb.mxu1 %v6853_v60 }
  0x33   : > { %844 = vmatpush.msra.mxu3 %v792_v61  ;;  %975 = vmatpush.msrb.mxu0 %v6890_v9  ;;  %v785_v61 = vld [vmem:[#allocation2 + $0x128] sm:$0xff] }
  0x34   : > { %1004 = vmatpush.msrb.mxu1 %v6862_v0 }
  0x35   : > { %5695 = vmatmul.msk.f32.gmra.mxu0 %vm497_vm0, %v493_v8  ;;  %v788_v8 = vld [vmem:[#allocation2 + $0x140] sm:$0xff]  ;;  %845 = vmatpush.msra.mxu3 %v790_v6 }
  0x36   : > { %1513 = vperm.xlu1 %5846, %v1505_v29   ;;  %1005 = vmatpush.msrb.mxu1 %v6866_v1  ;;  %v807_v29 = vld [vmem:[#allocation2 + $0x1d8] sm:$0xff] }
  0x37   : > { %678 = vperm.xlu0 %5845, %v668_v28   ;;  %846 = vmatpush.msra.mxu3 %v788_v8  ;;  %v6920_v28 = vld [vmem:[#allocation2 + $0x230] sm:$0xff] }
  0x38   : > { %1508 = vperm.xlu2 %5847, %v1504_v44   ;;  %1006 = vmatpush.msrb.mxu1 %v6869_v2  ;;  %v760_v44 = vld [vmem:[#allocation2 + $0x60] sm:$0xff] }
  0x39   : > { %847 = vmatpush.msra.mxu3 %v786_v11  ;;  %976 = vmatpush.msrb.mxu0 %v6895_v12  ;;  %v767_v11 = vld [vmem:[#allocation2 + $0x98] sm:$0xff] }
  0x3a   : > { %1007 = vmatpush.msrb.mxu1 %v6872_v3 }
  0x3b   : > { %848 = vmatpush.msra.mxu3 %v784_v14  ;;  %977 = vmatpush.msrb.mxu0 %v6899_v15 }
  0x3c   : > { %1084 = vmatpush.msra.mxu1 %v6788_v30  ;;  %v768_v30 = vld [vmem:[#allocation2 + $0xa0] sm:$0xff] }
  0x3d   : > { %5696 = vmatmul.msk.f32.gmra.mxu0 %vm497_vm0, %v494_v13  ;;  %v778_v13 = vld [vmem:[#allocation2 + $0xf0] sm:$0xff]  ;;  %849 = vmatpush.msra.mxu3 %v782_v17 }
  0x3e   : > { %1524 = vperm.xlu1 %5846, %v1520_v37   ;;  %1085 = vmatpush.msra.mxu1 %v6790_v31  ;;  %v6923_v31 = vld [vmem:[#allocation2 + $0x220] sm:$0xff] }
  0x3f   : > { %1529 = vperm.xlu0 %5845, %v1521_v36   ;;  %812 = vmatpush.msrb.mxu2 %v778_v13  ;;  %v2895_v36 = vld [vmem:[%s10518_s9] sm:$0xff]  ;;  %v765_v13 = vld [vmem:[#allocation2 + $0x88] sm:$0xff] }
  0x40   : > { %1086 = vmatpush.msra.mxu1 %v6793_v32  ;;  %2916 = vperm.xlu2 %5847, %v2898_v10   ;;  %v805_v32 = vld [vmem:[#allocation2 + $0x1c8] sm:$0xff]  ;;  %v764_v37 = vld [vmem:[#allocation2 + $0x80] sm:$0xff] }
  0x41   : > { %813 = vmatpush.msrb.mxu2 %v776_v16  ;;  %850 = vmatpush.msra.mxu3 %v780_v20  ;;  %v769_v10 = vld [vmem:[#allocation2 + $0xa8] sm:$0xff]  ;;  %v763_v20 = vld [vmem:[#allocation2 + $0x78] sm:$0xff] }
  0x42   : > { %1087 = vmatpush.msra.mxu1 %v6797_v35  ;;  %v803_v35 = vld [vmem:[#allocation2 + $0x1b8] sm:$0xff] }
  0x43   : > { %814 = vmatpush.msrb.mxu2 %v774_v19  ;;  %881 = vmatpush.msrb.mxu3 %v811_v22 }
  0x44   : > { %1088 = vmatpush.msra.mxu1 %v6806_v38  ;;  %v6934_v38 = vld [vmem:[#allocation2 + $0x200] sm:$0xff] }
  0x45   : > { %5697 = vmatmul.msk.f32.gmra.mxu0 %vm497_vm0, %v495_v18  ;;  %v6905_v18 = vld [vmem:[#allocation2 + $0x260] sm:$0xff]  ;;  %815 = vmatpush.msrb.mxu2 %v772_v24  ;;  %v761_v24 = vld [vmem:[#allocation2 + $0x68] sm:$0xff] }
  0x46   : > { %2911 = vperm.xlu1 %5846, %v2897_v51   ;;  %1089 = vmatpush.msra.mxu1 %v6814_v42  ;;  %v762_v42 = vld [vmem:[#allocation2 + $0x70] sm:$0xff] }
  0x47   : > { %2948 = vperm.xlu0 %5845, %v2930_v50   ;;  %978 = vmatpush.msrb.mxu0 %v6905_v18  ;;  %v793_v50 = vld [vmem:[#allocation2 + $0x168] sm:$0xff] }
  0x48   : > { %1090 = vmatpush.msra.mxu1 %v6820_v45  ;;  %882 = vmatpush.msrb.mxu3 %v809_v26  ;;  %v759_v26 = vld [vmem:[#allocation2 + $0x58] sm:$0xff] }
  0x49   : > { %979 = vmatpush.msrb.mxu0 %v6908_v21  ;;  %816 = vmatpush.msrb.mxu2 %v770_v27 }
  0x4a   : > { %1091 = vmatpush.msra.mxu1 %v6827_v48  ;;  %883 = vmatpush.msrb.mxu3 %v807_v29  ;;  %v758_v48 = vld [vmem:[#allocation2 + $0x50] sm:$0xff] }
  0x4b   : > { %980 = vmatpush.msrb.mxu0 %v6915_v25  ;;  %817 = vmatpush.msrb.mxu2 %v768_v30  ;;  %v6998_v29 = vld [vmem:[#allocation2 + $0x7d0] sm:$0xff]  ;;  %v757_v30 = vld [vmem:[#allocation2 + $0x48] sm:$0xff] }
  0x4c   : > { %1092 = vmatpush.msra.mxu1 %v6836_v52  ;;  %884 = vmatpush.msrb.mxu3 %v805_v32  ;;  %v754_v52 = vld [vmem:[#allocation2 + $0x30] sm:$0xff] }
  0x4d   : > { %5698 = vmatmul.msk.f32.gmra.mxu0 %vm497_vm0, %v6763_v23  ;;  %v2929_v23 = vld [vmem:[%s10519_s10 + $0x10] sm:$0xff]  ;;  %818 = vmatpush.msrb.mxu2 %v766_v33 }
  0x4e   : > { %2938 = vperm.xlu1 %5846, %v2928_v63   ;;  %1093 = vmatpush.msra.mxu1 %v6842_v55  ;;  %v752_v55 = vld [vmem:[#allocation2 + $0x20] sm:$0xff] }
  0x4f   : > { %2906 = vperm.xlu0 %5845, %v2896_v62   ;;  %2943 = vperm.xlu2 %5847, %v2929_v23   ;;  %v6991_v23 = vld [vmem:[#allocation2 + $0x7f0] sm:$0xff] }
  0x50   : > { %1094 = vmatpush.msra.mxu1 %v6845_v57  ;;  %981 = vmatpush.msrb.mxu0 %v6920_v28  ;;  %v750_v57 = vld [vmem:[#allocation2 + $0x10] sm:$0xff] }
  0x51   : > { %885 = vmatpush.msrb.mxu3 %v803_v35  ;;  %819 = vmatpush.msrb.mxu2 %v764_v37 }
  0x52   : > { %1095 = vmatpush.msra.mxu1 %v6853_v60  ;;  %982 = vmatpush.msrb.mxu0 %v6923_v31  ;;  %v779_v60 = vld [vmem:[#allocation2 + $0xf8] sm:$0xff] }
  0x53   : > { %886 = vmatpush.msrb.mxu3 %v801_v39  ;;  %820 = vmatpush.msrb.mxu2 %v762_v42  ;;  %v7014_v42 = vld [vmem:[#allocation2 + $0x7b0] sm:$0xff] }
  0x54   : > { %1096 = vmatpush.msra.mxu1 %v6862_v0  ;;  %983 = vmatpush.msrb.mxu0 %v6926_v34  ;;  %v783_v0 = vld [vmem:[#allocation2 + $0x118] sm:$0xff] }
  0x55   : > { %887 = vmatpush.msrb.mxu3 %v799_v43  ;;  %821 = vmatpush.msrb.mxu2 %v760_v44  ;;  %v753_v43 = vld [vmem:[#allocation2 + $0x28] sm:$0xff] }
  0x56   : > { %3661 = vperm.xlu1 %5846, %v3658_v5   ;;  %984 = vmatpush.msrb.mxu0 %v6934_v38 }
  0x57   : > { %2933 = vperm.xlu0 %5845, %v2927_v4   ;;  %2901 = vperm.xlu2 %5847, %v2895_v36   ;;  %v773_v4 = vld [vmem:[#allocation2 + $0xc8] sm:$0xff]  ;;  %v755_v36 = vld [vmem:[#allocation2 + $0x38] sm:$0xff] }
  0x58   : > { %1061 = vmatpush.msra.mxu0 %v6808_v40  ;;  %1097 = vmatpush.msra.mxu1 %v6866_v1  ;;  %v795_v40 = vld [vmem:[#allocation2 + $0x178] sm:$0xff]  ;;  %v777_v1 = vld [vmem:[#allocation2 + $0xe8] sm:$0xff] }
  0x59   : > { %888 = vmatpush.msrb.mxu3 %v797_v46  ;;  %822 = vmatpush.msrb.mxu2 %v758_v48  ;;  %v7023_v48 = vld [vmem:[#allocation2 + $0x7a0] sm:$0xff] }
  0x5a   : > { %1062 = vmatpush.msra.mxu0 %v6812_v41  ;;  %1098 = vmatpush.msra.mxu1 %v6869_v2  ;;  %v756_v41 = vld [vmem:[#allocation2 + $0x40] sm:$0xff]  ;;  %v775_v2 = vld [vmem:[#allocation2 + $0xd8] sm:$0xff] }
  0x5b   : > { %889 = vmatpush.msrb.mxu3 %v795_v40  ;;  %823 = vmatpush.msrb.mxu2 %v756_v41  ;;  %v751_v40 = vld [vmem:[#allocation2 + $0x18] sm:$0xff] }
  0x5c   : > { %1063 = vmatpush.msra.mxu0 %v6824_v47  ;;  %1099 = vmatpush.msra.mxu1 %v6872_v3  ;;  %v781_v3 = vld [vmem:[#allocation2 + $0x108] sm:$0xff] }
  0x5d   : > { %890 = vmatpush.msrb.mxu3 %v793_v50  ;;  %824 = vmatpush.msrb.mxu2 %v754_v52  ;;  %v7028_v52 = vld [vmem:[#allocation2 + $0x790] sm:$0xff] }
  0x5e   : > { %1064 = vmatpush.msra.mxu0 %v6840_v54  ;;  %v789_v54 = vld [vmem:[#allocation2 + $0x148] sm:$0xff] }
  0x5f   : > { %3669 = vperm.xlu2 %5847, %v3666_v49   ;;  %891 = vmatpush.msrb.mxu3 %v791_v53  ;;  %v749_v53 = vld [vmem:[#allocation2 + $0x8] sm:$0xff] }
  0x60   : > { %1065 = vmatpush.msra.mxu0 %v6849_v59  ;;  %825 = vmatpush.msrb.mxu2 %v752_v55  ;;  %v748_v59 = vld [vmem:[#allocation2] sm:$0xff] }
  0x61   : > { %892 = vmatpush.msrb.mxu3 %v789_v54 }
  0x62   : > { %1066 = vmatpush.msra.mxu0 %v6887_v7  ;;  %826 = vmatpush.msrb.mxu2 %v750_v57  ;;  %v771_v7 = vld [vmem:[#allocation2 + $0xb8] sm:$0xff] }
  0x63   : > { %893 = vmatpush.msrb.mxu3 %v787_v58  ;;  %v7036_v58 = vld [vmem:[#allocation2 + $0x780] sm:$0xff] }
  0x64   : > { %1067 = vmatpush.msra.mxu0 %v6890_v9  ;;  %827 = vmatpush.msrb.mxu2 %v748_v59 }
  0x65   : > { %894 = vmatpush.msrb.mxu3 %v785_v61  ;;  %v7044_v61 = vld [vmem:[#allocation2 + $0x3f8] sm:$0xff] }
  0x66   : > { %1068 = vmatpush.msra.mxu0 %v6895_v12  ;;  %858 = vmatpush.msra.mxu2 %v779_v60 }
  0x67   : > { %895 = vmatpush.msrb.mxu3 %v783_v0  ;;  %v7046_v0 = vld [vmem:[#allocation2 + $0x770] sm:$0xff] }
  0x68   : > { %1069 = vmatpush.msra.mxu0 %v6899_v15  ;;  %859 = vmatpush.msra.mxu2 %v777_v1  ;;  %v7050_v1 = vld [vmem:[#allocation2 + $0x3e8] sm:$0xff] }
  0x69   : > { %896 = vmatpush.msrb.mxu3 %v781_v3 }
  0x6a   : > { %v6940_v45 = vpop.permute.xlu2 %634  ;;  %1070 = vmatpush.msra.mxu0 %v6905_v18  ;;  %860 = vmatpush.msra.mxu2 %v775_v2  ;;  %v7053_v2 = vld [vmem:[#allocation2 + $0x760] sm:$0xff] }
  0x6c   : > { %1071 = vmatpush.msra.mxu0 %v6908_v21  ;;  %861 = vmatpush.msra.mxu2 %v773_v4 }
  0x6e   : > { %1072 = vmatpush.msra.mxu0 %v6915_v25  ;;  %862 = vmatpush.msra.mxu2 %v771_v7  ;;  %v6994_v25 = vld [vmem:[#allocation2 + $0x7e0] sm:$0xff]  ;;  %v7058_v7 = vld [vmem:[#allocation2 + $0x3d8] sm:$0xff] }
  0x70   : > { %1073 = vmatpush.msra.mxu0 %v6920_v28  ;;  %863 = vmatpush.msra.mxu2 %v769_v10  ;;  %v7060_v10 = vld [vmem:[#allocation2 + $0x750] sm:$0xff] }
  0x72   : > { %v6956_v56 = vpop.permute.xlu2 %698  ;;  %1074 = vmatpush.msra.mxu0 %v6923_v31  ;;  %864 = vmatpush.msra.mxu2 %v767_v11 }
  0x74   : > { %1075 = vmatpush.msra.mxu0 %v6926_v34  ;;  %865 = vmatpush.msra.mxu2 %v765_v13  ;;  %v7006_v34 = vld [vmem:[#allocation2 + $0x7c0] sm:$0xff] }
  0x76   : > { %1076 = vmatpush.msra.mxu0 %v6934_v38  ;;  %866 = vmatpush.msra.mxu2 %v763_v20 }
  0x78   : > { %867 = vmatpush.msra.mxu2 %v761_v24 }
  0x7a   : > { %v6967_v5 = vpop.permute.xlu2 %624  ;;  %868 = vmatpush.msra.mxu2 %v759_v26  ;;  %v7075_v26 = vld [vmem:[#allocation2 + $0x3b8] sm:$0xff] }
  0x7c   : > { %869 = vmatpush.msra.mxu2 %v757_v30  ;;  %v7085_v30 = vld [vmem:[#allocation2 + $0x3a8] sm:$0xff] }
  0x7e   : > { %870 = vmatpush.msra.mxu2 %v755_v36  ;;  %v7096_v36 = vld [vmem:[#allocation2 + $0x398] sm:$0xff] }
  0x80   : > { %v6950_v51 = vpop.permute.xlu1 %649  ;;  %871 = vmatpush.msra.mxu2 %v753_v43 }
  0x81   : > { %v6952_v47 = vpop.permute.xlu0 %644 }
  0x82   : > { %v6985_v19 = vpop.permute.xlu2 %693  ;;  %872 = vmatpush.msra.mxu2 %v751_v40  ;;  %v7102_v40 = vld [vmem:[#allocation2 + $0x710] sm:$0xff] }
  0x84   : > { %873 = vmatpush.msra.mxu2 %v749_v53  ;;  %v7112_v53 = vld [vmem:[#allocation2 + $0x700] sm:$0xff] }
  0x88   : > { %v6960_v62 = vpop.permute.xlu1 %713 }
  0x89   : > { %v6962_v63 = vpop.permute.xlu0 %708 }
  0x8a   : > { %v7012_v39 = vpop.permute.xlu2 %683 }
  0x8b   : > { %10797 = vst [vmem:[#allocation8_spill] sm:$0xff] %v7012_v39 }
  0x90   : > { %v6972_v8 = vpop.permute.xlu1 %703 }
  0x91   : > { %v6974_v9 = vpop.permute.xlu0 %639 }
  0x92   : > { %v6969_v6 = vpop.f32.mrf.mxu0 }
  0x94   : > { %v580_v15 = vpop.f32.mrf.mxu1 }
  0x98   : > { %v592_v12 = vpop.f32.mrf.mxu2  ;;  %v6989_v22 = vpop.permute.xlu1 %629 }
  0x99   : > { %v661_v14 = vmul.f32 %v6940_v45, %v592_v12  ;;  %v6983_v18 = vpop.permute.xlu0 %688 }
  0x9a   : > { %v6980_v16 = vpop.f32.mrf.mxu0 }
  0x9b   : > { %v725_v17 = vadd.f32 %v6956_v56, %v661_v14 }
  0x9c   : > { %v583_v35 = vpop.f32.mrf.mxu1 }
  0x9d   : > { %v6987_v21 = vmax.f32 %v725_v17, 0.0  ;;  %v7068_v17 = vld [vmem:[#allocation2 + $0x740] sm:$0xff] }
  0x9f   : > { %10794 = vst [vmem:[#allocation5_spill] sm:$0xff] %v6987_v21  ;;  %1008 = vmatmul.f32.vlgmr.msrb.gmra.mxu1 %v6987_v21 }
  0xa0   : > { %1241 = vmatpush.msrb.mxu1 %v6991_v23  ;;  %v595_v27 = vpop.f32.mrf.mxu2  ;;  %v7020_v46 = vpop.permute.xlu1 %614 }
  0xa1   : > { %v663_v28 = vmul.f32 %v6974_v9, %v595_v27  ;;  %v7004_v33 = vpop.permute.xlu0 %619  ;;  %v653_v41 = vmul.f32 %v7020_v46, %v580_v15  ;;  %v7066_v15 = vld [vmem:[#allocation2 + $0x3c8] sm:$0xff]  ;;  %v7077_v27 = vld [vmem:[#allocation2 + $0x730] sm:$0xff] }
  0xa2   : > { %1242 = vmatpush.msrb.mxu1 %v6994_v25  ;;  %v7001_v31 = vpop.f32.mrf.mxu0  ;;  %10795 = vst [vmem:[#allocation6_spill] sm:$0xff] %v7004_v33  ;;  %v655_v37 = vmul.f32 %v7004_v33, %v583_v35 }
  0xa3   : > { %v727_v32 = vadd.f32 %v6972_v8, %v663_v28 }
  0xa4   : > { %1243 = vmatpush.msrb.mxu1 %v6998_v29  ;;  %v7018_v44 = vadd.f32 %v7012_v39, %v655_v37  ;;  %v586_v12 = vpop.f32.mrf.mxu1  ;;  %v7098_v37 = vld [vmem:[#allocation2 + $0x6e0] sm:$0xff]  ;;  %v7190_v39 = vld [vmem:[#allocation2 + $0x308] sm:$0xff] }
  0xa5   : > { %v7010_v38 = vmax.f32 %v727_v32, 0.0  ;;  %v657_v28 = vmul.f32 %v6967_v5, %v586_v12  ;;  %v7088_v32 = vld [vmem:[#allocation2 + $0x6f0] sm:$0xff] }
  0xa6   : > { %1244 = vmatpush.msrb.mxu1 %v7006_v34  ;;  %10798 = vst [vmem:[#allocation9_spill] sm:$0xff] %v7018_v44  ;;  %v7132_v12 = vld [vmem:[#allocation2 + $0x6b0] sm:$0xff]  ;;  %v7185_v44 = vld [vmem:[#allocation2 + $0x2d8] sm:$0xff] }
  0xa7   : > { %10796 = vst [vmem:[#allocation7_spill] sm:$0xff] %v7010_v38  ;;  %1011 = vmatmul.f32.gmra.mxu1 %v7010_v38  ;;  %v721_v35 = vadd.f32 %v6983_v18, %v657_v28  ;;  %v7146_v28 = vld [vmem:[#allocation2 + $0x348] sm:$0xff] }
  0xa8   : > { %1245 = vmatpush.msrb.mxu1 %v7014_v42  ;;  %v598_v49 = vpop.f32.mrf.mxu2 }
  0xa9   : > { %v665_v50 = vmul.f32 %v6952_v47, %v598_v49  ;;  %v7034_v57 = vpop.permute.xlu0 %678 }
  0xaa   : > { %1246 = vmatpush.msrb.mxu1 %v7023_v48  ;;  %v7031_v55 = vpop.f32.mrf.mxu0  ;;  %v7040_v59 = vadd.f32 %v7034_v57, %v653_v41  ;;  %v7106_v41 = vld [vmem:[#allocation2 + $0x388] sm:$0xff] }
  0xab   : > { %v729_v54 = vadd.f32 %v6962_v63, %v665_v50  ;;  %v7108_v50 = vld [vmem:[#allocation2 + $0x6d0] sm:$0xff] }
  0xac   : > { %1247 = vmatpush.msrb.mxu1 %v7028_v52  ;;  %10799 = vst [vmem:[#allocation10_spill] sm:$0xff] %v7040_v59 }
  0xad   : > { %v7042_v60 = vmax.f32 %v729_v54, 0.0 }
  0xae   : > { %1248 = vmatpush.msrb.mxu1 %v7036_v58 }
  0xaf   : > { %10800 = vst [vmem:[#allocation11_spill] sm:$0xff] %v7042_v60  ;;  %851 = vmatmul.f32.vlgmr.msra.gmra.mxu3 %v7042_v60  ;;  %1100 = vmatmul.f32.vlgmr.msra.gmra.mxu1 %v7042_v60 }
  0xb0   : > { %1038 = vmatpush.msra.mxu3 %v7044_v61  ;;  %1249 = vmatpush.msrb.mxu1 %v7046_v0  ;;  %v601_v3 = vpop.f32.mrf.mxu2 }
  0xb1   : > { %v667_v4 = vmul.f32 %v6950_v51, %v601_v3  ;;  %v7115_v3 = vmax.f32 %v721_v35, 0.0  ;;  %v7148_v35 = vld [vmem:[#allocation2 + $0x690] sm:$0xff] }
  0xb2   : > { %1039 = vmatpush.msra.mxu3 %v7050_v1  ;;  %1250 = vmatpush.msrb.mxu1 %v7053_v2  ;;  %v551_v11 = vpop.f32.mrf.mxu0 }
  0xb3   : > { %v731_v13 = vadd.f32 %v6960_v62, %v667_v4  ;;  %v660_v14 = vmul.f32 %v6940_v45, %v551_v11  ;;  %v7118_v4 = vld [vmem:[#allocation2 + $0x378] sm:$0xff] }
  0xb4   : > { %1040 = vmatpush.msra.mxu3 %v7058_v7  ;;  %1251 = vmatpush.msrb.mxu1 %v7060_v10 }
  0xb5   : > { %v7072_v20 = vmax.f32 %v731_v13, 0.0  ;;  %v724_v24 = vadd.f32 %v6956_v56, %v660_v14  ;;  %v7092_v56 = vld [vmem:[#allocation2 + $0x720] sm:$0xff]  ;;  %v7138_v14 = vld [vmem:[#allocation2 + $0x358] sm:$0xff] }
  0xb6   : > { %1041 = vmatpush.msra.mxu3 %v7066_v15  ;;  %1252 = vmatpush.msrb.mxu1 %v7068_v17 }
  0xb7   : > { %10801 = vst [vmem:[#allocation12_spill] sm:$0xff] %v7072_v20  ;;  %v7082_v45 = vmax.f32 %v724_v24, 0.0  ;;  %854 = vmatmul.f32.gmra.mxu3 %v7072_v20  ;;  %1103 = vmatmul.f32.gmra.mxu1 %v7072_v20  ;;  %v7140_v24 = vld [vmem:[#allocation2 + $0x6a0] sm:$0xff] }
  0xb8   : > { %1042 = vmatpush.msra.mxu3 %v7075_v26  ;;  %1253 = vmatpush.msrb.mxu1 %v7077_v27 }
  0xb9   : > { %985 = vmatmul.f32.vlgmr.msrb.gmra.mxu0 %v7082_v45 }
  0xba   : > { %1043 = vmatpush.msra.mxu3 %v7085_v30  ;;  %1218 = vmatpush.msrb.mxu0 %v7088_v32  ;;  %v554_v43 = vpop.f32.mrf.mxu0 }
  0xbb   : > { %1254 = vmatpush.msrb.mxu1 %v7092_v56  ;;  %v662_v49 = vmul.f32 %v6974_v9, %v554_v43  ;;  %v7122_v9 = vld [vmem:[#allocation2 + $0x6c0] sm:$0xff]  ;;  %v7154_v43 = vld [vmem:[#allocation2 + $0x338] sm:$0xff] }
  0xbc   : > { %1044 = vmatpush.msra.mxu3 %v7096_v36  ;;  %1219 = vmatpush.msrb.mxu0 %v7098_v37 }
  0xbd   : > { %v726_v54 = vadd.f32 %v6972_v8, %v662_v49  ;;  %1255 = vmatpush.msrb.mxu1 %v7102_v40  ;;  %v7130_v8 = vld [vmem:[#allocation2 + $0x368] sm:$0xff]  ;;  %v7156_v49 = vld [vmem:[#allocation2 + $0x680] sm:$0xff] }
  0xbe   : > { %1045 = vmatpush.msra.mxu3 %v7106_v41  ;;  %1220 = vmatpush.msrb.mxu0 %v7108_v50 }
  0xbf   : > { %v7124_v11 = vmax.f32 %v726_v54, 0.0  ;;  %1256 = vmatpush.msrb.mxu1 %v7112_v53  ;;  %897 = vmatmul.f32.vlgmr.msrb.gmra.mxu3 %v7042_v60 }
  0xc0   : > { %1046 = vmatpush.msra.mxu3 %v7118_v4  ;;  %1221 = vmatpush.msrb.mxu0 %v7122_v9 }
  0xc1   : > { %1333 = vmatpush.msra.mxu1 %v6991_v23  ;;  %988 = vmatmul.f32.gmra.mxu0 %v7124_v11 }
  0xc2   : > { %1257 = vmatmul.f32.vlgmr.msrb.gmra.mxu1 %v7115_v3  ;;  %v557_v13 = vpop.f32.mrf.mxu0  ;;  %1047 = vmatpush.msra.mxu3 %v7130_v8 }
  0xc3   : > { %1334 = vmatpush.msra.mxu1 %v6994_v25  ;;  %1222 = vmatpush.msrb.mxu0 %v7132_v12  ;;  %v664_v23 = vmul.f32 %v6952_v47, %v557_v13  ;;  %v7164_v47 = vld [vmem:[#allocation2 + $0x2f8] sm:$0xff]  ;;  %v7174_v13 = vld [vmem:[#allocation2 + $0x2e8] sm:$0xff] }
  0xc4   : > { %1048 = vmatpush.msra.mxu3 %v7138_v14 }
  0xc5   : > { %1335 = vmatpush.msra.mxu1 %v6998_v29  ;;  %v728_v25 = vadd.f32 %v6962_v63, %v664_v23  ;;  %1223 = vmatpush.msrb.mxu0 %v7140_v24  ;;  %v7166_v63 = vld [vmem:[#allocation2 + $0x328] sm:$0xff]  ;;  %v7172_v29 = vld [vmem:[#allocation2 + $0x670] sm:$0xff]  ;;  %v7179_v23 = vld [vmem:[#allocation2 + $0x318] sm:$0xff] }
  0xc6   : > { %1049 = vmatpush.msra.mxu3 %v7146_v28 }
  0xc7   : > { %1336 = vmatpush.msra.mxu1 %v7006_v34  ;;  %v7158_v54 = vmax.f32 %v728_v25, 0.0  ;;  %1224 = vmatpush.msrb.mxu0 %v7148_v35  ;;  %v589_v25 = vpop.f32.mrf.mxu1 }
  0xc8   : > { %900 = vmatmul.f32.gmra.mxu3 %v7072_v20 }
  0xc9   : > { %1337 = vmatpush.msra.mxu1 %v7014_v42  ;;  %1050 = vmatpush.msra.mxu3 %v7154_v43 }
  0xca   : > { %1225 = vmatpush.msrb.mxu0 %v7156_v49  ;;  %828 = vmatmul.f32.vlgmr.msrb.gmra.mxu2 %v7158_v54  ;;  %v560_v34 = vpop.f32.mrf.mxu0 }
  0xcb   : > { %1338 = vmatpush.msra.mxu1 %v7023_v48  ;;  %1015 = vmatpush.msrb.mxu2 %v7164_v47  ;;  %v666_v42 = vmul.f32 %v6950_v51, %v560_v34  ;;  %v7183_v48 = vld [vmem:[#allocation2 + $0x660] sm:$0xff]  ;;  %v7194_v51 = vld [vmem:[#allocation2 + $0x650] sm:$0xff]  ;;  %v7199_v34 = vld [vmem:[#allocation2 + $0x2c8] sm:$0xff] }
  0xcc   : > { %1051 = vmatpush.msra.mxu3 %v7166_v63  ;;  %1077 = vmatmul.f32.vlgmr.msra.gmra.mxu0 %v7158_v54 }
  0xcd   : > { %1339 = vmatpush.msra.mxu1 %v7028_v52  ;;  %1226 = vmatpush.msrb.mxu0 %v7172_v29  ;;  %v730_v59 = vadd.f32 %v6960_v62, %v666_v42  ;;  %v659_v52 = vmul.f32 %v6989_v22, %v589_v25  ;;  %v7205_v62 = vld [vmem:[#allocation2 + $0x640] sm:$0xff]  ;;  %v7212_v42 = vld [vmem:[#allocation2 + $0x2b8] sm:$0xff] }
  0xce   : > { %1016 = vmatpush.msrb.mxu2 %v7174_v13  ;;  %1052 = vmatpush.msra.mxu3 %v7179_v23  ;;  %v7226_v25 = vld [vmem:[#allocation2 + $0x620] sm:$0xff] }
  0xcf   : > { %1340 = vmatpush.msra.mxu1 %v7036_v58  ;;  %1227 = vmatpush.msrb.mxu0 %v7183_v48  ;;  %v7201_v33 = vmax.f32 %v730_v59, 0.0  ;;  %v723_v58 = vadd.f32 %v6985_v19, %v659_v52  ;;  %v7216_v59 = vld [vmem:[#allocation2 + $0x630] sm:$0xff] }
  0xd0   : > { %1017 = vmatpush.msrb.mxu2 %v7185_v44  ;;  %1053 = vmatpush.msra.mxu3 %v7190_v39 }
  0xd1   : > { %1341 = vmatpush.msra.mxu1 %v7046_v0  ;;  %1228 = vmatpush.msrb.mxu0 %v7194_v51  ;;  %v7220_v0 = vld [vmem:[#allocation2 + $0x2a8] sm:$0xff]  ;;  %v7228_v52 = vmax.f32 %v723_v58, 0.0 }
  0xd2   : > { %1130 = vmatpush.msrb.mxu3 %v7044_v61  ;;  %1018 = vmatpush.msrb.mxu2 %v7199_v34  ;;  %v656_v61 = vmul.f32 %v6967_v5, %v7001_v31  ;;  %v7243_v31 = vld [vmem:[#allocation2 + $0x288] sm:$0xff] }
  0xd3   : > { %1054 = vmatmul.f32.vlgmr.msra.gmra.mxu3 %v6987_v21  ;;  %1229 = vmatpush.msrb.mxu0 %v7205_v62  ;;  %v1163_v58 = vld [vmem:[#allocation2 + $0x648] sm:$0xff] }
  0xd4   : > { %1131 = vmatpush.msrb.mxu3 %v7050_v1  ;;  %1342 = vmatpush.msra.mxu1 %v7053_v2  ;;  %v7232_v1 = vld [vmem:[#allocation2 + $0x298] sm:$0xff]  ;;  %v7236_v2 = vld [vmem:[#allocation2 + $0x610] sm:$0xff]  ;;  %v720_v5 = vadd.f32 %v6983_v18, %v656_v61  ;;  %v1155_v61 = vld [vmem:[#allocation2 + $0x608] sm:$0xff] }
  0xd5   : > { %831 = vmatmul.f32.gmra.mxu2 %v7201_v33  ;;  %1080 = vmatmul.f32.gmra.mxu0 %v7201_v33 }
  0xd6   : > { %1019 = vmatpush.msrb.mxu2 %v7212_v42  ;;  %1230 = vmatpush.msrb.mxu0 %v7216_v59  ;;  %v7253_v18 = vmax.f32 %v720_v5, 0.0  ;;  %v1565_v5 = vld [vmem:[#allocation2 + $0x4c0] sm:$0xff] }
  0xd7   : > { %1132 = vmatpush.msrb.mxu3 %v7058_v7  ;;  %1343 = vmatpush.msra.mxu1 %v7060_v10  ;;  %v7247_v7 = vld [vmem:[#allocation2 + $0x600] sm:$0xff]  ;;  %v7257_v10 = vld [vmem:[#allocation2 + $0x278] sm:$0xff] }
  0xd8   : > { %1020 = vmatpush.msrb.mxu2 %v7220_v0  ;;  %1231 = vmatpush.msrb.mxu0 %v7226_v25 }
  0xd9   : > { %1133 = vmatpush.msrb.mxu3 %v7066_v15  ;;  %1344 = vmatpush.msra.mxu1 %v7068_v17  ;;  %v658_v15 = vmul.f32 %v6989_v22, %v7031_v55  ;;  %v7265_v17 = vld [vmem:[#allocation2 + $0x268] sm:$0xff] }
  0xda   : > { %1021 = vmatpush.msrb.mxu2 %v7232_v1  ;;  %1232 = vmatpush.msrb.mxu0 %v7236_v2  ;;  %v7278_v55 = vld [vmem:[#allocation2 + $0x248] sm:$0xff] }
  0xdb   : > { %1260 = vmatmul.f32.gmra.mxu1 %v7228_v52  ;;  %1134 = vmatpush.msrb.mxu3 %v7075_v26  ;;  %v7271_v26 = vld [vmem:[#allocation2 + $0x258] sm:$0xff]  ;;  %v722_v22 = vadd.f32 %v6985_v19, %v658_v15 }
  0xdc   : > { %1345 = vmatpush.msra.mxu1 %v7077_v27  ;;  %1022 = vmatpush.msrb.mxu2 %v7243_v31  ;;  %v7290_v19 = vld [vmem:[#allocation2 + $0x238] sm:$0xff] }
  0xdd   : > { %1057 = vmatmul.f32.gmra.mxu3 %v7010_v38  ;;  %1233 = vmatpush.msrb.mxu0 %v7247_v7  ;;  %v7286_v27 = vmax.f32 %v722_v22, 0.0 }
  0xde   : > { %1135 = vmatpush.msrb.mxu3 %v7085_v30  ;;  %1346 = vmatpush.msra.mxu1 %v7092_v56  ;;  %v7296_v30 = vld [vmem:[#allocation2 + $0x228] sm:$0xff] }
  0xdf   : > { %1310 = vmatpush.msra.mxu0 %v7088_v32  ;;  %874 = vmatmul.f32.vlgmr.msra.gmra.mxu2 %v7158_v54  ;;  %v7302_v32 = vld [vmem:[#allocation2 + $0x218] sm:$0xff]  ;;  %v7308_v56 = vld [vmem:[#allocation2 + $0x208] sm:$0xff] }
  0xe0   : > { %1234 = vmatmul.f32.vlgmr.msrb.gmra.mxu0 %v7253_v18  ;;  %1023 = vmatpush.msrb.mxu2 %v7257_v10 }
  0xe1   : > { %1136 = vmatpush.msrb.mxu3 %v7096_v36  ;;  %1311 = vmatpush.msra.mxu0 %v7098_v37  ;;  %v7322_v36 = vld [vmem:[#allocation2 + $0x7f8] sm:$0xff]  ;;  %v7327_v37 = vld [vmem:[#allocation2 + $0x7e8] sm:$0xff] }
  0xe2   : > { %1347 = vmatpush.msra.mxu1 %v7102_v40  ;;  %1024 = vmatpush.msrb.mxu2 %v7265_v17  ;;  %v7332_v40 = vld [vmem:[#allocation2 + $0x7d8] sm:$0xff] }
  0xe3   : > { %1137 = vmatpush.msrb.mxu3 %v7106_v41  ;;  %1312 = vmatpush.msra.mxu0 %v7108_v50  ;;  %v1207_v41 = vld [vmem:[#allocation2 + $0x7a8] sm:$0xff]  ;;  %v1205_v50 = vld [vmem:[#allocation2 + $0x798] sm:$0xff] }
  0xe4   : > { %1348 = vmatpush.msra.mxu1 %v7112_v53  ;;  %1025 = vmatpush.msrb.mxu2 %v7271_v26  ;;  %v1203_v53 = vld [vmem:[#allocation2 + $0x788] sm:$0xff] }
  0xe5   : > { %1349 = vmatmul.f32.vlgmr.msra.gmra.mxu1 %v7042_v60  ;;  %1138 = vmatpush.msrb.mxu3 %v7118_v4  ;;  %v1201_v4 = vld [vmem:[#allocation2 + $0x778] sm:$0xff] }
  0xe6   : > { %1449 = vmatpush.msrb.mxu1 %v7201_v33  ;;  %1313 = vmatpush.msra.mxu0 %v7122_v9  ;;  %v1199_v9 = vld [vmem:[#allocation2 + $0x768] sm:$0xff] }
  0xe7   : > { %1026 = vmatpush.msrb.mxu2 %v7278_v55  ;;  %1139 = vmatpush.msrb.mxu3 %v7130_v8  ;;  %v1197_v8 = vld [vmem:[#allocation2 + $0x758] sm:$0xff] }
  0xe8   : > { %1450 = vmatpush.msrb.mxu1 %v7158_v54  ;;  %1314 = vmatpush.msra.mxu0 %v7132_v12  ;;  %v1195_v12 = vld [vmem:[#allocation2 + $0x748] sm:$0xff] }
  0xe9   : > { %877 = vmatmul.f32.gmra.mxu2 %v7201_v33  ;;  %1237 = vmatmul.f32.gmra.mxu0 %v7286_v27 }
  0xea   : > { %1458 = vmatpush.msra.mxu1 %v7010_v38  ;;  %1027 = vmatpush.msrb.mxu2 %v7290_v19 }
  0xeb   : > { %1140 = vmatpush.msrb.mxu3 %v7138_v14  ;;  %1315 = vmatpush.msra.mxu0 %v7140_v24  ;;  %v1193_v14 = vld [vmem:[#allocation2 + $0x738] sm:$0xff]  ;;  %v1191_v24 = vld [vmem:[#allocation2 + $0x728] sm:$0xff] }
  0xec   : > { %1459 = vmatpush.msra.mxu1 %v6987_v21  ;;  %1028 = vmatpush.msrb.mxu2 %v7296_v30 }
  0xed   : > { %1141 = vmatpush.msrb.mxu3 %v7146_v28  ;;  %1316 = vmatpush.msra.mxu0 %v7148_v35  ;;  %v1185_v28 = vld [vmem:[#allocation2 + $0x6f8] sm:$0xff] }
  0xee   : > { %1352 = vmatmul.f32.gmra.mxu1 %v7072_v20  ;;  %1029 = vmatpush.msrb.mxu2 %v7302_v32  ;;  %v1189_v35 = vld [vmem:[#allocation2 + $0x718] sm:$0xff] }
  0xef   : > { %1142 = vmatpush.msrb.mxu3 %v7154_v43  ;;  %1317 = vmatpush.msra.mxu0 %v7156_v49  ;;  %v1183_v43 = vld [vmem:[#allocation2 + $0x6e8] sm:$0xff] }
  0xf0   : > { %1030 = vmatpush.msrb.mxu2 %v7308_v56  ;;  %v1187_v49 = vld [vmem:[#allocation2 + $0x708] sm:$0xff] }
  0xf1   : > { %1143 = vmatpush.msrb.mxu3 %v7166_v63  ;;  %1318 = vmatpush.msra.mxu0 %v7172_v29  ;;  %v1179_v63 = vld [vmem:[#allocation2 + $0x6c8] sm:$0xff]  ;;  %v1177_v29 = vld [vmem:[#allocation2 + $0x6b8] sm:$0xff] }
  0xf2   : > { %1107 = vmatpush.msra.mxu2 %v7164_v47  ;;  %v1181_v47 = vld [vmem:[#allocation2 + $0x6d8] sm:$0xff] }
  0xf3   : > { %1031 = vmatmul.f32.vlgmr.msrb.gmra.mxu2 %v7082_v45  ;;  %1144 = vmatpush.msrb.mxu3 %v7179_v23  ;;  %v1173_v23 = vld [vmem:[#allocation2 + $0x698] sm:$0xff] }
  0xf4   : > { %1108 = vmatpush.msra.mxu2 %v7174_v13  ;;  %1319 = vmatpush.msra.mxu0 %v7183_v48  ;;  %v1175_v13 = vld [vmem:[#allocation2 + $0x6a8] sm:$0xff] }
  0xf5   : > { %1145 = vmatpush.msrb.mxu3 %v7190_v39  ;;  %v7338_v39 = vld [vmem:[#allocation2 + $0x7c8] sm:$0xff] }
  0xf6   : > { %1109 = vmatpush.msra.mxu2 %v7185_v44  ;;  %1320 = vmatpush.msra.mxu0 %v7194_v51  ;;  %v7343_v44 = vld [vmem:[#allocation2 + $0x7b8] sm:$0xff]  ;;  %v1171_v48 = vld [vmem:[#allocation2 + $0x688] sm:$0xff] }
  0xf7   : > { %1146 = vmatmul.f32.vlgmr.msrb.gmra.mxu3 %v7042_v60  ;;  %v1169_v51 = vld [vmem:[#allocation2 + $0x678] sm:$0xff] }
  0xf8   : > { %1287 = vmatpush.msra.mxu3 %v7322_v36  ;;  %1110 = vmatpush.msra.mxu2 %v7199_v34  ;;  %v1167_v34 = vld [vmem:[#allocation2 + $0x668] sm:$0xff] }
  0xf9   : > { %1321 = vmatpush.msra.mxu0 %v7205_v62  ;;  %v1165_v62 = vld [vmem:[#allocation2 + $0x658] sm:$0xff] }
  0xfa   : > { %1288 = vmatpush.msra.mxu3 %v7327_v37  ;;  %1111 = vmatpush.msra.mxu2 %v7212_v42  ;;  %v1161_v42 = vld [vmem:[#allocation2 + $0x638] sm:$0xff] }
  0xfb   : > { %1322 = vmatpush.msra.mxu0 %v7216_v59  ;;  %1034 = vmatmul.f32.gmra.mxu2 %v7124_v11  ;;  %v1159_v59 = vld [vmem:[#allocation2 + $0x628] sm:$0xff] }
  0xfc   : > { %1289 = vmatpush.msra.mxu3 %v7332_v40  ;;  %1112 = vmatpush.msra.mxu2 %v7220_v0  ;;  %v1157_v0 = vld [vmem:[#allocation2 + $0x618] sm:$0xff] }
  0xfd   : > { %1323 = vmatpush.msra.mxu0 %v7226_v25  ;;  %v1571_v25 = vld [vmem:[#allocation2 + $0x4f0] sm:$0xff] }
  0xfe   : > { %1290 = vmatpush.msra.mxu3 %v7338_v39  ;;  %1113 = vmatpush.msra.mxu2 %v7232_v1  ;;  %v1569_v1 = vld [vmem:[#allocation2 + $0x4e0] sm:$0xff] }
  0xff   : > { %1324 = vmatpush.msra.mxu0 %v7236_v2  ;;  %1149 = vmatmul.f32.gmra.mxu3 %v7072_v20  ;;  %v1567_v2 = vld [vmem:[#allocation2 + $0x4d0] sm:$0xff] }
 0x100   : > { %1291 = vmatpush.msra.mxu3 %v7343_v44  ;;  %1114 = vmatpush.msra.mxu2 %v7243_v31  ;;  %v1563_v31 = vld [vmem:[#allocation2 + $0x4b0] sm:$0xff] }
 0x101   : > { %1325 = vmatpush.msra.mxu0 %v7247_v7  ;;  %v1561_v7 = vld [vmem:[#allocation2 + $0x4a0] sm:$0xff] }
 0x102   : > { %1292 = vmatpush.msra.mxu3 %v1207_v41  ;;  %1326 = vmatmul.f32.vlgmr.msra.gmra.mxu0 %v7158_v54 }
 0x103   : > { %1412 = vmatpush.msrb.mxu0 %v7124_v11  ;;  %1115 = vmatpush.msra.mxu2 %v7257_v10  ;;  %v1559_v10 = vld [vmem:[#allocation2 + $0x490] sm:$0xff] }
 0x104   : > { %1293 = vmatpush.msra.mxu3 %v1205_v50 }
 0x105   : > { %1413 = vmatpush.msrb.mxu0 %v7082_v45  ;;  %1116 = vmatpush.msra.mxu2 %v7265_v17  ;;  %v1557_v17 = vld [vmem:[#allocation2 + $0x480] sm:$0xff] }
 0x106   : > { %1294 = vmatpush.msra.mxu3 %v1203_v53 }
 0x107   : > { %1117 = vmatpush.msra.mxu2 %v7271_v26  ;;  %v7382_v26 = vld [vmem:[%s10514_s5 + $0x8] sm:$0xff] }
 0x108   : > { %1295 = vmatpush.msra.mxu3 %v1201_v4  ;;  %5707 = vmatmul.msk.f32.vlgmr.msrb.gmra.mxu1 %vm497_vm0, %v7382_v26 }
 0x109   : > { %1118 = vmatpush.msra.mxu2 %v7278_v55  ;;  %v1555_v55 = vld [vmem:[#allocation2 + $0x470] sm:$0xff] }
 0x10a   : > { %1296 = vmatpush.msra.mxu3 %v1199_v9  ;;  %1329 = vmatmul.f32.gmra.mxu0 %v7201_v33 }
 0x10b   : > { %1119 = vmatpush.msra.mxu2 %v7290_v19  ;;  %v1553_v19 = vld [vmem:[#allocation2 + $0x460] sm:$0xff] }
 0x10c   : > { %1297 = vmatpush.msra.mxu3 %v1197_v8 }
 0x10d   : > { %1120 = vmatpush.msra.mxu2 %v7296_v30  ;;  %v1551_v30 = vld [vmem:[#allocation2 + $0x450] sm:$0xff] }
 0x10e   : > { %1298 = vmatpush.msra.mxu3 %v1195_v12 }
 0x10f   : > { %1121 = vmatpush.msra.mxu2 %v7302_v32  ;;  %v1549_v32 = vld [vmem:[#allocation2 + $0x440] sm:$0xff] }
 0x110   : > { %1299 = vmatpush.msra.mxu3 %v1193_v14 }
 0x111   : > { %1122 = vmatpush.msra.mxu2 %v7308_v56  ;;  %v7391_v56 = vld [vmem:[%s10514_s5 + $0x18] sm:$0xff] }
 0x112   : > { %1123 = vmatmul.f32.vlgmr.msra.gmra.mxu2 %v7158_v54  ;;  %1300 = vmatpush.msra.mxu3 %v1191_v24 }
 0x113   : > { %1264 = vmatpush.msrb.mxu2 %v1185_v28  ;;  %5708 = vmatmul.msk.f32.gmra.mxu1 %vm497_vm0, %v7391_v56 }
 0x114   : > { %1301 = vmatpush.msra.mxu3 %v1189_v35 }
 0x115   : > { %1265 = vmatpush.msrb.mxu2 %v1183_v43 }
 0x116   : > { %1302 = vmatpush.msra.mxu3 %v1187_v49 }
 0x117   : > { %1266 = vmatpush.msrb.mxu2 %v1181_v47  ;;  %1303 = vmatmul.f32.vlgmr.msra.gmra.mxu3 %v7115_v3 }
 0x118   : > { %1379 = vmatpush.msrb.mxu3 %v7322_v36 }
 0x119   : > { %1267 = vmatpush.msrb.mxu2 %v1179_v63 }
 0x11a   : > { %1380 = vmatpush.msrb.mxu3 %v7327_v37  ;;  %1126 = vmatmul.f32.gmra.mxu2 %v7201_v33  ;;  %v1547_v37 = vld [vmem:[#allocation2 + $0x430] sm:$0xff] }
 0x11b   : > { %1268 = vmatpush.msrb.mxu2 %v1177_v29 }
 0x11c   : > { %1381 = vmatpush.msrb.mxu3 %v7332_v40  ;;  %v7377_v15 = vpop.f32.mrf.mxu1 }
 0x11d   : > { %1269 = vmatpush.msrb.mxu2 %v1175_v13 }
 0x11e   : > { %1382 = vmatpush.msrb.mxu3 %v7338_v39  ;;  %v1545_v39 = vld [vmem:[#allocation2 + $0x420] sm:$0xff] }
 0x11f   : > { %1270 = vmatpush.msrb.mxu2 %v1173_v23  ;;  %1306 = vmatmul.f32.gmra.mxu3 %v7228_v52 }
 0x120   : > { %1383 = vmatpush.msrb.mxu3 %v7343_v44  ;;  %v1543_v44 = vld [vmem:[#allocation2 + $0x410] sm:$0xff] }
 0x121   : > { %1271 = vmatpush.msrb.mxu2 %v1171_v48 }
 0x122   : > { %1384 = vmatpush.msrb.mxu3 %v1207_v41  ;;  %v1572_v41 = vld [vmem:[#allocation2 + $0x4f8] sm:$0xff] }
 0x123   : > { %1272 = vmatpush.msrb.mxu2 %v1169_v51 }
 0x124   : > { %1385 = vmatpush.msrb.mxu3 %v1205_v50  ;;  %v7393_v36 = vpop.f32.mrf.mxu1  ;;  %v1541_v50 = vld [vmem:[#allocation2 + $0x400] sm:$0xff] }
 0x125   : > { %1273 = vmatpush.msrb.mxu2 %v1167_v34 }
 0x126   : > { %1386 = vmatpush.msrb.mxu3 %v1203_v53  ;;  %v1570_v53 = vld [vmem:[#allocation2 + $0x4e8] sm:$0xff] }
 0x127   : > { %1274 = vmatpush.msrb.mxu2 %v1165_v62 }
 0x128   : > { %1387 = vmatpush.msrb.mxu3 %v1201_v4  ;;  %v7402_v4 = vld [vmem:[#allocation2 + $0xaf0] sm:$0xff] }
 0x129   : > { %1275 = vmatpush.msrb.mxu2 %v1163_v58 }
 0x12a   : > { %1388 = vmatpush.msrb.mxu3 %v1199_v9 }
 0x12b   : > { %1276 = vmatpush.msrb.mxu2 %v1161_v42 }
 0x12c   : > { %1389 = vmatpush.msrb.mxu3 %v1197_v8  ;;  %v7404_v9 = vpop.f32.mrf.mxu1  ;;  %v1568_v8 = vld [vmem:[#allocation2 + $0x4d8] sm:$0xff] }
 0x12d   : > { %1277 = vmatpush.msrb.mxu2 %v1159_v59 }
 0x12e   : > { %1390 = vmatpush.msrb.mxu3 %v1195_v12  ;;  %v7407_v12 = vld [vmem:[#allocation2 + $0xae0] sm:$0xff] }
 0x12f   : > { %1278 = vmatpush.msrb.mxu2 %v1157_v0 }
 0x130   : > { %1391 = vmatpush.msrb.mxu3 %v1193_v14 }
 0x131   : > { %1279 = vmatpush.msrb.mxu2 %v1155_v61 }
 0x132   : > { %1280 = vmatmul.f32.vlgmr.msrb.gmra.mxu2 %v7253_v18  ;;  %1392 = vmatpush.msrb.mxu3 %v1191_v24  ;;  %v1566_v24 = vld [vmem:[#allocation2 + $0x4c8] sm:$0xff] }
 0x133   : > { %1356 = vmatpush.msra.mxu2 %v1185_v28  ;;  %v7412_v28 = vld [vmem:[#allocation2 + $0xad0] sm:$0xff] }
 0x134   : > { %1393 = vmatpush.msrb.mxu3 %v1189_v35  ;;  %v1564_v35 = vld [vmem:[#allocation2 + $0x4b8] sm:$0xff] }
 0x135   : > { %1357 = vmatpush.msra.mxu2 %v1183_v43  ;;  %v7416_v43 = vld [vmem:[#allocation2 + $0xac0] sm:$0xff] }
 0x136   : > { %1394 = vmatpush.msrb.mxu3 %v1187_v49  ;;  %v7384_v22 = vpop.f32.mrf.mxu0  ;;  %v1562_v49 = vld [vmem:[#allocation2 + $0x4a8] sm:$0xff] }
 0x137   : > { %1358 = vmatpush.msra.mxu2 %v1181_v47  ;;  %1395 = vmatmul.f32.vlgmr.msrb.gmra.mxu3 %v7042_v60  ;;  %v7419_v47 = vld [vmem:[#allocation2 + $0xab0] sm:$0xff] }
 0x138   : > { %1605 = vmatpush.msra.mxu3 %v1571_v25  ;;  %v7444_v25 = vld [vmem:[#allocation2 + $0xa50] sm:$0xff] }
 0x139   : > { %1359 = vmatpush.msra.mxu2 %v1179_v63  ;;  %v1560_v63 = vld [vmem:[#allocation2 + $0x498] sm:$0xff] }
 0x13a   : > { %1606 = vmatpush.msra.mxu3 %v1569_v1  ;;  %1283 = vmatmul.f32.gmra.mxu2 %v7286_v27 }
 0x13b   : > { %1360 = vmatpush.msra.mxu2 %v1177_v29  ;;  %v7423_v29 = vld [vmem:[#allocation2 + $0xaa0] sm:$0xff] }
 0x13c   : > { %1607 = vmatpush.msra.mxu3 %v1567_v2  ;;  %v1548_v2 = vld [vmem:[#allocation2 + $0x438] sm:$0xff] }
 0x13d   : > { %1361 = vmatpush.msra.mxu2 %v1175_v13  ;;  %v7426_v13 = vpop.f32.mrf.mxu1 }
 0x13e   : > { %1608 = vmatpush.msra.mxu3 %v1565_v5  ;;  %v7397_v40 = vpop.f32.mrf.mxu0  ;;  %v7451_v5 = vld [vmem:[#allocation2 + $0xa40] sm:$0xff] }
 0x13f   : > { %1362 = vmatpush.msra.mxu2 %v1173_v23  ;;  %1398 = vmatmul.f32.gmra.mxu3 %v7072_v20  ;;  %v1558_v23 = vld [vmem:[#allocation2 + $0x488] sm:$0xff] }
 0x140   : > { %1609 = vmatpush.msra.mxu3 %v1563_v31 }
 0x141   : > { %1363 = vmatpush.msra.mxu2 %v1171_v48  ;;  %v7428_v48 = vld [vmem:[#allocation2 + $0xa90] sm:$0xff] }
 0x142   : > { %1610 = vmatpush.msra.mxu3 %v1561_v7  ;;  %v1546_v7 = vld [vmem:[#allocation2 + $0x428] sm:$0xff] }
 0x143   : > { %1364 = vmatpush.msra.mxu2 %v1169_v51 }
 0x144   : > { %1611 = vmatpush.msra.mxu3 %v1559_v10  ;;  %v7456_v10 = vld [vmem:[#allocation2 + $0xa30] sm:$0xff] }
 0x145   : > { %1365 = vmatpush.msra.mxu2 %v1167_v34  ;;  %v1556_v34 = vld [vmem:[#allocation2 + $0x478] sm:$0xff]  ;;  %v7447_v1 = vpop.f32.mrf.mxu1 }
 0x146   : > { %1612 = vmatpush.msra.mxu3 %v1557_v17  ;;  %v652_v17 = vmul.f32 %v7020_v46, %v6969_v6  ;;  %v10802_v6 = vld [vmem:[#allocation6_spill] sm:$0xff] }
 0x147   : > { %1366 = vmatpush.msra.mxu2 %v1165_v62  ;;  %v7435_v62 = vld [vmem:[#allocation2 + $0xa80] sm:$0xff]  ;;  %v654_v46 = vmul.f32 %v10802_v6, %v6980_v16  ;;  %v10803_v16 = vld [vmem:[#allocation8_spill] sm:$0xff]  ;;  %v7564_v6 = vld [vmem:[#allocation2 + $0xa08] sm:$0xff] }
 0x148   : > { %1613 = vmatpush.msra.mxu3 %v1555_v55  ;;  %v1544_v55 = vld [vmem:[#allocation2 + $0x418] sm:$0xff] }
 0x149   : > { %1367 = vmatpush.msra.mxu2 %v1163_v58  ;;  %v7410_v14 = vpop.f32.mrf.mxu0  ;;  %v1554_v58 = vld [vmem:[#allocation2 + $0x468] sm:$0xff] }
 0x14a   : > { %1614 = vmatpush.msra.mxu3 %v1553_v19  ;;  %v7461_v19 = vld [vmem:[#allocation2 + $0xa20] sm:$0xff] }
 0x14b   : > { %1368 = vmatpush.msra.mxu2 %v1161_v42  ;;  %v7438_v42 = vld [vmem:[#allocation2 + $0xa70] sm:$0xff] }
 0x14c   : > { %1615 = vmatpush.msra.mxu3 %v1551_v30  ;;  %v716_v30 = vadd.f32 %v7034_v57, %v652_v17  ;;  %v7480_v57 = vld [vmem:[#allocation2 + $0xae8] sm:$0xff] }
 0x14d   : > { %1369 = vmatpush.msra.mxu2 %v1159_v59  ;;  %v1552_v59 = vld [vmem:[#allocation2 + $0x458] sm:$0xff] }
 0x14e   : > { %1616 = vmatpush.msra.mxu3 %v1549_v32  ;;  %v1542_v32 = vld [vmem:[#allocation2 + $0x408] sm:$0xff] }
 0x14f   : > { %1370 = vmatpush.msra.mxu2 %v1157_v0  ;;  %v7441_v0 = vld [vmem:[#allocation2 + $0xa60] sm:$0xff] }
 0x150   : > { %1617 = vmatpush.msra.mxu3 %v1547_v37 }
 0x151   : > { %1371 = vmatpush.msra.mxu2 %v1155_v61  ;;  %v1550_v61 = vld [vmem:[#allocation2 + $0x448] sm:$0xff] }
 0x152   : > { %1372 = vmatmul.f32.vlgmr.msra.gmra.mxu2 %v7158_v54  ;;  %1618 = vmatpush.msra.mxu3 %v1545_v39  ;;  %v7431_v51 = vpop.f32.mrf.mxu0  ;;  %v7470_v39 = vld [vmem:[#allocation2 + $0xaf8] sm:$0xff] }
 0x153   : > { %1495 = vmatpush.msrb.mxu2 %v7072_v20 }
 0x154   : > { %1619 = vmatpush.msra.mxu3 %v1543_v44  ;;  %v7472_v44 = vld [vmem:[#allocation2 + $0xa00] sm:$0xff] }
 0x155   : > { %1496 = vmatpush.msrb.mxu2 %v7042_v60 }
 0x156   : > { %1620 = vmatpush.msra.mxu3 %v1541_v50  ;;  %v7482_v50 = vpop.f32.mrf.mxu3 }
 0x157   : > { %1651 = vmatpush.msra.mxu2 %v1572_v41  ;;  %1621 = vmatmul.f32.vlgmr.msra.gmra.mxu3 %v7082_v45  ;;  %v7477_v41 = vmax.f32 %v716_v30, 0.0 }
 0x158   : > { %1762 = vmatpush.msrb.mxu3 %v7402_v4  ;;  %v7468_v37 = vpop.f32.mrf.mxu1 }
 0x159   : > { %1652 = vmatpush.msra.mxu2 %v1570_v53  ;;  %v7486_v53 = vpop.f32.mrf.mxu2 }
 0x15a   : > { %1763 = vmatpush.msrb.mxu3 %v7407_v12  ;;  %1375 = vmatmul.f32.gmra.mxu2 %v7201_v33 }
 0x15b   : > { %1653 = vmatpush.msra.mxu2 %v1568_v8 }
 0x15c   : > { %1764 = vmatpush.msrb.mxu3 %v7412_v28 }
 0x15d   : > { %1654 = vmatpush.msra.mxu2 %v1566_v24  ;;  %v7454_v31 = vpop.f32.mrf.mxu0  ;;  %v7491_v24 = vld [vmem:[#allocation2 + $0xad8] sm:$0xff] }
 0x15e   : > { %1765 = vmatpush.msrb.mxu3 %v7416_v43 }
 0x15f   : > { %1655 = vmatpush.msra.mxu2 %v1564_v35  ;;  %1624 = vmatmul.f32.gmra.mxu3 %v7124_v11  ;;  %v718_v35 = vadd.f32 %v10803_v16, %v654_v46  ;;  %v1597_v46 = vld [vmem:[#allocation2 + $0x5c0] sm:$0xff] }
 0x160   : > { %1766 = vmatpush.msrb.mxu3 %v7419_v47 }
 0x161   : > { %1656 = vmatpush.msra.mxu2 %v1562_v49  ;;  %v7496_v49 = vld [vmem:[#allocation2 + $0xac8] sm:$0xff] }
 0x162   : > { %1767 = vmatpush.msrb.mxu3 %v7423_v29  ;;  %5709 = vmatmul.msk.f32.vlgmr.msrb.gmra.mxu2 %vm497_vm0, %v7382_v26 }
 0x163   : > { %1657 = vmatpush.msra.mxu2 %v1560_v63  ;;  %v7500_v63 = vld [vmem:[#allocation2 + $0xab8] sm:$0xff] }
 0x164   : > { %1768 = vmatpush.msrb.mxu3 %v7428_v48 }
 0x165   : > { %1658 = vmatpush.msra.mxu2 %v1558_v23  ;;  %v7504_v23 = vmax.f32 %v718_v35, 0.0  ;;  %v1589_v35 = vld [vmem:[#allocation2 + $0x580] sm:$0xff] }
 0x166   : > { %1769 = vmatpush.msrb.mxu3 %v7435_v62  ;;  %v7488_v8 = vpop.f32.mrf.mxu0 }
 0x167   : > { %1659 = vmatpush.msra.mxu2 %v1556_v34  ;;  %v1350_v34 = vpop.f32.mrf.mxu1 }
 0x168   : > { %1770 = vmatpush.msrb.mxu3 %v7438_v42 }
 0x169   : > { %1660 = vmatpush.msra.mxu2 %v1554_v58 }
 0x16a   : > { %1771 = vmatpush.msrb.mxu3 %v7441_v0  ;;  %5710 = vmatmul.msk.f32.gmra.mxu2 %vm497_vm0, %v7391_v56  ;;  %v7465_v56 = vld [vmem:[#allocation2 + $0xa10] sm:$0xff] }
 0x16b   : > { %1661 = vmatpush.msra.mxu2 %v1552_v59  ;;  %v7514_v59 = vpop.f32.mrf.mxu3 }
 0x16c   : > { %1772 = vmatpush.msrb.mxu3 %v7444_v25 }
 0x16d   : > { %1662 = vmatpush.msra.mxu2 %v1550_v61  ;;  %v7520_v61 = vld [vmem:[#allocation2 + $0xa88] sm:$0xff] }
 0x16e   : > { %1773 = vmatpush.msrb.mxu3 %v7451_v5 }
 0x16f   : > { %1663 = vmatpush.msra.mxu2 %v1548_v2  ;;  %v7528_v2 = vld [vmem:[#allocation2 + $0xa68] sm:$0xff] }
 0x170   : > { %1774 = vmatpush.msrb.mxu3 %v7456_v10 }
 0x171   : > { %1664 = vmatpush.msra.mxu2 %v1546_v7  ;;  %v7532_v7 = vld [vmem:[#allocation2 + $0xa58] sm:$0xff] }
 0x172   : > { %1775 = vmatpush.msrb.mxu3 %v7461_v19 }
 0x173   : > { %1665 = vmatpush.msra.mxu2 %v1544_v55  ;;  %v7538_v55 = vld [vmem:[#allocation2 + $0xa48] sm:$0xff]  ;;  %v7540_v30 = vpop.f32.mrf.mxu3 }
 0x174   : > { %1776 = vmatpush.msrb.mxu3 %v7465_v56 }
 0x175   : > { %1666 = vmatpush.msra.mxu2 %v1542_v32  ;;  %v7549_v32 = vld [vmem:[#allocation2 + $0xa38] sm:$0xff] }
 0x176   : > { %1667 = vmatmul.f32.vlgmr.msra.gmra.mxu2 %v7082_v45  ;;  %1777 = vmatpush.msrb.mxu3 %v7472_v44 }
 0x177   : > { %1808 = vmatpush.msrb.mxu2 %v7470_v39  ;;  %1778 = vmatmul.f32.vlgmr.msrb.gmra.mxu3 %v7477_v41 }
 0x178   : > { %1854 = vmatpush.msra.mxu3 %v7402_v4  ;;  %v7507_v4 = vld [vmem:[#allocation2 + $0xaa8] sm:$0xff] }
 0x179   : > { %1809 = vmatpush.msrb.mxu2 %v7480_v57 }
 0x17a   : > { %1855 = vmatpush.msra.mxu3 %v7407_v12  ;;  %v7512_v12 = vld [vmem:[#allocation2 + $0xa98] sm:$0xff] }
 0x17b   : > { %1810 = vmatpush.msrb.mxu2 %v7491_v24 }
 0x17c   : > { %1856 = vmatpush.msra.mxu3 %v7412_v28  ;;  %v7518_v28 = vpop.f32.mrf.mxu2 }
 0x17d   : > { %1811 = vmatpush.msrb.mxu2 %v7496_v49 }
 0x17e   : > { %1670 = vmatmul.f32.gmra.mxu2 %v7124_v11  ;;  %1857 = vmatpush.msra.mxu3 %v7416_v43  ;;  %v7524_v43 = vld [vmem:[#allocation2 + $0xa78] sm:$0xff] }
 0x17f   : > { %1812 = vmatpush.msrb.mxu2 %v7500_v63  ;;  %1781 = vmatmul.f32.gmra.mxu3 %v7504_v23  ;;  %v1327_v58 = vpop.f32.mrf.mxu0 }
 0x180   : > { %1858 = vmatpush.msra.mxu3 %v7419_v47  ;;  %v1353_v47 = vpop.f32.mrf.mxu1 }
 0x181   : > { %1813 = vmatpush.msrb.mxu2 %v7507_v4 }
 0x182   : > { %1859 = vmatpush.msra.mxu3 %v7423_v29 }
 0x183   : > { %1814 = vmatpush.msrb.mxu2 %v7512_v12 }
 0x184   : > { %1860 = vmatpush.msra.mxu3 %v7428_v48  ;;  %v7544_v48 = vpop.f32.mrf.mxu2 }
 0x185   : > { %1815 = vmatpush.msrb.mxu2 %v7520_v61 }
 0x186   : > { %1861 = vmatpush.msra.mxu3 %v7435_v62  ;;  %v7546_v62 = vadd.f32 %v1350_v34, %v1327_v58  ;;  %v1583_v34 = vld [vmem:[#allocation2 + $0x550] sm:$0xff] }
 0x187   : > { %1816 = vmatpush.msrb.mxu2 %v7524_v43  ;;  %v1330_v17 = vpop.f32.mrf.mxu0 }
 0x188   : > { %1862 = vmatpush.msra.mxu3 %v7438_v42  ;;  %v7536_v29 = vadd.f32 %v1353_v47, %v1330_v17  ;;  %v7554_v42 = vld [vmem:[#allocation2 + $0xa28] sm:$0xff]  ;;  %v1758_v17 = vld [vmem:[#allocation2 + $0xbe0] sm:$0xff] }
 0x189   : > { %1817 = vmatpush.msrb.mxu2 %v7528_v2 }
 0x18a   : > { %1863 = vmatpush.msra.mxu3 %v7441_v0  ;;  %1414 = vmatpush.msrb.mxu0 %v7536_v29  ;;  %v7559_v0 = vld [vmem:[#allocation2 + $0xa18] sm:$0xff] }
 0x18b   : > { %1818 = vmatpush.msrb.mxu2 %v7532_v7 }
 0x18c   : > { %1864 = vmatpush.msra.mxu3 %v7444_v25  ;;  %1415 = vmatpush.msrb.mxu0 %v7546_v62  ;;  %v7569_v25 = vpop.f32.mrf.mxu3 }
 0x18d   : > { %1819 = vmatpush.msrb.mxu2 %v7538_v55 }
 0x18e   : > { %1865 = vmatpush.msra.mxu3 %v7451_v5  ;;  %1416 = vmatpush.msrb.mxu0 %v7286_v27  ;;  %v7575_v5 = vadd.f32 %v7468_v37, %v7488_v8 }
 0x18f   : > { %1820 = vmatpush.msrb.mxu2 %v7549_v32 }
 0x190   : > { %1866 = vmatpush.msra.mxu3 %v7456_v10  ;;  %1417 = vmatpush.msrb.mxu0 %v7253_v18  ;;  %v7577_v10 = vpop.f32.mrf.mxu2 }
 0x191   : > { %1821 = vmatpush.msrb.mxu2 %v7554_v42 }
 0x192   : > { %1867 = vmatpush.msra.mxu3 %v7461_v19  ;;  %1418 = vmatpush.msrb.mxu0 %v7504_v23  ;;  %v7585_v19 = vadd.f32 %v7447_v1, %v7454_v31  ;;  %v7600_v1 = vadd.f32 %v7404_v9, %v7410_v14  ;;  %v7617_v9 = vadd.f32 %v7377_v15, %v7384_v22  ;;  %v7633_v15 = vld [vmem:[%s10514_s5] sm:$0xff]  ;;  %v1603_v22 = vld [vmem:[#allocation2 + $0x5f0] sm:$0xff] }
 0x193   : > { %1822 = vmatpush.msrb.mxu2 %v7559_v0  ;;  %v1601_v31 = vld [vmem:[#allocation2 + $0x5e0] sm:$0xff] }
 0x194   : > { %1868 = vmatpush.msra.mxu3 %v7465_v56  ;;  %1419 = vmatpush.msrb.mxu0 %v7477_v41  ;;  %v7593_v56 = vadd.f32 %v7426_v13, %v7431_v51  ;;  %v7607_v13 = vadd.f32 %v7393_v36, %v7397_v40  ;;  %v7611_v51 = vpop.f32.mrf.mxu3  ;;  %v856_v36 = vadd.f32 %v7514_v59, %v7518_v28  ;;  %v1579_v59 = vld [vmem:[#allocation2 + $0x530] sm:$0xff]  ;;  %v1577_v28 = vld [vmem:[#allocation2 + $0x520] sm:$0xff] }
 0x195   : > { %1823 = vmatpush.msrb.mxu2 %v7564_v6  ;;  %v853_v40 = vadd.f32 %v7482_v50, %v7486_v53  ;;  %v1595_v50 = vld [vmem:[#allocation2 + $0x5b0] sm:$0xff]  ;;  %v1593_v53 = vld [vmem:[#allocation2 + $0x5a0] sm:$0xff] }
 0x196   : > { %1824 = vmatmul.f32.vlgmr.msrb.gmra.mxu2 %v7477_v41  ;;  %1869 = vmatpush.msra.mxu3 %v7472_v44 }
 0x197   : > { %1900 = vmatpush.msra.mxu2 %v7470_v39  ;;  %1870 = vmatmul.f32.vlgmr.msra.gmra.mxu3 %v7082_v45  ;;  %v1599_v39 = vld [vmem:[#allocation2 + $0x5d0] sm:$0xff] }
 0x198   : > { %1420 = vmatpush.msrb.mxu0 %v7575_v5  ;;  %1946 = vmatpush.msrb.mxu3 %v7201_v33  ;;  %v7619_v14 = vpop.f32.mrf.mxu2 }
 0x199   : > { %1901 = vmatpush.msra.mxu2 %v7480_v57  ;;  %v7647_v57 = vld [vmem:[%s10514_s5 + $0x10] sm:$0xff] }
 0x19a   : > { %1421 = vmatpush.msrb.mxu0 %v7585_v19  ;;  %1947 = vmatpush.msrb.mxu3 %v7158_v54 }
 0x19b   : > { %1902 = vmatpush.msra.mxu2 %v7491_v24  ;;  %v1591_v24 = vld [vmem:[#allocation2 + $0x590] sm:$0xff] }
 0x19c   : > { %1422 = vmatpush.msrb.mxu0 %v7593_v56  ;;  %1948 = vmatpush.msrb.mxu3 %v7124_v11  ;;  %v7638_v37 = vpop.f32.mrf.mxu3 }
 0x19d   : > { %1903 = vmatpush.msra.mxu2 %v7496_v49  ;;  %v1587_v49 = vld [vmem:[#allocation2 + $0x570] sm:$0xff] }
 0x19e   : > { %1827 = vmatmul.f32.gmra.mxu2 %v7504_v23  ;;  %1423 = vmatpush.msrb.mxu0 %v7600_v1 }
 0x19f   : > { %1904 = vmatpush.msra.mxu2 %v7500_v63  ;;  %1949 = vmatpush.msrb.mxu3 %v7082_v45  ;;  %v1585_v63 = vld [vmem:[#allocation2 + $0x560] sm:$0xff] }
 0x1a0   : > { %1873 = vmatmul.f32.gmra.mxu3 %v7124_v11  ;;  %1424 = vmatpush.msrb.mxu0 %v7607_v13  ;;  %v7641_v44 = vpop.f32.mrf.mxu2 }
 0x1a1   : > { %1905 = vmatpush.msra.mxu2 %v7507_v4 }
 0x1a2   : > { %1425 = vmatpush.msrb.mxu0 %v7617_v9 }
 0x1a3   : > { %1906 = vmatpush.msra.mxu2 %v7512_v12  ;;  %v1581_v12 = vld [vmem:[#allocation2 + $0x540] sm:$0xff] }
 0x1a4   : > { %1426 = vmatpush.msrb.mxu0 %v856_v36  ;;  %v7652_v8 = vpop.f32.mrf.mxu3  ;;  %v1750_v36 = vld [vmem:[#allocation2 + $0xba0] sm:$0xff] }
 0x1a5   : > { %1907 = vmatpush.msra.mxu2 %v7520_v61  ;;  %v1575_v61 = vld [vmem:[#allocation2 + $0x510] sm:$0xff] }
 0x1a6   : > { %1427 = vmatpush.msrb.mxu0 %v853_v40  ;;  %v1748_v40 = vld [vmem:[#allocation2 + $0xb90] sm:$0xff] }
 0x1a7   : > { %1908 = vmatpush.msra.mxu2 %v7524_v43  ;;  %1428 = vmatmul.f32.vlgmr.msrb.gmra.mxu0 %v7633_v15 }
 0x1a8   : > { %1628 = vmatpush.msra.mxu0 %v1603_v22  ;;  %v7655_v16 = vpop.f32.mrf.mxu2  ;;  %v1746_v22 = vld [vmem:[#allocation2 + $0xb80] sm:$0xff] }
 0x1a9   : > { %1909 = vmatpush.msra.mxu2 %v7528_v2  ;;  %v1573_v2 = vld [vmem:[#allocation2 + $0x500] sm:$0xff] }
 0x1aa   : > { %1629 = vmatpush.msra.mxu0 %v1601_v31 }
 0x1ab   : > { %1910 = vmatpush.msra.mxu2 %v7532_v7  ;;  %v1760_v7 = vld [vmem:[#allocation2 + $0xbf0] sm:$0xff] }
 0x1ac   : > { %1630 = vmatpush.msra.mxu0 %v1599_v39  ;;  %v7662_v4 = vpop.f32.mrf.mxu3  ;;  %v1744_v39 = vld [vmem:[#allocation2 + $0xb70] sm:$0xff] }
 0x1ad   : > { %1911 = vmatpush.msra.mxu2 %v7538_v55  ;;  %v1756_v55 = vld [vmem:[#allocation2 + $0xbd0] sm:$0xff] }
 0x1ae   : > { %1631 = vmatpush.msra.mxu0 %v1597_v46 }
 0x1af   : > { %1912 = vmatpush.msra.mxu2 %v7549_v32  ;;  %1431 = vmatmul.f32.gmra.mxu0 %v7647_v57  ;;  %v1754_v32 = vld [vmem:[#allocation2 + $0xbc0] sm:$0xff] }
 0x1b0   : > { %1632 = vmatpush.msra.mxu0 %v1595_v50  ;;  %v7665_v58 = vpop.f32.mrf.mxu2  ;;  %v1742_v50 = vld [vmem:[#allocation2 + $0xb60] sm:$0xff] }
 0x1b1   : > { %1913 = vmatpush.msra.mxu2 %v7554_v42 }
 0x1b2   : > { %1633 = vmatpush.msra.mxu0 %v1593_v53  ;;  %v1740_v53 = vld [vmem:[#allocation2 + $0xb50] sm:$0xff] }
 0x1b3   : > { %1914 = vmatpush.msra.mxu2 %v7559_v0  ;;  %v1752_v0 = vld [vmem:[#allocation2 + $0xbb0] sm:$0xff] }
 0x1b4   : > { %1634 = vmatpush.msra.mxu0 %v1591_v24  ;;  %v1304_v43 = vpop.f32.mrf.mxu3  ;;  %v1738_v24 = vld [vmem:[#allocation2 + $0xb40] sm:$0xff] }
 0x1b5   : > { %1915 = vmatpush.msra.mxu2 %v7564_v6 }
 0x1b6   : > { %1916 = vmatmul.f32.vlgmr.msra.gmra.mxu2 %v7082_v45  ;;  %1635 = vmatpush.msra.mxu0 %v1589_v35  ;;  %v1736_v35 = vld [vmem:[#allocation2 + $0xb30] sm:$0xff] }
 0x1b7   : > { %1992 = vmatpush.msrb.mxu2 %v7072_v20 }
 0x1b8   : > { %1636 = vmatpush.msra.mxu0 %v1587_v49  ;;  %v1281_v47 = vpop.f32.mrf.mxu2 }
 0x1b9   : > { %1993 = vmatpush.msrb.mxu2 %v7042_v60 }
 0x1ba   : > { %1637 = vmatpush.msra.mxu0 %v1585_v63 }
 0x1bb   : > { %1994 = vmatpush.msrb.mxu2 %v7010_v38 }
 0x1bc   : > { %1638 = vmatpush.msra.mxu0 %v1583_v34  ;;  %v1307_v42 = vpop.f32.mrf.mxu3  ;;  %v1734_v34 = vld [vmem:[#allocation2 + $0xb20] sm:$0xff] }
 0x1bd   : > { %1995 = vmatpush.msrb.mxu2 %v6987_v21 }
 0x1be   : > { %1919 = vmatmul.f32.gmra.mxu2 %v7124_v11  ;;  %1639 = vmatpush.msra.mxu0 %v1581_v12 }
 0x1c0   : > { %1640 = vmatpush.msra.mxu0 %v1579_v59  ;;  %v1284_v6 = vpop.f32.mrf.mxu2  ;;  %v1732_v59 = vld [vmem:[#allocation2 + $0xb10] sm:$0xff] }
 0x1c2   : > { %1641 = vmatpush.msra.mxu0 %v1577_v28 }
 0x1c4   : > { %1642 = vmatpush.msra.mxu0 %v1575_v61  ;;  %v1396_v31 = vpop.f32.mrf.mxu3  ;;  %v1730_v61 = vld [vmem:[#allocation2 + $0xb00] sm:$0xff] }
 0x1c6   : > { %1643 = vmatpush.msra.mxu0 %v1573_v2  ;;  %v10806_v2 = vld [vmem:[#allocation10_spill] sm:$0xff] }
 0x1c7   : > { %1644 = vmatmul.f32.vlgmr.msra.gmra.mxu0 %v6987_v21  ;;  %v7678_v60 = vmax.f32 %v10806_v2, 0.0  ;;  %v1741_v2 = vld [vmem:[#allocation2 + $0xb58] sm:$0xff] }
 0x1c8   : > { %1785 = vmatpush.msrb.mxu0 %v1760_v7 }
 0x1ca   : > { %1786 = vmatpush.msrb.mxu0 %v1758_v17 }
 0x1cc   : > { %1787 = vmatpush.msrb.mxu0 %v1756_v55  ;;  %v1399_v49 = vpop.f32.mrf.mxu3 }
 0x1ce   : > { %1788 = vmatpush.msrb.mxu0 %v1754_v32 }
 0x1cf   : > { %1647 = vmatmul.f32.gmra.mxu0 %v7010_v38 }
 0x1d0   : > { %1789 = vmatpush.msrb.mxu0 %v1752_v0 }
 0x1d2   : > { %1790 = vmatpush.msrb.mxu0 %v1750_v36 }
 0x1d4   : > { %1791 = vmatpush.msrb.mxu0 %v1748_v40 }
 0x1d5   : > { %v1373_v46 = vpop.f32.mrf.mxu2 }
 0x1d6   : > { %1792 = vmatpush.msrb.mxu0 %v1746_v22  ;;  %v7673_v28 = vadd.f32 %v1396_v31, %v1373_v46  ;;  %v7687_v31 = vadd.f32 %v1307_v42, %v1284_v6  ;;  %v7690_v46 = vadd.f32 %v1304_v43, %v1281_v47  ;;  %v7706_v43 = vadd.f32 %v7638_v37, %v7641_v44  ;;  %v1604_v44 = vld [vmem:[#allocation2 + $0x5f8] sm:$0xff]  ;;  %v1586_v47 = vld [vmem:[#allocation2 + $0x568] sm:$0xff] }
 0x1d7   : > { %v899_v37 = vadd.f32 %v7540_v30, %v7544_v48  ;;  %v1594_v30 = vld [vmem:[#allocation2 + $0x5a8] sm:$0xff]  ;;  %v1592_v48 = vld [vmem:[#allocation2 + $0x598] sm:$0xff] }
 0x1d8   : > { %1793 = vmatpush.msrb.mxu0 %v1744_v39  ;;  %10805 = vst [vmem:[#allocation8_spill] sm:$0xff] %v7673_v28  ;;  %v1580_v42 = vld [vmem:[#allocation2 + $0x538] sm:$0xff] }
 0x1d9   : > { %10808 = vst [vmem:[#allocation10_spill] sm:$0xff] %v7687_v31  ;;  %v1576_v6 = vld [vmem:[#allocation2 + $0x518] sm:$0xff] }
 0x1da   : > { %1794 = vmatpush.msrb.mxu0 %v1742_v50 }
 0x1dc   : > { %1795 = vmatpush.msrb.mxu0 %v1740_v53 }
 0x1dd   : > { %v1376_v63 = vpop.f32.mrf.mxu2 }
 0x1de   : > { %1796 = vmatpush.msrb.mxu0 %v1738_v24  ;;  %v7671_v12 = vadd.f32 %v1399_v49, %v1376_v63  ;;  %v10807_v49 = vld [vmem:[#allocation9_spill] sm:$0xff] }
 0x1df   : > { %v7683_v63 = vmax.f32 %v10807_v49, 0.0  ;;  %10809 = vst [vmem:[#allocation9_spill] sm:$0xff] %v7690_v46  ;;  %v1739_v49 = vld [vmem:[#allocation2 + $0xb48] sm:$0xff] }
 0x1e0   : > { %10804 = vst [vmem:[#allocation6_spill] sm:$0xff] %v7671_v12  ;;  %1797 = vmatpush.msrb.mxu0 %v1736_v35  ;;  %1460 = vmatpush.msra.mxu1 %v7671_v12  ;;  %v7855_v12 = vld [vmem:[#allocation2 + $0xe70] sm:$0xff] }
 0x1e2   : > { %1798 = vmatpush.msrb.mxu0 %v1734_v34  ;;  %1461 = vmatpush.msra.mxu1 %v7673_v28  ;;  %v7852_v28 = vld [vmem:[#allocation2 + $0xf10] sm:$0xff] }
 0x1e4   : > { %1799 = vmatpush.msrb.mxu0 %v1732_v59  ;;  %1462 = vmatpush.msra.mxu1 %v7228_v52 }
 0x1e6   : > { %1800 = vmatpush.msrb.mxu0 %v1730_v61  ;;  %1463 = vmatpush.msra.mxu1 %v7115_v3 }
 0x1e7   : > { %1801 = vmatmul.f32.vlgmr.msrb.gmra.mxu0 %v7678_v60 }
 0x1e8   : > { %1877 = vmatpush.msra.mxu0 %v1760_v7  ;;  %1464 = vmatpush.msra.mxu1 %v7683_v63  ;;  %v7696_v7 = vadd.f32 %v7662_v4, %v7665_v58  ;;  %v7711_v4 = vadd.f32 %v7611_v51, %v7619_v14  ;;  %v1602_v51 = vld [vmem:[#allocation2 + $0x5e8] sm:$0xff]  ;;  %v1600_v14 = vld [vmem:[#allocation2 + $0x5d8] sm:$0xff] }
 0x1e9   : > { %v1588_v58 = vld [vmem:[#allocation2 + $0x578] sm:$0xff] }
 0x1ea   : > { %1878 = vmatpush.msra.mxu0 %v1758_v17  ;;  %1465 = vmatpush.msra.mxu1 %v7678_v60  ;;  %v7701_v17 = vadd.f32 %v7652_v8, %v7655_v16  ;;  %v902_v8 = vadd.f32 %v7569_v25, %v7577_v10  ;;  %v1598_v25 = vld [vmem:[#allocation2 + $0x5c8] sm:$0xff]  ;;  %v1596_v10 = vld [vmem:[#allocation2 + $0x5b8] sm:$0xff] }
 0x1eb   : > { %v1590_v16 = vld [vmem:[#allocation2 + $0x588] sm:$0xff] }
 0x1ec   : > { %1879 = vmatpush.msra.mxu0 %v1756_v55  ;;  %1466 = vmatpush.msra.mxu1 %v7687_v31  ;;  %v1584_v55 = vld [vmem:[#allocation2 + $0x558] sm:$0xff]  ;;  %v7849_v31 = vld [vmem:[#allocation2 + $0xe80] sm:$0xff] }
 0x1ee   : > { %1880 = vmatpush.msra.mxu0 %v1754_v32  ;;  %1467 = vmatpush.msra.mxu1 %v7690_v46  ;;  %v1582_v32 = vld [vmem:[#allocation2 + $0x548] sm:$0xff]  ;;  %v7846_v46 = vld [vmem:[#allocation2 + $0xf20] sm:$0xff] }
 0x1ef   : > { %1804 = vmatmul.f32.gmra.mxu0 %v7683_v63 }
 0x1f0   : > { %1881 = vmatpush.msra.mxu0 %v1752_v0  ;;  %1468 = vmatpush.msra.mxu1 %v7696_v7  ;;  %v1578_v0 = vld [vmem:[#allocation2 + $0x528] sm:$0xff] }
 0x1f2   : > { %1882 = vmatpush.msra.mxu0 %v1750_v36  ;;  %1469 = vmatpush.msra.mxu1 %v7701_v17  ;;  %v1574_v36 = vld [vmem:[#allocation2 + $0x508] sm:$0xff] }
 0x1f4   : > { %1883 = vmatpush.msra.mxu0 %v1748_v40  ;;  %1470 = vmatpush.msra.mxu1 %v7706_v43  ;;  %v1761_v40 = vld [vmem:[#allocation2 + $0xbf8] sm:$0xff] }
 0x1f6   : > { %1884 = vmatpush.msra.mxu0 %v1746_v22  ;;  %1471 = vmatpush.msra.mxu1 %v7711_v4  ;;  %v1759_v22 = vld [vmem:[#allocation2 + $0xbe8] sm:$0xff] }
 0x1f8   : > { %1885 = vmatpush.msra.mxu0 %v1744_v39  ;;  %1472 = vmatpush.msra.mxu1 %v902_v8  ;;  %v1757_v39 = vld [vmem:[#allocation2 + $0xbd8] sm:$0xff] }
 0x1f9   : > { %v1737_v8 = vld [vmem:[#allocation2 + $0xb38] sm:$0xff] }
 0x1fa   : > { %1886 = vmatpush.msra.mxu0 %v1742_v50  ;;  %1473 = vmatpush.msra.mxu1 %v899_v37  ;;  %v1755_v50 = vld [vmem:[#allocation2 + $0xbc8] sm:$0xff] }
 0x1fb   : > { %1474 = vmatmul.f32.vlgmr.msra.gmra.mxu1 %v7633_v15  ;;  %v1735_v37 = vld [vmem:[#allocation2 + $0xb28] sm:$0xff] }
 0x1fc   : > { %1887 = vmatpush.msra.mxu0 %v1740_v53  ;;  %1674 = vmatpush.msrb.mxu1 %v1604_v44  ;;  %v1753_v53 = vld [vmem:[#allocation2 + $0xbb8] sm:$0xff] }
 0x1fd   : > { %v1733_v44 = vld [vmem:[#allocation2 + $0xb18] sm:$0xff] }
 0x1fe   : > { %1888 = vmatpush.msra.mxu0 %v1738_v24  ;;  %1675 = vmatpush.msrb.mxu1 %v1602_v51  ;;  %v1751_v24 = vld [vmem:[#allocation2 + $0xba8] sm:$0xff] }
 0x1ff   : > { %v1731_v51 = vld [vmem:[#allocation2 + $0xb08] sm:$0xff] }
 0x200   : > { %1889 = vmatpush.msra.mxu0 %v1736_v35  ;;  %1676 = vmatpush.msrb.mxu1 %v1600_v14  ;;  %v1749_v35 = vld [vmem:[#allocation2 + $0xb98] sm:$0xff] }
 0x202   : > { %1890 = vmatpush.msra.mxu0 %v1734_v34  ;;  %1677 = vmatpush.msrb.mxu1 %v1598_v25  ;;  %v1747_v34 = vld [vmem:[#allocation2 + $0xb88] sm:$0xff] }
 0x203   : > { %1477 = vmatmul.f32.gmra.mxu1 %v7647_v57 }
 0x204   : > { %1891 = vmatpush.msra.mxu0 %v1732_v59  ;;  %1678 = vmatpush.msrb.mxu1 %v1596_v10  ;;  %v1745_v59 = vld [vmem:[#allocation2 + $0xb78] sm:$0xff]  ;;  %v1622_v10 = vpop.f32.mrf.mxu3 }
 0x206   : > { %1892 = vmatpush.msra.mxu0 %v1730_v61  ;;  %1679 = vmatpush.msrb.mxu1 %v1594_v30  ;;  %v1743_v61 = vld [vmem:[#allocation2 + $0xb68] sm:$0xff] }
 0x207   : > { %1893 = vmatmul.f32.vlgmr.msra.gmra.mxu0 %v6987_v21 }
 0x208   : > { %1680 = vmatpush.msrb.mxu1 %v1592_v48 }
 0x20a   : > { %1681 = vmatpush.msrb.mxu1 %v1590_v16 }
 0x20c   : > { %1682 = vmatpush.msrb.mxu1 %v1588_v58  ;;  %v1625_v48 = vpop.f32.mrf.mxu3 }
 0x20e   : > { %1683 = vmatpush.msrb.mxu1 %v1586_v47 }
 0x20f   : > { %1896 = vmatmul.f32.gmra.mxu0 %v7010_v38 }
 0x210   : > { %1684 = vmatpush.msrb.mxu1 %v1584_v55 }
 0x212   : > { %1685 = vmatpush.msrb.mxu1 %v1582_v32 }
 0x214   : > { %1686 = vmatpush.msrb.mxu1 %v1580_v42  ;;  %v1779_v58 = vpop.f32.mrf.mxu3 }
 0x216   : > { %1687 = vmatpush.msrb.mxu1 %v1578_v0 }
 0x218   : > { %1688 = vmatpush.msrb.mxu1 %v1576_v6 }
 0x21a   : > { %1689 = vmatpush.msrb.mxu1 %v1574_v36 }
 0x21b   : > { %1690 = vmatmul.f32.vlgmr.msrb.gmra.mxu1 %v6987_v21 }
 0x21c   : > { %1831 = vmatpush.msra.mxu1 %v1761_v40  ;;  %v1782_v55 = vpop.f32.mrf.mxu3 }
 0x21e   : > { %1832 = vmatpush.msra.mxu1 %v1759_v22 }
 0x220   : > { %1833 = vmatpush.msra.mxu1 %v1757_v39 }
 0x222   : > { %1834 = vmatpush.msra.mxu1 %v1755_v50 }
 0x223   : > { %1693 = vmatmul.f32.gmra.mxu1 %v7010_v38 }
 0x224   : > { %1835 = vmatpush.msra.mxu1 %v1753_v53  ;;  %v7726_v14 = vpop.f32.mrf.mxu0 }
 0x225   : > { %10810 = vst [vmem:[#allocation13_spill] sm:$0xff] %v7726_v14  ;;  %v7837_v14 = vld [vmem:[#allocation2 + $0xea0] sm:$0xff] }
 0x226   : > { %1836 = vmatpush.msra.mxu1 %v1751_v24 }
 0x228   : > { %1837 = vmatpush.msra.mxu1 %v1749_v35 }
 0x22a   : > { %1838 = vmatpush.msra.mxu1 %v1747_v34 }
 0x22c   : > { %1839 = vmatpush.msra.mxu1 %v1745_v59  ;;  %v7729_v25 = vpop.f32.mrf.mxu0 }
 0x22d   : > { %10811 = vst [vmem:[#allocation14_spill] sm:$0xff] %v7729_v25  ;;  %v7843_v25 = vld [vmem:[#allocation2 + $0xe90] sm:$0xff] }
 0x22e   : > { %1840 = vmatpush.msra.mxu1 %v1743_v61 }
 0x230   : > { %1841 = vmatpush.msra.mxu1 %v1741_v2 }
 0x232   : > { %1842 = vmatpush.msra.mxu1 %v1739_v49 }
 0x234   : > { %1843 = vmatpush.msra.mxu1 %v1737_v8 }
 0x236   : > { %1844 = vmatpush.msra.mxu1 %v1735_v37 }
 0x238   : > { %1845 = vmatpush.msra.mxu1 %v1733_v44 }
 0x23a   : > { %1846 = vmatpush.msra.mxu1 %v1731_v51 }
 0x23b   : > { %1847 = vmatmul.f32.vlgmr.msra.gmra.mxu1 %v7678_v60 }
 0x23c   : > { %1923 = vmatpush.msrb.mxu1 %v1761_v40  ;;  %v1871_v40 = vpop.f32.mrf.mxu3 }
 0x23e   : > { %1924 = vmatpush.msrb.mxu1 %v1759_v22  ;;  %v2113_v22 = vld [vmem:[#allocation2 + $0xdf0] sm:$0xff] }
 0x240   : > { %1925 = vmatpush.msrb.mxu1 %v1757_v39  ;;  %v7746_v39 = vpop.f32.mrf.mxu1 }
 0x241   : > { %10814 = vst [vmem:[#allocation17_spill] sm:$0xff] %v7746_v39 }
 0x242   : > { %1926 = vmatpush.msrb.mxu1 %v1755_v50 }
 0x243   : > { %1850 = vmatmul.f32.gmra.mxu1 %v7683_v63 }
 0x244   : > { %1927 = vmatpush.msrb.mxu1 %v1753_v53  ;;  %v1645_v30 = vpop.f32.mrf.mxu0  ;;  %v2111_v53 = vld [vmem:[#allocation2 + $0xde0] sm:$0xff] }
 0x245   : > { %v1646_v36 = vadd.f32 %v1645_v30, %v1622_v10  ;;  %v2077_v10 = vld [vmem:[#allocation2 + $0xcd0] sm:$0xff]  ;;  %v2095_v30 = vld [vmem:[#allocation2 + $0xd60] sm:$0xff] }
 0x246   : > { %1928 = vmatpush.msrb.mxu1 %v1751_v24  ;;  %v2109_v24 = vld [vmem:[#allocation2 + $0xdd0] sm:$0xff] }
 0x248   : > { %1929 = vmatpush.msrb.mxu1 %v1749_v35  ;;  %v2107_v35 = vld [vmem:[#allocation2 + $0xdc0] sm:$0xff] }
 0x24a   : > { %1930 = vmatpush.msrb.mxu1 %v1747_v34  ;;  %v1874_v34 = vpop.f32.mrf.mxu3 }
 0x24c   : > { %1931 = vmatpush.msrb.mxu1 %v1745_v59  ;;  %v1648_v16 = vpop.f32.mrf.mxu0 }
 0x24d   : > { %v1649_v6 = vadd.f32 %v1648_v16, %v1625_v48  ;;  %v2075_v16 = vld [vmem:[#allocation2 + $0xcc0] sm:$0xff] }
 0x24e   : > { %1932 = vmatpush.msrb.mxu1 %v1743_v61  ;;  %v7752_v61 = vpop.f32.mrf.mxu1 }
 0x24f   : > { %10815 = vst [vmem:[#allocation18_spill] sm:$0xff] %v7752_v61  ;;  %v7840_v61 = vld [vmem:[#allocation2 + $0xf30] sm:$0xff] }
 0x250   : > { %1933 = vmatpush.msrb.mxu1 %v1741_v2 }
 0x252   : > { %1934 = vmatpush.msrb.mxu1 %v1739_v49  ;;  %v2081_v49 = vld [vmem:[#allocation2 + $0xcf0] sm:$0xff] }
 0x254   : > { %1935 = vmatpush.msrb.mxu1 %v1737_v8  ;;  %v2099_v8 = vld [vmem:[#allocation2 + $0xd80] sm:$0xff] }
 0x256   : > { %1936 = vmatpush.msrb.mxu1 %v1735_v37  ;;  %v7759_v37 = vpop.f32.mrf.mxu2 }
 0x257   : > { %10816 = vst [vmem:[#allocation19_spill] sm:$0xff] %v7759_v37  ;;  %v7867_v37 = vld [vmem:[#allocation2 + $0xe50] sm:$0xff] }
 0x258   : > { %1937 = vmatpush.msrb.mxu1 %v1733_v44  ;;  %v2079_v44 = vld [vmem:[#allocation2 + $0xce0] sm:$0xff] }
 0x25a   : > { %1938 = vmatpush.msrb.mxu1 %v1731_v51  ;;  %v2097_v51 = vld [vmem:[#allocation2 + $0xd70] sm:$0xff] }
 0x25b   : > { %1939 = vmatmul.f32.vlgmr.msrb.gmra.mxu1 %v6987_v21  ;;  %v7858_v21 = vld [vmem:[#allocation2 + $0xf00] sm:$0xff] }
 0x263   : > { %1942 = vmatmul.f32.gmra.mxu1 %v7010_v38 }
 0x264   : > { %v1802_v47 = vpop.f32.mrf.mxu0 }
 0x265   : > { %v7735_v0 = vadd.f32 %v1802_v47, %v1779_v58  ;;  %v2093_v58 = vld [vmem:[#allocation2 + $0xd50] sm:$0xff] }
 0x266   : > { %v2073_v47 = vld [vmem:[#allocation2 + $0xcb0] sm:$0xff] }
 0x267   : > { %10813 = vst [vmem:[#allocation16_spill] sm:$0xff] %v7735_v0 }
 0x26c   : > { %v1805_v32 = vpop.f32.mrf.mxu0 }
 0x26d   : > { %v7733_v42 = vadd.f32 %v1805_v32, %v1782_v55  ;;  %v2091_v55 = vld [vmem:[#allocation2 + $0xd40] sm:$0xff] }
 0x26e   : > { %v2071_v32 = vld [vmem:[#allocation2 + $0xca0] sm:$0xff] }
 0x26f   : > { %10812 = vst [vmem:[#allocation15_spill] sm:$0xff] %v7733_v42  ;;  %1950 = vmatpush.msrb.mxu3 %v7733_v42 }
 0x271   : > { %1951 = vmatpush.msrb.mxu3 %v7735_v0  ;;  %v7861_v0 = vld [vmem:[#allocation2 + $0xe60] sm:$0xff] }
 0x273   : > { %1952 = vmatpush.msrb.mxu3 %v7286_v27 }
 0x275   : > { %1953 = vmatpush.msrb.mxu3 %v7253_v18 }
 0x277   : > { %1954 = vmatpush.msrb.mxu3 %v7504_v23 }
 0x278   : > { %v7763_v48 = vpop.f32.mrf.mxu1 }
 0x279   : > { %1955 = vmatpush.msrb.mxu3 %v7477_v41  ;;  %10817 = vst [vmem:[#allocation20_spill] sm:$0xff] %v7763_v48 }
 0x27b   : > { %1956 = vmatpush.msrb.mxu3 %v1649_v6  ;;  %v2089_v6 = vld [vmem:[#allocation2 + $0xd30] sm:$0xff] }
 0x27d   : > { %1957 = vmatpush.msrb.mxu3 %v1646_v36  ;;  %v7772_v36 = vpop.f32.mrf.mxu2 }
 0x27e   : > { %10818 = vst [vmem:[#allocation21_spill] sm:$0xff] %v7772_v36  ;;  %v7874_v36 = vld [vmem:[#allocation2 + $0xe40] sm:$0xff] }
 0x27f   : > { %1958 = vmatpush.msrb.mxu3 %v7593_v56  ;;  %v2105_v56 = vld [vmem:[#allocation2 + $0xdb0] sm:$0xff] }
 0x281   : > { %1959 = vmatpush.msrb.mxu3 %v7600_v1 }
 0x283   : > { %1960 = vmatpush.msrb.mxu3 %v7607_v13  ;;  %v2103_v13 = vld [vmem:[#allocation2 + $0xda0] sm:$0xff] }
 0x284   : > { %v1894_v50 = vpop.f32.mrf.mxu0 }
 0x285   : > { %1961 = vmatpush.msrb.mxu3 %v7617_v9  ;;  %v7754_v2 = vadd.f32 %v1894_v50, %v1871_v40  ;;  %v2101_v9 = vld [vmem:[#allocation2 + $0xd90] sm:$0xff]  ;;  %v2067_v50 = vld [vmem:[#allocation2 + $0xc80] sm:$0xff] }
 0x286   : > { %1962 = vmatmul.f32.vlgmr.msrb.gmra.mxu3 %v7633_v15  ;;  %v2069_v40 = vld [vmem:[#allocation2 + $0xc90] sm:$0xff] }
 0x287   : > { %2138 = vmatpush.msra.mxu3 %v2113_v22  ;;  %v2087_v22 = vld [vmem:[#allocation2 + $0xd20] sm:$0xff] }
 0x289   : > { %2139 = vmatpush.msra.mxu3 %v2111_v53  ;;  %v2085_v53 = vld [vmem:[#allocation2 + $0xd10] sm:$0xff] }
 0x28b   : > { %2140 = vmatpush.msra.mxu3 %v2109_v24  ;;  %v7774_v24 = vpop.f32.mrf.mxu1 }
 0x28c   : > { %v1897_v1 = vpop.f32.mrf.mxu0 }
 0x28d   : > { %2141 = vmatpush.msra.mxu3 %v2107_v35  ;;  %v7750_v59 = vadd.f32 %v1897_v1, %v1874_v34  ;;  %v2065_v35 = vld [vmem:[#allocation2 + $0xc70] sm:$0xff]  ;;  %v2063_v34 = vld [vmem:[#allocation2 + $0xc60] sm:$0xff] }
 0x28e   : > { %1965 = vmatmul.f32.gmra.mxu3 %v7647_v57  ;;  %v7776_v1 = vld [vmem:[#allocation2 + $0xff0] sm:$0xff] }
 0x28f   : > { %2142 = vmatpush.msra.mxu3 %v2105_v56  ;;  %1983 = vmatpush.msra.mxu1 %v7750_v59  ;;  %v2083_v56 = vld [vmem:[#allocation2 + $0xd00] sm:$0xff] }
 0x291   : > { %2143 = vmatpush.msra.mxu3 %v2103_v13  ;;  %1984 = vmatpush.msra.mxu1 %v7754_v2  ;;  %v2061_v13 = vld [vmem:[#allocation2 + $0xc50] sm:$0xff] }
 0x292   : > { %5711 = vmatmul.msk.f32.vlgmr.msra.gmra.mxu1 %vm497_vm0, %v7382_v26  ;;  %v7768_v26 = vld [vmem:[%s10514_s5 + $0x18] sm:$0xff] }
 0x293   : > { %2144 = vmatpush.msra.mxu3 %v2101_v9  ;;  %2115 = vmatpush.msrb.mxu1 %v2081_v49  ;;  %v7779_v9 = vld [vmem:[#allocation2 + $0xfe0] sm:$0xff]  ;;  %v7781_v49 = vpop.f32.mrf.mxu2 }
 0x295   : > { %2145 = vmatpush.msra.mxu3 %v2099_v8  ;;  %2116 = vmatpush.msrb.mxu1 %v2079_v44  ;;  %v2059_v8 = vld [vmem:[#allocation2 + $0xc40] sm:$0xff]  ;;  %v7784_v44 = vld [vmem:[#allocation2 + $0xfd0] sm:$0xff] }
 0x297   : > { %2146 = vmatpush.msra.mxu3 %v2097_v51  ;;  %2117 = vmatpush.msrb.mxu1 %v2077_v10  ;;  %v2057_v10 = vld [vmem:[#allocation2 + $0xc30] sm:$0xff] }
 0x298   : > { %v7786_v51 = vpop.f32.mrf.mxu1 }
 0x299   : > { %2147 = vmatpush.msra.mxu3 %v2095_v30  ;;  %2118 = vmatpush.msrb.mxu1 %v2075_v16  ;;  %v7789_v30 = vld [vmem:[#allocation2 + $0xfc0] sm:$0xff] }
 0x29a   : > { %5712 = vmatmul.msk.f32.gmra.mxu1 %vm497_vm0, %v7768_v26  ;;  %v2055_v16 = vld [vmem:[#allocation2 + $0xc20] sm:$0xff] }
 0x29b   : > { %2148 = vmatpush.msra.mxu3 %v2093_v58  ;;  %2119 = vmatpush.msrb.mxu1 %v2073_v47  ;;  %v7792_v58 = vld [vmem:[#allocation2 + $0xfb0] sm:$0xff] }
 0x29c   : > { %v2053_v47 = vld [vmem:[#allocation2 + $0xc10] sm:$0xff] }
 0x29d   : > { %2149 = vmatpush.msra.mxu3 %v2091_v55  ;;  %2120 = vmatpush.msrb.mxu1 %v2071_v32  ;;  %v7796_v55 = vld [vmem:[#allocation2 + $0xfa0] sm:$0xff] }
 0x29e   : > { %v2051_v32 = vld [vmem:[#allocation2 + $0xc00] sm:$0xff] }
 0x29f   : > { %2150 = vmatpush.msra.mxu3 %v2089_v6  ;;  %2121 = vmatpush.msrb.mxu1 %v2069_v40  ;;  %v7799_v6 = vld [vmem:[#allocation2 + $0xf90] sm:$0xff]  ;;  %v7801_v40 = vpop.f32.mrf.mxu2 }
 0x2a1   : > { %2151 = vmatpush.msra.mxu3 %v2087_v22  ;;  %2122 = vmatpush.msrb.mxu1 %v2067_v50  ;;  %v7804_v22 = vld [vmem:[#allocation2 + $0xef0] sm:$0xff]  ;;  %v7806_v50 = vld [vmem:[#allocation2 + $0xf80] sm:$0xff] }
 0x2a3   : > { %2152 = vmatpush.msra.mxu3 %v2085_v53  ;;  %2123 = vmatpush.msrb.mxu1 %v2065_v35  ;;  %v7808_v53 = vpop.f32.mrf.mxu1  ;;  %v7812_v35 = vld [vmem:[#allocation2 + $0xee0] sm:$0xff] }
 0x2a5   : > { %2153 = vmatpush.msra.mxu3 %v2083_v56  ;;  %2124 = vmatpush.msrb.mxu1 %v2063_v34  ;;  %v7815_v56 = vld [vmem:[#allocation2 + $0xf70] sm:$0xff] }
 0x2a6   : > { %2154 = vmatmul.f32.vlgmr.msra.gmra.mxu3 %v7115_v3  ;;  %v7818_v34 = vld [vmem:[#allocation2 + $0xed0] sm:$0xff] }
 0x2a7   : > { %2295 = vmatpush.msrb.mxu3 %v7776_v1  ;;  %2125 = vmatpush.msrb.mxu1 %v2061_v13  ;;  %v7821_v13 = vld [vmem:[#allocation2 + $0xf60] sm:$0xff] }
 0x2a9   : > { %2296 = vmatpush.msrb.mxu3 %v7779_v9  ;;  %2126 = vmatpush.msrb.mxu1 %v2059_v8  ;;  %v7824_v8 = vld [vmem:[#allocation2 + $0xec0] sm:$0xff] }
 0x2ab   : > { %2297 = vmatpush.msrb.mxu3 %v7784_v44  ;;  %2127 = vmatpush.msrb.mxu1 %v2057_v10  ;;  %v7827_v10 = vld [vmem:[#allocation2 + $0xf50] sm:$0xff] }
 0x2ad   : > { %2298 = vmatpush.msrb.mxu3 %v7789_v30  ;;  %2128 = vmatpush.msrb.mxu1 %v2055_v16  ;;  %v1825_v16 = vpop.f32.mrf.mxu2 }
 0x2ae   : > { %2157 = vmatmul.f32.gmra.mxu3 %v7228_v52 }
 0x2af   : > { %2299 = vmatpush.msrb.mxu3 %v7792_v58  ;;  %2129 = vmatpush.msrb.mxu1 %v2053_v47  ;;  %v7830_v47 = vld [vmem:[#allocation2 + $0xeb0] sm:$0xff] }
 0x2b1   : > { %2300 = vmatpush.msrb.mxu3 %v7796_v55  ;;  %2130 = vmatpush.msrb.mxu1 %v2051_v32  ;;  %v7833_v32 = vld [vmem:[#allocation2 + $0xf40] sm:$0xff] }
 0x2b2   : > { %2131 = vmatmul.f32.vlgmr.msrb.gmra.mxu1 %v7253_v18 }
 0x2b3   : > { %2301 = vmatpush.msrb.mxu3 %v7799_v6  ;;  %2272 = vmatpush.msra.mxu1 %v7804_v22 }
 0x2b5   : > { %2302 = vmatpush.msrb.mxu3 %v7806_v50  ;;  %2273 = vmatpush.msra.mxu1 %v7812_v35  ;;  %v1828_v38 = vpop.f32.mrf.mxu2 }
 0x2b7   : > { %2303 = vmatpush.msrb.mxu3 %v7815_v56  ;;  %2274 = vmatpush.msra.mxu1 %v7818_v34 }
 0x2b8   : > { %v1848_v39 = vpop.f32.mrf.mxu1 }
 0x2b9   : > { %2304 = vmatpush.msrb.mxu3 %v7821_v13  ;;  %2275 = vmatpush.msra.mxu1 %v7824_v8  ;;  %v7871_v48 = vadd.f32 %v1848_v39, %v1825_v16  ;;  %v7889_v39 = vld [vmem:[#allocation2 + $0xe10] sm:$0xff]  ;;  %v2062_v16 = vld [vmem:[#allocation2 + $0xc58] sm:$0xff] }
 0x2ba   : > { %2134 = vmatmul.f32.gmra.mxu1 %v7286_v27 }
 0x2bb   : > { %2305 = vmatpush.msrb.mxu3 %v7827_v10  ;;  %2276 = vmatpush.msra.mxu1 %v7830_v47 }
 0x2bd   : > { %2306 = vmatpush.msrb.mxu3 %v7833_v32  ;;  %2277 = vmatpush.msra.mxu1 %v7837_v14 }
 0x2bf   : > { %2307 = vmatpush.msrb.mxu3 %v7840_v61  ;;  %2278 = vmatpush.msra.mxu1 %v7843_v25 }
 0x2c0   : > { %v1851_v20 = vpop.f32.mrf.mxu1 }
 0x2c1   : > { %2308 = vmatpush.msrb.mxu3 %v7846_v46  ;;  %2279 = vmatpush.msra.mxu1 %v7849_v31  ;;  %v7863_v42 = vadd.f32 %v1851_v20, %v1828_v38  ;;  %v7879_v38 = vld [vmem:[#allocation2 + $0xe30] sm:$0xff]  ;;  %v7884_v20 = vld [vmem:[#allocation2 + $0xe20] sm:$0xff] }
 0x2c3   : > { %2309 = vmatpush.msrb.mxu3 %v7852_v28  ;;  %2280 = vmatpush.msra.mxu1 %v7855_v12 }
 0x2c4   : > { %1996 = vmatpush.msrb.mxu2 %v7863_v42 }
 0x2c5   : > { %2310 = vmatpush.msrb.mxu3 %v7858_v21  ;;  %2281 = vmatpush.msra.mxu1 %v7861_v0 }
 0x2c6   : > { %2311 = vmatmul.f32.vlgmr.msrb.gmra.mxu3 %v7678_v60  ;;  %1997 = vmatpush.msrb.mxu2 %v7871_v48 }
 0x2c7   : > { %2282 = vmatpush.msra.mxu1 %v7867_v37  ;;  %2387 = vmatpush.msra.mxu3 %v7776_v1  ;;  %v7895_v1 = vld [vmem:[#allocation2 + $0xe00] sm:$0xff] }
 0x2c8   : > { %1998 = vmatpush.msrb.mxu2 %v7228_v52 }
 0x2c9   : > { %2283 = vmatpush.msra.mxu1 %v7874_v36  ;;  %2388 = vmatpush.msra.mxu3 %v7779_v9  ;;  %v1695_v9 = vadd.f32 %v7808_v53, %v7801_v40  ;;  %v2094_v40 = vld [vmem:[#allocation2 + $0xd58] sm:$0xff] }
 0x2ca   : > { %1999 = vmatpush.msrb.mxu2 %v7115_v3  ;;  %v2090_v53 = vld [vmem:[#allocation2 + $0xd38] sm:$0xff] }
 0x2cb   : > { %2284 = vmatpush.msra.mxu1 %v7879_v38  ;;  %2389 = vmatpush.msra.mxu3 %v7784_v44  ;;  %v1692_v44 = vadd.f32 %v7786_v51, %v7781_v49  ;;  %v2114_v51 = vld [vmem:[#allocation2 + $0xdf8] sm:$0xff] }
 0x2cc   : > { %2000 = vmatpush.msrb.mxu2 %v7683_v63 }
 0x2cd   : > { %2285 = vmatpush.msra.mxu1 %v7884_v20  ;;  %2390 = vmatpush.msra.mxu3 %v7789_v30  ;;  %v1917_v30 = vpop.f32.mrf.mxu2 }
 0x2ce   : > { %2314 = vmatmul.f32.gmra.mxu3 %v7683_v63  ;;  %2001 = vmatpush.msrb.mxu2 %v7678_v60 }
 0x2cf   : > { %2286 = vmatpush.msra.mxu1 %v7889_v39  ;;  %2391 = vmatpush.msra.mxu3 %v7792_v58 }
 0x2d0   : > { %2002 = vmatpush.msrb.mxu2 %v1695_v9  ;;  %v7968_v9 = vld [vmem:[#allocation2 + $0xfc8] sm:$0xff] }
 0x2d1   : > { %2287 = vmatpush.msra.mxu1 %v7895_v1  ;;  %2392 = vmatpush.msra.mxu3 %v7796_v55  ;;  %v2106_v55 = vld [vmem:[#allocation2 + $0xdb8] sm:$0xff] }
 0x2d2   : > { %2288 = vmatmul.f32.vlgmr.msra.gmra.mxu1 %v7477_v41  ;;  %2003 = vmatpush.msrb.mxu2 %v1692_v44  ;;  %v2054_v44 = vld [vmem:[#allocation2 + $0xc18] sm:$0xff] }
 0x2d3   : > { %2364 = vmatpush.msrb.mxu1 %v7804_v22  ;;  %2393 = vmatpush.msra.mxu3 %v7799_v6  ;;  %v2096_v6 = vld [vmem:[#allocation2 + $0xd68] sm:$0xff] }
 0x2d4   : > { %2004 = vmatpush.msrb.mxu2 %v7696_v7  ;;  %v2112_v7 = vld [vmem:[#allocation2 + $0xde8] sm:$0xff] }
 0x2d5   : > { %2365 = vmatpush.msrb.mxu1 %v7812_v35  ;;  %2394 = vmatpush.msra.mxu3 %v7806_v50  ;;  %v1920_v58 = vpop.f32.mrf.mxu2  ;;  %v2092_v22 = vld [vmem:[#allocation2 + $0xd48] sm:$0xff]  ;;  %v2070_v50 = vld [vmem:[#allocation2 + $0xc98] sm:$0xff] }
 0x2d6   : > { %2005 = vmatpush.msrb.mxu2 %v7701_v17  ;;  %v2110_v17 = vld [vmem:[#allocation2 + $0xdd8] sm:$0xff]  ;;  %v2068_v35 = vld [vmem:[#allocation2 + $0xc88] sm:$0xff] }
 0x2d7   : > { %2366 = vmatpush.msrb.mxu1 %v7818_v34  ;;  %2395 = vmatpush.msra.mxu3 %v7815_v56  ;;  %v2088_v56 = vld [vmem:[#allocation2 + $0xd28] sm:$0xff]  ;;  %v2066_v34 = vld [vmem:[#allocation2 + $0xc78] sm:$0xff] }
 0x2d8   : > { %v1940_v49 = vpop.f32.mrf.mxu1  ;;  %2006 = vmatpush.msrb.mxu2 %v7706_v43  ;;  %v2108_v43 = vld [vmem:[#allocation2 + $0xdc8] sm:$0xff] }
 0x2d9   : > { %2367 = vmatpush.msrb.mxu1 %v7824_v8  ;;  %2396 = vmatpush.msra.mxu3 %v7821_v13  ;;  %v2086_v13 = vld [vmem:[#allocation2 + $0xd18] sm:$0xff]  ;;  %v2064_v8 = vld [vmem:[#allocation2 + $0xc68] sm:$0xff] }
 0x2da   : > { %2291 = vmatmul.f32.gmra.mxu1 %v7504_v23  ;;  %2007 = vmatpush.msrb.mxu2 %v7711_v4 }
 0x2db   : > { %2368 = vmatpush.msrb.mxu1 %v7830_v47  ;;  %2397 = vmatpush.msra.mxu3 %v7827_v10  ;;  %v2084_v10 = vld [vmem:[#allocation2 + $0xd08] sm:$0xff]  ;;  %v7959_v47 = vld [vmem:[#allocation2 + $0xff8] sm:$0xff] }
 0x2dc   : > { %2184 = vmatpush.msra.mxu2 %v2114_v51  ;;  %v7975_v51 = vld [vmem:[#allocation2 + $0xfa8] sm:$0xff] }
 0x2dd   : > { %2369 = vmatpush.msrb.mxu1 %v7837_v14  ;;  %2398 = vmatpush.msra.mxu3 %v7833_v32  ;;  %v2060_v32 = vld [vmem:[#allocation2 + $0xc48] sm:$0xff] }
 0x2de   : > { %2008 = vmatmul.f32.vlgmr.msrb.gmra.mxu2 %v7633_v15  ;;  %v2104_v15 = vld [vmem:[#allocation2 + $0xda8] sm:$0xff] }
 0x2df   : > { %2370 = vmatpush.msrb.mxu1 %v7843_v25  ;;  %2185 = vmatpush.msra.mxu2 %v2112_v7  ;;  %v7935_v25 = vadd.f32 %v1940_v49, %v1917_v30  ;;  %v7971_v30 = vld [vmem:[#allocation2 + $0xfb8] sm:$0xff]  ;;  %v2052_v49 = vld [vmem:[#allocation2 + $0xc08] sm:$0xff] }
 0x2e0   : > { %2399 = vmatpush.msra.mxu3 %v7840_v61  ;;  %v1943_v4 = vpop.f32.mrf.mxu1  ;;  %v2098_v61 = vld [vmem:[#allocation2 + $0xd78] sm:$0xff] }
 0x2e1   : > { %2371 = vmatpush.msrb.mxu1 %v7849_v31  ;;  %2186 = vmatpush.msra.mxu2 %v2110_v17  ;;  %v7929_v14 = vadd.f32 %v1943_v4, %v1920_v58  ;;  %v2082_v31 = vld [vmem:[#allocation2 + $0xcf8] sm:$0xff]  ;;  %v7986_v58 = vld [vmem:[#allocation2 + $0xf88] sm:$0xff] }
 0x2e2   : > { %2400 = vmatpush.msra.mxu3 %v7846_v46  ;;  %v2100_v46 = vld [vmem:[#allocation2 + $0xd88] sm:$0xff]  ;;  %v7978_v7 = vld [vmem:[#allocation2 + $0xef8] sm:$0xff] }
 0x2e3   : > { %2372 = vmatpush.msrb.mxu1 %v7855_v12  ;;  %2187 = vmatpush.msra.mxu2 %v2108_v43  ;;  %v2102_v12 = vld [vmem:[#allocation2 + $0xd98] sm:$0xff]  ;;  %v7984_v43 = vld [vmem:[#allocation2 + $0xee8] sm:$0xff] }
 0x2e4   : > { %2401 = vmatpush.msra.mxu3 %v7852_v28  ;;  %2029 = vmatpush.msrb.mxu0 %v7929_v14  ;;  %v7944_v28 = vld [vmem:[%s10514_s5 + $0x8] sm:$0xff]  ;;  %v7980_v17 = vld [vmem:[#allocation2 + $0xf98] sm:$0xff] }
 0x2e5   : > { %2373 = vmatpush.msrb.mxu1 %v7861_v0  ;;  %2188 = vmatpush.msra.mxu2 %v2106_v55  ;;  %v2078_v0 = vld [vmem:[#allocation2 + $0xcd8] sm:$0xff] }
 0x2e6   : > { %2402 = vmatpush.msra.mxu3 %v7858_v21  ;;  %2030 = vmatpush.msrb.mxu0 %v7935_v25  ;;  %v2080_v21 = vld [vmem:[#allocation2 + $0xce8] sm:$0xff]  ;;  %v2235_v4 = vld [vmem:[#allocation2 + $0xed8] sm:$0xff] }
 0x2e7   : > { %2374 = vmatpush.msrb.mxu1 %v7867_v37  ;;  %2403 = vmatmul.f32.vlgmr.msra.gmra.mxu3 %v7115_v3  ;;  %v2076_v37 = vld [vmem:[#allocation2 + $0xcc8] sm:$0xff]  ;;  %v2255_v55 = vld [vmem:[#allocation2 + $0xf78] sm:$0xff] }
 0x2e8   : > { %2189 = vmatpush.msra.mxu2 %v2104_v15  ;;  %5713 = vmatmul.msk.f32.vlgmr.msrb.gmra.mxu0 %vm497_vm0, %v7944_v28  ;;  %v2233_v15 = vld [vmem:[#allocation2 + $0xec8] sm:$0xff] }
 0x2e9   : > { %2375 = vmatpush.msrb.mxu1 %v7874_v36  ;;  %2161 = vmatpush.msra.mxu0 %v2082_v31  ;;  %v2074_v36 = vld [vmem:[#allocation2 + $0xcb8] sm:$0xff]  ;;  %v2253_v31 = vld [vmem:[#allocation2 + $0xf68] sm:$0xff] }
 0x2ea   : > { %2190 = vmatpush.msra.mxu2 %v2102_v12  ;;  %v2231_v12 = vld [vmem:[#allocation2 + $0xeb8] sm:$0xff] }
 0x2eb   : > { %2011 = vmatmul.f32.gmra.mxu2 %v7647_v57  ;;  %2376 = vmatpush.msrb.mxu1 %v7879_v38  ;;  %v2072_v57 = vld [vmem:[#allocation2 + $0xca8] sm:$0xff] }
 0x2ec   : > { %2162 = vmatpush.msra.mxu0 %v2080_v21  ;;  %2191 = vmatpush.msra.mxu2 %v2100_v46  ;;  %v7962_v38 = vld [vmem:[#allocation2 + $0xfe8] sm:$0xff]  ;;  %v2251_v21 = vld [vmem:[#allocation2 + $0xf58] sm:$0xff] }
 0x2ed   : > { %2377 = vmatpush.msrb.mxu1 %v7884_v20  ;;  %v2058_v20 = vld [vmem:[#allocation2 + $0xc38] sm:$0xff]  ;;  %v2229_v46 = vld [vmem:[#allocation2 + $0xea8] sm:$0xff] }
 0x2ee   : > { %2163 = vmatpush.msra.mxu0 %v2078_v0  ;;  %2192 = vmatpush.msra.mxu2 %v2098_v61  ;;  %v2249_v0 = vld [vmem:[#allocation2 + $0xf48] sm:$0xff]  ;;  %v2227_v61 = vld [vmem:[#allocation2 + $0xe98] sm:$0xff] }
 0x2ef   : > { %2378 = vmatpush.msrb.mxu1 %v7889_v39  ;;  %2406 = vmatmul.f32.gmra.mxu3 %v7228_v52  ;;  %v7965_v39 = vld [vmem:[#allocation2 + $0xfd8] sm:$0xff] }
 0x2f0   : > { %2164 = vmatpush.msra.mxu0 %v2076_v37  ;;  %2193 = vmatpush.msra.mxu2 %v2096_v6  ;;  %v2247_v37 = vld [vmem:[#allocation2 + $0xf38] sm:$0xff]  ;;  %v2225_v6 = vld [vmem:[#allocation2 + $0xe88] sm:$0xff] }
 0x2f1   : > { %5714 = vmatmul.msk.f32.gmra.mxu0 %vm497_vm0, %v7768_v26  ;;  %2379 = vmatpush.msrb.mxu1 %v7895_v1  ;;  %v2056_v1 = vld [vmem:[#allocation2 + $0xc28] sm:$0xff] }
 0x2f2   : > { %2165 = vmatpush.msra.mxu0 %v2074_v36  ;;  %2194 = vmatpush.msra.mxu2 %v2094_v40  ;;  %v2245_v36 = vld [vmem:[#allocation2 + $0xf28] sm:$0xff]  ;;  %v2223_v40 = vld [vmem:[#allocation2 + $0xe78] sm:$0xff] }
 0x2f3   : > { %2380 = vmatmul.f32.vlgmr.msrb.gmra.mxu1 %v7253_v18 }
 0x2f4   : > { %2166 = vmatpush.msra.mxu0 %v2072_v57  ;;  %2195 = vmatpush.msra.mxu2 %v2092_v22  ;;  %v2243_v57 = vld [vmem:[#allocation2 + $0xf18] sm:$0xff]  ;;  %v2221_v22 = vld [vmem:[#allocation2 + $0xe68] sm:$0xff] }
 0x2f6   : > { %2167 = vmatpush.msra.mxu0 %v2070_v50  ;;  %2196 = vmatpush.msra.mxu2 %v2090_v53  ;;  %v2241_v50 = vld [vmem:[#allocation2 + $0xf08] sm:$0xff]  ;;  %v2219_v53 = vld [vmem:[#allocation2 + $0xe58] sm:$0xff] }
 0x2f8   : > { %2168 = vmatpush.msra.mxu0 %v2068_v35  ;;  %2197 = vmatpush.msra.mxu2 %v2088_v56  ;;  %v2217_v35 = vld [vmem:[#allocation2 + $0xe48] sm:$0xff]  ;;  %v2215_v56 = vld [vmem:[#allocation2 + $0xe38] sm:$0xff] }
 0x2fa   : > { %2169 = vmatpush.msra.mxu0 %v2066_v34  ;;  %2198 = vmatpush.msra.mxu2 %v2086_v13  ;;  %v2213_v34 = vld [vmem:[#allocation2 + $0xe28] sm:$0xff]  ;;  %v2211_v13 = vld [vmem:[#allocation2 + $0xe18] sm:$0xff] }
 0x2fb   : > { %2383 = vmatmul.f32.gmra.mxu1 %v7286_v27 }
 0x2fc   : > { %2170 = vmatpush.msra.mxu0 %v2064_v8  ;;  %2199 = vmatpush.msra.mxu2 %v2084_v10  ;;  %v2209_v8 = vld [vmem:[#allocation2 + $0xe08] sm:$0xff] }
 0x2fd   : > { %2200 = vmatmul.f32.vlgmr.msra.gmra.mxu2 %v7115_v3 }
 0x2fe   : > { %2171 = vmatpush.msra.mxu0 %v2062_v16  ;;  %2341 = vmatpush.msrb.mxu2 %v7959_v47 }
 0x300   : > { %2172 = vmatpush.msra.mxu0 %v2060_v32  ;;  %2342 = vmatpush.msrb.mxu2 %v7962_v38 }
 0x302   : > { %2173 = vmatpush.msra.mxu0 %v2058_v20  ;;  %2343 = vmatpush.msrb.mxu2 %v7965_v39 }
 0x304   : > { %2174 = vmatpush.msra.mxu0 %v2056_v1  ;;  %2344 = vmatpush.msrb.mxu2 %v7968_v9 }
 0x305   : > { %2203 = vmatmul.f32.gmra.mxu2 %v7228_v52 }
 0x306   : > { %2175 = vmatpush.msra.mxu0 %v2054_v44  ;;  %2345 = vmatpush.msrb.mxu2 %v7971_v30 }
 0x308   : > { %2176 = vmatpush.msra.mxu0 %v2052_v49  ;;  %2346 = vmatpush.msrb.mxu2 %v7975_v51 }
 0x309   : > { %2177 = vmatmul.f32.vlgmr.msra.gmra.mxu0 %v7253_v18  ;;  %v8001_v10 = vpop.f32.mrf.mxu3 }
 0x30a   : > { %2318 = vmatpush.msrb.mxu0 %v7978_v7  ;;  %2347 = vmatpush.msrb.mxu2 %v7980_v17 }
 0x30c   : > { %2319 = vmatpush.msrb.mxu0 %v7984_v43  ;;  %2348 = vmatpush.msrb.mxu2 %v7986_v58 }
 0x30e   : > { %2320 = vmatpush.msrb.mxu0 %v2235_v4  ;;  %2349 = vmatpush.msrb.mxu2 %v2255_v55 }
 0x30f   : > { %v8006_v16 = vpop.f32.mrf.mxu1 }
 0x310   : > { %2321 = vmatpush.msrb.mxu0 %v2233_v15  ;;  %2350 = vmatpush.msrb.mxu2 %v2253_v31 }
 0x311   : > { %2180 = vmatmul.f32.gmra.mxu0 %v7286_v27 }
 0x312   : > { %2322 = vmatpush.msrb.mxu0 %v2231_v12  ;;  %2351 = vmatpush.msrb.mxu2 %v2251_v21 }
 0x314   : > { %2323 = vmatpush.msrb.mxu0 %v2229_v46  ;;  %2352 = vmatpush.msrb.mxu2 %v2249_v0 }
 0x316   : > { %2324 = vmatpush.msrb.mxu0 %v2227_v61  ;;  %2353 = vmatpush.msrb.mxu2 %v2247_v37 }
 0x317   : > { %v8013_v32 = vpop.f32.mrf.mxu1 }
 0x318   : > { %2325 = vmatpush.msrb.mxu0 %v2225_v6  ;;  %2354 = vmatpush.msrb.mxu2 %v2245_v36 }
 0x31a   : > { %2326 = vmatpush.msrb.mxu0 %v2223_v40  ;;  %2355 = vmatpush.msrb.mxu2 %v2243_v57 }
 0x31c   : > { %2327 = vmatpush.msrb.mxu0 %v2221_v22  ;;  %2356 = vmatpush.msrb.mxu2 %v2241_v50 }
 0x31d   : > { %2357 = vmatmul.f32.vlgmr.msrb.gmra.mxu2 %v7678_v60 }
 0x31e   : > { %2328 = vmatpush.msrb.mxu0 %v2219_v53  ;;  %2433 = vmatpush.msra.mxu2 %v7959_v47  ;;  %v8011_v47 = vpop.f32.mrf.mxu3 }
 0x320   : > { %2329 = vmatpush.msrb.mxu0 %v2217_v35  ;;  %2434 = vmatpush.msra.mxu2 %v7962_v38 }
 0x322   : > { %2330 = vmatpush.msrb.mxu0 %v2215_v56  ;;  %2435 = vmatpush.msra.mxu2 %v7965_v39 }
 0x324   : > { %2331 = vmatpush.msrb.mxu0 %v2213_v34  ;;  %2436 = vmatpush.msra.mxu2 %v7968_v9 }
 0x325   : > { %2360 = vmatmul.f32.gmra.mxu2 %v7683_v63 }
 0x326   : > { %2332 = vmatpush.msrb.mxu0 %v2211_v13  ;;  %2437 = vmatpush.msra.mxu2 %v7971_v30 }
 0x328   : > { %2333 = vmatpush.msrb.mxu0 %v2209_v8  ;;  %2438 = vmatpush.msra.mxu2 %v7975_v51 }
 0x329   : > { %2334 = vmatmul.f32.vlgmr.msrb.gmra.mxu0 %v7477_v41  ;;  %v2155_v38 = vpop.f32.mrf.mxu3 }
 0x32a   : > { %2410 = vmatpush.msra.mxu0 %v7978_v7  ;;  %2439 = vmatpush.msra.mxu2 %v7980_v17 }
 0x32c   : > { %2411 = vmatpush.msra.mxu0 %v7984_v43  ;;  %2440 = vmatpush.msra.mxu2 %v7986_v58 }
 0x32e   : > { %2412 = vmatpush.msra.mxu0 %v2235_v4  ;;  %2441 = vmatpush.msra.mxu2 %v2255_v55  ;;  %v2623_v55 = vld [vmem:[#allocation2 + $0x11f0] sm:$0xff] }
 0x32f   : > { %v2132_v20 = vpop.f32.mrf.mxu1 }
 0x330   : > { %2413 = vmatpush.msra.mxu0 %v2233_v15  ;;  %2442 = vmatpush.msra.mxu2 %v2253_v31  ;;  %v2156_v43 = vadd.f32 %v2155_v38, %v2132_v20  ;;  %v2577_v20 = vld [vmem:[#allocation2 + $0x1080] sm:$0xff] }
 0x331   : > { %2337 = vmatmul.f32.gmra.mxu0 %v7504_v23  ;;  %v2158_v39 = vpop.f32.mrf.mxu3 }
 0x332   : > { %2414 = vmatpush.msra.mxu0 %v2231_v12  ;;  %2443 = vmatpush.msra.mxu2 %v2251_v21  ;;  %v8042_v21 = vld [vmem:[%s10514_s5] sm:$0xff] }
 0x334   : > { %2415 = vmatpush.msra.mxu0 %v2229_v46  ;;  %2444 = vmatpush.msra.mxu2 %v2249_v0  ;;  %v2617_v0 = vld [vmem:[#allocation2 + $0x11c0] sm:$0xff] }
 0x336   : > { %2416 = vmatpush.msra.mxu0 %v2227_v61  ;;  %2445 = vmatpush.msra.mxu2 %v2247_v37  ;;  %v2615_v61 = vld [vmem:[#allocation2 + $0x11b0] sm:$0xff] }
 0x337   : > { %v2135_v1 = vpop.f32.mrf.mxu1 }
 0x338   : > { %2417 = vmatpush.msra.mxu0 %v2225_v6  ;;  %2446 = vmatpush.msra.mxu2 %v2245_v36  ;;  %v2159_v17 = vadd.f32 %v2158_v39, %v2135_v1  ;;  %v2587_v6 = vld [vmem:[#allocation2 + $0x10d0] sm:$0xff]  ;;  %v2613_v36 = vld [vmem:[#allocation2 + $0x11a0] sm:$0xff] }
 0x339   : > { %v2603_v39 = vld [vmem:[#allocation2 + $0x1150] sm:$0xff] }
 0x33a   : > { %2418 = vmatpush.msra.mxu0 %v2223_v40  ;;  %2447 = vmatpush.msra.mxu2 %v2243_v57  ;;  %v2585_v57 = vld [vmem:[#allocation2 + $0x10c0] sm:$0xff] }
 0x33c   : > { %2419 = vmatpush.msra.mxu0 %v2221_v22  ;;  %2448 = vmatpush.msra.mxu2 %v2241_v50  ;;  %v2611_v22 = vld [vmem:[#allocation2 + $0x1190] sm:$0xff] }
 0x33d   : > { %2449 = vmatmul.f32.vlgmr.msra.gmra.mxu2 %v7115_v3  ;;  %v8058_v50 = vld [vmem:[%s10514_s5 + $0x10] sm:$0xff] }
 0x33e   : > { %2420 = vmatpush.msra.mxu0 %v2219_v53  ;;  %v2583_v53 = vld [vmem:[#allocation2 + $0x10b0] sm:$0xff] }
 0x340   : > { %2421 = vmatpush.msra.mxu0 %v2217_v35  ;;  %v2609_v35 = vld [vmem:[#allocation2 + $0x1180] sm:$0xff] }
 0x342   : > { %2422 = vmatpush.msra.mxu0 %v2215_v56  ;;  %v2581_v56 = vld [vmem:[#allocation2 + $0x10a0] sm:$0xff] }
 0x344   : > { %2423 = vmatpush.msra.mxu0 %v2213_v34  ;;  %v2607_v34 = vld [vmem:[#allocation2 + $0x1170] sm:$0xff] }
 0x345   : > { %2452 = vmatmul.f32.gmra.mxu2 %v7228_v52 }
 0x346   : > { %2424 = vmatpush.msra.mxu0 %v2211_v13  ;;  %v2579_v13 = vld [vmem:[#allocation2 + $0x1090] sm:$0xff] }
 0x348   : > { %2425 = vmatpush.msra.mxu0 %v2209_v8  ;;  %v2605_v8 = vld [vmem:[#allocation2 + $0x1160] sm:$0xff] }
 0x349   : > { %2426 = vmatmul.f32.vlgmr.msra.gmra.mxu0 %v7253_v18  ;;  %v2312_v9 = vpop.f32.mrf.mxu3 }
 0x34f   : > { %v2289_v44 = vpop.f32.mrf.mxu1 }
 0x350   : > { %v8021_v7 = vadd.f32 %v2312_v9, %v2289_v44  ;;  %v2575_v9 = vld [vmem:[#allocation2 + $0x1070] sm:$0xff]  ;;  %v2601_v44 = vld [vmem:[#allocation2 + $0x1140] sm:$0xff] }
 0x351   : > { %2429 = vmatmul.f32.gmra.mxu0 %v7286_v27  ;;  %v2315_v30 = vpop.f32.mrf.mxu3 }
 0x357   : > { %v2292_v49 = vpop.f32.mrf.mxu1 }
 0x358   : > { %v8019_v51 = vadd.f32 %v2315_v30, %v2292_v49  ;;  %v2599_v30 = vld [vmem:[#allocation2 + $0x1130] sm:$0xff] }
 0x359   : > { %v2571_v49 = vld [vmem:[#allocation2 + $0x1050] sm:$0xff] }
 0x35a   : > { %2456 = vmatpush.msra.mxu1 %v8019_v51 }
 0x35c   : > { %2457 = vmatpush.msra.mxu1 %v8021_v7 }
 0x35e   : > { %2458 = vmatpush.msra.mxu1 %v2159_v17  ;;  %v2597_v17 = vld [vmem:[#allocation2 + $0x1120] sm:$0xff] }
 0x360   : > { %2459 = vmatpush.msra.mxu1 %v2156_v43 }
 0x361   : > { %v8051_v37 = vpop.f32.mrf.mxu2 }
 0x362   : > { %2460 = vmatpush.msra.mxu1 %v7201_v33 }
 0x364   : > { %2461 = vmatpush.msra.mxu1 %v7158_v54 }
 0x365   : > { %v8053_v40 = vpop.f32.mrf.mxu0 }
 0x366   : > { %2462 = vmatpush.msra.mxu1 %v7124_v11 }
 0x368   : > { %2463 = vmatpush.msra.mxu1 %v7082_v45 }
 0x36a   : > { %2464 = vmatpush.msra.mxu1 %v7536_v29  ;;  %v2404_v58 = vpop.f32.mrf.mxu3  ;;  %v2621_v29 = vld [vmem:[#allocation2 + $0x11e0] sm:$0xff] }
 0x36c   : > { %2465 = vmatpush.msra.mxu1 %v7546_v62  ;;  %v2619_v62 = vld [vmem:[#allocation2 + $0x11d0] sm:$0xff] }
 0x36e   : > { %2466 = vmatpush.msra.mxu1 %v7286_v27  ;;  %v8063_v38 = vpop.f32.mrf.mxu2  ;;  %v8065_v1 = vpop.f32.mrf.mxu0 }
 0x370   : > { %v2381_v4 = vpop.f32.mrf.mxu1  ;;  %2467 = vmatpush.msra.mxu1 %v7253_v18 }
 0x371   : > { %v8045_v46 = vadd.f32 %v2404_v58, %v2381_v4  ;;  %v2569_v58 = vld [vmem:[#allocation2 + $0x1040] sm:$0xff]  ;;  %v2595_v4 = vld [vmem:[#allocation2 + $0x1110] sm:$0xff] }
 0x372   : > { %2468 = vmatpush.msra.mxu1 %v7504_v23  ;;  %v2407_v15 = vpop.f32.mrf.mxu3 }
 0x374   : > { %2469 = vmatpush.msra.mxu1 %v7477_v41 }
 0x376   : > { %2470 = vmatpush.msra.mxu1 %v7575_v5  ;;  %v2591_v5 = vld [vmem:[#allocation2 + $0x10f0] sm:$0xff] }
 0x378   : > { %v2384_v31 = vpop.f32.mrf.mxu1  ;;  %2471 = vmatpush.msra.mxu1 %v7585_v19  ;;  %v2589_v19 = vld [vmem:[#allocation2 + $0x10e0] sm:$0xff] }
 0x379   : > { %v8037_v12 = vadd.f32 %v2407_v15, %v2384_v31  ;;  %2472 = vmatmul.f32.vlgmr.msra.gmra.mxu1 %v8042_v21  ;;  %v2567_v15 = vld [vmem:[#allocation2 + $0x1030] sm:$0xff]  ;;  %v2593_v31 = vld [vmem:[#allocation2 + $0x1100] sm:$0xff] }
 0x37a   : > { %2648 = vmatpush.msrb.mxu1 %v2623_v55 }
 0x37b   : > { %2493 = vmatpush.msrb.mxu3 %v8037_v12 }
 0x37c   : > { %2649 = vmatpush.msrb.mxu1 %v2621_v29  ;;  %v2565_v29 = vld [vmem:[#allocation2 + $0x1020] sm:$0xff] }
 0x37d   : > { %2494 = vmatpush.msrb.mxu3 %v8045_v46 }
 0x37e   : > { %2650 = vmatpush.msrb.mxu1 %v2619_v62  ;;  %5715 = vmatmul.msk.f32.vlgmr.msrb.gmra.mxu3 %vm497_vm0, %v7944_v28  ;;  %v2563_v62 = vld [vmem:[#allocation2 + $0x1010] sm:$0xff] }
 0x37f   : > { %2625 = vmatpush.msra.mxu3 %v2591_v5  ;;  %v2561_v5 = vld [vmem:[#allocation2 + $0x1000] sm:$0xff] }
 0x380   : > { %2651 = vmatpush.msrb.mxu1 %v2617_v0  ;;  %v2201_v43 = vpop.f32.mrf.mxu2 }
 0x381   : > { %2626 = vmatpush.msra.mxu3 %v2589_v19  ;;  %2475 = vmatmul.f32.gmra.mxu1 %v8058_v50 }
 0x382   : > { %2652 = vmatpush.msrb.mxu1 %v2615_v61 }
 0x383   : > { %2627 = vmatpush.msra.mxu3 %v2587_v6 }
 0x384   : > { %2653 = vmatpush.msrb.mxu1 %v2613_v36 }
 0x385   : > { %2628 = vmatpush.msra.mxu3 %v2585_v57 }
 0x386   : > { %2654 = vmatpush.msrb.mxu1 %v2611_v22  ;;  %5716 = vmatmul.msk.f32.gmra.mxu3 %vm497_vm0, %v7768_v26  ;;  %v2573_v26 = vld [vmem:[#allocation2 + $0x1060] sm:$0xff]  ;;  %v2178_v55 = vpop.f32.mrf.mxu0 }
 0x387   : > { %2629 = vmatpush.msra.mxu3 %v2583_v53  ;;  %v10822_v53 = vld [vmem:[#allocation15_spill] sm:$0xff] }
 0x388   : > { %2655 = vmatpush.msrb.mxu1 %v2609_v35  ;;  %v2204_v0 = vpop.f32.mrf.mxu2  ;;  %v2202_v35 = vadd.f32 %v2201_v43, %v2178_v55  ;;  %v2624_v55 = vld [vmem:[#allocation2 + $0x11f8] sm:$0xff] }
 0x389   : > { %2630 = vmatpush.msra.mxu3 %v2581_v56  ;;  %v10823_v56 = vld [vmem:[#allocation16_spill] sm:$0xff] }
 0x38a   : > { %2656 = vmatpush.msrb.mxu1 %v2607_v34  ;;  %v8100_v34 = vpop.permute.xlu0 %1529 }
 0x38b   : > { %2631 = vmatpush.msra.mxu3 %v2579_v13 }
 0x38c   : > { %2657 = vmatpush.msrb.mxu1 %v2605_v8  ;;  %v10824_v8 = vld [vmem:[#allocation12_spill] sm:$0xff] }
 0x38d   : > { %2632 = vmatpush.msra.mxu3 %v2577_v20 }
 0x38e   : > { %2658 = vmatpush.msrb.mxu1 %v2603_v39  ;;  %v2181_v19 = vpop.f32.mrf.mxu0  ;;  %v10825_v39 = vld [vmem:[#allocation11_spill] sm:$0xff] }
 0x38f   : > { %2633 = vmatpush.msra.mxu3 %v2575_v9 }
 0x390   : > { %2659 = vmatpush.msrb.mxu1 %v2601_v44 }
 0x391   : > { %2634 = vmatpush.msra.mxu3 %v2573_v26  ;;  %v10827_v26 = vld [vmem:[#allocation5_spill] sm:$0xff] }
 0x392   : > { %2660 = vmatpush.msrb.mxu1 %v2599_v30  ;;  %v10828_v30 = vld [vmem:[#allocation6_spill] sm:$0xff] }
 0x393   : > { %2635 = vmatpush.msra.mxu3 %v2571_v49  ;;  %v10829_v49 = vld [vmem:[#allocation8_spill] sm:$0xff] }
 0x394   : > { %2661 = vmatpush.msrb.mxu1 %v2597_v17 }
 0x395   : > { %2636 = vmatpush.msra.mxu3 %v2569_v58  ;;  %v8124_v58 = vld [vmem:[%s10517_s8] sm:$0xff] }
 0x396   : > { %2662 = vmatpush.msrb.mxu1 %v2595_v4  ;;  %v10830_v4 = vld [vmem:[#allocation10_spill] sm:$0xff] }
 0x397   : > { %2637 = vmatpush.msra.mxu3 %v2567_v15 }
 0x398   : > { %2663 = vmatpush.msrb.mxu1 %v2593_v31 }
 0x399   : > { %2664 = vmatmul.f32.vlgmr.msrb.gmra.mxu1 %v7678_v60  ;;  %2638 = vmatpush.msra.mxu3 %v2565_v29 }
 0x39b   : > { %2639 = vmatpush.msra.mxu3 %v2563_v62  ;;  %v10831_v62 = vld [vmem:[#allocation9_spill] sm:$0xff] }
 0x39d   : > { %2640 = vmatpush.msra.mxu3 %v2561_v5  ;;  %v2622_v5 = vld [vmem:[#allocation2 + $0x11e8] sm:$0xff] }
 0x39e   : > { %2641 = vmatmul.f32.vlgmr.msra.gmra.mxu3 %v7477_v41 }
 0x39f   : > { %2717 = vmatpush.msrb.mxu3 %v8037_v12 }
 0x3a0   : > { %v2358_v61 = vpop.f32.mrf.mxu2 }
 0x3a1   : > { %2667 = vmatmul.f32.gmra.mxu1 %v7683_v63  ;;  %2718 = vmatpush.msrb.mxu3 %v8045_v46 }
 0x3a3   : > { %2719 = vmatpush.msrb.mxu3 %v8019_v51  ;;  %v8082_v51 = vpop.permute.xlu1 %1513 }
 0x3a5   : > { %2720 = vmatpush.msrb.mxu3 %v8021_v7  ;;  %v10819_v7 = vld [vmem:[#allocation21_spill] sm:$0xff] }
 0x3a6   : > { %v2335_v6 = vpop.f32.mrf.mxu0  ;;  %2644 = vmatmul.f32.gmra.mxu3 %v7504_v23  ;;  %v1502_v46 = vadd.f32 %v10819_v7, %v7774_v24  ;;  %v8096_v24 = vpop.permute.xlu2 %1508  ;;  %v2616_v7 = vld [vmem:[#allocation2 + $0x11b8] sm:$0xff] }
 0x3a7   : > { %2721 = vmatpush.msrb.mxu3 %v7750_v59  ;;  %v8086_v22 = vadd.f32 %v2358_v61, %v2335_v6  ;;  %v10821_v59 = vld [vmem:[#allocation19_spill] sm:$0xff]  ;;  %v2592_v61 = vld [vmem:[#allocation2 + $0x10f8] sm:$0xff]  ;;  %v8140_v6 = vld [vmem:[%s10517_s8 + $0x8] sm:$0xff] }
 0x3a8   : > { %v2361_v12 = vpop.f32.mrf.mxu2 }
 0x3a9   : > { %2722 = vmatpush.msrb.mxu3 %v7754_v2  ;;  %v2205_v2 = vadd.f32 %v2204_v0, %v2181_v19  ;;  %v2620_v19 = vld [vmem:[#allocation2 + $0x11d8] sm:$0xff] }
 0x3ab   : > { %2723 = vmatpush.msrb.mxu3 %v7201_v33  ;;  %v10820_v33 = vld [vmem:[#allocation20_spill] sm:$0xff]  ;;  %v8105_v20 = vpop.permute.xlu1 %1524 }
 0x3ad   : > { %2724 = vmatpush.msrb.mxu3 %v7158_v54  ;;  %v1499_v54 = vadd.f32 %v10821_v59, %v10820_v33  ;;  %v2614_v33 = vld [vmem:[#allocation2 + $0x11a8] sm:$0xff] }
 0x3ae   : > { %v2338_v36 = vpop.f32.mrf.mxu0  ;;  %v2586_v59 = vld [vmem:[#allocation2 + $0x10c8] sm:$0xff] }
 0x3af   : > { %v8079_v57 = vadd.f32 %v2361_v12, %v2338_v36  ;;  %2725 = vmatpush.msrb.mxu3 %v7124_v11  ;;  %v1519_v11 = vmul.f32 %v8082_v51, %v1502_v46  ;;  %v2618_v12 = vld [vmem:[#allocation2 + $0x11c8] sm:$0xff]  ;;  %v2588_v46 = vld [vmem:[#allocation2 + $0x10d8] sm:$0xff] }
 0x3b0   : > { %v2590_v36 = vld [vmem:[#allocation2 + $0x10e8] sm:$0xff] }
 0x3b1   : > { %2726 = vmatpush.msrb.mxu3 %v7082_v45  ;;  %2502 = vmatpush.msrb.mxu0 %v8079_v57  ;;  %v1517_v45 = vmul.f32 %v8096_v24, %v1499_v54  ;;  %v1535_v13 = vadd.f32 %v8100_v34, %v1519_v11  ;;  %v2612_v54 = vld [vmem:[#allocation2 + $0x1198] sm:$0xff]  ;;  %v2610_v11 = vld [vmem:[#allocation2 + $0x1188] sm:$0xff] }
 0x3b3   : > { %2727 = vmatpush.msrb.mxu3 %v10822_v53  ;;  %2503 = vmatpush.msrb.mxu0 %v8086_v22  ;;  %v1533_v9 = vadd.f32 %v8105_v20, %v1517_v45  ;;  %v1539_v44 = vmax.f32 %v1535_v13, 0.0  ;;  %v8150_v53 = vld [vmem:[%s10517_s8 + $0x10] sm:$0xff]  ;;  %v2608_v45 = vld [vmem:[#allocation2 + $0x1178] sm:$0xff] }
 0x3b4   : > { %v2580_v13 = vld [vmem:[#allocation2 + $0x1098] sm:$0xff] }
 0x3b5   : > { %2728 = vmatpush.msrb.mxu3 %v10823_v56  ;;  %2504 = vmatpush.msrb.mxu0 %v2205_v2  ;;  %v2584_v2 = vld [vmem:[#allocation2 + $0x10b8] sm:$0xff]  ;;  %v2582_v56 = vld [vmem:[#allocation2 + $0x10a8] sm:$0xff] }
 0x3b7   : > { %2729 = vmatpush.msrb.mxu3 %v7286_v27  ;;  %2505 = vmatpush.msrb.mxu0 %v2202_v35  ;;  %v10826_v27 = vld [vmem:[#allocation7_spill] sm:$0xff]  ;;  %v8155_v35 = vld [vmem:[%s10514_s5 + $0x18] sm:$0xff] }
 0x3b9   : > { %2730 = vmatpush.msrb.mxu3 %v7253_v18  ;;  %2506 = vmatpush.msrb.mxu0 %v10824_v8  ;;  %v1537_v18 = vmax.f32 %v1533_v9, 0.0  ;;  %v2606_v9 = vld [vmem:[#allocation2 + $0x1168] sm:$0xff] }
 0x3bb   : > { %2731 = vmatpush.msrb.mxu3 %v7504_v23  ;;  %2507 = vmatpush.msrb.mxu0 %v10825_v39 }
 0x3bd   : > { %2732 = vmatpush.msrb.mxu3 %v7477_v41  ;;  %2508 = vmatpush.msrb.mxu0 %v10826_v27 }
 0x3be   : > { %2733 = vmatmul.f32.vlgmr.msrb.gmra.mxu3 %v8042_v21 }
 0x3bf   : > { %2880 = vmatpush.msra.mxu3 %v1539_v44  ;;  %2509 = vmatpush.msrb.mxu0 %v10827_v26  ;;  %v2578_v44 = vld [vmem:[#allocation2 + $0x1088] sm:$0xff] }
 0x3c0   : > { %v2450_v17 = vpop.f32.mrf.mxu2 }
 0x3c1   : > { %2881 = vmatpush.msra.mxu3 %v1537_v18  ;;  %2510 = vmatpush.msrb.mxu0 %v10828_v30  ;;  %v2604_v18 = vld [vmem:[#allocation2 + $0x1158] sm:$0xff] }
 0x3c2   : > { %v2576_v30 = vld [vmem:[#allocation2 + $0x1078] sm:$0xff] }
 0x3c3   : > { %2511 = vmatpush.msrb.mxu0 %v10829_v49  ;;  %v8164_v49 = vld [vmem:[%s10517_s8 + $0x18] sm:$0xff] }
 0x3c5   : > { %2512 = vmatpush.msrb.mxu0 %v7228_v52 }
 0x3c6   : > { %v2427_v43 = vpop.f32.mrf.mxu0  ;;  %2736 = vmatmul.f32.gmra.mxu3 %v8058_v50 }
 0x3c7   : > { %2513 = vmatpush.msrb.mxu0 %v7115_v3  ;;  %v8132_v0 = vadd.f32 %v2450_v17, %v2427_v43  ;;  %v2602_v17 = vld [vmem:[#allocation2 + $0x1148] sm:$0xff] }
 0x3c8   : > { %v2453_v15 = vpop.f32.mrf.mxu2  ;;  %v2574_v43 = vld [vmem:[#allocation2 + $0x1068] sm:$0xff] }
 0x3c9   : > { %2514 = vmatpush.msrb.mxu0 %v7683_v63 }
 0x3cb   : > { %2515 = vmatpush.msrb.mxu0 %v7678_v60 }
 0x3cd   : > { %2516 = vmatpush.msrb.mxu0 %v10830_v4  ;;  %v2600_v4 = vld [vmem:[#allocation2 + $0x1138] sm:$0xff] }
 0x3ce   : > { %v2430_v31 = vpop.f32.mrf.mxu0  ;;  %5727 = vmatmul.msk.f32.vlgmr.msra.gmra.mxu3 %vm497_vm0, %v8124_v58 }
 0x3cf   : > { %v8129_v29 = vadd.f32 %v2453_v15, %v2430_v31  ;;  %2517 = vmatpush.msrb.mxu0 %v10831_v62  ;;  %v2598_v15 = vld [vmem:[#allocation2 + $0x1128] sm:$0xff]  ;;  %v2596_v62 = vld [vmem:[#allocation2 + $0x1118] sm:$0xff] }
 0x3d0   : > { %2518 = vmatmul.f32.vlgmr.msrb.gmra.mxu0 %v8042_v21  ;;  %v2570_v31 = vld [vmem:[#allocation2 + $0x1048] sm:$0xff] }
 0x3d1   : > { %2694 = vmatpush.msra.mxu0 %v2624_v55  ;;  %2539 = vmatpush.msrb.mxu2 %v8129_v29  ;;  %v2572_v55 = vld [vmem:[#allocation2 + $0x1058] sm:$0xff] }
 0x3d3   : > { %2695 = vmatpush.msra.mxu0 %v2622_v5  ;;  %2540 = vmatpush.msrb.mxu2 %v8132_v0  ;;  %v2568_v5 = vld [vmem:[#allocation2 + $0x1038] sm:$0xff] }
 0x3d4   : > { %5717 = vmatmul.msk.f32.vlgmr.msrb.gmra.mxu2 %vm497_vm0, %v7944_v28 }
 0x3d5   : > { %2696 = vmatpush.msra.mxu0 %v2620_v19  ;;  %2671 = vmatpush.msra.mxu2 %v2592_v61  ;;  %v2594_v19 = vld [vmem:[#allocation2 + $0x1108] sm:$0xff] }
 0x3d6   : > { %5728 = vmatmul.msk.f32.gmra.mxu3 %vm497_vm0, %v8140_v6  ;;  %v2566_v61 = vld [vmem:[#allocation2 + $0x1028] sm:$0xff] }
 0x3d7   : > { %2697 = vmatpush.msra.mxu0 %v2618_v12  ;;  %2672 = vmatpush.msra.mxu2 %v2590_v36  ;;  %v2564_v12 = vld [vmem:[#allocation2 + $0x1018] sm:$0xff]  ;;  %v2562_v36 = vld [vmem:[#allocation2 + $0x1008] sm:$0xff] }
 0x3d8   : > { %2521 = vmatmul.f32.gmra.mxu0 %v8058_v50 }
 0x3d9   : > { %2698 = vmatpush.msra.mxu0 %v2616_v7  ;;  %2673 = vmatpush.msra.mxu2 %v2588_v46 }
 0x3db   : > { %2699 = vmatpush.msra.mxu0 %v2614_v33  ;;  %2674 = vmatpush.msra.mxu2 %v2586_v59 }
 0x3dc   : > { %5718 = vmatmul.msk.f32.gmra.mxu2 %vm497_vm0, %v8155_v35 }
 0x3dd   : > { %2700 = vmatpush.msra.mxu0 %v2612_v54  ;;  %2675 = vmatpush.msra.mxu2 %v2584_v2 }
 0x3de   : > { %5729 = vmatmul.msk.f32.gmra.mxu3 %vm497_vm0, %v8150_v53 }
 0x3df   : > { %2701 = vmatpush.msra.mxu0 %v2610_v11  ;;  %2676 = vmatpush.msra.mxu2 %v2582_v56 }
 0x3e1   : > { %2702 = vmatpush.msra.mxu0 %v2608_v45  ;;  %2677 = vmatpush.msra.mxu2 %v2580_v13 }
 0x3e3   : > { %2703 = vmatpush.msra.mxu0 %v2606_v9  ;;  %2678 = vmatpush.msra.mxu2 %v2578_v44 }
 0x3e5   : > { %2704 = vmatpush.msra.mxu0 %v2604_v18  ;;  %2679 = vmatpush.msra.mxu2 %v2576_v30 }
 0x3e6   : > { %5730 = vmatmul.msk.f32.gmra.mxu3 %vm497_vm0, %v8164_v49 }
 0x3e7   : > { %2705 = vmatpush.msra.mxu0 %v2602_v17  ;;  %2680 = vmatpush.msra.mxu2 %v2574_v43  ;;  %v5854_v17 = vld [vmem:[#allocation2 + $0xe0] sm:$0xff]  ;;  %v5855_v43 = vld [vmem:[#allocation2 + $0xd0] sm:$0xff] }
 0x3e9   : > { %2706 = vmatpush.msra.mxu0 %v2600_v4  ;;  %2681 = vmatpush.msra.mxu2 %v2572_v55  ;;  %v5856_v4 = vld [vmem:[#allocation2 + $0xc0] sm:$0xff]  ;;  %v5857_v55 = vld [vmem:[#allocation2 + $0xb0] sm:$0xff] }
 0x3eb   : > { %2707 = vmatpush.msra.mxu0 %v2598_v15  ;;  %2682 = vmatpush.msra.mxu2 %v2570_v31  ;;  %v5858_v15 = vld [vmem:[#allocation2 + $0xa0] sm:$0xff]  ;;  %v5859_v31 = vld [vmem:[#allocation2 + $0x90] sm:$0xff] }
 0x3ed   : > { %2708 = vmatpush.msra.mxu0 %v2596_v62  ;;  %2683 = vmatpush.msra.mxu2 %v2568_v5  ;;  %v5860_v62 = vld [vmem:[#allocation2 + $0x80] sm:$0xff]  ;;  %v5861_v5 = vld [vmem:[#allocation2 + $0x70] sm:$0xff] }
 0x3ef   : > { %2709 = vmatpush.msra.mxu0 %v2594_v19  ;;  %2684 = vmatpush.msra.mxu2 %v2566_v61  ;;  %v5862_v19 = vld [vmem:[#allocation2 + $0x60] sm:$0xff] }
 0x3f0   : > { %2710 = vmatmul.f32.vlgmr.msra.gmra.mxu0 %v7678_v60 }
 0x3f1   : > { %2685 = vmatpush.msra.mxu2 %v2564_v12  ;;  %v5863_v12 = vld [vmem:[#allocation2 + $0x50] sm:$0xff] }
 0x3f3   : > { %2686 = vmatpush.msra.mxu2 %v2562_v36  ;;  %v5864_v36 = vld [vmem:[#allocation2 + $0x40] sm:$0xff] }
 0x3f4   : > { %2687 = vmatmul.f32.vlgmr.msra.gmra.mxu2 %v7477_v41  ;;  %v2036_v41 = vadd.f32 %v8065_v1, %v8063_v38 }
 0x3f5   : > { %2763 = vmatpush.msrb.mxu2 %v8129_v29 }
 0x3f7   : > { %2764 = vmatpush.msrb.mxu2 %v8132_v0 }
 0x3f8   : > { %2713 = vmatmul.f32.gmra.mxu0 %v7683_v63 }
 0x3f9   : > { %2765 = vmatpush.msrb.mxu2 %v8079_v57  ;;  %v2033_v57 = vadd.f32 %v8053_v40, %v8051_v37 }
 0x3fb   : > { %2766 = vmatpush.msrb.mxu2 %v8086_v22 }
 0x3fc   : > { %2690 = vmatmul.f32.gmra.mxu2 %v7504_v23  ;;  %v2041_v23 = vmul.f32 %v2036_v41, %v8082_v51 }
 0x3fd   : > { %2767 = vmatpush.msrb.mxu2 %v7929_v14  ;;  %v2039_v14 = vmul.f32 %v2033_v57, %v8096_v24  ;;  %v5865_v57 = vld [vmem:[#allocation2 + $0x30] sm:$0xff] }
 0x3fe   : > { %v2045_v22 = vadd.f32 %v2041_v23, %v8100_v34  ;;  %v5866_v23 = vld [vmem:[#allocation2 + $0x20] sm:$0xff] }
 0x3ff   : > { %2768 = vmatpush.msrb.mxu2 %v7935_v25  ;;  %v2473_v25 = vpop.f32.mrf.mxu1  ;;  %v2043_v37 = vadd.f32 %v2039_v14, %v8105_v20 }
 0x400   : > { %v2049_v40 = vmax.f32 %v2045_v22, 0.0 }
 0x401   : > { %2769 = vmatpush.msrb.mxu2 %v10824_v8  ;;  %v2496_v8 = vpop.f32.mrf.mxu3 }
 0x402   : > { %v2497_v0 = vadd.f32 %v2496_v8, %v2473_v25  ;;  %v5867_v25 = vld [vmem:[#allocation2 + $0x10] sm:$0xff]  ;;  %v5868_v8 = vld [vmem:[#allocation2] sm:$0xff] }
 0x403   : > { %2770 = vmatpush.msrb.mxu2 %v10825_v39  ;;  %v10832_v39 = vld [vmem:[#allocation14_spill] sm:$0xff] }
 0x404   : > { %v2548_v2 = vmul.f32 %v2497_v0, %v8096_v24  ;;  %v5876_v0 = vld [vmem:[#allocation2 + $0x1f0] sm:$0xff] }
 0x405   : > { %2771 = vmatpush.msrb.mxu2 %v10826_v27 }
 0x406   : > { %v2552_v9 = vadd.f32 %v2548_v2, %v8105_v20  ;;  %v8274_v2 = vld [vmem:[#allocation2 + $0x250] sm:$0xff] }
 0x407   : > { %2772 = vmatpush.msrb.mxu2 %v10827_v26  ;;  %v10835_v26 = vld [vmem:[#allocation17_spill] sm:$0xff]  ;;  %10841 = vst [vmem:[#allocation12_spill] sm:$0xff] %v8274_v2 }
 0x408   : > { %v2556_v30 = vmax.f32 %v2552_v9, 0.0 }
 0x409   : > { %2773 = vmatpush.msrb.mxu2 %v7863_v42  ;;  %v2047_v42 = vmax.f32 %v2043_v37, 0.0  ;;  %v2499_v38 = vpop.f32.mrf.mxu3 }
 0x40b   : > { %2774 = vmatpush.msrb.mxu2 %v7871_v48  ;;  %v2476_v48 = vpop.f32.mrf.mxu1 }
 0x40d   : > { %2775 = vmatpush.msrb.mxu2 %v7228_v52 }
 0x40f   : > { %2776 = vmatpush.msrb.mxu2 %v7115_v3  ;;  %v10833_v3 = vld [vmem:[#allocation18_spill] sm:$0xff] }
 0x410   : > { %v1456_v27 = vadd.f32 %v10833_v3, %v10832_v39  ;;  %v8242_v3 = vld [vmem:[#allocation2 + $0x2d0] sm:$0xff] }
 0x411   : > { %2777 = vmatpush.msrb.mxu2 %v7683_v63  ;;  %v10834_v63 = vld [vmem:[#allocation13_spill] sm:$0xff] }
 0x412   : > { %v1453_v29 = vadd.f32 %v10835_v26, %v10834_v63  ;;  %v8245_v63 = vld [vmem:[#allocation2 + $0x2c0] sm:$0xff] }
 0x413   : > { %2778 = vmatpush.msrb.mxu2 %v7678_v60  ;;  %v2500_v60 = vadd.f32 %v2499_v38, %v2476_v48  ;;  %v8233_v48 = vld [vmem:[#allocation2 + $0x2f0] sm:$0xff] }
 0x414   : > { %2779 = vmatmul.f32.vlgmr.msrb.gmra.mxu2 %v8042_v21  ;;  %v1518_v21 = vmul.f32 %v8082_v51, %v1456_v27  ;;  %v1516_v7 = vmul.f32 %v8096_v24, %v1453_v29  ;;  %v8250_v29 = vld [vmem:[#allocation2 + $0x2b0] sm:$0xff] }
 0x415   : > { %3010 = vmatpush.msra.mxu2 %v2049_v40  ;;  %v2550_v46 = vmul.f32 %v2500_v60, %v8082_v51  ;;  %v8253_v60 = vld [vmem:[#allocation2 + $0x2a0] sm:$0xff] }
 0x416   : > { %v2665_v52 = vpop.f32.mrf.mxu1  ;;  %v1534_v59 = vadd.f32 %v8100_v34, %v1518_v21  ;;  %v1532_v56 = vadd.f32 %v8105_v20, %v1516_v7  ;;  %10836 = vst [vmem:[#allocation21_spill] sm:$0xff] %v8253_v60  ;;  %v8258_v21 = vld [vmem:[#allocation2 + $0x290] sm:$0xff]  ;;  %v8261_v7 = vld [vmem:[#allocation2 + $0x280] sm:$0xff] }
 0x417   : > { %3011 = vmatpush.msra.mxu2 %v2047_v42  ;;  %v2554_v45 = vadd.f32 %v2550_v46, %v8100_v34  ;;  %10837 = vst [vmem:[#allocation20_spill] sm:$0xff] %v8258_v21  ;;  %v5878_v46 = vld [vmem:[#allocation2 + $0x1e0] sm:$0xff] }
 0x418   : > { %v1538_v13 = vmax.f32 %v1534_v59, 0.0  ;;  %v1536_v44 = vmax.f32 %v1532_v56, 0.0  ;;  %10838 = vst [vmem:[#allocation19_spill] sm:$0xff] %v8261_v7  ;;  %v8269_v59 = vld [vmem:[#allocation2 + $0x260] sm:$0xff] }
 0x419   : > { %v2558_v18 = vmax.f32 %v2554_v45, 0.0  ;;  %10840 = vst [vmem:[#allocation16_spill] sm:$0xff] %v8269_v59  ;;  %v8277_v45 = vld [vmem:[#allocation2 + $0x240] sm:$0xff] }
 0x41a   : > { %10842 = vst [vmem:[#allocation11_spill] sm:$0xff] %v8277_v45 }
 0x41c   : > { %2782 = vmatmul.f32.gmra.mxu2 %v8058_v50 }
 0x41e   : > { %v2668_v50 = vpop.f32.mrf.mxu1 }
 0x421   : > { %v2642_v1 = vpop.f32.mrf.mxu3 }
 0x422   : > { %v2666_v11 = vadd.f32 %v2665_v52, %v2642_v1  ;;  %v8237_v52 = vld [vmem:[#allocation2 + $0x2e0] sm:$0xff] }
 0x424   : > { %5735 = vmatmul.msk.f32.vlgmr.msra.gmra.mxu2 %vm497_vm0, %v8124_v58 }
 0x429   : > { %v2645_v33 = vpop.f32.mrf.mxu3 }
 0x42a   : > { %v2669_v54 = vadd.f32 %v2668_v50, %v2645_v33  ;;  %v8266_v50 = vld [vmem:[#allocation2 + $0x270] sm:$0xff] }
 0x42b   : > { %10839 = vst [vmem:[#allocation15_spill] sm:$0xff] %v8266_v50  ;;  %v5880_v33 = vld [vmem:[#allocation2 + $0x1d0] sm:$0xff] }
 0x42c   : > { %5736 = vmatmul.msk.f32.gmra.mxu2 %vm497_vm0, %v8140_v6  ;;  %2754 = vmatpush.msra.mxu1 %v2669_v54  ;;  %v5882_v54 = vld [vmem:[#allocation2 + $0x1c0] sm:$0xff] }
 0x42e   : > { %2755 = vmatpush.msra.mxu1 %v2666_v11  ;;  %v5884_v11 = vld [vmem:[#allocation2 + $0x1b0] sm:$0xff] }
 0x42f   : > { %5719 = vmatmul.msk.f32.vlgmr.msra.gmra.mxu1 %vm497_vm0, %v7944_v28  ;;  %v5853_v28 = vld [vmem:[#allocation2 + $0xf0] sm:$0xff] }
 0x430   : > { %2851 = vmatpush.msrb.mxu1 %v1538_v13  ;;  %v5886_v13 = vld [vmem:[#allocation2 + $0x1a0] sm:$0xff] }
 0x432   : > { %2852 = vmatpush.msrb.mxu1 %v1536_v44  ;;  %v1990_v44 = vadd.f32 %v8013_v32, %v8011_v47  ;;  %v8295_v32 = vld [vmem:[#allocation2 + $0x210] sm:$0xff] }
 0x433   : > { %10845 = vst [vmem:[#allocation6_spill] sm:$0xff] %v8295_v32 }
 0x434   : > { %3063 = vmatpush.msra.mxu1 %v2558_v18  ;;  %5737 = vmatmul.msk.f32.gmra.mxu2 %vm497_vm0, %v8150_v53  ;;  %v8284_v18 = vld [vmem:[#allocation2 + $0x230] sm:$0xff]  ;;  %v2040_v47 = vmul.f32 %v1990_v44, %v8082_v51 }
 0x435   : > { %10843 = vst [vmem:[#allocation7_spill] sm:$0xff] %v8284_v18 }
 0x436   : > { %3064 = vmatpush.msra.mxu1 %v2556_v30  ;;  %v5888_v30 = vld [vmem:[#allocation2 + $0x190] sm:$0xff] }
 0x437   : > { %5720 = vmatmul.msk.f32.gmra.mxu1 %vm497_vm0, %v8155_v35 }
 0x43c   : > { %5738 = vmatmul.msk.f32.gmra.mxu2 %vm497_vm0, %v8164_v49 }
 0x43f   : > { %5723 = vmatmul.msk.f32.vlgmr.msrb.gmra.mxu1 %vm497_vm0, %v8124_v58 }
 0x440   : > { %3213 = vmatpush.msrb.mxu1 %v5853_v28  ;;  %v1987_v28 = vadd.f32 %v8006_v16, %v8001_v10  ;;  %v8299_v10 = vld [vmem:[#allocation2 + $0x200] sm:$0xff] }
 0x441   : > { %10846 = vst [vmem:[#allocation8_spill] sm:$0xff] %v8299_v10  ;;  %v5894_v16 = vld [vmem:[#allocation2 + $0x160] sm:$0xff] }
 0x442   : > { %3214 = vmatpush.msrb.mxu1 %v5854_v17  ;;  %v8289_v17 = vld [vmem:[#allocation2 + $0x220] sm:$0xff] }
 0x443   : > { %10844 = vst [vmem:[#allocation5_spill] sm:$0xff] %v8289_v17 }
 0x444   : > { %3215 = vmatpush.msrb.mxu1 %v5855_v43  ;;  %v5890_v43 = vld [vmem:[#allocation2 + $0x180] sm:$0xff] }
 0x446   : > { %3216 = vmatpush.msrb.mxu1 %v5856_v4  ;;  %v5892_v4 = vld [vmem:[#allocation2 + $0x170] sm:$0xff] }
 0x447   : > { %5724 = vmatmul.msk.f32.gmra.mxu1 %vm497_vm0, %v8140_v6 }
 0x448   : > { %3217 = vmatpush.msrb.mxu1 %v5857_v55  ;;  %v2038_v55 = vmul.f32 %v1987_v28, %v8096_v24 }
 0x44a   : > { %3218 = vmatpush.msrb.mxu1 %v5858_v15 }
 0x44c   : > { %3219 = vmatpush.msrb.mxu1 %v5859_v31 }
 0x44d   : > { %v2519_v61 = vpop.f32.mrf.mxu0 }
 0x44e   : > { %3220 = vmatpush.msrb.mxu1 %v5860_v62  ;;  %v2044_v62 = vadd.f32 %v2040_v47, %v8100_v34 }
 0x44f   : > { %5725 = vmatmul.msk.f32.gmra.mxu1 %vm497_vm0, %v8150_v53 }
 0x450   : > { %3221 = vmatpush.msrb.mxu1 %v5861_v5 }
 0x452   : > { %3222 = vmatpush.msrb.mxu1 %v5862_v19  ;;  %v5895_v19 = vld [vmem:[#allocation2 + $0x150] sm:$0xff] }
 0x454   : > { %3223 = vmatpush.msrb.mxu1 %v5863_v12  ;;  %v2042_v12 = vadd.f32 %v2038_v55, %v8105_v20 }
 0x455   : > { %v2522_v22 = vpop.f32.mrf.mxu0 }
 0x456   : > { %3224 = vmatpush.msrb.mxu1 %v5864_v36  ;;  %v5896_v36 = vld [vmem:[#allocation2 + $0x140] sm:$0xff] }
 0x457   : > { %v2542_v41 = vpop.f32.mrf.mxu2  ;;  %5726 = vmatmul.msk.f32.gmra.mxu1 %vm497_vm0, %v8164_v49 }
 0x458   : > { %3225 = vmatpush.msrb.mxu1 %v5865_v57  ;;  %v2543_v14 = vadd.f32 %v2542_v41, %v2519_v61  ;;  %v2048_v41 = vmax.f32 %v2044_v62, 0.0  ;;  %v5897_v57 = vld [vmem:[#allocation2 + $0x130] sm:$0xff] }
 0x45a   : > { %3226 = vmatpush.msrb.mxu1 %v5866_v23  ;;  %v2549_v40 = vmul.f32 %v2543_v14, %v8096_v24  ;;  %v5898_v23 = vld [vmem:[%s10514_s5 + $0x8] sm:$0xff]  ;;  %v2046_v14 = vmax.f32 %v2042_v12, 0.0 }
 0x45b   : > { %v5921_v12 = vld [vmem:[#allocation2 + $0xc8] sm:$0xff] }
 0x45c   : > { %3227 = vmatpush.msrb.mxu1 %v5867_v25  ;;  %v2553_v39 = vadd.f32 %v2549_v40, %v8105_v20  ;;  %v5899_v25 = vld [vmem:[#allocation2 + $0x120] sm:$0xff] }
 0x45d   : > { %v8315_v40 = vld [vmem:[#allocation2 + $0x3e0] sm:$0xff] }
 0x45e   : > { %3228 = vmatpush.msrb.mxu1 %v5868_v8  ;;  %v2557_v26 = vmax.f32 %v2553_v39, 0.0  ;;  %v5901_v8 = vld [vmem:[#allocation2 + $0x100] sm:$0xff]  ;;  %v8332_v39 = vld [vmem:[#allocation2 + $0x390] sm:$0xff] }
 0x45f   : > { %v2545_v37 = vpop.f32.mrf.mxu2  ;;  %5739 = vmatmul.msk.f32.vlgmr.msra.gmra.mxu1 %vm497_vm0, %v8124_v58 }
 0x460   : > { %v2546_v42 = vadd.f32 %v2545_v37, %v2522_v22  ;;  %3293 = vmatpush.msra.mxu1 %v8233_v48  ;;  %v5900_v22 = vld [vmem:[#allocation2 + $0x110] sm:$0xff] }
 0x461   : > { %v8310_v37 = vld [vmem:[#allocation2 + $0x3f0] sm:$0xff] }
 0x462   : > { %v2551_v38 = vmul.f32 %v2546_v42, %v8082_v51  ;;  %3294 = vmatpush.msra.mxu1 %v8237_v52  ;;  %v8318_v42 = vld [vmem:[#allocation2 + $0x3d0] sm:$0xff] }
 0x464   : > { %v2555_v1 = vadd.f32 %v2551_v38, %v8100_v34  ;;  %3295 = vmatpush.msra.mxu1 %v8242_v3  ;;  %v8321_v38 = vld [vmem:[#allocation2 + $0x3c0] sm:$0xff] }
 0x466   : > { %v2559_v27 = vmax.f32 %v2555_v1, 0.0  ;;  %3296 = vmatpush.msra.mxu1 %v8245_v63  ;;  %v8324_v1 = vld [vmem:[#allocation2 + $0x3b0] sm:$0xff] }
 0x467   : > { %5740 = vmatmul.msk.f32.gmra.mxu1 %vm497_vm0, %v8140_v6 }
 0x468   : > { %3092 = vmatpush.msrb.mxu3 %v2559_v27  ;;  %3297 = vmatpush.msra.mxu1 %v8250_v29  ;;  %v8335_v27 = vld [vmem:[#allocation2 + $0x380] sm:$0xff] }
 0x469   : > { %10847 = vst [vmem:[#allocation10_spill] sm:$0xff] %v8335_v27 }
 0x46a   : > { %3093 = vmatpush.msrb.mxu3 %v2557_v26  ;;  %3298 = vmatpush.msra.mxu1 %v8253_v60  ;;  %v8338_v26 = vld [vmem:[#allocation2 + $0x370] sm:$0xff] }
 0x46b   : > { %5743 = vmatmul.msk.f32.vlgmr.msrb.gmra.mxu3 %vm497_vm0, %v8124_v58  ;;  %10848 = vst [vmem:[#allocation9_spill] sm:$0xff] %v8338_v26 }
 0x46c   : > { %3299 = vmatpush.msra.mxu1 %v8258_v21  ;;  %3233 = vmatpush.msra.mxu3 %v5876_v0  ;;  %v8343_v0 = vld [vmem:[#allocation2 + $0x360] sm:$0xff] }
 0x46d   : > { %v2711_v56 = vpop.f32.mrf.mxu0  ;;  %10849 = vst [vmem:[#allocation14_spill] sm:$0xff] %v8343_v0 }
 0x46e   : > { %3300 = vmatpush.msra.mxu1 %v8261_v7  ;;  %3234 = vmatpush.msra.mxu3 %v5878_v46  ;;  %v8346_v46 = vld [vmem:[#allocation2 + $0x350] sm:$0xff] }
 0x46f   : > { %5741 = vmatmul.msk.f32.gmra.mxu1 %vm497_vm0, %v8150_v53  ;;  %10850 = vst [vmem:[#allocation18_spill] sm:$0xff] %v8346_v46 }
 0x470   : > { %3301 = vmatpush.msra.mxu1 %v8266_v50  ;;  %3235 = vmatpush.msra.mxu3 %v5880_v33  ;;  %v8349_v33 = vld [vmem:[#allocation2 + $0x340] sm:$0xff] }
 0x471   : > { %10851 = vst [vmem:[#allocation13_spill] sm:$0xff] %v8349_v33 }
 0x472   : > { %3302 = vmatpush.msra.mxu1 %v8269_v59  ;;  %3236 = vmatpush.msra.mxu3 %v5882_v54  ;;  %v8352_v54 = vld [vmem:[#allocation2 + $0x330] sm:$0xff] }
 0x473   : > { %5744 = vmatmul.msk.f32.gmra.mxu3 %vm497_vm0, %v8140_v6  ;;  %10852 = vst [vmem:[#allocation17_spill] sm:$0xff] %v8352_v54 }
 0x474   : > { %3303 = vmatpush.msra.mxu1 %v8274_v2  ;;  %3237 = vmatpush.msra.mxu3 %v5884_v11  ;;  %v8357_v11 = vld [vmem:[#allocation2 + $0x320] sm:$0xff] }
 0x475   : > { %v2714_v15 = vpop.f32.mrf.mxu0  ;;  %10853 = vst [vmem:[#allocation22_spill] sm:$0xff] %v8357_v11 }
 0x476   : > { %3304 = vmatpush.msra.mxu1 %v8277_v45  ;;  %3238 = vmatpush.msra.mxu3 %v5886_v13  ;;  %v8363_v13 = vld [vmem:[#allocation2 + $0x300] sm:$0xff] }
 0x477   : > { %v2688_v9 = vpop.f32.mrf.mxu2  ;;  %5742 = vmatmul.msk.f32.gmra.mxu1 %vm497_vm0, %v8164_v49  ;;  %10855 = vst [vmem:[#allocation24_spill] sm:$0xff] %v8363_v13 }
 0x478   : > { %3305 = vmatpush.msra.mxu1 %v8284_v18  ;;  %3239 = vmatpush.msra.mxu3 %v5888_v30  ;;  %v2712_v61 = vadd.f32 %v2711_v56, %v2688_v9  ;;  %v8360_v56 = vld [vmem:[#allocation2 + $0x310] sm:$0xff]  ;;  %v2734_v9 = vpop.f32.mrf.mxu3 }
 0x479   : > { %10854 = vst [vmem:[#allocation23_spill] sm:$0xff] %v8360_v56 }
 0x47a   : > { %3306 = vmatpush.msra.mxu1 %v8289_v17  ;;  %3240 = vmatpush.msra.mxu3 %v5890_v43 }
 0x47b   : > { %5745 = vmatmul.msk.f32.gmra.mxu3 %vm497_vm0, %v8150_v53 }
 0x47c   : > { %3307 = vmatpush.msra.mxu1 %v8295_v32  ;;  %3241 = vmatpush.msra.mxu3 %v5892_v4 }
 0x47e   : > { %3308 = vmatpush.msra.mxu1 %v8299_v10  ;;  %3242 = vmatpush.msra.mxu3 %v5894_v16 }
 0x47f   : > { %v2691_v31 = vpop.f32.mrf.mxu2 }
 0x480   : > { %v2715_v5 = vadd.f32 %v2714_v15, %v2691_v31  ;;  %3243 = vmatpush.msra.mxu3 %v5895_v19  ;;  %v2737_v28 = vpop.f32.mrf.mxu3  ;;  %v5919_v19 = vld [vmem:[#allocation2 + $0xe8] sm:$0xff] }
 0x482   : > { %2800 = vmatpush.msrb.mxu0 %v2715_v5  ;;  %3244 = vmatpush.msra.mxu3 %v5896_v36  ;;  %v5918_v5 = vld [vmem:[#allocation2 + $0xf8] sm:$0xff] }
 0x483   : > { %5746 = vmatmul.msk.f32.gmra.mxu3 %vm497_vm0, %v8164_v49  ;;  %v5922_v36 = vld [vmem:[#allocation2 + $0xb8] sm:$0xff] }
 0x484   : > { %2801 = vmatpush.msrb.mxu0 %v2712_v61  ;;  %3245 = vmatpush.msra.mxu3 %v5897_v57  ;;  %v5920_v61 = vld [vmem:[#allocation2 + $0xd8] sm:$0xff] }
 0x485   : > { %5721 = vmatmul.msk.f32.vlgmr.msrb.gmra.mxu0 %vm497_vm0, %v5898_v23  ;;  %v5924_v57 = vld [vmem:[#allocation2 + $0x98] sm:$0xff]  ;;  %v5925_v23 = vld [vmem:[#allocation2 + $0x88] sm:$0xff] }
 0x486   : > { %2981 = vmatpush.msra.mxu0 %v2048_v41  ;;  %3246 = vmatpush.msra.mxu3 %v5899_v25  ;;  %v5923_v41 = vld [vmem:[#allocation2 + $0xa8] sm:$0xff] }
 0x487   : > { %v5927_v25 = vld [vmem:[#allocation2 + $0x68] sm:$0xff] }
 0x488   : > { %2982 = vmatpush.msra.mxu0 %v2046_v14  ;;  %3247 = vmatpush.msra.mxu3 %v5900_v22  ;;  %v5926_v14 = vld [vmem:[#allocation2 + $0x78] sm:$0xff] }
 0x489   : > { %v5928_v22 = vld [vmem:[#allocation2 + $0x58] sm:$0xff] }
 0x48a   : > { %3248 = vmatpush.msra.mxu3 %v5901_v8  ;;  %v5929_v8 = vld [vmem:[#allocation2 + $0x48] sm:$0xff] }
 0x48c   : > { %3313 = vmatpush.msrb.mxu3 %v8310_v37 }
 0x48d   : > { %5722 = vmatmul.msk.f32.gmra.mxu0 %vm497_vm0, %v8155_v35  ;;  %v8329_v35 = vld [vmem:[#allocation2 + $0x3a0] sm:$0xff] }
 0x48e   : > { %3314 = vmatpush.msrb.mxu3 %v8315_v40 }
 0x490   : > { %3315 = vmatpush.msrb.mxu3 %v8318_v42 }
 0x492   : > { %3316 = vmatpush.msrb.mxu3 %v8321_v38 }
 0x494   : > { %3317 = vmatpush.msrb.mxu3 %v8324_v1 }
 0x495   : > { %5731 = vmatmul.msk.f32.vlgmr.msra.gmra.mxu0 %vm497_vm0, %v8124_v58 }
 0x496   : > { %3318 = vmatpush.msrb.mxu3 %v8329_v35 }
 0x498   : > { %3319 = vmatpush.msrb.mxu3 %v8332_v39 }
 0x49a   : > { %3320 = vmatpush.msrb.mxu3 %v8335_v27  ;;  %v6012_v27 = vld [vmem:[#allocation2 + $0x600] sm:$0xff] }
 0x49c   : > { %3321 = vmatpush.msrb.mxu3 %v8338_v26 }
 0x49d   : > { %5732 = vmatmul.msk.f32.gmra.mxu0 %vm497_vm0, %v8140_v6 }
 0x49e   : > { %3322 = vmatpush.msrb.mxu3 %v8343_v0  ;;  %v8520_v0 = vpop.permute.xlu1 %2911 }
 0x4a0   : > { %3323 = vmatpush.msrb.mxu3 %v8346_v46  ;;  %v8513_v46 = vld [vmem:[#allocation2 + $0x308] sm:$0xff] }
 0x4a1   : > { %10889 = vst [vmem:[#allocation58_spill] sm:$0xff] %v8513_v46 }
 0x4a2   : > { %3324 = vmatpush.msrb.mxu3 %v8349_v33 }
 0x4a4   : > { %3325 = vmatpush.msrb.mxu3 %v8352_v54 }
 0x4a5   : > { %5733 = vmatmul.msk.f32.gmra.mxu0 %vm497_vm0, %v8150_v53 }
 0x4a6   : > { %3326 = vmatpush.msrb.mxu3 %v8357_v11 }
 0x4a8   : > { %3327 = vmatpush.msrb.mxu3 %v8360_v56 }
 0x4aa   : > { %3328 = vmatpush.msrb.mxu3 %v8363_v13 }
 0x4ac   : > { %v2757_v44 = vpop.f32.mrf.mxu1 }
 0x4ad   : > { %5734 = vmatmul.msk.f32.gmra.mxu0 %vm497_vm0, %v8164_v49  ;;  %v2758_v30 = vadd.f32 %v2757_v44, %v2734_v9  ;;  %v5930_v9 = vld [vmem:[#allocation2 + $0x38] sm:$0xff]  ;;  %v5931_v44 = vld [vmem:[#allocation2 + $0x28] sm:$0xff] }
 0x4af   : > { %v2809_v47 = vmul.f32 %v2758_v30, %v8096_v24  ;;  %v5932_v30 = vld [vmem:[#allocation2 + $0x18] sm:$0xff] }
 0x4b1   : > { %v2813_v15 = vadd.f32 %v2809_v47, %v8105_v20  ;;  %v8383_v47 = vld [vmem:[#allocation2 + $0x2e8] sm:$0xff] }
 0x4b2   : > { %10857 = vst [vmem:[#allocation26_spill] sm:$0xff] %v8383_v47 }
 0x4b3   : > { %v2817_v62 = vmax.f32 %v2813_v15, 0.0  ;;  %v8395_v15 = vld [vmem:[#allocation2 + $0x2a8] sm:$0xff] }
 0x4b4   : > { %v2760_v43 = vpop.f32.mrf.mxu1  ;;  %10861 = vst [vmem:[#allocation30_spill] sm:$0xff] %v8395_v15 }
 0x4b5   : > { %v2761_v4 = vadd.f32 %v2760_v43, %v2737_v28  ;;  %v5933_v28 = vld [vmem:[#allocation2 + $0x8] sm:$0xff]  ;;  %v8380_v43 = vld [vmem:[#allocation2 + $0x2f8] sm:$0xff] }
 0x4b6   : > { %10856 = vst [vmem:[#allocation25_spill] sm:$0xff] %v8380_v43 }
 0x4b7   : > { %v2811_v55 = vmul.f32 %v2761_v4, %v8082_v51  ;;  %v8386_v4 = vld [vmem:[#allocation2 + $0x2d8] sm:$0xff] }
 0x4b8   : > { %10858 = vst [vmem:[#allocation27_spill] sm:$0xff] %v8386_v4 }
 0x4b9   : > { %v2815_v16 = vadd.f32 %v2811_v55, %v8100_v34  ;;  %v8389_v55 = vld [vmem:[#allocation2 + $0x2c8] sm:$0xff] }
 0x4ba   : > { %10859 = vst [vmem:[#allocation28_spill] sm:$0xff] %v8389_v55 }
 0x4bb   : > { %v2819_v31 = vmax.f32 %v2815_v16, 0.0  ;;  %v8392_v16 = vld [vmem:[#allocation2 + $0x2b8] sm:$0xff] }
 0x4bc   : > { %10860 = vst [vmem:[#allocation29_spill] sm:$0xff] %v8392_v16 }
 0x4bd   : > { %3145 = vmatpush.msrb.mxu0 %v2819_v31  ;;  %v8398_v31 = vld [vmem:[#allocation2 + $0x298] sm:$0xff] }
 0x4be   : > { %10862 = vst [vmem:[#allocation31_spill] sm:$0xff] %v8398_v31 }
 0x4bf   : > { %3146 = vmatpush.msrb.mxu0 %v2817_v62  ;;  %v8401_v62 = vld [vmem:[#allocation2 + $0x288] sm:$0xff] }
 0x4c0   : > { %5747 = vmatmul.msk.f32.vlgmr.msrb.gmra.mxu0 %vm497_vm0, %v8124_v58  ;;  %10863 = vst [vmem:[#allocation32_spill] sm:$0xff] %v8401_v62 }
 0x4c1   : > { %3253 = vmatpush.msra.mxu0 %v5918_v5  ;;  %v8404_v5 = vld [vmem:[#allocation2 + $0x278] sm:$0xff] }
 0x4c2   : > { %10864 = vst [vmem:[#allocation33_spill] sm:$0xff] %v8404_v5 }
 0x4c3   : > { %3254 = vmatpush.msra.mxu0 %v5919_v19  ;;  %v8407_v19 = vld [vmem:[#allocation2 + $0x268] sm:$0xff] }
 0x4c4   : > { %10865 = vst [vmem:[#allocation34_spill] sm:$0xff] %v8407_v19 }
 0x4c5   : > { %3255 = vmatpush.msra.mxu0 %v5920_v61  ;;  %v8410_v61 = vld [vmem:[#allocation2 + $0x258] sm:$0xff] }
 0x4c6   : > { %10866 = vst [vmem:[#allocation35_spill] sm:$0xff] %v8410_v61 }
 0x4c7   : > { %3256 = vmatpush.msra.mxu0 %v5921_v12  ;;  %v8413_v12 = vld [vmem:[#allocation2 + $0x248] sm:$0xff] }
 0x4c8   : > { %5748 = vmatmul.msk.f32.gmra.mxu0 %vm497_vm0, %v8140_v6  ;;  %10867 = vst [vmem:[#allocation36_spill] sm:$0xff] %v8413_v12 }
 0x4c9   : > { %3257 = vmatpush.msra.mxu0 %v5922_v36  ;;  %v8416_v36 = vld [vmem:[#allocation2 + $0x238] sm:$0xff] }
 0x4ca   : > { %10868 = vst [vmem:[#allocation37_spill] sm:$0xff] %v8416_v36 }
 0x4cb   : > { %3258 = vmatpush.msra.mxu0 %v5923_v41  ;;  %v8419_v41 = vld [vmem:[#allocation2 + $0x228] sm:$0xff] }
 0x4cc   : > { %10869 = vst [vmem:[#allocation38_spill] sm:$0xff] %v8419_v41 }
 0x4cd   : > { %3259 = vmatpush.msra.mxu0 %v5924_v57  ;;  %v8422_v57 = vld [vmem:[#allocation2 + $0x218] sm:$0xff] }
 0x4ce   : > { %10870 = vst [vmem:[#allocation39_spill] sm:$0xff] %v8422_v57 }
 0x4cf   : > { %3260 = vmatpush.msra.mxu0 %v5925_v23  ;;  %v8425_v23 = vld [vmem:[#allocation2 + $0x208] sm:$0xff] }
 0x4d0   : > { %5749 = vmatmul.msk.f32.gmra.mxu0 %vm497_vm0, %v8150_v53  ;;  %10871 = vst [vmem:[#allocation40_spill] sm:$0xff] %v8425_v23 }
 0x4d1   : > { %3261 = vmatpush.msra.mxu0 %v5926_v14  ;;  %v2780_v14 = vpop.f32.mrf.mxu2 }
 0x4d3   : > { %3262 = vmatpush.msra.mxu0 %v5927_v25 }
 0x4d5   : > { %3263 = vmatpush.msra.mxu0 %v5928_v22 }
 0x4d7   : > { %3264 = vmatpush.msra.mxu0 %v5929_v8 }
 0x4d8   : > { %5750 = vmatmul.msk.f32.gmra.mxu0 %vm497_vm0, %v8164_v49 }
 0x4d9   : > { %3265 = vmatpush.msra.mxu0 %v5930_v9  ;;  %v2783_v8 = vpop.f32.mrf.mxu2 }
 0x4db   : > { %3266 = vmatpush.msra.mxu0 %v5931_v44 }
 0x4dd   : > { %3267 = vmatpush.msra.mxu0 %v5932_v30 }
 0x4df   : > { %3268 = vmatpush.msra.mxu0 %v5933_v28 }
 0x4e1   : > { %3333 = vmatpush.msrb.mxu0 %v8380_v43 }
 0x4e3   : > { %3334 = vmatpush.msrb.mxu0 %v8383_v47 }
 0x4e5   : > { %3335 = vmatpush.msrb.mxu0 %v8386_v4 }
 0x4e7   : > { %3336 = vmatpush.msrb.mxu0 %v8389_v55 }
 0x4e9   : > { %3337 = vmatpush.msrb.mxu0 %v8392_v16 }
 0x4eb   : > { %3338 = vmatpush.msrb.mxu0 %v8395_v15 }
 0x4ed   : > { %3339 = vmatpush.msrb.mxu0 %v8398_v31 }
 0x4ef   : > { %3340 = vmatpush.msrb.mxu0 %v8401_v62 }
 0x4f1   : > { %3341 = vmatpush.msrb.mxu0 %v8404_v5 }
 0x4f3   : > { %3342 = vmatpush.msrb.mxu0 %v8407_v19 }
 0x4f5   : > { %3343 = vmatpush.msrb.mxu0 %v8410_v61 }
 0x4f7   : > { %3344 = vmatpush.msrb.mxu0 %v8413_v12 }
 0x4f9   : > { %3345 = vmatpush.msrb.mxu0 %v8416_v36 }
 0x4fb   : > { %3346 = vmatpush.msrb.mxu0 %v8419_v41 }
 0x4fd   : > { %3347 = vmatpush.msrb.mxu0 %v8422_v57 }
 0x4ff   : > { %3348 = vmatpush.msrb.mxu0 %v8425_v23 }
 0x502   : > { %v2803_v25 = vpop.f32.mrf.mxu0 }
 0x503   : > { %v2804_v22 = vadd.f32 %v2803_v25, %v2780_v14  ;;  %v5950_v14 = vld [vmem:[#allocation2 + $0x1f8] sm:$0xff]  ;;  %v5951_v25 = vld [vmem:[#allocation2 + $0x1e8] sm:$0xff] }
 0x505   : > { %v2810_v44 = vmul.f32 %v2804_v22, %v8096_v24  ;;  %v8436_v24 = vpop.f32.mrf.mxu1  ;;  %v5958_v22 = vld [vmem:[#allocation2 + $0x178] sm:$0xff] }
 0x506   : > { %10873 = vst [vmem:[#allocation42_spill] sm:$0xff] %v8436_v24  ;;  %v8495_v24 = vld [vmem:[#allocation2 + $0x348] sm:$0xff] }
 0x507   : > { %v2814_v56 = vadd.f32 %v2810_v44, %v8105_v20  ;;  %v5954_v20 = vld [vmem:[#allocation2 + $0x1b8] sm:$0xff]  ;;  %v5961_v44 = vld [vmem:[#allocation2 + $0x148] sm:$0xff]  ;;  %10883 = vst [vmem:[#allocation52_spill] sm:$0xff] %v8495_v24 }
 0x509   : > { %v2818_v54 = vmax.f32 %v2814_v56, 0.0 }
 0x50a   : > { %v2806_v9 = vpop.f32.mrf.mxu0 }
 0x50b   : > { %v2807_v30 = vadd.f32 %v2806_v9, %v2783_v8  ;;  %v5959_v8 = vld [vmem:[#allocation2 + $0x168] sm:$0xff]  ;;  %v5960_v9 = vld [vmem:[#allocation2 + $0x158] sm:$0xff] }
 0x50d   : > { %v2812_v28 = vmul.f32 %v2807_v30, %v8082_v51  ;;  %v5952_v51 = vld [vmem:[#allocation2 + $0x1d8] sm:$0xff]  ;;  %v8442_v56 = vpop.f32.mrf.mxu1 }
 0x50e   : > { %10874 = vst [vmem:[#allocation43_spill] sm:$0xff] %v8442_v56 }
 0x50f   : > { %v2816_v13 = vadd.f32 %v2812_v28, %v8100_v34  ;;  %v5953_v34 = vld [vmem:[#allocation2 + $0x1c8] sm:$0xff]  ;;  %v5962_v28 = vld [vmem:[#allocation2 + $0x138] sm:$0xff] }
 0x511   : > { %v2820_v11 = vmax.f32 %v2816_v13, 0.0  ;;  %v5957_v13 = vld [vmem:[#allocation2 + $0x188] sm:$0xff] }
 0x512   : > { %v8434_v33 = vpop.f32.mrf.mxu0 }
 0x513   : > { %3174 = vmatpush.msrb.mxu2 %v2820_v11  ;;  %10872 = vst [vmem:[#allocation41_spill] sm:$0xff] %v8434_v33  ;;  %v5956_v11 = vld [vmem:[#allocation2 + $0x198] sm:$0xff]  ;;  %v8505_v33 = vld [vmem:[#allocation2 + $0x328] sm:$0xff] }
 0x514   : > { %10887 = vst [vmem:[#allocation56_spill] sm:$0xff] %v8505_v33 }
 0x515   : > { %3175 = vmatpush.msrb.mxu2 %v2818_v54  ;;  %v8450_v30 = vpop.f32.mrf.mxu1 }
 0x516   : > { %5751 = vmatmul.msk.f32.vlgmr.msrb.gmra.mxu2 %vm497_vm0, %v8124_v58  ;;  %v5955_v58 = vld [vmem:[#allocation2 + $0x1a8] sm:$0xff] }
 0x517   : > { %3273 = vmatpush.msra.mxu2 %v5950_v14  ;;  %v5963_v14 = vld [vmem:[#allocation2 + $0x128] sm:$0xff] }
 0x519   : > { %3274 = vmatpush.msra.mxu2 %v5951_v25 }
 0x51a   : > { %v8440_v54 = vpop.f32.mrf.mxu0 }
 0x51b   : > { %3275 = vmatpush.msra.mxu2 %v5952_v51  ;;  %v5965_v51 = vld [vmem:[#allocation2 + $0x108] sm:$0xff] }
 0x51d   : > { %3276 = vmatpush.msra.mxu2 %v5953_v34  ;;  %v8454_v34 = vld [vmem:[#allocation2 + $0x3f8] sm:$0xff] }
 0x51e   : > { %5752 = vmatmul.msk.f32.gmra.mxu2 %vm497_vm0, %v8140_v6 }
 0x51f   : > { %3277 = vmatpush.msra.mxu2 %v5954_v20  ;;  %v8457_v20 = vld [vmem:[#allocation2 + $0x3e8] sm:$0xff] }
 0x521   : > { %3278 = vmatpush.msra.mxu2 %v5955_v58  ;;  %v8462_v58 = vld [vmem:[#allocation2 + $0x3d8] sm:$0xff] }
 0x522   : > { %v8446_v6 = vpop.f32.mrf.mxu0 }
 0x523   : > { %3279 = vmatpush.msra.mxu2 %v5956_v11  ;;  %10875 = vst [vmem:[#allocation44_spill] sm:$0xff] %v8446_v6  ;;  %v8465_v11 = vld [vmem:[#allocation2 + $0x3c8] sm:$0xff]  ;;  %v8508_v6 = vld [vmem:[#allocation2 + $0x318] sm:$0xff] }
 0x524   : > { %10888 = vst [vmem:[#allocation57_spill] sm:$0xff] %v8508_v6 }
 0x525   : > { %3280 = vmatpush.msra.mxu2 %v5957_v13 }
 0x526   : > { %5753 = vmatmul.msk.f32.gmra.mxu2 %vm497_vm0, %v8150_v53  ;;  %v5964_v53 = vld [vmem:[#allocation2 + $0x118] sm:$0xff] }
 0x527   : > { %3281 = vmatpush.msra.mxu2 %v5958_v22  ;;  %v8470_v22 = vld [vmem:[#allocation2 + $0x3b8] sm:$0xff] }
 0x529   : > { %3282 = vmatpush.msra.mxu2 %v5959_v8  ;;  %v8473_v8 = vld [vmem:[#allocation2 + $0x3a8] sm:$0xff] }
 0x52a   : > { %v8452_v25 = vpop.f32.mrf.mxu0 }
 0x52b   : > { %3283 = vmatpush.msra.mxu2 %v5960_v9  ;;  %v8476_v9 = vld [vmem:[#allocation2 + $0x398] sm:$0xff] }
 0x52d   : > { %3284 = vmatpush.msra.mxu2 %v5961_v44 }
 0x52e   : > { %5754 = vmatmul.msk.f32.gmra.mxu2 %vm497_vm0, %v8164_v49  ;;  %v8460_v49 = vpop.f32.mrf.mxu1 }
 0x52f   : > { %3285 = vmatpush.msra.mxu2 %v5962_v28  ;;  %v8481_v28 = vld [vmem:[#allocation2 + $0x388] sm:$0xff] }
 0x530   : > { %10878 = vst [vmem:[#allocation47_spill] sm:$0xff] %v8481_v28 }
 0x531   : > { %3286 = vmatpush.msra.mxu2 %v5963_v14 }
 0x533   : > { %3287 = vmatpush.msra.mxu2 %v5964_v53  ;;  %v8486_v53 = vld [vmem:[#allocation2 + $0x378] sm:$0xff] }
 0x534   : > { %10880 = vst [vmem:[#allocation49_spill] sm:$0xff] %v8486_v53 }
 0x535   : > { %3288 = vmatpush.msra.mxu2 %v5965_v51  ;;  %v8489_v51 = vld [vmem:[#allocation2 + $0x368] sm:$0xff] }
 0x536   : > { %v8479_v44 = vpop.f32.mrf.mxu1  ;;  %10881 = vst [vmem:[#allocation50_spill] sm:$0xff] %v8489_v51 }
 0x537   : > { %3353 = vmatpush.msrb.mxu2 %v8454_v34  ;;  %10877 = vst [vmem:[#allocation46_spill] sm:$0xff] %v8479_v44 }
 0x539   : > { %3354 = vmatpush.msrb.mxu2 %v8457_v20 }
 0x53b   : > { %3355 = vmatpush.msrb.mxu2 %v8462_v58 }
 0x53d   : > { %3356 = vmatpush.msrb.mxu2 %v8465_v11  ;;  %v8468_v13 = vpop.f32.mrf.mxu0 }
 0x53e   : > { %10876 = vst [vmem:[#allocation45_spill] sm:$0xff] %v8468_v13  ;;  %v8492_v13 = vld [vmem:[#allocation2 + $0x358] sm:$0xff]  ;;  %v8498_v44 = vpop.f32.mrf.mxu1 }
 0x53f   : > { %3357 = vmatpush.msrb.mxu2 %v8470_v22  ;;  %10882 = vst [vmem:[#allocation51_spill] sm:$0xff] %v8492_v13 }
 0x540   : > { %10884 = vst [vmem:[#allocation53_spill] sm:$0xff] %v8498_v44 }
 0x541   : > { %3358 = vmatpush.msrb.mxu2 %v8473_v8 }
 0x543   : > { %3359 = vmatpush.msrb.mxu2 %v8476_v9 }
 0x545   : > { %3360 = vmatpush.msrb.mxu2 %v8481_v28  ;;  %v8484_v14 = vpop.f32.mrf.mxu0 }
 0x546   : > { %10879 = vst [vmem:[#allocation48_spill] sm:$0xff] %v8484_v14  ;;  %v8502_v14 = vld [vmem:[#allocation2 + $0x338] sm:$0xff] }
 0x547   : > { %3361 = vmatpush.msrb.mxu2 %v8486_v53  ;;  %10886 = vst [vmem:[#allocation55_spill] sm:$0xff] %v8502_v14 }
 0x549   : > { %3362 = vmatpush.msrb.mxu2 %v8489_v51 }
 0x54b   : > { %3363 = vmatpush.msrb.mxu2 %v8492_v13  ;;  %v8511_v13 = vpop.permute.xlu2 %2916 }
 0x54d   : > { %3364 = vmatpush.msrb.mxu2 %v8495_v24  ;;  %v8500_v56 = vpop.f32.mrf.mxu0  ;;  %v8517_v24 = vpop.permute.xlu0 %2948 }
 0x54e   : > { %10885 = vst [vmem:[#allocation54_spill] sm:$0xff] %v8500_v56 }
 0x54f   : > { %3365 = vmatpush.msrb.mxu2 %v8502_v14  ;;  %v3072_v14 = vpop.f32.mrf.mxu1 }
 0x551   : > { %3366 = vmatpush.msrb.mxu2 %v8505_v33  ;;  %v3111_v33 = vmul.f32 %v3072_v14, %v8520_v0 }
 0x553   : > { %3367 = vmatpush.msrb.mxu2 %v8508_v6  ;;  %v8527_v6 = vpop.permute.xlu2 %2943 }
 0x555   : > { %3368 = vmatpush.msrb.mxu2 %v8513_v46  ;;  %v3157_v44 = vpop.f32.mrf.mxu0  ;;  %v6003_v46 = vld [vmem:[#allocation2 + $0x658] sm:$0xff] }
 0x556   : > { %v3195_v56 = vmul.f32 %v3157_v44, %v8511_v13  ;;  %v3119_v44 = vadd.f32 %v3111_v33, %v8527_v6 }
 0x557   : > { %v3075_v33 = vpop.f32.mrf.mxu1 }
 0x558   : > { %v3203_v51 = vadd.f32 %v3195_v56, %v8517_v24  ;;  %v8536_v56 = vmax.f32 %v3119_v44, 0.0  ;;  %v3113_v14 = vmul.f32 %v3075_v33, %v8511_v13 }
 0x55a   : > { %v8523_v53 = vmax.f32 %v3203_v51, 0.0  ;;  %10891 = vst [vmem:[#allocation60_spill] sm:$0xff] %v8536_v56  ;;  %v8557_v51 = vpop.f32.mrf.mxu2  ;;  %v3121_v44 = vadd.f32 %v3113_v14, %v8517_v24 }
 0x55b   : > { %10892 = vst [vmem:[#allocation61_spill] sm:$0xff] %v8557_v51  ;;  %v8578_v51 = vld [vmem:[#allocation2 + $0x6f0] sm:$0xff] }
 0x55c   : > { %10890 = vst [vmem:[#allocation59_spill] sm:$0xff] %v8523_v53  ;;  %3229 = vmatmul.f32.vlgmr.msrb.gmra.mxu1 %v8523_v53  ;;  %3269 = vmatmul.f32.vlgmr.msra.gmra.mxu0 %v8523_v53  ;;  %v8568_v33 = vmax.f32 %v3121_v44, 0.0  ;;  %v8581_v53 = vld [vmem:[#allocation2 + $0x6f8] sm:$0xff]  ;;  %v8584_v44 = vld [vmem:[#allocation2 + $0x6e0] sm:$0xff] }
 0x55d   : > { %3373 = vmatpush.msrb.mxu1 %v8233_v48  ;;  %3413 = vmatpush.msra.mxu0 %v8380_v43  ;;  %v6001_v43 = vld [vmem:[#allocation2 + $0x668] sm:$0xff] }
 0x55e   : > { %10893 = vst [vmem:[#allocation62_spill] sm:$0xff] %v8568_v33 }
 0x55f   : > { %3374 = vmatpush.msrb.mxu1 %v8237_v52  ;;  %3414 = vmatpush.msra.mxu0 %v8383_v47  ;;  %v6000_v47 = vld [vmem:[#allocation2 + $0x660] sm:$0xff] }
 0x561   : > { %3375 = vmatpush.msrb.mxu1 %v8242_v3  ;;  %3415 = vmatpush.msra.mxu0 %v8386_v4 }
 0x562   : > { %v8576_v14 = vpop.f32.mrf.mxu2 }
 0x563   : > { %3376 = vmatpush.msrb.mxu1 %v8245_v63  ;;  %3416 = vmatpush.msra.mxu0 %v8389_v55  ;;  %10895 = vst [vmem:[#allocation64_spill] sm:$0xff] %v8576_v14  ;;  %v5999_v55 = vld [vmem:[#allocation2 + $0x678] sm:$0xff]  ;;  %v8632_v14 = vpop.permute.xlu0 %2906 }
 0x564   : > { %3309 = vmatmul.f32.vlgmr.msra.gmra.mxu1 %v8536_v56  ;;  %3349 = vmatmul.f32.vlgmr.msrb.gmra.mxu0 %v8536_v56  ;;  %v8570_v56 = vpop.f32.mrf.mxu3  ;;  %10899 = vst [vmem:[#allocation68_spill] sm:$0xff] %v8632_v14 }
 0x565   : > { %3377 = vmatpush.msrb.mxu1 %v8250_v29  ;;  %3417 = vmatpush.msra.mxu0 %v8392_v16  ;;  %10894 = vst [vmem:[#allocation63_spill] sm:$0xff] %v8570_v56  ;;  %v8587_v56 = vld [vmem:[#allocation2 + $0x6e8] sm:$0xff]  ;;  %v5998_v16 = vld [vmem:[#allocation2 + $0x670] sm:$0xff] }
 0x567   : > { %3378 = vmatpush.msrb.mxu1 %v8253_v60  ;;  %3418 = vmatpush.msra.mxu0 %v8395_v15  ;;  %v8624_v15 = vld [vmem:[#allocation2 + $0x680] sm:$0xff]  ;;  %v6013_v60 = vld [vmem:[#allocation2 + $0x608] sm:$0xff] }
 0x569   : > { %3379 = vmatpush.msrb.mxu1 %v8258_v21  ;;  %3419 = vmatpush.msra.mxu0 %v8398_v31  ;;  %v8618_v31 = vld [vmem:[#allocation2 + $0x690] sm:$0xff] }
 0x56b   : > { %3380 = vmatpush.msrb.mxu1 %v8261_v7  ;;  %3420 = vmatpush.msra.mxu0 %v8401_v62  ;;  %v8615_v62 = vld [vmem:[#allocation2 + $0x6a8] sm:$0xff] }
 0x56c   : > { %v6009_v7 = vld [vmem:[#allocation2 + $0x628] sm:$0xff] }
 0x56d   : > { %3381 = vmatpush.msrb.mxu1 %v8266_v50  ;;  %3421 = vmatpush.msra.mxu0 %v8404_v5  ;;  %v8612_v5 = vld [vmem:[#allocation2 + $0x6a0] sm:$0xff] }
 0x56f   : > { %3382 = vmatpush.msrb.mxu1 %v8269_v59  ;;  %3422 = vmatpush.msra.mxu0 %v8407_v19  ;;  %v8610_v19 = vpop.f32.mrf.mxu2  ;;  %v6007_v59 = vld [vmem:[#allocation2 + $0x638] sm:$0xff] }
 0x570   : > { %10897 = vst [vmem:[#allocation66_spill] sm:$0xff] %v8610_v19  ;;  %v8627_v19 = vld [vmem:[#allocation2 + $0x688] sm:$0xff] }
 0x571   : > { %3383 = vmatpush.msrb.mxu1 %v8274_v2  ;;  %3423 = vmatpush.msra.mxu0 %v8410_v61  ;;  %v8607_v61 = vld [vmem:[#allocation2 + $0x6b8] sm:$0xff]  ;;  %v6006_v2 = vld [vmem:[#allocation2 + $0x630] sm:$0xff] }
 0x573   : > { %3384 = vmatpush.msrb.mxu1 %v8277_v45  ;;  %3424 = vmatpush.msra.mxu0 %v8413_v12  ;;  %v8604_v12 = vld [vmem:[#allocation2 + $0x6b0] sm:$0xff]  ;;  %v6005_v45 = vld [vmem:[#allocation2 + $0x648] sm:$0xff] }
 0x575   : > { %3385 = vmatpush.msrb.mxu1 %v8284_v18  ;;  %3425 = vmatpush.msra.mxu0 %v8416_v36  ;;  %v8602_v36 = vpop.f32.mrf.mxu3  ;;  %v6004_v18 = vld [vmem:[#allocation2 + $0x640] sm:$0xff] }
 0x576   : > { %10896 = vst [vmem:[#allocation65_spill] sm:$0xff] %v8602_v36  ;;  %v8621_v36 = vld [vmem:[#allocation2 + $0x698] sm:$0xff] }
 0x577   : > { %3386 = vmatpush.msrb.mxu1 %v8289_v17  ;;  %3426 = vmatpush.msra.mxu0 %v8419_v41  ;;  %v8599_v41 = vld [vmem:[#allocation2 + $0x6c8] sm:$0xff]  ;;  %v3027_v17 = vmul.f32 %v8440_v54, %v8632_v14  ;;  %v6010_v54 = vld [vmem:[#allocation2 + $0x610] sm:$0xff]  ;;  %v6011_v14 = vld [vmem:[#allocation2 + $0x618] sm:$0xff] }
 0x579   : > { %3387 = vmatpush.msrb.mxu1 %v8295_v32  ;;  %3427 = vmatpush.msra.mxu0 %v8422_v57  ;;  %v8596_v57 = vld [vmem:[#allocation2 + $0x6c0] sm:$0xff]  ;;  %v6002_v32 = vld [vmem:[#allocation2 + $0x650] sm:$0xff] }
 0x57b   : > { %3388 = vmatpush.msrb.mxu1 %v8299_v10  ;;  %3428 = vmatpush.msra.mxu0 %v8425_v23  ;;  %v8590_v23 = vld [vmem:[#allocation2 + $0x6d0] sm:$0xff]  ;;  %v8634_v10 = vpop.f32.mrf.mxu2 }
 0x57c   : > { %3389 = vmatmul.f32.vlgmr.msrb.gmra.mxu1 %v8568_v33  ;;  %3429 = vmatmul.f32.vlgmr.msra.gmra.mxu0 %v8568_v33  ;;  %v8593_v33 = vld [vmem:[#allocation2 + $0x6d8] sm:$0xff]  ;;  %10900 = vst [vmem:[#allocation69_spill] sm:$0xff] %v8634_v10  ;;  %v6008_v10 = vld [vmem:[#allocation2 + $0x620] sm:$0xff] }
 0x57d   : > { %3453 = vmatpush.msra.mxu1 %v8578_v51  ;;  %3493 = vmatpush.msrb.mxu0 %v8581_v53  ;;  %v8630_v4 = vpop.f32.mrf.mxu3 }
 0x57e   : > { %10898 = vst [vmem:[#allocation67_spill] sm:$0xff] %v8630_v4  ;;  %v8638_v4 = vpop.permute.xlu1 %2938 }
 0x57f   : > { %3454 = vmatpush.msra.mxu1 %v8584_v44  ;;  %3494 = vmatpush.msrb.mxu0 %v8587_v56  ;;  %v3035_v50 = vadd.f32 %v3027_v17, %v8638_v4 }
 0x581   : > { %3455 = vmatpush.msra.mxu1 %v8590_v23  ;;  %3495 = vmatpush.msrb.mxu0 %v8593_v33  ;;  %v8645_v28 = vmax.f32 %v3035_v50, 0.0 }
 0x583   : > { %3456 = vmatpush.msra.mxu1 %v8596_v57  ;;  %3496 = vmatpush.msrb.mxu0 %v8599_v41  ;;  %10902 = vst [vmem:[#allocation71_spill] sm:$0xff] %v8645_v28 }
 0x585   : > { %3457 = vmatpush.msra.mxu1 %v8604_v12  ;;  %3497 = vmatpush.msrb.mxu0 %v8607_v61  ;;  %v8641_v26 = vpop.f32.mrf.mxu3 }
 0x587   : > { %3458 = vmatpush.msra.mxu1 %v8612_v5  ;;  %3498 = vmatpush.msrb.mxu0 %v8615_v62 }
 0x589   : > { %3459 = vmatpush.msra.mxu1 %v8618_v31  ;;  %3499 = vmatpush.msrb.mxu0 %v8621_v36 }
 0x58b   : > { %3460 = vmatpush.msra.mxu1 %v8624_v15  ;;  %3500 = vmatpush.msrb.mxu0 %v8627_v19 }
 0x58d   : > { %3461 = vmatpush.msra.mxu1 %v5998_v16  ;;  %3501 = vmatpush.msrb.mxu0 %v5999_v55  ;;  %v8653_v17 = vpop.f32.mrf.mxu3 }
 0x58e   : > { %10903 = vst [vmem:[#allocation72_spill] sm:$0xff] %v8653_v17  ;;  %v6035_v17 = vld [vmem:[#allocation2 + $0x758] sm:$0xff] }
 0x58f   : > { %3462 = vmatpush.msra.mxu1 %v6000_v47  ;;  %3502 = vmatpush.msrb.mxu0 %v6001_v43 }
 0x591   : > { %3463 = vmatpush.msra.mxu1 %v6002_v32  ;;  %3503 = vmatpush.msrb.mxu0 %v6003_v46 }
 0x593   : > { %3464 = vmatpush.msra.mxu1 %v6004_v18  ;;  %3504 = vmatpush.msrb.mxu0 %v6005_v45 }
 0x595   : > { %3465 = vmatpush.msra.mxu1 %v6006_v2  ;;  %3505 = vmatpush.msrb.mxu0 %v6007_v59 }
 0x597   : > { %3466 = vmatpush.msra.mxu1 %v6008_v10  ;;  %3506 = vmatpush.msrb.mxu0 %v6009_v7 }
 0x599   : > { %v8643_v21 = vpop.f32.mrf.mxu2  ;;  %3467 = vmatpush.msra.mxu1 %v6010_v54  ;;  %3507 = vmatpush.msrb.mxu0 %v6011_v14 }
 0x59a   : > { %10901 = vst [vmem:[#allocation70_spill] sm:$0xff] %v8643_v21 }
 0x59b   : > { %3468 = vmatpush.msra.mxu1 %v6012_v27  ;;  %3508 = vmatpush.msrb.mxu0 %v6013_v60 }
 0x59c   : > { %3469 = vmatmul.f32.vlgmr.msra.gmra.mxu1 %v8645_v28  ;;  %3509 = vmatmul.f32.vlgmr.msrb.gmra.mxu0 %v8645_v28 }
 0x59d   : > { %3533 = vmatpush.msrb.mxu1 %v8578_v51  ;;  %3573 = vmatpush.msra.mxu0 %v8581_v53  ;;  %v8669_v53 = vpop.f32.mrf.mxu3 }
 0x59e   : > { %10905 = vst [vmem:[#allocation74_spill] sm:$0xff] %v8669_v53  ;;  %v6036_v53 = vld [vmem:[#allocation2 + $0x740] sm:$0xff] }
 0x59f   : > { %3534 = vmatpush.msrb.mxu1 %v8584_v44  ;;  %3574 = vmatpush.msra.mxu0 %v8587_v56  ;;  %v10929_v56 = vld [vmem:[#allocation54_spill] sm:$0xff] }
 0x5a0   : > { %v3193_v51 = vmul.f32 %v10929_v56, %v8520_v0  ;;  %v8796_v56 = vld [vmem:[#allocation2 + $0x7d8] sm:$0xff] }
 0x5a1   : > { %3535 = vmatpush.msrb.mxu1 %v8590_v23  ;;  %3575 = vmatpush.msra.mxu0 %v8593_v33  ;;  %v8657_v50 = vpop.f32.mrf.mxu2  ;;  %v10930_v33 = vld [vmem:[#allocation22_spill] sm:$0xff] }
 0x5a2   : > { %10904 = vst [vmem:[#allocation73_spill] sm:$0xff] %v8657_v50  ;;  %v6037_v50 = vld [vmem:[#allocation2 + $0x748] sm:$0xff] }
 0x5a3   : > { %3536 = vmatpush.msrb.mxu1 %v8596_v57  ;;  %3576 = vmatpush.msra.mxu0 %v8599_v41  ;;  %v10925_v41 = vld [vmem:[#allocation12_spill] sm:$0xff]  ;;  %v10926_v57 = vld [vmem:[#allocation17_spill] sm:$0xff] }
 0x5a5   : > { %3537 = vmatpush.msrb.mxu1 %v8604_v12  ;;  %3577 = vmatpush.msra.mxu0 %v8607_v61  ;;  %v2925_v61 = vmul.f32 %v8511_v13, %v8460_v49  ;;  %v10923_v12 = vld [vmem:[#allocation13_spill] sm:$0xff]  ;;  %v10928_v49 = vld [vmem:[#allocation11_spill] sm:$0xff] }
 0x5a7   : > { %3538 = vmatpush.msrb.mxu1 %v8612_v5  ;;  %3578 = vmatpush.msra.mxu0 %v8615_v62 }
 0x5a9   : > { %3539 = vmatpush.msrb.mxu1 %v8618_v31  ;;  %3579 = vmatpush.msra.mxu0 %v8621_v36  ;;  %v8667_v23 = vpop.f32.mrf.mxu2  ;;  %v3031_v31 = vmul.f32 %v8452_v25, %v8511_v13  ;;  %v10924_v36 = vld [vmem:[#allocation52_spill] sm:$0xff]  ;;  %v10927_v25 = vld [vmem:[#allocation55_spill] sm:$0xff] }
 0x5ab   : > { %3540 = vmatpush.msrb.mxu1 %v8624_v15  ;;  %3580 = vmatpush.msra.mxu0 %v8627_v19  ;;  %v3101_v19 = vpop.f32.mrf.mxu3 }
 0x5ad   : > { %3541 = vmatpush.msrb.mxu1 %v5998_v16  ;;  %3581 = vmatpush.msra.mxu0 %v5999_v55  ;;  %v10921_v55 = vld [vmem:[#allocation51_spill] sm:$0xff]  ;;  %v10922_v16 = vld [vmem:[#allocation16_spill] sm:$0xff] }
 0x5af   : > { %3542 = vmatpush.msrb.mxu1 %v6000_v47  ;;  %3582 = vmatpush.msra.mxu0 %v6001_v43  ;;  %v3039_v43 = vadd.f32 %v3031_v31, %v8517_v24 }
 0x5b1   : > { %3543 = vmatpush.msrb.mxu1 %v6002_v32  ;;  %3583 = vmatpush.msra.mxu0 %v6003_v46  ;;  %v3186_v5 = vpop.f32.mrf.mxu2  ;;  %v2923_v32 = vmul.f32 %v8520_v0, %v8450_v30 }
 0x5b2   : > { %v3196_v62 = vmul.f32 %v3186_v5, %v8511_v13  ;;  %v10933_v5 = vld [vmem:[#allocation7_spill] sm:$0xff] }
 0x5b3   : > { %3544 = vmatpush.msrb.mxu1 %v6004_v18  ;;  %3584 = vmatpush.msra.mxu0 %v6005_v45  ;;  %v2957_v18 = vadd.f32 %v8517_v24, %v2925_v61  ;;  %v3112_v45 = vmul.f32 %v3101_v19, %v8520_v0  ;;  %v10936_v61 = vld [vmem:[#allocation57_spill] sm:$0xff]  ;;  %v3201_v19 = vadd.f32 %v3193_v51, %v8527_v6 }
 0x5b4   : > { %v3204_v15 = vadd.f32 %v3196_v62, %v8517_v24  ;;  %v10934_v62 = vld [vmem:[#allocation23_spill] sm:$0xff]  ;;  %v8799_v51 = vld [vmem:[#allocation2 + $0x7c0] sm:$0xff] }
 0x5b5   : > { %3545 = vmatpush.msrb.mxu1 %v6006_v2  ;;  %3585 = vmatpush.msra.mxu0 %v6007_v59  ;;  %v2955_v59 = vadd.f32 %v8527_v6, %v2923_v32  ;;  %v8691_v2 = vmax.f32 %v3039_v43, 0.0  ;;  %v10938_v32 = vld [vmem:[#allocation24_spill] sm:$0xff] }
 0x5b6   : > { %v8681_v46 = vmax.f32 %v3204_v15, 0.0  ;;  %v10937_v15 = vld [vmem:[#allocation5_spill] sm:$0xff] }
 0x5b7   : > { %3546 = vmatpush.msrb.mxu1 %v6008_v10  ;;  %3586 = vmatpush.msra.mxu0 %v6009_v7  ;;  %v8695_v7 = vmax.f32 %v2957_v18, 0.0  ;;  %v3120_v10 = vadd.f32 %v3112_v45, %v8527_v6  ;;  %v10939_v18 = vld [vmem:[#allocation58_spill] sm:$0xff]  ;;  %v8761_v45 = vpop.permute.xlu2 %2901 }
 0x5b8   : > { %10906 = vst [vmem:[#allocation75_spill] sm:$0xff] %v8681_v46  ;;  %3249 = vmatmul.f32.vlgmr.msra.gmra.mxu3 %v8681_v46  ;;  %3289 = vmatmul.f32.vlgmr.msra.gmra.mxu2 %v8681_v46  ;;  %v6039_v46 = vld [vmem:[#allocation2 + $0x738] sm:$0xff] }
 0x5b9   : > { %3393 = vmatpush.msra.mxu3 %v8310_v37  ;;  %3433 = vmatpush.msra.mxu2 %v8454_v34  ;;  %10907 = vst [vmem:[#allocation76_spill] sm:$0xff] %v8695_v7  ;;  %v8700_v37 = vmax.f32 %v2955_v59, 0.0  ;;  %v8764_v59 = vld [vmem:[#allocation2 + $0x7f0] sm:$0xff] }
 0x5ba   : > { %3547 = vmatpush.msrb.mxu1 %v6010_v54  ;;  %3587 = vmatpush.msra.mxu0 %v6011_v14  ;;  %v10931_v14 = vld [vmem:[#allocation44_spill] sm:$0xff] }
 0x5bb   : > { %3394 = vmatpush.msra.mxu3 %v8315_v40  ;;  %3434 = vmatpush.msra.mxu2 %v8457_v20  ;;  %10908 = vst [vmem:[#allocation77_spill] sm:$0xff] %v8700_v37  ;;  %v8706_v40 = vmax.f32 %v3120_v10, 0.0  ;;  %v3029_v44 = vmul.f32 %v10931_v14, %v8520_v0  ;;  %v10932_v54 = vld [vmem:[#allocation56_spill] sm:$0xff]  ;;  %v10940_v10 = vld [vmem:[#allocation41_spill] sm:$0xff]  ;;  %v8804_v14 = vld [vmem:[#allocation2 + $0x7c8] sm:$0xff] }
 0x5bc   : > { %3548 = vmatpush.msrb.mxu1 %v6012_v27  ;;  %3588 = vmatpush.msra.mxu0 %v6013_v60  ;;  %v10913_v60 = vld [vmem:[#allocation20_spill] sm:$0xff]  ;;  %v10920_v27 = vld [vmem:[#allocation18_spill] sm:$0xff] }
 0x5bd   : > { %3549 = vmatmul.f32.vlgmr.msrb.gmra.mxu1 %v8691_v2  ;;  %3589 = vmatmul.f32.vlgmr.msra.gmra.mxu0 %v8691_v2  ;;  %10909 = vst [vmem:[#allocation78_spill] sm:$0xff] %v8706_v40  ;;  %v3037_v43 = vadd.f32 %v3029_v44, %v8527_v6  ;;  %v8807_v44 = vld [vmem:[#allocation2 + $0x7b0] sm:$0xff] }
 0x5be   : > { %3625 = vmatpush.msra.mxu1 %v8695_v7  ;;  %3676 = vmatpush.msrb.mxu0 %v8233_v48  ;;  %v10910_v48 = vld [vmem:[#allocation21_spill] sm:$0xff] }
 0x5bf   : > { %3395 = vmatpush.msra.mxu3 %v8318_v42  ;;  %3435 = vmatpush.msra.mxu2 %v8462_v58  ;;  %v10914_v42 = vld [vmem:[#allocation9_spill] sm:$0xff] }
 0x5c0   : > { %3626 = vmatpush.msra.mxu1 %v8700_v37  ;;  %3677 = vmatpush.msrb.mxu0 %v8237_v52  ;;  %v10911_v52 = vld [vmem:[#allocation10_spill] sm:$0xff] }
 0x5c1   : > { %3396 = vmatpush.msra.mxu3 %v8321_v38  ;;  %3436 = vmatpush.msra.mxu2 %v8465_v11  ;;  %v10916_v38 = vld [vmem:[#allocation19_spill] sm:$0xff] }
 0x5c2   : > { %3678 = vmatpush.msrb.mxu0 %v8242_v3  ;;  %3329 = vmatmul.f32.vlgmr.msrb.gmra.mxu3 %v8706_v40  ;;  %v10912_v3 = vld [vmem:[#allocation47_spill] sm:$0xff] }
 0x5c3   : > { %3369 = vmatmul.f32.vlgmr.msrb.gmra.mxu2 %v8706_v40  ;;  %3397 = vmatpush.msra.mxu3 %v8324_v1  ;;  %v3104_v1 = vpop.f32.mrf.mxu3 }
 0x5c4   : > { %3437 = vmatpush.msra.mxu2 %v8470_v22  ;;  %3679 = vmatpush.msrb.mxu0 %v8245_v63  ;;  %v10915_v63 = vld [vmem:[#allocation49_spill] sm:$0xff]  ;;  %v3114_v47 = vmul.f32 %v3104_v1, %v8511_v13  ;;  %v10943_v1 = vld [vmem:[#allocation43_spill] sm:$0xff] }
 0x5c5   : > { %3398 = vmatpush.msra.mxu3 %v8329_v35  ;;  %v10918_v35 = vld [vmem:[#allocation50_spill] sm:$0xff] }
 0x5c6   : > { %3438 = vmatpush.msra.mxu2 %v8473_v8  ;;  %3680 = vmatpush.msrb.mxu0 %v8250_v29  ;;  %v10917_v29 = vld [vmem:[#allocation14_spill] sm:$0xff]  ;;  %v3122_v30 = vadd.f32 %v3114_v47, %v8517_v24 }
 0x5c7   : > { %3399 = vmatpush.msra.mxu3 %v8332_v39  ;;  %v10919_v39 = vld [vmem:[#allocation15_spill] sm:$0xff]  ;;  %v8782_v47 = vld [vmem:[#allocation2 + $0x7e8] sm:$0xff] }
 0x5c8   : > { %3439 = vmatpush.msra.mxu2 %v8476_v9  ;;  %3681 = vmatpush.msrb.mxu0 %v10910_v48  ;;  %v8752_v31 = vmax.f32 %v3122_v30, 0.0  ;;  %v3025_v48 = vmul.f32 %v10940_v10, %v8761_v45  ;;  %v6026_v10 = vld [vmem:[#allocation2 + $0x790] sm:$0xff] }
 0x5c9   : > { %3400 = vmatpush.msra.mxu3 %v10911_v52  ;;  %v8769_v52 = vld [vmem:[#allocation2 + $0x7f8] sm:$0xff] }
 0x5ca   : > { %3440 = vmatpush.msra.mxu2 %v10912_v3  ;;  %3682 = vmatpush.msrb.mxu0 %v10913_v60  ;;  %10935 = vst [vmem:[#allocation21_spill] sm:$0xff] %v8752_v31  ;;  %v10941_v60 = vld [vmem:[#allocation6_spill] sm:$0xff] }
 0x5cb   : > { %3401 = vmatpush.msra.mxu3 %v10914_v42  ;;  %v8773_v42 = vmax.f32 %v3201_v19, 0.0  ;;  %v8817_v19 = vld [vmem:[#allocation2 + $0x7a0] sm:$0xff] }
 0x5cc   : > { %3441 = vmatpush.msra.mxu2 %v10915_v63  ;;  %3683 = vmatpush.msrb.mxu0 %v10916_v38  ;;  %v8775_v38 = vld [vmem:[#allocation2 + $0x7e0] sm:$0xff] }
 0x5cd   : > { %3402 = vmatpush.msra.mxu3 %v10917_v29  ;;  %10942 = vst [vmem:[#allocation10_spill] sm:$0xff] %v8773_v42  ;;  %v10944_v29 = vld [vmem:[#allocation68_spill] sm:$0xff] }
 0x5ce   : > { %3442 = vmatpush.msra.mxu2 %v10918_v35  ;;  %3684 = vmatpush.msrb.mxu0 %v10919_v39  ;;  %v2921_v39 = vmul.f32 %v10944_v29, %v10943_v1  ;;  %v6028_v1 = vld [vmem:[#allocation2 + $0x780] sm:$0xff] }
 0x5cf   : > { %3403 = vmatpush.msra.mxu3 %v10920_v27  ;;  %v8780_v27 = vmax.f32 %v3037_v43, 0.0  ;;  %v6025_v43 = vld [vmem:[#allocation2 + $0x7a8] sm:$0xff] }
 0x5d0   : > { %3443 = vmatpush.msra.mxu2 %v10921_v55  ;;  %3685 = vmatpush.msrb.mxu0 %v10922_v16  ;;  %v10945_v16 = vld [vmem:[#allocation8_spill] sm:$0xff]  ;;  %v6045_v55 = vld [vmem:[#allocation2 + $0x708] sm:$0xff] }
 0x5d1   : > { %3404 = vmatpush.msra.mxu3 %v10923_v12  ;;  %v8786_v12 = vpop.permute.xlu0 %2933 }
 0x5d2   : > { %3444 = vmatpush.msra.mxu2 %v10924_v36  ;;  %3686 = vmatpush.msrb.mxu0 %v10925_v41  ;;  %v8789_v41 = vld [vmem:[#allocation2 + $0x7d0] sm:$0xff]  ;;  %v6044_v36 = vld [vmem:[#allocation2 + $0x700] sm:$0xff] }
 0x5d3   : > { %3405 = vmatpush.msra.mxu3 %v10926_v57  ;;  %v10946_v57 = vld [vmem:[#allocation42_spill] sm:$0xff] }
 0x5d4   : > { %3445 = vmatpush.msra.mxu2 %v10927_v25  ;;  %3687 = vmatpush.msrb.mxu0 %v10928_v49  ;;  %v2919_v30 = vmul.f32 %v8761_v45, %v10946_v57  ;;  %v3033_v49 = vadd.f32 %v3025_v48, %v8786_v12  ;;  %v6030_v57 = vld [vmem:[#allocation2 + $0x770] sm:$0xff] }
 0x5d5   : > { %3406 = vmatpush.msra.mxu3 %v10930_v33  ;;  %v2953_v33 = vadd.f32 %v8638_v4, %v2921_v39  ;;  %v6029_v39 = vld [vmem:[#allocation2 + $0x788] sm:$0xff] }
 0x5d6   : > { %3446 = vmatpush.msra.mxu2 %v10932_v54  ;;  %3688 = vmatpush.msrb.mxu0 %v10933_v5  ;;  %v2951_v5 = vadd.f32 %v8786_v12, %v2919_v30  ;;  %v6031_v30 = vld [vmem:[#allocation2 + $0x778] sm:$0xff]  ;;  %v6042_v54 = vld [vmem:[#allocation2 + $0x710] sm:$0xff] }
 0x5d7   : > { %3407 = vmatpush.msra.mxu3 %v10934_v62  ;;  %v8811_v62 = vmax.f32 %v3033_v49, 0.0  ;;  %v6032_v49 = vld [vmem:[#allocation2 + $0x760] sm:$0xff] }
 0x5d8   : > { %3447 = vmatpush.msra.mxu2 %v10936_v61  ;;  %3689 = vmatpush.msrb.mxu0 %v10937_v15  ;;  %v8814_v15 = vld [vmem:[#allocation2 + $0x7b8] sm:$0xff]  ;;  %v8823_v48 = vmax.f32 %v2951_v5, 0.0  ;;  %v6034_v5 = vld [vmem:[#allocation2 + $0x750] sm:$0xff]  ;;  %v6041_v61 = vld [vmem:[#allocation2 + $0x728] sm:$0xff] }
 0x5d9   : > { %3408 = vmatpush.msra.mxu3 %v10938_v32  ;;  %v8820_v32 = vmax.f32 %v2953_v33, 0.0  ;;  %v6033_v33 = vld [vmem:[#allocation2 + $0x768] sm:$0xff] }
 0x5da   : > { %3448 = vmatpush.msra.mxu2 %v10939_v18  ;;  %3409 = vmatmul.f32.vlgmr.msra.gmra.mxu3 %v8752_v31  ;;  %10948 = vst [vmem:[#allocation20_spill] sm:$0xff] %v8823_v48  ;;  %v6040_v18 = vld [vmem:[#allocation2 + $0x720] sm:$0xff] }
 0x5db   : > { %3449 = vmatmul.f32.vlgmr.msra.gmra.mxu2 %v8752_v31  ;;  %3473 = vmatpush.msrb.mxu3 %v8764_v59  ;;  %10947 = vst [vmem:[#allocation47_spill] sm:$0xff] %v8820_v32  ;;  %v10949_v31 = vld [vmem:[#allocation64_spill] sm:$0xff] }
 0x5dc   : > { %3513 = vmatpush.msrb.mxu2 %v8769_v52  ;;  %3690 = vmatpush.msrb.mxu0 %v10941_v60  ;;  %v6027_v60 = vld [vmem:[#allocation2 + $0x798] sm:$0xff]  ;;  %v3028_v21 = vmul.f32 %v10949_v31, %v10944_v29 }
 0x5dd   : > { %3474 = vmatpush.msrb.mxu3 %v8775_v38  ;;  %v6043_v31 = vld [vmem:[#allocation2 + $0x718] sm:$0xff] }
 0x5de   : > { %3514 = vmatpush.msrb.mxu2 %v8782_v47  ;;  %3691 = vmatpush.msrb.mxu0 %v10945_v16  ;;  %v3036_v40 = vadd.f32 %v3028_v21, %v8638_v4  ;;  %v10951_v21 = vld [vmem:[#allocation69_spill] sm:$0xff] }
 0x5df   : > { %3692 = vmatmul.f32.vlgmr.msrb.gmra.mxu0 %v8773_v42  ;;  %3475 = vmatpush.msrb.mxu3 %v8789_v41 }
 0x5e0   : > { %3763 = vmatpush.msra.mxu0 %v8780_v27  ;;  %3515 = vmatpush.msrb.mxu2 %v8796_v56  ;;  %v8830_v25 = vmax.f32 %v3036_v40, 0.0  ;;  %v3032_v40 = vmul.f32 %v10951_v21, %v8511_v13  ;;  %v6056_v21 = vld [vmem:[#allocation2 + $0x250] sm:$0xff] }
 0x5e1   : > { %3476 = vmatpush.msrb.mxu3 %v8799_v51 }
 0x5e2   : > { %3764 = vmatpush.msra.mxu0 %v8695_v7  ;;  %3516 = vmatpush.msrb.mxu2 %v8804_v14  ;;  %10950 = vst [vmem:[#allocation9_spill] sm:$0xff] %v8830_v25 }
 0x5e3   : > { %3477 = vmatpush.msrb.mxu3 %v8807_v44 }
 0x5e4   : > { %3765 = vmatpush.msra.mxu0 %v8700_v37  ;;  %3517 = vmatpush.msrb.mxu2 %v8814_v15  ;;  %v6038_v37 = vld [vmem:[#allocation2 + $0x730] sm:$0xff] }
 0x5e5   : > { %3478 = vmatpush.msrb.mxu3 %v8817_v19 }
 0x5e6   : > { %3766 = vmatpush.msra.mxu0 %v8811_v62  ;;  %3518 = vmatpush.msrb.mxu2 %v6025_v43 }
 0x5e7   : > { %3479 = vmatpush.msrb.mxu3 %v6026_v10 }
 0x5e8   : > { %3767 = vmatpush.msra.mxu0 %v8820_v32  ;;  %3519 = vmatpush.msrb.mxu2 %v6027_v60 }
 0x5e9   : > { %3480 = vmatpush.msrb.mxu3 %v6028_v1 }
 0x5ea   : > { %3768 = vmatpush.msra.mxu0 %v8823_v48  ;;  %3520 = vmatpush.msrb.mxu2 %v6029_v39 }
 0x5eb   : > { %3481 = vmatpush.msrb.mxu3 %v6030_v57 }
 0x5ec   : > { %3521 = vmatpush.msrb.mxu2 %v6031_v30 }
 0x5ed   : > { %3482 = vmatpush.msrb.mxu3 %v6032_v49 }
 0x5ee   : > { %3522 = vmatpush.msrb.mxu2 %v6033_v33 }
 0x5ef   : > { %3483 = vmatpush.msrb.mxu3 %v6034_v5 }
 0x5f0   : > { %3523 = vmatpush.msrb.mxu2 %v6035_v17 }
 0x5f1   : > { %3484 = vmatpush.msrb.mxu3 %v6036_v53 }
 0x5f2   : > { %3524 = vmatpush.msrb.mxu2 %v6037_v50 }
 0x5f3   : > { %3485 = vmatpush.msrb.mxu3 %v6038_v37 }
 0x5f4   : > { %3525 = vmatpush.msrb.mxu2 %v6039_v46 }
 0x5f5   : > { %3486 = vmatpush.msrb.mxu3 %v6040_v18 }
 0x5f6   : > { %3526 = vmatpush.msrb.mxu2 %v6041_v61 }
 0x5f7   : > { %3487 = vmatpush.msrb.mxu3 %v6042_v54 }
 0x5f8   : > { %3527 = vmatpush.msrb.mxu2 %v6043_v31 }
 0x5f9   : > { %3488 = vmatpush.msrb.mxu3 %v6044_v36 }
 0x5fa   : > { %3528 = vmatpush.msrb.mxu2 %v6045_v55  ;;  %3489 = vmatmul.f32.vlgmr.msrb.gmra.mxu3 %v8830_v25 }
 0x5fb   : > { %3529 = vmatmul.f32.vlgmr.msrb.gmra.mxu2 %v8830_v25  ;;  %3553 = vmatpush.msra.mxu3 %v8764_v59  ;;  %v2926_v59 = vmul.f32 %v8511_v13, %v8641_v26 }
 0x5fc   : > { %3593 = vmatpush.msra.mxu2 %v8769_v52  ;;  %v10952_v52 = vld [vmem:[#allocation67_spill] sm:$0xff] }
 0x5fd   : > { %3554 = vmatpush.msra.mxu3 %v8775_v38  ;;  %v2924_v38 = vmul.f32 %v8520_v0, %v10952_v52  ;;  %v6059_v52 = vld [vmem:[#allocation2 + $0x220] sm:$0xff] }
 0x5fe   : > { %3594 = vmatpush.msra.mxu2 %v8782_v47  ;;  %v3040_v47 = vadd.f32 %v3032_v40, %v8517_v24  ;;  %v6057_v40 = vld [vmem:[#allocation2 + $0x240] sm:$0xff] }
 0x5ff   : > { %3555 = vmatpush.msra.mxu3 %v8789_v41  ;;  %v2958_v41 = vadd.f32 %v8517_v24, %v2926_v59  ;;  %v10955_v24 = vld [vmem:[#allocation25_spill] sm:$0xff]  ;;  %v6058_v59 = vld [vmem:[#allocation2 + $0x230] sm:$0xff] }
 0x600   : > { %3595 = vmatpush.msra.mxu2 %v8796_v56  ;;  %v2956_v56 = vadd.f32 %v8527_v6, %v2924_v38  ;;  %v6060_v38 = vld [vmem:[#allocation2 + $0x210] sm:$0xff] }
 0x601   : > { %3556 = vmatpush.msra.mxu3 %v8799_v51  ;;  %v8856_v26 = vmax.f32 %v2958_v41, 0.0  ;;  %v10965_v51 = vld [vmem:[#allocation35_spill] sm:$0xff]  ;;  %v3230_v41 = vpop.f32.mrf.mxu1 }
 0x602   : > { %3596 = vmatpush.msra.mxu2 %v8804_v14  ;;  %v8859_v13 = vmax.f32 %v2956_v56, 0.0  ;;  %v10966_v14 = vld [vmem:[#allocation36_spill] sm:$0xff] }
 0x603   : > { %3557 = vmatpush.msra.mxu3 %v8807_v44  ;;  %10954 = vst [vmem:[#allocation19_spill] sm:$0xff] %v8856_v26  ;;  %v10967_v44 = vld [vmem:[#allocation37_spill] sm:$0xff] }
 0x604   : > { %3597 = vmatpush.msra.mxu2 %v8814_v15  ;;  %v10968_v15 = vld [vmem:[#allocation38_spill] sm:$0xff] }
 0x605   : > { %3558 = vmatpush.msra.mxu3 %v8817_v19  ;;  %v10969_v19 = vld [vmem:[#allocation39_spill] sm:$0xff] }
 0x606   : > { %3598 = vmatpush.msra.mxu2 %v6025_v43  ;;  %v10970_v43 = vld [vmem:[#allocation40_spill] sm:$0xff] }
 0x607   : > { %3559 = vmatpush.msra.mxu3 %v6026_v10  ;;  %v6046_v10 = vld [vmem:[#allocation2 + $0x2f0] sm:$0xff] }
 0x608   : > { %3599 = vmatpush.msra.mxu2 %v6027_v60  ;;  %v6047_v60 = vld [vmem:[#allocation2 + $0x2e0] sm:$0xff] }
 0x609   : > { %3560 = vmatpush.msra.mxu3 %v6028_v1  ;;  %v6048_v1 = vld [vmem:[#allocation2 + $0x2d0] sm:$0xff] }
 0x60a   : > { %3600 = vmatpush.msra.mxu2 %v6029_v39  ;;  %v6049_v39 = vld [vmem:[#allocation2 + $0x2c0] sm:$0xff] }
 0x60b   : > { %3561 = vmatpush.msra.mxu3 %v6030_v57  ;;  %v6050_v57 = vld [vmem:[#allocation2 + $0x2b0] sm:$0xff] }
 0x60c   : > { %3601 = vmatpush.msra.mxu2 %v6031_v30  ;;  %v6051_v30 = vld [vmem:[#allocation2 + $0x2a0] sm:$0xff] }
 0x60d   : > { %3562 = vmatpush.msra.mxu3 %v6032_v49  ;;  %v6052_v49 = vld [vmem:[#allocation2 + $0x290] sm:$0xff] }
 0x60e   : > { %3602 = vmatpush.msra.mxu2 %v6033_v33  ;;  %v6053_v33 = vld [vmem:[#allocation2 + $0x280] sm:$0xff] }
 0x60f   : > { %3563 = vmatpush.msra.mxu3 %v6034_v5  ;;  %v6054_v5 = vld [vmem:[#allocation2 + $0x270] sm:$0xff] }
 0x610   : > { %3603 = vmatpush.msra.mxu2 %v6035_v17  ;;  %v8854_v17 = vmax.f32 %v3040_v47, 0.0  ;;  %v10971_v47 = vld [vmem:[#allocation59_spill] sm:$0xff] }
 0x611   : > { %3564 = vmatpush.msra.mxu3 %v6036_v53  ;;  %v10957_v53 = vld [vmem:[#allocation27_spill] sm:$0xff] }
 0x612   : > { %3604 = vmatpush.msra.mxu2 %v6037_v50  ;;  %10953 = vst [vmem:[#allocation49_spill] sm:$0xff] %v8854_v17  ;;  %v10956_v50 = vld [vmem:[#allocation26_spill] sm:$0xff] }
 0x613   : > { %3565 = vmatpush.msra.mxu3 %v6038_v37  ;;  %v10959_v37 = vld [vmem:[#allocation29_spill] sm:$0xff] }
 0x614   : > { %3605 = vmatpush.msra.mxu2 %v6039_v46  ;;  %v10958_v46 = vld [vmem:[#allocation28_spill] sm:$0xff] }
 0x615   : > { %3566 = vmatpush.msra.mxu3 %v6040_v18  ;;  %v10964_v18 = vld [vmem:[#allocation34_spill] sm:$0xff] }
 0x616   : > { %3606 = vmatpush.msra.mxu2 %v6041_v61  ;;  %v10963_v61 = vld [vmem:[#allocation33_spill] sm:$0xff] }
 0x617   : > { %3567 = vmatpush.msra.mxu3 %v6042_v54  ;;  %v10962_v54 = vld [vmem:[#allocation32_spill] sm:$0xff] }
 0x618   : > { %3607 = vmatpush.msra.mxu2 %v6043_v31  ;;  %v6055_v31 = vld [vmem:[#allocation2 + $0x260] sm:$0xff] }
 0x619   : > { %3568 = vmatpush.msra.mxu3 %v6044_v36  ;;  %v10961_v36 = vld [vmem:[#allocation31_spill] sm:$0xff] }
 0x61a   : > { %3608 = vmatpush.msra.mxu2 %v6045_v55  ;;  %3569 = vmatmul.f32.vlgmr.msra.gmra.mxu3 %v8854_v17  ;;  %v10960_v55 = vld [vmem:[#allocation30_spill] sm:$0xff] }
 0x61b   : > { %3609 = vmatmul.f32.vlgmr.msra.gmra.mxu2 %v8854_v17  ;;  %3645 = vmatpush.msrb.mxu3 %v8856_v26 }
 0x61c   : > { %3716 = vmatpush.msrb.mxu2 %v10955_v24  ;;  %v3270_v24 = vpop.f32.mrf.mxu0 }
 0x61d   : > { %3646 = vmatpush.msrb.mxu3 %v8859_v13 }
 0x61e   : > { %3717 = vmatpush.msrb.mxu2 %v10956_v50 }
 0x620   : > { %3718 = vmatpush.msrb.mxu2 %v10957_v53  ;;  %v3310_v53 = vpop.f32.mrf.mxu1 }
 0x622   : > { %3719 = vmatpush.msrb.mxu2 %v10958_v46 }
 0x624   : > { %3720 = vmatpush.msrb.mxu2 %v10959_v37  ;;  %v3350_v46 = vpop.f32.mrf.mxu0 }
 0x626   : > { %3721 = vmatpush.msrb.mxu2 %v10960_v55 }
 0x628   : > { %3722 = vmatpush.msrb.mxu2 %v10961_v36  ;;  %v3390_v55 = vpop.f32.mrf.mxu1 }
 0x62a   : > { %3723 = vmatpush.msrb.mxu2 %v10962_v54 }
 0x62c   : > { %3724 = vmatpush.msrb.mxu2 %v10963_v61  ;;  %v3430_v54 = vpop.f32.mrf.mxu0 }
 0x62e   : > { %3725 = vmatpush.msrb.mxu2 %v10964_v18 }
 0x630   : > { %3726 = vmatpush.msrb.mxu2 %v10965_v51  ;;  %v3470_v18 = vpop.f32.mrf.mxu1 }
 0x632   : > { %3727 = vmatpush.msrb.mxu2 %v10966_v14 }
 0x634   : > { %3728 = vmatpush.msrb.mxu2 %v10967_v44  ;;  %v3510_v14 = vpop.f32.mrf.mxu0 }
 0x636   : > { %3729 = vmatpush.msrb.mxu2 %v10968_v15  ;;  %v10972_v15 = vld [vmem:[#allocation65_spill] sm:$0xff] }
 0x638   : > { %3730 = vmatpush.msrb.mxu2 %v10969_v19  ;;  %v2922_v19 = vmul.f32 %v10944_v29, %v10972_v15 }
 0x63a   : > { %3731 = vmatpush.msrb.mxu2 %v10970_v43  ;;  %v10973_v43 = vld [vmem:[#allocation63_spill] sm:$0xff] }
 0x63b   : > { %3732 = vmatmul.f32.vlgmr.msrb.gmra.mxu2 %v8773_v42  ;;  %v3250_v56 = vpop.f32.mrf.mxu3  ;;  %v3290_v50 = vpop.f32.mrf.mxu2  ;;  %v9111_v42 = vld [vmem:[#allocation2 + $0xa78] sm:$0xff] }
 0x63c   : > { %3802 = vmatpush.msra.mxu2 %v6046_v10  ;;  %v2920_v10 = vmul.f32 %v8761_v45, %v10973_v43  ;;  %11004 = vst [vmem:[#allocation68_spill] sm:$0xff] %v9111_v42 }
 0x63e   : > { %3803 = vmatpush.msra.mxu2 %v6047_v60  ;;  %v2954_v60 = vadd.f32 %v8638_v4, %v2922_v19  ;;  %v10985_v19 = vld [vmem:[#allocation61_spill] sm:$0xff] }
 0x63f   : > { %v3026_v43 = vmul.f32 %v10985_v19, %v8761_v45  ;;  %v6087_v19 = vld [vmem:[#allocation2 + $0x3c8] sm:$0xff] }
 0x640   : > { %3804 = vmatpush.msra.mxu2 %v6048_v1  ;;  %v3550_v1 = vpop.f32.mrf.mxu1 }
 0x642   : > { %3805 = vmatpush.msra.mxu2 %v6049_v39 }
 0x644   : > { %3806 = vmatpush.msra.mxu2 %v6050_v57  ;;  %v3590_v57 = vpop.f32.mrf.mxu0 }
 0x646   : > { %3807 = vmatpush.msra.mxu2 %v6051_v30  ;;  %v3370_v37 = vpop.f32.mrf.mxu2 }
 0x648   : > { %3808 = vmatpush.msra.mxu2 %v6052_v49 }
 0x64a   : > { %3809 = vmatpush.msra.mxu2 %v6053_v33  ;;  %v2952_v33 = vadd.f32 %v8786_v12, %v2920_v10 }
 0x64c   : > { %3810 = vmatpush.msra.mxu2 %v6054_v5 }
 0x64e   : > { %3811 = vmatpush.msra.mxu2 %v6055_v31  ;;  %v8900_v31 = vmax.f32 %v2954_v60, 0.0  ;;  %v10987_v60 = vld [vmem:[#allocation57_spill] sm:$0xff] }
 0x650   : > { %3812 = vmatpush.msra.mxu2 %v6056_v21  ;;  %10976 = vst [vmem:[#allocation15_spill] sm:$0xff] %v8900_v31  ;;  %v8904_v21 = vmax.f32 %v2952_v33, 0.0  ;;  %v10991_v33 = vld [vmem:[#allocation75_spill] sm:$0xff] }
 0x652   : > { %3813 = vmatpush.msra.mxu2 %v6057_v40  ;;  %10977 = vst [vmem:[#allocation18_spill] sm:$0xff] %v8904_v21 }
 0x654   : > { %3814 = vmatpush.msra.mxu2 %v6058_v59 }
 0x656   : > { %3815 = vmatpush.msra.mxu2 %v6059_v52 }
 0x658   : > { %3816 = vmatpush.msra.mxu2 %v6060_v38 }
 0x65a   : > { %3817 = vmatpush.msra.mxu2 %v10945_v16  ;;  %v3330_v16 = vpop.f32.mrf.mxu3 }
 0x65b   : > { %3818 = vmatmul.f32.vlgmr.msra.gmra.mxu2 %v10971_v47  ;;  %v8919_v15 = vadd.f32 %v3330_v16, %v3310_v53  ;;  %v6063_v53 = vld [vmem:[#allocation2 + $0x3d0] sm:$0xff]  ;;  %v6066_v16 = vld [vmem:[#allocation2 + $0x3a0] sm:$0xff] }
 0x65c   : > { %3889 = vmatpush.msrb.mxu2 %v8691_v2 }
 0x65e   : > { %3890 = vmatpush.msrb.mxu2 %v8780_v27  ;;  %v3450_v61 = vpop.f32.mrf.mxu2 }
 0x65f   : > { %v8916_v38 = vadd.f32 %v3450_v61, %v3430_v54  ;;  %v6072_v54 = vld [vmem:[#allocation2 + $0x340] sm:$0xff]  ;;  %v6073_v61 = vld [vmem:[#allocation2 + $0x330] sm:$0xff] }
 0x660   : > { %3891 = vmatpush.msrb.mxu2 %v8695_v7  ;;  %v9159_v7 = vld [vmem:[#allocation2 + $0xb10] sm:$0xff] }
 0x661   : > { %11015 = vst [vmem:[#allocation30_spill] sm:$0xff] %v9159_v7 }
 0x662   : > { %3892 = vmatpush.msrb.mxu2 %v8645_v28  ;;  %v3410_v36 = vpop.f32.mrf.mxu3 }
 0x663   : > { %v8913_v52 = vadd.f32 %v3410_v36, %v3390_v55  ;;  %v8929_v55 = vld [vmem:[%s10520_s11] sm:$0xff]  ;;  %v3291_v36 = vadd.f32 %v3290_v50, %v3270_v24  ;;  %v6065_v50 = vld [vmem:[#allocation2 + $0x3b0] sm:$0xff] }
 0x664   : > { %3893 = vmatpush.msrb.mxu2 %v8811_v62  ;;  %v6064_v24 = vld [vmem:[#allocation2 + $0x3c0] sm:$0xff] }
 0x666   : > { %3894 = vmatpush.msrb.mxu2 %v8820_v32 }
 0x67d   : > { %v3490_v51 = vpop.f32.mrf.mxu3 }
 0x67e   : > { %v3530_v44 = vpop.f32.mrf.mxu2  ;;  %v8907_v40 = vadd.f32 %v3490_v51, %v3470_v18  ;;  %v8922_v18 = vadd.f32 %v3370_v37, %v3350_v46  ;;  %v3251_v51 = vadd.f32 %v3250_v56, %v3230_v41  ;;  %v6061_v41 = vld [vmem:[#allocation2 + $0x3f0] sm:$0xff]  ;;  %v6062_v56 = vld [vmem:[#allocation2 + $0x3e0] sm:$0xff] }
 0x67f   : > { %v8910_v59 = vadd.f32 %v3530_v44, %v3510_v14  ;;  %v10980_v46 = vld [vmem:[#allocation51_spill] sm:$0xff]  ;;  %v6074_v44 = vld [vmem:[#allocation2 + $0x320] sm:$0xff] }
 0x680   : > { %10978 = vst [vmem:[#allocation16_spill] sm:$0xff] %v8907_v40  ;;  %v10983_v14 = vld [vmem:[#allocation55_spill] sm:$0xff] }
 0x681   : > { %10979 = vst [vmem:[#allocation13_spill] sm:$0xff] %v8910_v59 }
 0x69d   : > { %v3570_v39 = vpop.f32.mrf.mxu3 }
 0x69e   : > { %v8894_v30 = vadd.f32 %v3570_v39, %v3550_v1  ;;  %v3610_v49 = vpop.f32.mrf.mxu2  ;;  %v6076_v39 = vld [vmem:[#allocation2 + $0x300] sm:$0xff] }
 0x69f   : > { %v8897_v5 = vadd.f32 %v3610_v49, %v3590_v57  ;;  %v10989_v57 = vld [vmem:[#allocation58_spill] sm:$0xff] }
 0x6a0   : > { %10974 = vst [vmem:[#allocation14_spill] sm:$0xff] %v8894_v30  ;;  %3627 = vmatpush.msra.mxu1 %v8894_v30  ;;  %v9138_v30 = vld [vmem:[#allocation2 + $0xa48] sm:$0xff] }
 0x6a1   : > { %10975 = vst [vmem:[#allocation50_spill] sm:$0xff] %v8897_v5  ;;  %3647 = vmatpush.msrb.mxu3 %v8897_v5  ;;  %v9120_v5 = vld [vmem:[#allocation2 + $0xa68] sm:$0xff] }
 0x6a2   : > { %3628 = vmatpush.msra.mxu1 %v8820_v32  ;;  %11006 = vst [vmem:[#allocation42_spill] sm:$0xff] %v9120_v5  ;;  %v9155_v32 = vld [vmem:[#allocation2 + $0xa28] sm:$0xff] }
 0x6a3   : > { %3648 = vmatpush.msrb.mxu3 %v8900_v31  ;;  %11010 = vst [vmem:[#allocation25_spill] sm:$0xff] %v9138_v30 }
 0x6a4   : > { %3629 = vmatpush.msra.mxu1 %v8823_v48  ;;  %11014 = vst [vmem:[#allocation29_spill] sm:$0xff] %v9155_v32 }
 0x6a5   : > { %3649 = vmatpush.msrb.mxu3 %v8904_v21 }
 0x6a6   : > { %3630 = vmatpush.msra.mxu1 %v8907_v40  ;;  %v9135_v40 = vld [vmem:[#allocation2 + $0xb40] sm:$0xff] }
 0x6a7   : > { %3650 = vmatpush.msrb.mxu3 %v8910_v59  ;;  %v9117_v59 = vld [vmem:[#allocation2 + $0xb60] sm:$0xff]  ;;  %11009 = vst [vmem:[#allocation67_spill] sm:$0xff] %v9135_v40 }
 0x6a8   : > { %3631 = vmatpush.msra.mxu1 %v8913_v52  ;;  %11005 = vst [vmem:[#allocation8_spill] sm:$0xff] %v9117_v59 }
 0x6a9   : > { %3651 = vmatpush.msrb.mxu3 %v8916_v38 }
 0x6aa   : > { %3632 = vmatpush.msra.mxu1 %v8919_v15 }
 0x6ab   : > { %3652 = vmatpush.msrb.mxu3 %v8922_v18 }
 0x6ac   : > { %3633 = vmatpush.msra.mxu1 %v3251_v51  ;;  %v8982_v51 = vpop.permute.xlu1 %3661 }
 0x6ad   : > { %3653 = vmatpush.msrb.mxu3 %v3291_v36  ;;  %5755 = vmatmul.msk.f32.vlgmr.msra.gmra.mxu1 %vm3614_vm1, %v8929_v55 }
 0x6ae   : > { %5756 = vmatmul.msk.f32.vlgmr.msrb.gmra.mxu3 %vm3614_vm1, %v8929_v55  ;;  %3696 = vmatpush.msrb.mxu1 %v6061_v41 }
 0x6af   : > { %3736 = vmatpush.msra.mxu3 %v8454_v34  ;;  %v6067_v34 = vld [vmem:[#allocation2 + $0x390] sm:$0xff] }
 0x6b0   : > { %3697 = vmatpush.msrb.mxu1 %v6062_v56 }
 0x6b1   : > { %3737 = vmatpush.msra.mxu3 %v8457_v20  ;;  %v6068_v20 = vld [vmem:[#allocation2 + $0x380] sm:$0xff] }
 0x6b2   : > { %3698 = vmatpush.msrb.mxu1 %v6063_v53 }
 0x6b3   : > { %3738 = vmatpush.msra.mxu3 %v8462_v58  ;;  %v6069_v58 = vld [vmem:[#allocation2 + $0x370] sm:$0xff] }
 0x6b4   : > { %3699 = vmatpush.msrb.mxu1 %v6064_v24 }
 0x6b5   : > { %3739 = vmatpush.msra.mxu3 %v8465_v11  ;;  %v6070_v11 = vld [vmem:[#allocation2 + $0x360] sm:$0xff] }
 0x6b6   : > { %3700 = vmatpush.msrb.mxu1 %v6065_v50 }
 0x6b7   : > { %3740 = vmatpush.msra.mxu3 %v8470_v22  ;;  %v6071_v22 = vld [vmem:[#allocation2 + $0x350] sm:$0xff] }
 0x6b8   : > { %3701 = vmatpush.msrb.mxu1 %v6066_v16 }
 0x6b9   : > { %3741 = vmatpush.msra.mxu3 %v8473_v8  ;;  %v3194_v8 = vmul.f32 %v8667_v23, %v8520_v0  ;;  %v10984_v23 = vld [vmem:[#allocation56_spill] sm:$0xff] }
 0x6ba   : > { %3702 = vmatpush.msrb.mxu1 %v6067_v34 }
 0x6bb   : > { %3742 = vmatpush.msra.mxu3 %v8476_v9  ;;  %v10981_v9 = vld [vmem:[#allocation66_spill] sm:$0xff] }
 0x6bc   : > { %3703 = vmatpush.msrb.mxu1 %v6068_v20  ;;  %v3030_v37 = vmul.f32 %v10981_v9, %v8520_v0  ;;  %v6075_v0 = vld [vmem:[#allocation2 + $0x310] sm:$0xff] }
 0x6bd   : > { %3743 = vmatpush.msra.mxu3 %v10912_v3  ;;  %v10982_v3 = vld [vmem:[#allocation52_spill] sm:$0xff] }
 0x6be   : > { %3704 = vmatpush.msrb.mxu1 %v6069_v58 }
 0x6bf   : > { %3744 = vmatpush.msra.mxu3 %v10915_v63  ;;  %v3202_v63 = vadd.f32 %v3194_v8, %v8527_v6  ;;  %v3733_v8 = vpop.f32.mrf.mxu2 }
 0x6c0   : > { %3705 = vmatpush.msrb.mxu1 %v6070_v11 }
 0x6c1   : > { %3745 = vmatpush.msra.mxu3 %v10918_v35  ;;  %v3038_v35 = vadd.f32 %v3030_v37, %v8527_v6  ;;  %v8958_v10 = vmax.f32 %v3202_v63, 0.0  ;;  %v3034_v6 = vadd.f32 %v3026_v43, %v8786_v12  ;;  %v6077_v37 = vld [vmem:[#allocation2 + $0x2f8] sm:$0xff] }
 0x6c2   : > { %3706 = vmatpush.msrb.mxu1 %v6071_v22  ;;  %v6082_v63 = vld [vmem:[#allocation2 + $0x2b8] sm:$0xff] }
 0x6c3   : > { %3746 = vmatpush.msra.mxu3 %v10980_v46  ;;  %10986 = vst [vmem:[#allocation12_spill] sm:$0xff] %v8958_v10  ;;  %v8961_v1 = vmax.f32 %v3038_v35, 0.0  ;;  %v8969_v49 = vmax.f32 %v3034_v6, 0.0  ;;  %v6084_v35 = vld [vmem:[#allocation2 + $0x2a8] sm:$0xff]  ;;  %v6089_v43 = vld [vmem:[#allocation2 + $0x3b8] sm:$0xff] }
 0x6c4   : > { %3707 = vmatpush.msrb.mxu1 %v6072_v54  ;;  %v6094_v6 = vld [vmem:[#allocation2 + $0x258] sm:$0xff] }
 0x6c5   : > { %3747 = vmatpush.msra.mxu3 %v10982_v3  ;;  %10988 = vst [vmem:[#allocation17_spill] sm:$0xff] %v8961_v1  ;;  %v6079_v3 = vld [vmem:[#allocation2 + $0x2d8] sm:$0xff] }
 0x6c6   : > { %3708 = vmatpush.msrb.mxu1 %v6073_v61  ;;  %10990 = vst [vmem:[#allocation11_spill] sm:$0xff] %v8969_v49 }
 0x6c7   : > { %3748 = vmatpush.msra.mxu3 %v10983_v14  ;;  %v6083_v14 = vld [vmem:[#allocation2 + $0x3e8] sm:$0xff] }
 0x6c8   : > { %3709 = vmatpush.msrb.mxu1 %v6074_v44 }
 0x6c9   : > { %3749 = vmatpush.msra.mxu3 %v10984_v23  ;;  %v6086_v23 = vld [vmem:[#allocation2 + $0x298] sm:$0xff] }
 0x6ca   : > { %3710 = vmatpush.msrb.mxu1 %v6075_v0 }
 0x6cb   : > { %3750 = vmatpush.msra.mxu3 %v10987_v60  ;;  %v6091_v60 = vld [vmem:[#allocation2 + $0x3a8] sm:$0xff] }
 0x6cc   : > { %3711 = vmatpush.msrb.mxu1 %v6076_v39 }
 0x6cd   : > { %3751 = vmatpush.msra.mxu3 %v10989_v57  ;;  %3712 = vmatmul.f32.vlgmr.msrb.gmra.mxu1 %v8958_v10  ;;  %v6093_v57 = vld [vmem:[#allocation2 + $0x398] sm:$0xff] }
 0x6ce   : > { %3752 = vmatmul.f32.vlgmr.msra.gmra.mxu3 %v8958_v10  ;;  %3783 = vmatpush.msra.mxu1 %v8961_v1  ;;  %v9108_v10 = vld [vmem:[#allocation2 + $0xb70] sm:$0xff] }
 0x6cf   : > { %3822 = vmatpush.msrb.mxu3 %v6061_v41  ;;  %11003 = vst [vmem:[#allocation43_spill] sm:$0xff] %v9108_v10 }
 0x6d0   : > { %3784 = vmatpush.msra.mxu1 %v8856_v26 }
 0x6d1   : > { %3823 = vmatpush.msrb.mxu3 %v6062_v56  ;;  %v8986_v56 = vpop.permute.xlu2 %3669 }
 0x6d2   : > { %3785 = vmatpush.msra.mxu1 %v8859_v13 }
 0x6d3   : > { %3824 = vmatpush.msrb.mxu3 %v6063_v53 }
 0x6d4   : > { %3786 = vmatpush.msra.mxu1 %v8969_v49 }
 0x6d5   : > { %3825 = vmatpush.msrb.mxu3 %v6064_v24 }
 0x6d6   : > { %3787 = vmatpush.msra.mxu1 %v8900_v31 }
 0x6d7   : > { %3826 = vmatpush.msrb.mxu3 %v6065_v50 }
 0x6d8   : > { %3788 = vmatpush.msra.mxu1 %v8904_v21 }
 0x6d9   : > { %3827 = vmatpush.msrb.mxu3 %v6066_v16 }
 0x6db   : > { %3828 = vmatpush.msrb.mxu3 %v6067_v34 }
 0x6dd   : > { %3829 = vmatpush.msrb.mxu3 %v6068_v20 }
 0x6df   : > { %3830 = vmatpush.msrb.mxu3 %v6069_v58  ;;  %v3693_v58 = vpop.f32.mrf.mxu0 }
 0x6e1   : > { %3831 = vmatpush.msrb.mxu3 %v6070_v11 }
 0x6e3   : > { %3832 = vmatpush.msrb.mxu3 %v6071_v22 }
 0x6e5   : > { %3833 = vmatpush.msrb.mxu3 %v6072_v54  ;;  %v6078_v54 = vld [vmem:[#allocation2 + $0x2e8] sm:$0xff] }
 0x6e7   : > { %3834 = vmatpush.msrb.mxu3 %v6073_v61  ;;  %v6081_v61 = vld [vmem:[#allocation2 + $0x3f8] sm:$0xff] }
 0x6e9   : > { %3835 = vmatpush.msrb.mxu3 %v6074_v44  ;;  %v6085_v44 = vld [vmem:[#allocation2 + $0x3d8] sm:$0xff] }
 0x6eb   : > { %3836 = vmatpush.msrb.mxu3 %v6075_v0  ;;  %v6090_v0 = vld [vmem:[#allocation2 + $0x278] sm:$0xff] }
 0x6ed   : > { %3837 = vmatpush.msrb.mxu3 %v6076_v39  ;;  %v6092_v39 = vld [vmem:[#allocation2 + $0x268] sm:$0xff] }
 0x6ee   : > { %3838 = vmatmul.f32.vlgmr.msrb.gmra.mxu3 %v10991_v33 }
 0x6ef   : > { %3909 = vmatpush.msra.mxu3 %v8854_v17  ;;  %v9152_v17 = vld [vmem:[#allocation2 + $0xb20] sm:$0xff] }
 0x6f0   : > { %11013 = vst [vmem:[#allocation28_spill] sm:$0xff] %v9152_v17 }
 0x6f1   : > { %3910 = vmatpush.msra.mxu3 %v8961_v1  ;;  %v9147_v1 = vld [vmem:[#allocation2 + $0xa38] sm:$0xff] }
 0x6f2   : > { %11012 = vst [vmem:[#allocation27_spill] sm:$0xff] %v9147_v1 }
 0x6f3   : > { %3911 = vmatpush.msra.mxu3 %v8856_v26  ;;  %v9132_v26 = vld [vmem:[#allocation2 + $0xa10] sm:$0xff] }
 0x6f5   : > { %3912 = vmatpush.msra.mxu3 %v8830_v25  ;;  %v9144_v25 = vld [vmem:[#allocation2 + $0xb30] sm:$0xff] }
 0x6f6   : > { %11011 = vst [vmem:[#allocation26_spill] sm:$0xff] %v9144_v25 }
 0x6f7   : > { %3913 = vmatpush.msra.mxu3 %v8969_v49  ;;  %v9141_v49 = vld [vmem:[#allocation2 + $0xa00] sm:$0xff] }
 0x6f9   : > { %3914 = vmatpush.msra.mxu3 %v8900_v31  ;;  %v9129_v31 = vld [vmem:[#allocation2 + $0xa58] sm:$0xff] }
 0x6fa   : > { %11008 = vst [vmem:[#allocation69_spill] sm:$0xff] %v9129_v31 }
 0x72a   : > { %v3635_v36 = vpop.f32.mrf.mxu1 }
 0x72b   : > { %v3664_v41 = vmul.f32 %v8982_v51, %v3635_v36  ;;  %v6095_v36 = vld [vmem:[#allocation2 + $0x388] sm:$0xff] }
 0x72d   : > { %v3672_v53 = vadd.f32 %v8986_v56, %v3664_v41  ;;  %v6096_v41 = vld [vmem:[#allocation2 + $0x248] sm:$0xff] }
 0x72f   : > { %v3674_v24 = vmax.f32 %v3672_v53, 0.0  ;;  %v6097_v53 = vld [vmem:[#allocation2 + $0x378] sm:$0xff] }
 0x731   : > { %5566 = vst [vmem:[%s8992_s23] sm:$0xff] %v3674_v24  ;;  %v3655_v50 = vpop.f32.mrf.mxu3  ;;  %v6098_v24 = vld [vmem:[#allocation2 + $0x238] sm:$0xff] }
 0x732   : > { %v3665_v16 = vmul.f32 %v8982_v51, %v3655_v50  ;;  %v6099_v50 = vld [vmem:[#allocation2 + $0x368] sm:$0xff] }
 0x734   : > { %v3673_v34 = vadd.f32 %v8986_v56, %v3665_v16  ;;  %v6100_v16 = vld [vmem:[#allocation2 + $0x228] sm:$0xff] }
 0x736   : > { %v3675_v20 = vmax.f32 %v3673_v34, 0.0  ;;  %v6101_v34 = vld [vmem:[#allocation2 + $0x358] sm:$0xff] }
 0x738   : > { %5567 = vst [vmem:[%s8992_s23 + $0x8] sm:$0xff] %v3675_v20  ;;  %v6102_v20 = vld [vmem:[#allocation2 + $0x218] sm:$0xff] }
 0x74a   : > { %v3713_v11 = vpop.f32.mrf.mxu1 }
 0x74b   : > { %v8998_v22 = vadd.f32 %v3713_v11, %v3693_v58  ;;  %v6103_v58 = vld [vmem:[#allocation2 + $0x348] sm:$0xff]  ;;  %v3819_v11 = vpop.f32.mrf.mxu2 }
 0x74d   : > { %10992 = vst [vmem:[#allocation54_spill] sm:$0xff] %v8998_v22  ;;  %3769 = vmatpush.msra.mxu0 %v8998_v22 }
 0x74f   : > { %3770 = vmatpush.msra.mxu0 %v8913_v52 }
 0x751   : > { %v3753_v46 = vpop.f32.mrf.mxu3  ;;  %3771 = vmatpush.msra.mxu0 %v8919_v15  ;;  %v6080_v15 = vld [vmem:[#allocation2 + $0x2c8] sm:$0xff] }
 0x752   : > { %v9003_v9 = vadd.f32 %v3753_v46, %v3733_v8  ;;  %5757 = vmatmul.msk.f32.vlgmr.msra.gmra.mxu0 %vm3614_vm1, %v8929_v55  ;;  %v6104_v46 = vld [vmem:[#allocation2 + $0x208] sm:$0xff] }
 0x753   : > { %3842 = vmatpush.msrb.mxu0 %v6077_v37 }
 0x754   : > { %3789 = vmatpush.msra.mxu1 %v9003_v9 }
 0x755   : > { %3843 = vmatpush.msrb.mxu0 %v6078_v54  ;;  %v6105_v54 = vld [vmem:[#allocation2 + $0x338] sm:$0xff] }
 0x756   : > { %3790 = vmatpush.msra.mxu1 %v8916_v38 }
 0x757   : > { %3844 = vmatpush.msrb.mxu0 %v6079_v3  ;;  %v6106_v3 = vld [vmem:[#allocation2 + $0x4f0] sm:$0xff] }
 0x758   : > { %3791 = vmatpush.msra.mxu1 %v8922_v18  ;;  %v6088_v18 = vld [vmem:[#allocation2 + $0x288] sm:$0xff] }
 0x759   : > { %5758 = vmatmul.msk.f32.vlgmr.msra.gmra.mxu1 %vm3614_vm1, %v8929_v55  ;;  %3845 = vmatpush.msrb.mxu0 %v6080_v15  ;;  %v6107_v15 = vld [vmem:[#allocation2 + $0x328] sm:$0xff] }
 0x75a   : > { %3862 = vmatpush.msrb.mxu1 %v6081_v61  ;;  %v6108_v61 = vld [vmem:[#allocation2 + $0x4e0] sm:$0xff] }
 0x75b   : > { %3846 = vmatpush.msrb.mxu0 %v6082_v63  ;;  %v6109_v63 = vld [vmem:[#allocation2 + $0x318] sm:$0xff] }
 0x75c   : > { %3863 = vmatpush.msrb.mxu1 %v6083_v14  ;;  %v6110_v14 = vld [vmem:[#allocation2 + $0x4d0] sm:$0xff] }
 0x75d   : > { %3847 = vmatpush.msrb.mxu0 %v6084_v35  ;;  %v6111_v35 = vld [vmem:[#allocation2 + $0x308] sm:$0xff] }
 0x75e   : > { %3864 = vmatpush.msrb.mxu1 %v6085_v44  ;;  %v6112_v44 = vld [vmem:[#allocation2 + $0x4c0] sm:$0xff] }
 0x75f   : > { %3848 = vmatpush.msrb.mxu0 %v6086_v23  ;;  %v6113_v23 = vld [vmem:[#allocation2 + $0x5f0] sm:$0xff] }
 0x760   : > { %3865 = vmatpush.msrb.mxu1 %v6087_v19  ;;  %v6114_v19 = vld [vmem:[#allocation2 + $0x4f8] sm:$0xff] }
 0x761   : > { %3849 = vmatpush.msrb.mxu0 %v6088_v18  ;;  %v6115_v18 = vld [vmem:[#allocation2 + $0x4b0] sm:$0xff] }
 0x762   : > { %3866 = vmatpush.msrb.mxu1 %v6089_v43  ;;  %v6116_v43 = vld [vmem:[#allocation2 + $0x5e0] sm:$0xff] }
 0x763   : > { %3850 = vmatpush.msrb.mxu0 %v6090_v0  ;;  %v6117_v0 = vld [vmem:[#allocation2 + $0x4e8] sm:$0xff] }
 0x764   : > { %3867 = vmatpush.msrb.mxu1 %v6091_v60  ;;  %v6118_v60 = vld [vmem:[#allocation2 + $0x4a0] sm:$0xff] }
 0x765   : > { %3851 = vmatpush.msrb.mxu0 %v6092_v39  ;;  %v6120_v39 = vld [vmem:[#allocation2 + $0x4d8] sm:$0xff] }
 0x766   : > { %3868 = vmatpush.msrb.mxu1 %v6093_v57  ;;  %v6121_v57 = vld [vmem:[#allocation2 + $0x490] sm:$0xff] }
 0x767   : > { %3852 = vmatpush.msrb.mxu0 %v6094_v6  ;;  %v6122_v6 = vld [vmem:[#allocation2 + $0x5c0] sm:$0xff] }
 0x768   : > { %3869 = vmatpush.msrb.mxu1 %v6095_v36  ;;  %v6123_v36 = vld [vmem:[#allocation2 + $0x4c8] sm:$0xff] }
 0x769   : > { %3853 = vmatpush.msrb.mxu0 %v6096_v41  ;;  %v6124_v41 = vld [vmem:[#allocation2 + $0x480] sm:$0xff] }
 0x76a   : > { %3870 = vmatpush.msrb.mxu1 %v6097_v53  ;;  %v6125_v53 = vld [vmem:[#allocation2 + $0x5b0] sm:$0xff] }
 0x76b   : > { %3854 = vmatpush.msrb.mxu0 %v6098_v24  ;;  %v6126_v24 = vld [vmem:[#allocation2 + $0x4b8] sm:$0xff] }
 0x76c   : > { %3871 = vmatpush.msrb.mxu1 %v6099_v50  ;;  %v6127_v50 = vld [vmem:[#allocation2 + $0x470] sm:$0xff] }
 0x76d   : > { %3855 = vmatpush.msrb.mxu0 %v6100_v16  ;;  %v6128_v16 = vld [vmem:[#allocation2 + $0x5a0] sm:$0xff] }
 0x76e   : > { %3872 = vmatpush.msrb.mxu1 %v6101_v34  ;;  %v6129_v34 = vld [vmem:[#allocation2 + $0x4a8] sm:$0xff] }
 0x76f   : > { %3856 = vmatpush.msrb.mxu0 %v6102_v20  ;;  %v6130_v20 = vld [vmem:[#allocation2 + $0x460] sm:$0xff] }
 0x770   : > { %3873 = vmatpush.msrb.mxu1 %v6103_v58  ;;  %v6131_v58 = vld [vmem:[#allocation2 + $0x590] sm:$0xff] }
 0x771   : > { %v3839_v8 = vpop.f32.mrf.mxu3  ;;  %3857 = vmatpush.msrb.mxu0 %v6104_v46  ;;  %v6134_v46 = vld [vmem:[#allocation2 + $0x580] sm:$0xff] }
 0x772   : > { %v9012_v37 = vadd.f32 %v3839_v8, %v3819_v11  ;;  %3874 = vmatpush.msrb.mxu1 %v6105_v54  ;;  %3858 = vmatmul.f32.vlgmr.msrb.gmra.mxu0 %v10971_v47  ;;  %v6132_v11 = vld [vmem:[#allocation2 + $0x498] sm:$0xff]  ;;  %v6133_v8 = vld [vmem:[#allocation2 + $0x450] sm:$0xff]  ;;  %v6135_v54 = vld [vmem:[#allocation2 + $0x488] sm:$0xff] }
 0x773   : > { %3928 = vmatpush.msra.mxu0 %v6106_v3  ;;  %v6136_v3 = vld [vmem:[#allocation2 + $0x440] sm:$0xff]  ;;  %v9126_v47 = vld [vmem:[#allocation2 + $0xb50] sm:$0xff] }
 0x774   : > { %10993 = vst [vmem:[#allocation22_spill] sm:$0xff] %v9012_v37  ;;  %3875 = vmatpush.msrb.mxu1 %v6107_v15  ;;  %3895 = vmatpush.msrb.mxu2 %v9012_v37  ;;  %v6137_v15 = vld [vmem:[#allocation2 + $0x570] sm:$0xff]  ;;  %v9169_v37 = vld [vmem:[#allocation2 + $0xa08] sm:$0xff] }
 0x775   : > { %3929 = vmatpush.msra.mxu0 %v6108_v61  ;;  %v6138_v61 = vld [vmem:[#allocation2 + $0x478] sm:$0xff]  ;;  %11007 = vst [vmem:[#allocation64_spill] sm:$0xff] %v9126_v47 }
 0x776   : > { %3876 = vmatpush.msrb.mxu1 %v6109_v63  ;;  %3896 = vmatpush.msrb.mxu2 %v8998_v22  ;;  %v6139_v63 = vld [vmem:[#allocation2 + $0x430] sm:$0xff]  ;;  %v9162_v22 = vld [vmem:[#allocation2 + $0xa18] sm:$0xff]  ;;  %11018 = vst [vmem:[#allocation33_spill] sm:$0xff] %v9169_v37 }
 0x777   : > { %3930 = vmatpush.msra.mxu0 %v6110_v14  ;;  %v6140_v14 = vld [vmem:[#allocation2 + $0x560] sm:$0xff]  ;;  %11016 = vst [vmem:[#allocation31_spill] sm:$0xff] %v9162_v22 }
 0x778   : > { %3877 = vmatpush.msrb.mxu1 %v6111_v35  ;;  %3897 = vmatpush.msrb.mxu2 %v8913_v52  ;;  %v6119_v52 = vld [vmem:[#allocation2 + $0x5d0] sm:$0xff]  ;;  %v6141_v35 = vld [vmem:[#allocation2 + $0x468] sm:$0xff] }
 0x779   : > { %3878 = vmatmul.f32.vlgmr.msrb.gmra.mxu1 %v10991_v33  ;;  %5759 = vmatmul.msk.f32.vlgmr.msrb.gmra.mxu2 %vm3614_vm1, %v8929_v55  ;;  %v9114_v33 = vld [vmem:[#allocation2 + $0xa30] sm:$0xff] }
 0x77a   : > { %3931 = vmatpush.msra.mxu0 %v6112_v44  ;;  %3948 = vmatpush.msra.mxu1 %v6113_v23  ;;  %v6142_v44 = vld [vmem:[#allocation2 + $0x420] sm:$0xff]  ;;  %v6143_v23 = vld [vmem:[#allocation2 + $0x550] sm:$0xff] }
 0x77b   : > { %3968 = vmatpush.msra.mxu2 %v6114_v19  ;;  %v6144_v19 = vld [vmem:[#allocation2 + $0x458] sm:$0xff] }
 0x77c   : > { %3932 = vmatpush.msra.mxu0 %v6115_v18  ;;  %3949 = vmatpush.msra.mxu1 %v6116_v43  ;;  %v6145_v18 = vld [vmem:[#allocation2 + $0x410] sm:$0xff]  ;;  %v6146_v43 = vld [vmem:[#allocation2 + $0x540] sm:$0xff] }
 0x77d   : > { %3969 = vmatpush.msra.mxu2 %v6117_v0  ;;  %v6147_v0 = vld [vmem:[#allocation2 + $0x448] sm:$0xff] }
 0x77e   : > { %3933 = vmatpush.msra.mxu0 %v6118_v60  ;;  %3950 = vmatpush.msra.mxu1 %v6119_v52  ;;  %v6148_v60 = vld [vmem:[#allocation2 + $0x400] sm:$0xff]  ;;  %v6149_v52 = vld [vmem:[#allocation2 + $0x530] sm:$0xff] }
 0x77f   : > { %3970 = vmatpush.msra.mxu2 %v6120_v39  ;;  %v6150_v39 = vld [vmem:[#allocation2 + $0x438] sm:$0xff] }
 0x780   : > { %3934 = vmatpush.msra.mxu0 %v6121_v57  ;;  %3951 = vmatpush.msra.mxu1 %v6122_v6  ;;  %v10994_v57 = vld [vmem:[#allocation60_spill] sm:$0xff]  ;;  %v9022_v6 = vld [vmem:[#allocation2 + $0xaf0] sm:$0xff] }
 0x781   : > { %3971 = vmatpush.msra.mxu2 %v6123_v36  ;;  %10995 = vst [vmem:[#allocation44_spill] sm:$0xff] %v9022_v6  ;;  %v6152_v36 = vld [vmem:[#allocation2 + $0x520] sm:$0xff] }
 0x782   : > { %3935 = vmatpush.msra.mxu0 %v6124_v41  ;;  %3952 = vmatpush.msra.mxu1 %v6125_v53  ;;  %v6153_v41 = vld [vmem:[#allocation2 + $0x428] sm:$0xff]  ;;  %v9025_v53 = vld [vmem:[#allocation2 + $0xae0] sm:$0xff] }
 0x783   : > { %3972 = vmatpush.msra.mxu2 %v6126_v24  ;;  %v6155_v24 = vld [vmem:[#allocation2 + $0x510] sm:$0xff] }
 0x784   : > { %3936 = vmatpush.msra.mxu0 %v6127_v50  ;;  %3953 = vmatpush.msra.mxu1 %v6128_v16  ;;  %v6156_v50 = vld [vmem:[#allocation2 + $0x418] sm:$0xff]  ;;  %v9028_v16 = vld [vmem:[#allocation2 + $0xad0] sm:$0xff] }
 0x785   : > { %3973 = vmatpush.msra.mxu2 %v6129_v34  ;;  %v6158_v34 = vld [vmem:[#allocation2 + $0x500] sm:$0xff] }
 0x786   : > { %3937 = vmatpush.msra.mxu0 %v6130_v20  ;;  %3954 = vmatpush.msra.mxu1 %v6131_v58  ;;  %v6159_v20 = vld [vmem:[#allocation2 + $0x408] sm:$0xff] }
 0x787   : > { %3974 = vmatpush.msra.mxu2 %v6132_v11  ;;  %v10996_v58 = vld [vmem:[#allocation78_spill] sm:$0xff]  ;;  %v9033_v11 = vld [vmem:[#allocation2 + $0xac0] sm:$0xff] }
 0x788   : > { %3938 = vmatpush.msra.mxu0 %v6133_v8  ;;  %3955 = vmatpush.msra.mxu1 %v6134_v46  ;;  %v9036_v8 = vld [vmem:[#allocation2 + $0xbf0] sm:$0xff]  ;;  %v9039_v46 = vld [vmem:[#allocation2 + $0xaf8] sm:$0xff] }
 0x789   : > { %3975 = vmatpush.msra.mxu2 %v6135_v54  ;;  %v9042_v54 = vld [vmem:[#allocation2 + $0xab0] sm:$0xff] }
 0x78a   : > { %3939 = vmatpush.msra.mxu0 %v6136_v3  ;;  %3956 = vmatpush.msra.mxu1 %v6137_v15  ;;  %v9045_v3 = vld [vmem:[#allocation2 + $0xbe0] sm:$0xff]  ;;  %v9048_v15 = vld [vmem:[#allocation2 + $0xae8] sm:$0xff] }
 0x78b   : > { %3976 = vmatpush.msra.mxu2 %v6138_v61  ;;  %v9051_v61 = vld [vmem:[#allocation2 + $0xaa0] sm:$0xff] }
 0x78c   : > { %3940 = vmatpush.msra.mxu0 %v6139_v63  ;;  %3957 = vmatpush.msra.mxu1 %v6140_v14  ;;  %v9054_v63 = vld [vmem:[#allocation2 + $0xbd0] sm:$0xff]  ;;  %v9057_v14 = vld [vmem:[#allocation2 + $0xad8] sm:$0xff] }
 0x78d   : > { %3977 = vmatpush.msra.mxu2 %v6141_v35  ;;  %v9060_v35 = vld [vmem:[#allocation2 + $0xa90] sm:$0xff] }
 0x78e   : > { %3941 = vmatpush.msra.mxu0 %v6142_v44  ;;  %3958 = vmatpush.msra.mxu1 %v6143_v23  ;;  %v9063_v44 = vld [vmem:[#allocation2 + $0xbc0] sm:$0xff]  ;;  %v9066_v23 = vld [vmem:[#allocation2 + $0xac8] sm:$0xff] }
 0x78f   : > { %3978 = vmatpush.msra.mxu2 %v6144_v19  ;;  %v9069_v19 = vld [vmem:[#allocation2 + $0xa80] sm:$0xff] }
 0x790   : > { %3942 = vmatpush.msra.mxu0 %v6145_v18  ;;  %3959 = vmatpush.msra.mxu1 %v6146_v43  ;;  %v9072_v18 = vld [vmem:[#allocation2 + $0xbb0] sm:$0xff]  ;;  %v9075_v43 = vld [vmem:[#allocation2 + $0xab8] sm:$0xff] }
 0x791   : > { %3979 = vmatpush.msra.mxu2 %v6147_v0  ;;  %10997 = vst [vmem:[#allocation7_spill] sm:$0xff] %v9072_v18  ;;  %v9078_v0 = vld [vmem:[#allocation2 + $0xa70] sm:$0xff] }
 0x792   : > { %3943 = vmatpush.msra.mxu0 %v6148_v60  ;;  %3960 = vmatpush.msra.mxu1 %v6149_v52  ;;  %v9081_v60 = vld [vmem:[#allocation2 + $0xba0] sm:$0xff]  ;;  %v9084_v52 = vld [vmem:[#allocation2 + $0xaa8] sm:$0xff] }
 0x793   : > { %3980 = vmatpush.msra.mxu2 %v6150_v39  ;;  %3944 = vmatmul.f32.vlgmr.msra.gmra.mxu0 %v10994_v57  ;;  %10998 = vst [vmem:[#allocation23_spill] sm:$0xff] %v9081_v60  ;;  %v9087_v39 = vld [vmem:[#allocation2 + $0xa60] sm:$0xff] }
 0x794   : > { %4008 = vmatpush.msrb.mxu0 %v9022_v6  ;;  %3961 = vmatpush.msra.mxu1 %v6152_v36  ;;  %v9090_v36 = vld [vmem:[#allocation2 + $0xb90] sm:$0xff] }
 0x795   : > { %3981 = vmatpush.msra.mxu2 %v6153_v41  ;;  %10999 = vst [vmem:[#allocation5_spill] sm:$0xff] %v9090_v36  ;;  %v9093_v41 = vld [vmem:[#allocation2 + $0xa98] sm:$0xff] }
 0x796   : > { %4009 = vmatpush.msrb.mxu0 %v9025_v53  ;;  %3962 = vmatpush.msra.mxu1 %v6155_v24  ;;  %11000 = vst [vmem:[#allocation24_spill] sm:$0xff] %v9093_v41  ;;  %v9096_v24 = vld [vmem:[#allocation2 + $0xa50] sm:$0xff] }
 0x797   : > { %3982 = vmatpush.msra.mxu2 %v6156_v50  ;;  %v9099_v50 = vld [vmem:[#allocation2 + $0xb80] sm:$0xff] }
 0x798   : > { %4010 = vmatpush.msrb.mxu0 %v9028_v16  ;;  %3963 = vmatpush.msra.mxu1 %v6158_v34  ;;  %11001 = vst [vmem:[#allocation41_spill] sm:$0xff] %v9099_v50  ;;  %v9102_v34 = vld [vmem:[#allocation2 + $0xa88] sm:$0xff] }
 0x799   : > { %3983 = vmatpush.msra.mxu2 %v6159_v20  ;;  %3964 = vmatmul.f32.vlgmr.msra.gmra.mxu1 %v10996_v58  ;;  %11002 = vst [vmem:[#allocation6_spill] sm:$0xff] %v9102_v34  ;;  %v9105_v20 = vld [vmem:[#allocation2 + $0xa40] sm:$0xff] }
 0x79a   : > { %3984 = vmatmul.f32.vlgmr.msra.gmra.mxu2 %v10994_v57  ;;  %4011 = vmatpush.msrb.mxu0 %v9033_v11  ;;  %v9123_v57 = vld [vmem:[#allocation2 + $0xa20] sm:$0xff] }
 0x79b   : > { %4028 = vmatpush.msrb.mxu1 %v9036_v8  ;;  %4048 = vmatpush.msrb.mxu2 %v9039_v46 }
 0x79c   : > { %4012 = vmatpush.msrb.mxu0 %v9042_v54 }
 0x79d   : > { %4029 = vmatpush.msrb.mxu1 %v9045_v3  ;;  %4049 = vmatpush.msrb.mxu2 %v9048_v15 }
 0x79e   : > { %4013 = vmatpush.msrb.mxu0 %v9051_v61 }
 0x79f   : > { %4030 = vmatpush.msrb.mxu1 %v9054_v63  ;;  %4050 = vmatpush.msrb.mxu2 %v9057_v14 }
 0x7a0   : > { %4014 = vmatpush.msrb.mxu0 %v9060_v35 }
 0x7a1   : > { %4031 = vmatpush.msrb.mxu1 %v9063_v44  ;;  %4051 = vmatpush.msrb.mxu2 %v9066_v23 }
 0x7a2   : > { %4015 = vmatpush.msrb.mxu0 %v9069_v19 }
 0x7a3   : > { %4032 = vmatpush.msrb.mxu1 %v9072_v18  ;;  %4052 = vmatpush.msrb.mxu2 %v9075_v43 }
 0x7a4   : > { %4016 = vmatpush.msrb.mxu0 %v9078_v0 }
 0x7a5   : > { %4033 = vmatpush.msrb.mxu1 %v9081_v60  ;;  %4053 = vmatpush.msrb.mxu2 %v9084_v52 }
 0x7a6   : > { %4017 = vmatpush.msrb.mxu0 %v9087_v39 }
 0x7a7   : > { %4034 = vmatpush.msrb.mxu1 %v9090_v36  ;;  %4054 = vmatpush.msrb.mxu2 %v9093_v41 }
 0x7a8   : > { %4018 = vmatpush.msrb.mxu0 %v9096_v24 }
 0x7a9   : > { %4035 = vmatpush.msrb.mxu1 %v9099_v50  ;;  %4055 = vmatpush.msrb.mxu2 %v9102_v34 }
 0x7aa   : > { %4019 = vmatpush.msrb.mxu0 %v9105_v20 }
 0x7ab   : > { %4036 = vmatpush.msrb.mxu1 %v9108_v10  ;;  %4056 = vmatpush.msrb.mxu2 %v9111_v42 }
 0x7ac   : > { %4020 = vmatpush.msrb.mxu0 %v9114_v33 }
 0x7ad   : > { %4037 = vmatpush.msrb.mxu1 %v9117_v59  ;;  %4057 = vmatpush.msrb.mxu2 %v9120_v5 }
 0x7ae   : > { %4021 = vmatpush.msrb.mxu0 %v9123_v57 }
 0x7af   : > { %4038 = vmatpush.msrb.mxu1 %v9126_v47  ;;  %4058 = vmatpush.msrb.mxu2 %v9129_v31 }
 0x7b0   : > { %4022 = vmatpush.msrb.mxu0 %v9132_v26 }
 0x7b1   : > { %4039 = vmatpush.msrb.mxu1 %v9135_v40  ;;  %4059 = vmatpush.msrb.mxu2 %v9138_v30 }
 0x7b2   : > { %4023 = vmatpush.msrb.mxu0 %v9141_v49 }
 0x7b3   : > { %4040 = vmatpush.msrb.mxu1 %v9144_v25  ;;  %4060 = vmatpush.msrb.mxu2 %v9147_v1 }
 0x7b4   : > { %4024 = vmatmul.f32.vlgmr.msrb.gmra.mxu0 %v8823_v48 }
 0x7b5   : > { %4088 = vmatpush.msra.mxu0 %v9022_v6  ;;  %4041 = vmatpush.msrb.mxu1 %v9152_v17  ;;  %v9166_v6 = vld [vmem:[#allocation2 + $0xb00] sm:$0xff] }
 0x7b6   : > { %4061 = vmatpush.msrb.mxu2 %v9155_v32  ;;  %11017 = vst [vmem:[#allocation32_spill] sm:$0xff] %v9166_v6 }
 0x7b7   : > { %4089 = vmatpush.msra.mxu0 %v9025_v53  ;;  %4042 = vmatpush.msrb.mxu1 %v9159_v7 }
 0x7b8   : > { %4062 = vmatpush.msrb.mxu2 %v9162_v22 }
 0x7b9   : > { %4090 = vmatpush.msra.mxu0 %v9028_v16  ;;  %4043 = vmatpush.msrb.mxu1 %v9166_v6 }
 0x7ba   : > { %4063 = vmatpush.msrb.mxu2 %v9169_v37  ;;  %4044 = vmatmul.f32.vlgmr.msrb.gmra.mxu1 %v8904_v21 }
 0x7bb   : > { %4064 = vmatmul.f32.vlgmr.msrb.gmra.mxu2 %v8823_v48  ;;  %4091 = vmatpush.msra.mxu0 %v9033_v11 }
 0x7bc   : > { %4108 = vmatpush.msra.mxu1 %v9036_v8  ;;  %4128 = vmatpush.msra.mxu2 %v9039_v46 }
 0x7bd   : > { %4092 = vmatpush.msra.mxu0 %v9042_v54 }
 0x7be   : > { %4109 = vmatpush.msra.mxu1 %v9045_v3  ;;  %4129 = vmatpush.msra.mxu2 %v9048_v15 }
 0x7bf   : > { %4093 = vmatpush.msra.mxu0 %v9051_v61 }
 0x7c0   : > { %4110 = vmatpush.msra.mxu1 %v9054_v63  ;;  %4130 = vmatpush.msra.mxu2 %v9057_v14 }
 0x7c1   : > { %4094 = vmatpush.msra.mxu0 %v9060_v35 }
 0x7c2   : > { %4111 = vmatpush.msra.mxu1 %v9063_v44  ;;  %4131 = vmatpush.msra.mxu2 %v9066_v23 }
 0x7c3   : > { %4095 = vmatpush.msra.mxu0 %v9069_v19 }
 0x7c4   : > { %4112 = vmatpush.msra.mxu1 %v9072_v18  ;;  %4132 = vmatpush.msra.mxu2 %v9075_v43 }
 0x7c5   : > { %4096 = vmatpush.msra.mxu0 %v9078_v0 }
 0x7c6   : > { %4113 = vmatpush.msra.mxu1 %v9081_v60  ;;  %4133 = vmatpush.msra.mxu2 %v9084_v52 }
 0x7c7   : > { %4097 = vmatpush.msra.mxu0 %v9087_v39 }
 0x7c8   : > { %4114 = vmatpush.msra.mxu1 %v9090_v36  ;;  %4134 = vmatpush.msra.mxu2 %v9093_v41 }
 0x7c9   : > { %4098 = vmatpush.msra.mxu0 %v9096_v24 }
 0x7ca   : > { %4115 = vmatpush.msra.mxu1 %v9099_v50  ;;  %4135 = vmatpush.msra.mxu2 %v9102_v34  ;;  %v9350_v34 = vld [vmem:[#allocation2 + $0xb08] sm:$0xff] }
 0x7cb   : > { %4099 = vmatpush.msra.mxu0 %v9105_v20  ;;  %11050 = vst [vmem:[#allocation85_spill] sm:$0xff] %v9350_v34 }
 0x7cc   : > { %4116 = vmatpush.msra.mxu1 %v9108_v10  ;;  %4136 = vmatpush.msra.mxu2 %v9111_v42  ;;  %v9347_v42 = vld [vmem:[#allocation2 + $0xb18] sm:$0xff] }
 0x7cd   : > { %4100 = vmatpush.msra.mxu0 %v9114_v33  ;;  %11049 = vst [vmem:[#allocation84_spill] sm:$0xff] %v9347_v42 }
 0x7ce   : > { %4117 = vmatpush.msra.mxu1 %v9117_v59  ;;  %4137 = vmatpush.msra.mxu2 %v9120_v5  ;;  %v9344_v5 = vld [vmem:[#allocation2 + $0xb28] sm:$0xff] }
 0x7cf   : > { %4101 = vmatpush.msra.mxu0 %v9123_v57  ;;  %v3773_v36 = vpop.f32.mrf.mxu0  ;;  %11048 = vst [vmem:[#allocation83_spill] sm:$0xff] %v9344_v5 }
 0x7d0   : > { %4118 = vmatpush.msra.mxu1 %v9126_v47  ;;  %4138 = vmatpush.msra.mxu2 %v9129_v31  ;;  %v3796_v50 = vmul.f32 %v3773_v36, %v8982_v51  ;;  %v11019_v47 = vld [vmem:[#allocation77_spill] sm:$0xff]  ;;  %v6229_v31 = vld [vmem:[#allocation2 + $0x578] sm:$0xff] }
 0x7d1   : > { %4102 = vmatpush.msra.mxu0 %v9132_v26 }
 0x7d2   : > { %4119 = vmatpush.msra.mxu1 %v9135_v40  ;;  %4139 = vmatpush.msra.mxu2 %v9138_v30  ;;  %v3798_v59 = vadd.f32 %v3796_v50, %v8986_v56  ;;  %v6228_v30 = vld [vmem:[#allocation2 + $0x588] sm:$0xff] }
 0x7d3   : > { %4103 = vmatpush.msra.mxu0 %v9141_v49 }
 0x7d4   : > { %4120 = vmatpush.msra.mxu1 %v9144_v25  ;;  %4140 = vmatpush.msra.mxu2 %v9147_v1  ;;  %v3800_v10 = vmax.f32 %v3798_v59, 0.0  ;;  %v9281_v1 = vld [vmem:[#allocation2 + $0x610] sm:$0xff] }
 0x7d5   : > { %4104 = vmatmul.f32.vlgmr.msra.gmra.mxu0 %v11019_v47  ;;  %11037 = vst [vmem:[#allocation61_spill] sm:$0xff] %v9281_v1 }
 0x7d6   : > { %5787 = vst [vmem:[%s8992_s23 + $0x10] sm:$0xff] %v3800_v10  ;;  %4121 = vmatpush.msra.mxu1 %v9152_v17  ;;  %4141 = vmatpush.msra.mxu2 %v9155_v32  ;;  %v3793_v36 = vpop.f32.mrf.mxu1  ;;  %v9227_v10 = vld [vmem:[#allocation2 + $0x6f0] sm:$0xff]  ;;  %v9265_v17 = vld [vmem:[#allocation2 + $0x640] sm:$0xff] }
 0x7d7   : > { %v3797_v40 = vmul.f32 %v3793_v36, %v8982_v51  ;;  %11020 = vst [vmem:[#allocation34_spill] sm:$0xff] %v9227_v10  ;;  %v9231_v36 = vld [vmem:[#allocation2 + $0x6e0] sm:$0xff] }
 0x7d8   : > { %4122 = vmatpush.msra.mxu1 %v9159_v7  ;;  %4142 = vmatpush.msra.mxu2 %v9162_v22  ;;  %11021 = vst [vmem:[#allocation35_spill] sm:$0xff] %v9231_v36  ;;  %v9234_v7 = vld [vmem:[#allocation2 + $0x6d0] sm:$0xff] }
 0x7d9   : > { %v3799_v50 = vadd.f32 %v3797_v40, %v8986_v56  ;;  %11022 = vst [vmem:[#allocation36_spill] sm:$0xff] %v9234_v7  ;;  %v9237_v40 = vld [vmem:[#allocation2 + $0x6c0] sm:$0xff]  ;;  %v9270_v22 = vld [vmem:[#allocation2 + $0x630] sm:$0xff] }
 0x7da   : > { %4123 = vmatpush.msra.mxu1 %v9166_v6  ;;  %4143 = vmatpush.msra.mxu2 %v9169_v37  ;;  %11023 = vst [vmem:[#allocation37_spill] sm:$0xff] %v9237_v40  ;;  %v9240_v6 = vld [vmem:[#allocation2 + $0x6b0] sm:$0xff] }
 0x7db   : > { %4124 = vmatmul.f32.vlgmr.msra.gmra.mxu1 %v8859_v13  ;;  %4144 = vmatmul.f32.vlgmr.msra.gmra.mxu2 %v11019_v47  ;;  %v3801_v59 = vmax.f32 %v3799_v50, 0.0  ;;  %11024 = vst [vmem:[#allocation38_spill] sm:$0xff] %v9240_v6  ;;  %v9243_v50 = vld [vmem:[#allocation2 + $0x6a0] sm:$0xff] }
 0x7dc   : > { %4214 = vmatpush.msrb.mxu2 %v9227_v10  ;;  %11025 = vst [vmem:[#allocation39_spill] sm:$0xff] %v9243_v50 }
 0x7dd   : > { %5788 = vst [vmem:[%s8992_s23 + $0x18] sm:$0xff] %v3801_v59  ;;  %v9246_v59 = vld [vmem:[#allocation2 + $0x690] sm:$0xff] }
 0x7de   : > { %4215 = vmatpush.msrb.mxu2 %v9231_v36  ;;  %11026 = vst [vmem:[#allocation40_spill] sm:$0xff] %v9246_v59  ;;  %v9249_v36 = vld [vmem:[#allocation2 + $0x680] sm:$0xff] }
 0x7df   : > { %11027 = vst [vmem:[#allocation65_spill] sm:$0xff] %v9249_v36 }
 0x7e0   : > { %4216 = vmatpush.msrb.mxu2 %v9234_v7  ;;  %v9252_v7 = vld [vmem:[#allocation2 + $0x670] sm:$0xff]  ;;  %11033 = vst [vmem:[#allocation52_spill] sm:$0xff] %v9265_v17 }
 0x7e1   : > { %11028 = vst [vmem:[#allocation63_spill] sm:$0xff] %v9252_v7 }
 0x7e2   : > { %4217 = vmatpush.msrb.mxu2 %v9237_v40  ;;  %v9255_v40 = vld [vmem:[#allocation2 + $0x660] sm:$0xff]  ;;  %11035 = vst [vmem:[#allocation55_spill] sm:$0xff] %v9270_v22 }
 0x7e3   : > { %11029 = vst [vmem:[#allocation51_spill] sm:$0xff] %v9255_v40 }
 0x7e4   : > { %4218 = vmatpush.msrb.mxu2 %v9240_v6  ;;  %v9258_v6 = vld [vmem:[#allocation2 + $0x650] sm:$0xff] }
 0x7e5   : > { %11030 = vst [vmem:[#allocation66_spill] sm:$0xff] %v9258_v6 }
 0x7e6   : > { %4219 = vmatpush.msrb.mxu2 %v9243_v50  ;;  %v11031_v50 = vld [vmem:[#allocation48_spill] sm:$0xff] }
 0x7e7   : > { %v3191_v10 = vmul.f32 %v11031_v50, %v10944_v29  ;;  %v9275_v50 = vld [vmem:[#allocation2 + $0x620] sm:$0xff] }
 0x7e8   : > { %4220 = vmatpush.msrb.mxu2 %v9246_v59  ;;  %v11032_v59 = vld [vmem:[#allocation53_spill] sm:$0xff]  ;;  %11036 = vst [vmem:[#allocation56_spill] sm:$0xff] %v9275_v50 }
 0x7e9   : > { %v3109_v37 = vmul.f32 %v11032_v59, %v10944_v29 }
 0x7ea   : > { %4221 = vmatpush.msrb.mxu2 %v9249_v36 }
 0x7ec   : > { %4222 = vmatpush.msrb.mxu2 %v9252_v7  ;;  %v11034_v7 = vld [vmem:[#allocation46_spill] sm:$0xff] }
 0x7ed   : > { %v3107_v36 = vmul.f32 %v11034_v7, %v8761_v45 }
 0x7ee   : > { %4223 = vmatpush.msrb.mxu2 %v9255_v40  ;;  %v3199_v40 = vadd.f32 %v3191_v10, %v8638_v4 }
 0x7ef   : > { %v3859_v25 = vpop.f32.mrf.mxu0 }
 0x7f0   : > { %4224 = vmatpush.msrb.mxu2 %v9258_v6  ;;  %v3117_v6 = vadd.f32 %v3109_v37, %v8638_v4  ;;  %v9284_v7 = vmax.f32 %v3199_v40, 0.0  ;;  %v9289_v37 = vld [vmem:[#allocation2 + $0x600] sm:$0xff] }
 0x7f1   : > { %11040 = vst [vmem:[#allocation77_spill] sm:$0xff] %v9289_v37 }
 0x7f2   : > { %4225 = vmatpush.msrb.mxu2 %v9265_v17  ;;  %v3115_v17 = vadd.f32 %v3107_v36, %v8786_v12  ;;  %11038 = vst [vmem:[#allocation57_spill] sm:$0xff] %v9284_v7  ;;  %v9287_v10 = vmax.f32 %v3117_v6, 0.0 }
 0x7f4   : > { %4226 = vmatpush.msrb.mxu2 %v9270_v22  ;;  %11039 = vst [vmem:[#allocation58_spill] sm:$0xff] %v9287_v10  ;;  %v6227_v22 = vld [vmem:[#allocation2 + $0x598] sm:$0xff] }
 0x7f6   : > { %4227 = vmatpush.msrb.mxu2 %v9275_v50  ;;  %v3879_v59 = vpop.f32.mrf.mxu1  ;;  %v6224_v50 = vld [vmem:[#allocation2 + $0x5c8] sm:$0xff] }
 0x7f7   : > { %v9278_v32 = vadd.f32 %v3879_v59, %v3859_v25  ;;  %v9294_v25 = vmax.f32 %v3115_v17, 0.0  ;;  %v6221_v59 = vld [vmem:[#allocation2 + $0x5f8] sm:$0xff] }
 0x7f8   : > { %4228 = vmatpush.msrb.mxu2 %v9281_v1  ;;  %v6222_v1 = vld [vmem:[#allocation2 + $0x5e8] sm:$0xff]  ;;  %v6223_v17 = vld [vmem:[#allocation2 + $0x5d8] sm:$0xff] }
 0x7f9   : > { %3915 = vmatpush.msra.mxu3 %v9278_v32  ;;  %11041 = vst [vmem:[#allocation48_spill] sm:$0xff] %v9294_v25 }
 0x7fa   : > { %4229 = vmatpush.msrb.mxu2 %v9289_v37 }
 0x7fb   : > { %4230 = vmatmul.f32.vlgmr.msrb.gmra.mxu2 %v9284_v7  ;;  %3916 = vmatpush.msra.mxu3 %v9003_v9 }
 0x7fc   : > { %4301 = vmatpush.msra.mxu2 %v9287_v10  ;;  %v3899_v36 = vpop.f32.mrf.mxu2 }
 0x7fd   : > { %v3922_v40 = vmul.f32 %v3899_v36, %v8982_v51  ;;  %3917 = vmatpush.msra.mxu3 %v8916_v38  ;;  %v6225_v36 = vld [vmem:[#allocation2 + $0x5b8] sm:$0xff]  ;;  %v6226_v38 = vld [vmem:[#allocation2 + $0x5a8] sm:$0xff] }
 0x7fe   : > { %4302 = vmatpush.msra.mxu2 %v9294_v25  ;;  %5760 = vmatmul.msk.f32.vlgmr.msra.gmra.mxu3 %vm3614_vm1, %v8929_v55 }
 0x7ff   : > { %v3924_v6 = vadd.f32 %v3922_v40, %v8986_v56  ;;  %3988 = vmatpush.msrb.mxu3 %v6221_v59  ;;  %v6230_v40 = vld [vmem:[#allocation2 + $0x568] sm:$0xff] }
 0x800   : > { %v6234_v59 = vld [vmem:[#allocation2 + $0x528] sm:$0xff] }
 0x801   : > { %v3926_v37 = vmax.f32 %v3924_v6, 0.0  ;;  %3989 = vmatpush.msrb.mxu3 %v6222_v1  ;;  %v6231_v6 = vld [vmem:[#allocation2 + $0x558] sm:$0xff]  ;;  %v6232_v1 = vld [vmem:[#allocation2 + $0x548] sm:$0xff] }
 0x803   : > { %5789 = vst [vmem:[%s8992_s23 + $0x20] sm:$0xff] %v3926_v37  ;;  %3990 = vmatpush.msrb.mxu3 %v6223_v17  ;;  %v6233_v37 = vld [vmem:[#allocation2 + $0x538] sm:$0xff]  ;;  %v6236_v17 = vld [vmem:[#allocation2 + $0x508] sm:$0xff] }
 0x805   : > { %3991 = vmatpush.msrb.mxu3 %v6224_v50  ;;  %v6235_v50 = vld [vmem:[#allocation2 + $0x518] sm:$0xff] }
 0x807   : > { %3992 = vmatpush.msrb.mxu3 %v6225_v36  ;;  %v9314_v36 = vld [vmem:[#allocation2 + $0xbc8] sm:$0xff] }
 0x808   : > { %11044 = vst [vmem:[#allocation79_spill] sm:$0xff] %v9314_v36 }
 0x809   : > { %3993 = vmatpush.msrb.mxu3 %v6226_v38  ;;  %v9317_v38 = vld [vmem:[#allocation2 + $0xbb8] sm:$0xff] }
 0x80a   : > { %11045 = vst [vmem:[#allocation80_spill] sm:$0xff] %v9317_v38 }
 0x80b   : > { %3994 = vmatpush.msrb.mxu3 %v6227_v22  ;;  %v9305_v22 = vld [vmem:[#allocation2 + $0xbf8] sm:$0xff] }
 0x80c   : > { %11042 = vst [vmem:[#allocation53_spill] sm:$0xff] %v9305_v22 }
 0x80d   : > { %3995 = vmatpush.msrb.mxu3 %v6228_v30  ;;  %v9308_v30 = vld [vmem:[#allocation2 + $0xbe8] sm:$0xff] }
 0x80f   : > { %3996 = vmatpush.msrb.mxu3 %v6229_v31  ;;  %v9311_v31 = vld [vmem:[#allocation2 + $0xbd8] sm:$0xff] }
 0x810   : > { %11043 = vst [vmem:[#allocation46_spill] sm:$0xff] %v9311_v31  ;;  %v3945_v60 = vpop.f32.mrf.mxu0 }
 0x811   : > { %3997 = vmatpush.msrb.mxu3 %v6230_v40  ;;  %v9320_v40 = vld [vmem:[#allocation2 + $0xba8] sm:$0xff] }
 0x813   : > { %3998 = vmatpush.msrb.mxu3 %v6231_v6  ;;  %v9323_v6 = vld [vmem:[#allocation2 + $0xb98] sm:$0xff] }
 0x815   : > { %3999 = vmatpush.msrb.mxu3 %v6232_v1  ;;  %v9326_v1 = vld [vmem:[#allocation2 + $0xb88] sm:$0xff] }
 0x816   : > { %v3965_v41 = vpop.f32.mrf.mxu1 }
 0x817   : > { %4000 = vmatpush.msrb.mxu3 %v6233_v37  ;;  %v9329_v37 = vld [vmem:[#allocation2 + $0xb78] sm:$0xff] }
 0x819   : > { %4001 = vmatpush.msrb.mxu3 %v6234_v59  ;;  %v9332_v59 = vld [vmem:[#allocation2 + $0xb68] sm:$0xff] }
 0x81b   : > { %4002 = vmatpush.msrb.mxu3 %v6235_v50  ;;  %v9335_v50 = vld [vmem:[#allocation2 + $0xb58] sm:$0xff] }
 0x81c   : > { %11046 = vst [vmem:[#allocation81_spill] sm:$0xff] %v9335_v50 }
 0x81d   : > { %4003 = vmatpush.msrb.mxu3 %v6236_v17  ;;  %v9338_v17 = vld [vmem:[#allocation2 + $0xb48] sm:$0xff] }
 0x81e   : > { %4004 = vmatmul.f32.vlgmr.msrb.gmra.mxu3 %v10996_v58  ;;  %v9341_v58 = vld [vmem:[#allocation2 + $0xb38] sm:$0xff] }
 0x81f   : > { %4068 = vmatpush.msra.mxu3 %v9305_v22  ;;  %11047 = vst [vmem:[#allocation82_spill] sm:$0xff] %v9341_v58 }
 0x821   : > { %4069 = vmatpush.msra.mxu3 %v9308_v30 }
 0x823   : > { %4070 = vmatpush.msra.mxu3 %v9311_v31 }
 0x825   : > { %4071 = vmatpush.msra.mxu3 %v9314_v36 }
 0x827   : > { %4072 = vmatpush.msra.mxu3 %v9317_v38 }
 0x829   : > { %4073 = vmatpush.msra.mxu3 %v9320_v40 }
 0x82b   : > { %4074 = vmatpush.msra.mxu3 %v9323_v6 }
 0x82d   : > { %4075 = vmatpush.msra.mxu3 %v9326_v1 }
 0x82f   : > { %4076 = vmatpush.msra.mxu3 %v9329_v37 }
 0x831   : > { %4077 = vmatpush.msra.mxu3 %v9332_v59  ;;  %v4025_v18 = vpop.f32.mrf.mxu0 }
 0x833   : > { %4078 = vmatpush.msra.mxu3 %v9335_v50 }
 0x835   : > { %4079 = vmatpush.msra.mxu3 %v9338_v17 }
 0x837   : > { %4080 = vmatpush.msra.mxu3 %v9341_v58 }
 0x839   : > { %4081 = vmatpush.msra.mxu3 %v9344_v5 }
 0x83b   : > { %4082 = vmatpush.msra.mxu3 %v9347_v42 }
 0x83d   : > { %4083 = vmatpush.msra.mxu3 %v9350_v34 }
 0x83e   : > { %4084 = vmatmul.f32.vlgmr.msra.gmra.mxu3 %v8904_v21 }
 0x83f   : > { %4148 = vmatpush.msrb.mxu3 %v9305_v22  ;;  %v4045_v22 = vpop.f32.mrf.mxu1 }
 0x841   : > { %4149 = vmatpush.msrb.mxu3 %v9308_v30 }
 0x843   : > { %4150 = vmatpush.msrb.mxu3 %v9311_v31 }
 0x845   : > { %4151 = vmatpush.msrb.mxu3 %v9314_v36 }
 0x847   : > { %4152 = vmatpush.msrb.mxu3 %v9317_v38 }
 0x849   : > { %4153 = vmatpush.msrb.mxu3 %v9320_v40 }
 0x84b   : > { %4154 = vmatpush.msrb.mxu3 %v9323_v6 }
 0x84d   : > { %4155 = vmatpush.msrb.mxu3 %v9326_v1 }
 0x84f   : > { %4156 = vmatpush.msrb.mxu3 %v9329_v37 }
 0x851   : > { %4157 = vmatpush.msrb.mxu3 %v9332_v59 }
 0x852   : > { %v4105_v38 = vpop.f32.mrf.mxu0 }
 0x853   : > { %4158 = vmatpush.msrb.mxu3 %v9335_v50  ;;  %v9375_v50 = vadd.f32 %v4045_v22, %v4025_v18  ;;  %v3966_v18 = vadd.f32 %v3965_v41, %v3945_v60  ;;  %v9390_v22 = vld [vmem:[#allocation2 + $0x7c0] sm:$0xff]  ;;  %v9401_v60 = vld [vmem:[#allocation2 + $0x790] sm:$0xff]  ;;  %v9406_v41 = vld [vmem:[#allocation2 + $0x6f8] sm:$0xff] }
 0x854   : > { %11055 = vst [vmem:[#allocation90_spill] sm:$0xff] %v9390_v22 }
 0x855   : > { %4159 = vmatpush.msrb.mxu3 %v9338_v17  ;;  %11051 = vst [vmem:[#allocation86_spill] sm:$0xff] %v9375_v50 }
 0x856   : > { %11061 = vst [vmem:[#allocation92_spill] sm:$0xff] %v9406_v41 }
 0x857   : > { %4160 = vmatpush.msrb.mxu3 %v9341_v58  ;;  %v9378_v58 = vld [vmem:[#allocation2 + $0x7f0] sm:$0xff] }
 0x858   : > { %v4125_v36 = vpop.f32.mrf.mxu1  ;;  %11052 = vst [vmem:[#allocation87_spill] sm:$0xff] %v9378_v58 }
 0x859   : > { %v9367_v31 = vadd.f32 %v4125_v36, %v4105_v38  ;;  %4161 = vmatpush.msrb.mxu3 %v9344_v5  ;;  %v9382_v36 = vld [vmem:[#allocation2 + $0x7e0] sm:$0xff]  ;;  %v9386_v38 = vld [vmem:[#allocation2 + $0x7d0] sm:$0xff]  ;;  %v9495_v5 = vld [vmem:[#allocation2 + $0x628] sm:$0xff] }
 0x85a   : > { %11053 = vst [vmem:[#allocation88_spill] sm:$0xff] %v9382_v36 }
 0x85b   : > { %4175 = vmatpush.msrb.mxu0 %v9367_v31  ;;  %4162 = vmatpush.msrb.mxu3 %v9347_v42  ;;  %11054 = vst [vmem:[#allocation89_spill] sm:$0xff] %v9386_v38  ;;  %v9442_v42 = vld [vmem:[#allocation2 + $0x6a8] sm:$0xff] }
 0x85d   : > { %4176 = vmatpush.msrb.mxu0 %v8691_v2  ;;  %4163 = vmatpush.msrb.mxu3 %v9350_v34  ;;  %v11059_v34 = vld [vmem:[#allocation54_spill] sm:$0xff] }
 0x85e   : > { %4164 = vmatmul.f32.vlgmr.msrb.gmra.mxu3 %v8859_v13  ;;  %11060 = vst [vmem:[#allocation54_spill] sm:$0xff] %v9401_v60 }
 0x85f   : > { %4177 = vmatpush.msrb.mxu0 %v8780_v27  ;;  %4234 = vmatpush.msra.mxu3 %v9378_v58  ;;  %v9393_v58 = vld [vmem:[#allocation2 + $0x7b0] sm:$0xff] }
 0x860   : > { %11056 = vst [vmem:[#allocation91_spill] sm:$0xff] %v9393_v58 }
 0x861   : > { %4178 = vmatpush.msrb.mxu0 %v9375_v50  ;;  %4235 = vmatpush.msra.mxu3 %v9382_v36  ;;  %v11057_v50 = vld [vmem:[#allocation22_spill] sm:$0xff]  ;;  %v9397_v36 = vld [vmem:[#allocation2 + $0x7a0] sm:$0xff] }
 0x862   : > { %11058 = vst [vmem:[#allocation22_spill] sm:$0xff] %v9397_v36 }
 0x863   : > { %4179 = vmatpush.msrb.mxu0 %v8645_v28  ;;  %4236 = vmatpush.msra.mxu3 %v9386_v38  ;;  %v9434_v38 = vld [vmem:[#allocation2 + $0x6b8] sm:$0xff] }
 0x865   : > { %4180 = vmatpush.msrb.mxu0 %v8811_v62  ;;  %4237 = vmatpush.msra.mxu3 %v9390_v22 }
 0x867   : > { %4181 = vmatpush.msrb.mxu0 %v3966_v18  ;;  %4238 = vmatpush.msra.mxu3 %v9393_v58  ;;  %v9409_v18 = vld [vmem:[#allocation2 + $0x780] sm:$0xff]  ;;  %v9424_v58 = vld [vmem:[#allocation2 + $0x6c8] sm:$0xff] }
 0x868   : > { %11062 = vst [vmem:[#allocation93_spill] sm:$0xff] %v9409_v18 }
 0x869   : > { %4182 = vmatpush.msrb.mxu0 %v11057_v50  ;;  %4239 = vmatpush.msra.mxu3 %v9397_v36  ;;  %v9412_v50 = vld [vmem:[#allocation2 + $0x6e8] sm:$0xff]  ;;  %v9421_v36 = vld [vmem:[#allocation2 + $0x760] sm:$0xff]  ;;  %11067 = vst [vmem:[#allocation98_spill] sm:$0xff] %v9424_v58 }
 0x86a   : > { %11063 = vst [vmem:[#allocation94_spill] sm:$0xff] %v9412_v50 }
 0x86b   : > { %4183 = vmatpush.msrb.mxu0 %v11059_v34  ;;  %4240 = vmatpush.msra.mxu3 %v9401_v60  ;;  %v9415_v34 = vld [vmem:[#allocation2 + $0x770] sm:$0xff]  ;;  %v9418_v60 = vld [vmem:[#allocation2 + $0x6d8] sm:$0xff]  ;;  %11066 = vst [vmem:[#allocation97_spill] sm:$0xff] %v9421_v36 }
 0x86c   : > { %5761 = vmatmul.msk.f32.vlgmr.msrb.gmra.mxu0 %vm3614_vm1, %v8929_v55  ;;  %11064 = vst [vmem:[#allocation95_spill] sm:$0xff] %v9415_v34 }
 0x86d   : > { %4254 = vmatpush.msra.mxu0 %v9406_v41  ;;  %4241 = vmatpush.msra.mxu3 %v9409_v18  ;;  %11065 = vst [vmem:[#allocation96_spill] sm:$0xff] %v9418_v60  ;;  %v9427_v18 = vld [vmem:[#allocation2 + $0x750] sm:$0xff] }
 0x86e   : > { %11068 = vst [vmem:[#allocation99_spill] sm:$0xff] %v9427_v18 }
 0x86f   : > { %4255 = vmatpush.msra.mxu0 %v9412_v50  ;;  %4242 = vmatpush.msra.mxu3 %v9415_v34  ;;  %v11069_v50 = vld [vmem:[#allocation73_spill] sm:$0xff]  ;;  %v11070_v34 = vld [vmem:[#allocation74_spill] sm:$0xff] }
 0x870   : > { %v3192_v22 = vmul.f32 %v11069_v50, %v10944_v29  ;;  %v3110_v41 = vmul.f32 %v11070_v34, %v10944_v29  ;;  %11071 = vst [vmem:[#allocation73_spill] sm:$0xff] %v9434_v38  ;;  %v9450_v34 = vld [vmem:[#allocation2 + $0x698] sm:$0xff] }
 0x871   : > { %4256 = vmatpush.msra.mxu0 %v9418_v60  ;;  %4243 = vmatpush.msra.mxu3 %v9421_v36  ;;  %v9437_v60 = vld [vmem:[#allocation2 + $0x740] sm:$0xff]  ;;  %v11073_v36 = vld [vmem:[#allocation72_spill] sm:$0xff]  ;;  %11076 = vst [vmem:[#allocation101_spill] sm:$0xff] %v9450_v34 }
 0x872   : > { %11072 = vst [vmem:[#allocation74_spill] sm:$0xff] %v9437_v60  ;;  %v3200_v29 = vadd.f32 %v3192_v22, %v8638_v4  ;;  %v3118_v50 = vadd.f32 %v3110_v41, %v8638_v4  ;;  %v9467_v41 = vld [vmem:[#allocation2 + $0x678] sm:$0xff] }
 0x873   : > { %4257 = vmatpush.msra.mxu0 %v9424_v58  ;;  %4244 = vmatpush.msra.mxu3 %v9427_v18  ;;  %v3108_v58 = vmul.f32 %v11073_v36, %v8761_v45  ;;  %11074 = vst [vmem:[#allocation72_spill] sm:$0xff] %v9442_v42  ;;  %v9445_v18 = vld [vmem:[#allocation2 + $0x730] sm:$0xff] }
 0x874   : > { %11075 = vst [vmem:[#allocation100_spill] sm:$0xff] %v9445_v18  ;;  %v9463_v22 = vmax.f32 %v3200_v29, 0.0  ;;  %v9465_v4 = vmax.f32 %v3118_v50, 0.0  ;;  %v9480_v29 = vld [vmem:[#allocation2 + $0x658] sm:$0xff] }
 0x875   : > { %4258 = vmatpush.msra.mxu0 %v9434_v38  ;;  %4245 = vmatpush.msra.mxu3 %v9437_v60  ;;  %v9453_v60 = vld [vmem:[#allocation2 + $0x720] sm:$0xff]  ;;  %v3116_v36 = vadd.f32 %v3108_v58, %v8786_v12  ;;  %v9457_v38 = vld [vmem:[#allocation2 + $0x688] sm:$0xff]  ;;  %11082 = vst [vmem:[#allocation107_spill] sm:$0xff] %v9467_v41 }
 0x876   : > { %11077 = vst [vmem:[#allocation102_spill] sm:$0xff] %v9453_v60 }
 0x877   : > { %4259 = vmatpush.msra.mxu0 %v9442_v42  ;;  %4246 = vmatpush.msra.mxu3 %v9445_v18  ;;  %11078 = vst [vmem:[#allocation103_spill] sm:$0xff] %v9457_v38  ;;  %v9460_v42 = vld [vmem:[#allocation2 + $0x710] sm:$0xff]  ;;  %v9470_v18 = vld [vmem:[#allocation2 + $0x700] sm:$0xff]  ;;  %v9474_v58 = vmax.f32 %v3116_v36, 0.0 }
 0x878   : > { %11079 = vst [vmem:[#allocation104_spill] sm:$0xff] %v9460_v42 }
 0x879   : > { %4260 = vmatpush.msra.mxu0 %v9450_v34  ;;  %4247 = vmatpush.msra.mxu3 %v9453_v60  ;;  %11080 = vst [vmem:[#allocation105_spill] sm:$0xff] %v9463_v22  ;;  %v9476_v60 = vld [vmem:[#allocation2 + $0x668] sm:$0xff] }
 0x87a   : > { %11081 = vst [vmem:[#allocation106_spill] sm:$0xff] %v9465_v4 }
 0x87b   : > { %4261 = vmatpush.msra.mxu0 %v9457_v38  ;;  %4248 = vmatpush.msra.mxu3 %v9460_v42  ;;  %11083 = vst [vmem:[#allocation108_spill] sm:$0xff] %v9470_v18  ;;  %v11087_v42 = vld [vmem:[#allocation45_spill] sm:$0xff]  ;;  %v9491_v38 = vld [vmem:[#allocation2 + $0x638] sm:$0xff] }
 0x87c   : > { %11084 = vst [vmem:[#allocation109_spill] sm:$0xff] %v9474_v58  ;;  %v3189_v36 = vmul.f32 %v11087_v42, %v8761_v45 }
 0x87d   : > { %4262 = vmatpush.msra.mxu0 %v9467_v41  ;;  %4249 = vmatpush.msra.mxu3 %v9470_v18  ;;  %11085 = vst [vmem:[#allocation110_spill] sm:$0xff] %v9476_v60  ;;  %v9487_v41 = vld [vmem:[#allocation2 + $0x648] sm:$0xff] }
 0x87e   : > { %4250 = vmatmul.f32.vlgmr.msra.gmra.mxu3 %v9463_v22  ;;  %11086 = vst [vmem:[#allocation111_spill] sm:$0xff] %v9480_v29 }
 0x87f   : > { %4263 = vmatpush.msra.mxu0 %v9476_v60  ;;  %4321 = vmatpush.msrb.mxu3 %v9465_v4  ;;  %11088 = vst [vmem:[#allocation45_spill] sm:$0xff] %v9487_v41 }
 0x881   : > { %4264 = vmatpush.msra.mxu0 %v9480_v29  ;;  %4322 = vmatpush.msrb.mxu3 %v9474_v58  ;;  %v3919_v50 = vpop.f32.mrf.mxu3  ;;  %v3197_v29 = vadd.f32 %v3189_v36, %v8786_v12  ;;  %v9554_v36 = vld [vmem:[%s10520_s11] sm:$0xff] }
 0x882   : > { %v3923_v18 = vmul.f32 %v3919_v50, %v8982_v51  ;;  %v9499_v50 = vld [vmem:[#allocation2 + $0x618] sm:$0xff] }
 0x883   : > { %4265 = vmatpush.msra.mxu0 %v9487_v41  ;;  %v9502_v42 = vmax.f32 %v3197_v29, 0.0  ;;  %v9504_v41 = vld [vmem:[#allocation2 + $0x608] sm:$0xff]  ;;  %v11096_v29 = vld [vmem:[#allocation11_spill] sm:$0xff] }
 0x884   : > { %v3925_v60 = vadd.f32 %v3923_v18, %v8986_v56  ;;  %v11091_v18 = vld [vmem:[#allocation47_spill] sm:$0xff] }
 0x885   : > { %4266 = vmatpush.msra.mxu0 %v9491_v38  ;;  %11089 = vst [vmem:[#allocation112_spill] sm:$0xff] %v9502_v42 }
 0x886   : > { %v3927_v34 = vmax.f32 %v3925_v60, 0.0  ;;  %v11090_v60 = vld [vmem:[#allocation76_spill] sm:$0xff] }
 0x887   : > { %4267 = vmatpush.msra.mxu0 %v9495_v5 }
 0x888   : > { %5790 = vst [vmem:[%s8992_s23 + $0x28] sm:$0xff] %v3927_v34  ;;  %v11092_v34 = vld [vmem:[#allocation44_spill] sm:$0xff] }
 0x889   : > { %4268 = vmatpush.msra.mxu0 %v9499_v50 }
 0x88b   : > { %4269 = vmatpush.msra.mxu0 %v9504_v41 }
 0x88c   : > { %4270 = vmatmul.f32.vlgmr.msra.gmra.mxu0 %v9284_v7 }
 0x88d   : > { %4347 = vmatpush.msrb.mxu0 %v9502_v42 }
 0x88f   : > { %4348 = vmatpush.msrb.mxu0 %v9287_v10 }
 0x891   : > { %4349 = vmatpush.msrb.mxu0 %v9294_v25 }
 0x893   : > { %4350 = vmatpush.msrb.mxu0 %v8780_v27 }
 0x895   : > { %4351 = vmatpush.msrb.mxu0 %v11090_v60 }
 0x897   : > { %4352 = vmatpush.msrb.mxu0 %v11019_v47 }
 0x899   : > { %4353 = vmatpush.msrb.mxu0 %v8811_v62 }
 0x89b   : > { %4354 = vmatpush.msrb.mxu0 %v11091_v18 }
 0x89d   : > { %4355 = vmatpush.msrb.mxu0 %v8823_v48 }
 0x89e   : > { %5765 = vmatmul.msk.f32.vlgmr.msrb.gmra.mxu0 %vm3614_vm1, %v8929_v55  ;;  %v3985_v55 = vpop.f32.mrf.mxu2 }
 0x89f   : > { %4432 = vmatpush.msra.mxu0 %v11092_v34  ;;  %v9558_v34 = vld [vmem:[#allocation2 + $0x7f8] sm:$0xff] }
 0x8a1   : > { %4433 = vmatpush.msra.mxu0 %v9025_v53  ;;  %v4005_v53 = vpop.f32.mrf.mxu3 }
 0x8a3   : > { %4434 = vmatpush.msra.mxu0 %v9028_v16 }
 0x8a5   : > { %4435 = vmatpush.msra.mxu0 %v9033_v11 }
 0x8a6   : > { %v4065_v16 = vpop.f32.mrf.mxu2 }
 0x8a7   : > { %4436 = vmatpush.msra.mxu0 %v9042_v54 }
 0x8a9   : > { %4437 = vmatpush.msra.mxu0 %v9051_v61 }
 0x8ab   : > { %4438 = vmatpush.msra.mxu0 %v9060_v35 }
 0x8ad   : > { %4439 = vmatpush.msra.mxu0 %v9069_v19 }
 0x8ae   : > { %v4145_v54 = vpop.f32.mrf.mxu2 }
 0x8af   : > { %4440 = vmatpush.msra.mxu0 %v9078_v0 }
 0x8b1   : > { %4441 = vmatpush.msra.mxu0 %v9087_v39  ;;  %v11095_v39 = vld [vmem:[#allocation9_spill] sm:$0xff] }
 0x8b3   : > { %4442 = vmatpush.msra.mxu0 %v9096_v24  ;;  %v4006_v24 = vadd.f32 %v4005_v53, %v3985_v55  ;;  %v9561_v55 = vld [vmem:[#allocation2 + $0x7e8] sm:$0xff]  ;;  %v9564_v53 = vld [vmem:[#allocation2 + $0x7d8] sm:$0xff] }
 0x8b5   : > { %4443 = vmatpush.msra.mxu0 %v9105_v20 }
 0x8b7   : > { %4444 = vmatpush.msra.mxu0 %v9114_v33  ;;  %v11093_v33 = vld [vmem:[#allocation49_spill] sm:$0xff] }
 0x8b9   : > { %4445 = vmatpush.msra.mxu0 %v9123_v57 }
 0x8bb   : > { %4446 = vmatpush.msra.mxu0 %v9132_v26  ;;  %v11094_v26 = vld [vmem:[#allocation17_spill] sm:$0xff] }
 0x8bd   : > { %4447 = vmatpush.msra.mxu0 %v9141_v49 }
 0x8be   : > { %4448 = vmatmul.f32.vlgmr.msra.gmra.mxu0 %v9294_v25 }
 0x8c1   : > { %v4085_v11 = vpop.f32.mrf.mxu3 }
 0x8c2   : > { %v9540_v57 = vadd.f32 %v4085_v11, %v4065_v16  ;;  %v9573_v16 = vld [vmem:[#allocation2 + $0x7a8] sm:$0xff]  ;;  %v4231_v11 = vpop.f32.mrf.mxu2 }
 0x8e1   : > { %v4165_v61 = vpop.f32.mrf.mxu3 }
 0x8e2   : > { %v9536_v35 = vadd.f32 %v4165_v61, %v4145_v54 }
 0x8e4   : > { %4195 = vmatpush.msrb.mxu1 %v9536_v35 }
 0x8e6   : > { %4196 = vmatpush.msrb.mxu1 %v11093_v33 }
 0x8e8   : > { %4197 = vmatpush.msrb.mxu1 %v11094_v26 }
 0x8e9   : > { %v4185_v49 = vpop.f32.mrf.mxu0 }
 0x8ea   : > { %v4208_v19 = vmul.f32 %v4185_v49, %v8982_v51  ;;  %4198 = vmatpush.msrb.mxu1 %v9540_v57  ;;  %v9578_v49 = vld [vmem:[#allocation2 + $0x798] sm:$0xff] }
 0x8ec   : > { %v4210_v0 = vadd.f32 %v4208_v19, %v8986_v56  ;;  %4199 = vmatpush.msrb.mxu1 %v11095_v39  ;;  %v9581_v19 = vld [vmem:[#allocation2 + $0x788] sm:$0xff] }
 0x8ed   : > { %11098 = vst [vmem:[#allocation47_spill] sm:$0xff] %v9581_v19 }
 0x8ee   : > { %v4212_v20 = vmax.f32 %v4210_v0, 0.0  ;;  %4200 = vmatpush.msrb.mxu1 %v11096_v29  ;;  %v9585_v0 = vld [vmem:[#allocation2 + $0x778] sm:$0xff] }
 0x8ef   : > { %11099 = vst [vmem:[#allocation44_spill] sm:$0xff] %v9585_v0 }
 0x8f0   : > { %5791 = vst [vmem:[%s8992_s23 + $0x30] sm:$0xff] %v4212_v20  ;;  %4201 = vmatpush.msrb.mxu1 %v4006_v24  ;;  %v9589_v24 = vld [vmem:[#allocation2 + $0x768] sm:$0xff]  ;;  %v9593_v20 = vld [vmem:[#allocation2 + $0x758] sm:$0xff] }
 0x8f1   : > { %11100 = vst [vmem:[#allocation49_spill] sm:$0xff] %v9589_v24 }
 0x8f2   : > { %4202 = vmatpush.msrb.mxu1 %v9278_v32  ;;  %v9567_v32 = vld [vmem:[#allocation2 + $0x7c8] sm:$0xff]  ;;  %11101 = vst [vmem:[#allocation17_spill] sm:$0xff] %v9593_v20 }
 0x8f4   : > { %4203 = vmatpush.msrb.mxu1 %v9003_v9  ;;  %v9570_v9 = vld [vmem:[#allocation2 + $0x7b8] sm:$0xff] }
 0x8f5   : > { %5762 = vmatmul.msk.f32.vlgmr.msrb.gmra.mxu1 %vm3614_vm1, %v9554_v36 }
 0x8f6   : > { %4274 = vmatpush.msra.mxu1 %v9558_v34 }
 0x8f8   : > { %4275 = vmatpush.msra.mxu1 %v9561_v55 }
 0x8fa   : > { %4276 = vmatpush.msra.mxu1 %v9564_v53 }
 0x8fc   : > { %4277 = vmatpush.msra.mxu1 %v9567_v32 }
 0x8fe   : > { %4278 = vmatpush.msra.mxu1 %v9570_v9 }
 0x900   : > { %4279 = vmatpush.msra.mxu1 %v9573_v16 }
 0x901   : > { %v4251_v54 = vpop.f32.mrf.mxu3 }
 0x902   : > { %v9576_v61 = vadd.f32 %v4251_v54, %v4231_v11  ;;  %4280 = vmatpush.msra.mxu1 %v9578_v49  ;;  %v11102_v11 = vld [vmem:[#allocation14_spill] sm:$0xff] }
 0x903   : > { %v11103_v54 = vld [vmem:[#allocation70_spill] sm:$0xff] }
 0x904   : > { %11097 = vst [vmem:[#allocation76_spill] sm:$0xff] %v9576_v61  ;;  %4281 = vmatpush.msra.mxu1 %v9581_v19  ;;  %4303 = vmatpush.msra.mxu2 %v9576_v61  ;;  %v3190_v61 = vmul.f32 %v11103_v54, %v8761_v45  ;;  %v9599_v19 = vld [vmem:[#allocation2 + $0x748] sm:$0xff]  ;;  %v9615_v45 = vld [vmem:[#allocation2 + $0x718] sm:$0xff] }
 0x905   : > { %11105 = vst [vmem:[#allocation70_spill] sm:$0xff] %v9615_v45 }
 0x906   : > { %4282 = vmatpush.msra.mxu1 %v9585_v0  ;;  %4304 = vmatpush.msra.mxu2 %v11090_v60  ;;  %v9603_v0 = vld [vmem:[#allocation2 + $0x738] sm:$0xff] }
 0x908   : > { %4283 = vmatpush.msra.mxu1 %v9589_v24  ;;  %4305 = vmatpush.msra.mxu2 %v11019_v47  ;;  %v3198_v24 = vadd.f32 %v3190_v61, %v8786_v12  ;;  %v9623_v12 = vld [vmem:[#allocation2 + $0x708] sm:$0xff] }
 0x909   : > { %v9618_v54 = vpop.f32.mrf.mxu0  ;;  %11107 = vst [vmem:[#allocation113_spill] sm:$0xff] %v9623_v12 }
 0x90a   : > { %4284 = vmatpush.msra.mxu1 %v9593_v20  ;;  %4306 = vmatpush.msra.mxu2 %v11102_v11  ;;  %v9608_v20 = vld [vmem:[#allocation2 + $0x728] sm:$0xff]  ;;  %v11104_v11 = vld [vmem:[#allocation16_spill] sm:$0xff] }
 0x90c   : > { %4285 = vmatpush.msra.mxu1 %v9599_v19  ;;  %4307 = vmatpush.msra.mxu2 %v11091_v18 }
 0x90e   : > { %4286 = vmatpush.msra.mxu1 %v9603_v0  ;;  %4308 = vmatpush.msra.mxu2 %v8823_v48  ;;  %v9620_v48 = vmax.f32 %v3198_v24, 0.0 }
 0x910   : > { %4287 = vmatpush.msra.mxu1 %v9608_v20  ;;  %4309 = vmatpush.msra.mxu2 %v11104_v11  ;;  %11106 = vst [vmem:[#allocation16_spill] sm:$0xff] %v9620_v48 }
 0x911   : > { %5763 = vmatmul.msk.f32.vlgmr.msra.gmra.mxu2 %vm3614_vm1, %v9554_v36 }
 0x912   : > { %4393 = vmatpush.msrb.mxu2 %v9284_v7  ;;  %4288 = vmatpush.msra.mxu1 %v9615_v45 }
 0x914   : > { %4394 = vmatpush.msrb.mxu2 %v9502_v42  ;;  %4289 = vmatpush.msra.mxu1 %v9623_v12  ;;  %v11108_v12 = vld [vmem:[#allocation19_spill] sm:$0xff] }
 0x915   : > { %4290 = vmatmul.f32.vlgmr.msra.gmra.mxu1 %v9463_v22 }
 0x916   : > { %4367 = vmatpush.msrb.mxu1 %v9620_v48  ;;  %4395 = vmatpush.msrb.mxu2 %v9287_v10 }
 0x918   : > { %4368 = vmatpush.msrb.mxu1 %v9465_v4  ;;  %4396 = vmatpush.msrb.mxu2 %v8691_v2 }
 0x91a   : > { %4369 = vmatpush.msrb.mxu1 %v9474_v58  ;;  %4397 = vmatpush.msrb.mxu2 %v8780_v27 }
 0x91b   : > { %v4357_v61 = vpop.f32.mrf.mxu0 }
 0x91c   : > { %v4380_v24 = vmul.f32 %v4357_v61, %v8982_v51  ;;  %4370 = vmatpush.msrb.mxu1 %v11094_v26  ;;  %4398 = vmatpush.msrb.mxu2 %v11090_v60  ;;  %v11109_v61 = vld [vmem:[#allocation15_spill] sm:$0xff] }
 0x91e   : > { %v4382_v11 = vadd.f32 %v4380_v24, %v8986_v56  ;;  %4371 = vmatpush.msrb.mxu1 %v11108_v12  ;;  %4399 = vmatpush.msrb.mxu2 %v8645_v28  ;;  %v11121_v24 = vld [vmem:[#allocation25_spill] sm:$0xff] }
 0x920   : > { %v4384_v45 = vmax.f32 %v4382_v11, 0.0  ;;  %4372 = vmatpush.msrb.mxu1 %v8859_v13  ;;  %4400 = vmatpush.msrb.mxu2 %v8811_v62  ;;  %v11122_v11 = vld [vmem:[#allocation64_spill] sm:$0xff] }
 0x922   : > { %5795 = vst [vmem:[%s8992_s23 + $0x50] sm:$0xff] %v4384_v45  ;;  %4373 = vmatpush.msrb.mxu1 %v11096_v29  ;;  %4401 = vmatpush.msrb.mxu2 %v11091_v18  ;;  %v11112_v45 = vld [vmem:[#allocation23_spill] sm:$0xff] }
 0x923   : > { %5767 = vmatmul.msk.f32.vlgmr.msrb.gmra.mxu2 %vm3614_vm1, %v9554_v36 }
 0x924   : > { %4472 = vmatpush.msra.mxu2 %v9039_v46  ;;  %4374 = vmatpush.msrb.mxu1 %v11109_v61  ;;  %v11110_v46 = vld [vmem:[#allocation7_spill] sm:$0xff] }
 0x926   : > { %4473 = vmatpush.msra.mxu2 %v9048_v15  ;;  %4375 = vmatpush.msrb.mxu1 %v8904_v21  ;;  %v11111_v15 = vld [vmem:[#allocation24_spill] sm:$0xff] }
 0x927   : > { %5766 = vmatmul.msk.f32.vlgmr.msrb.gmra.mxu1 %vm3614_vm1, %v9554_v36 }
 0x928   : > { %4452 = vmatpush.msra.mxu1 %v9036_v8  ;;  %4474 = vmatpush.msra.mxu2 %v9057_v14  ;;  %v11113_v8 = vld [vmem:[#allocation6_spill] sm:$0xff]  ;;  %v11114_v14 = vld [vmem:[#allocation5_spill] sm:$0xff] }
 0x92a   : > { %4453 = vmatpush.msra.mxu1 %v9045_v3  ;;  %4475 = vmatpush.msra.mxu2 %v9066_v23  ;;  %v11115_v3 = vld [vmem:[#allocation68_spill] sm:$0xff]  ;;  %v11116_v23 = vld [vmem:[#allocation41_spill] sm:$0xff] }
 0x92c   : > { %4454 = vmatpush.msra.mxu1 %v9054_v63  ;;  %4476 = vmatpush.msra.mxu2 %v9075_v43  ;;  %v11117_v63 = vld [vmem:[#allocation42_spill] sm:$0xff]  ;;  %v11118_v43 = vld [vmem:[#allocation43_spill] sm:$0xff] }
 0x92e   : > { %4455 = vmatpush.msra.mxu1 %v9063_v44  ;;  %4477 = vmatpush.msra.mxu2 %v9084_v52  ;;  %v11119_v44 = vld [vmem:[#allocation69_spill] sm:$0xff]  ;;  %v11120_v52 = vld [vmem:[#allocation8_spill] sm:$0xff] }
 0x930   : > { %4456 = vmatpush.msra.mxu1 %v11110_v46  ;;  %4478 = vmatpush.msra.mxu2 %v11111_v15  ;;  %v11123_v46 = vld [vmem:[#allocation27_spill] sm:$0xff] }
 0x931   : > { %v11124_v15 = vld [vmem:[#allocation67_spill] sm:$0xff] }
 0x932   : > { %4457 = vmatpush.msra.mxu1 %v11112_v45  ;;  %4479 = vmatpush.msra.mxu2 %v11113_v8  ;;  %v11125_v45 = vld [vmem:[#allocation29_spill] sm:$0xff]  ;;  %v11126_v8 = vld [vmem:[#allocation26_spill] sm:$0xff] }
 0x934   : > { %4458 = vmatpush.msra.mxu1 %v11114_v14  ;;  %4480 = vmatpush.msra.mxu2 %v11115_v3  ;;  %v11127_v14 = vld [vmem:[#allocation31_spill] sm:$0xff]  ;;  %v11128_v3 = vld [vmem:[#allocation28_spill] sm:$0xff] }
 0x936   : > { %4459 = vmatpush.msra.mxu1 %v11116_v23  ;;  %4481 = vmatpush.msra.mxu2 %v11117_v63  ;;  %v11129_v23 = vld [vmem:[#allocation33_spill] sm:$0xff]  ;;  %v11130_v63 = vld [vmem:[#allocation34_spill] sm:$0xff] }
 0x938   : > { %4460 = vmatpush.msra.mxu1 %v11118_v43  ;;  %4482 = vmatpush.msra.mxu2 %v11119_v44  ;;  %v11131_v43 = vld [vmem:[#allocation30_spill] sm:$0xff]  ;;  %v11132_v44 = vld [vmem:[#allocation35_spill] sm:$0xff] }
 0x93a   : > { %4461 = vmatpush.msra.mxu1 %v11120_v52  ;;  %4483 = vmatpush.msra.mxu2 %v11121_v24  ;;  %v11133_v52 = vld [vmem:[#allocation32_spill] sm:$0xff] }
 0x93b   : > { %v11134_v24 = vld [vmem:[#allocation36_spill] sm:$0xff] }
 0x93c   : > { %4462 = vmatpush.msra.mxu1 %v11122_v11  ;;  %4484 = vmatpush.msra.mxu2 %v11123_v46  ;;  %v11135_v11 = vld [vmem:[#allocation37_spill] sm:$0xff]  ;;  %v11136_v46 = vld [vmem:[#allocation38_spill] sm:$0xff] }
 0x93e   : > { %4463 = vmatpush.msra.mxu1 %v11124_v15  ;;  %4485 = vmatpush.msra.mxu2 %v11125_v45  ;;  %v11137_v15 = vld [vmem:[#allocation39_spill] sm:$0xff]  ;;  %v11138_v45 = vld [vmem:[#allocation40_spill] sm:$0xff] }
 0x940   : > { %4464 = vmatpush.msra.mxu1 %v11126_v8  ;;  %4486 = vmatpush.msra.mxu2 %v11127_v14  ;;  %v11139_v8 = vld [vmem:[#allocation65_spill] sm:$0xff]  ;;  %v11140_v14 = vld [vmem:[#allocation63_spill] sm:$0xff] }
 0x942   : > { %4465 = vmatpush.msra.mxu1 %v11128_v3  ;;  %4487 = vmatpush.msra.mxu2 %v11129_v23  ;;  %v11141_v3 = vld [vmem:[#allocation51_spill] sm:$0xff]  ;;  %v11142_v23 = vld [vmem:[#allocation66_spill] sm:$0xff] }
 0x943   : > { %4488 = vmatmul.f32.vlgmr.msra.gmra.mxu2 %v9294_v25 }
 0x944   : > { %4558 = vmatpush.msrb.mxu2 %v11130_v63  ;;  %4466 = vmatpush.msra.mxu1 %v11131_v43  ;;  %v11143_v63 = vld [vmem:[#allocation52_spill] sm:$0xff]  ;;  %v11144_v43 = vld [vmem:[#allocation55_spill] sm:$0xff] }
 0x946   : > { %4559 = vmatpush.msrb.mxu2 %v11132_v44  ;;  %4467 = vmatpush.msra.mxu1 %v11133_v52  ;;  %v11145_v44 = vld [vmem:[#allocation56_spill] sm:$0xff]  ;;  %v11146_v52 = vld [vmem:[#allocation61_spill] sm:$0xff] }
 0x947   : > { %4468 = vmatmul.f32.vlgmr.msra.gmra.mxu1 %v9474_v58 }
 0x948   : > { %4560 = vmatpush.msrb.mxu2 %v11134_v24  ;;  %v11147_v24 = vld [vmem:[#allocation77_spill] sm:$0xff] }
 0x94a   : > { %4561 = vmatpush.msrb.mxu2 %v11135_v11  ;;  %v11148_v11 = vld [vmem:[#allocation59_spill] sm:$0xff] }
 0x94c   : > { %4562 = vmatpush.msrb.mxu2 %v11136_v46  ;;  %v11149_v46 = vld [vmem:[#allocation62_spill] sm:$0xff] }
 0x94e   : > { %4563 = vmatpush.msrb.mxu2 %v11137_v15  ;;  %v11150_v15 = vld [vmem:[#allocation60_spill] sm:$0xff] }
 0x950   : > { %4564 = vmatpush.msrb.mxu2 %v11138_v45 }
 0x952   : > { %4565 = vmatpush.msrb.mxu2 %v11139_v8 }
 0x954   : > { %4566 = vmatpush.msrb.mxu2 %v11140_v14 }
 0x956   : > { %4567 = vmatpush.msrb.mxu2 %v11141_v3 }
 0x958   : > { %4568 = vmatpush.msrb.mxu2 %v11142_v23 }
 0x95a   : > { %4569 = vmatpush.msrb.mxu2 %v11143_v63 }
 0x95c   : > { %4570 = vmatpush.msrb.mxu2 %v11144_v43 }
 0x95e   : > { %4571 = vmatpush.msrb.mxu2 %v11145_v44 }
 0x960   : > { %4572 = vmatpush.msrb.mxu2 %v11146_v52 }
 0x962   : > { %4573 = vmatpush.msrb.mxu2 %v11147_v24 }
 0x963   : > { %4574 = vmatmul.f32.vlgmr.msrb.gmra.mxu2 %v11148_v11 }
 0x964   : > { %4645 = vmatpush.msra.mxu2 %v11149_v46 }
 0x966   : > { %4646 = vmatpush.msra.mxu2 %v11150_v15 }
 0x972   : > { %v4205_v45 = vpop.f32.mrf.mxu1 }
 0x973   : > { %v4209_v8 = vmul.f32 %v4205_v45, %v8982_v51  ;;  %v11152_v45 = vld [vmem:[#allocation50_spill] sm:$0xff] }
 0x975   : > { %v4211_v14 = vadd.f32 %v4209_v8, %v8986_v56 }
 0x977   : > { %v4213_v3 = vmax.f32 %v4211_v14, 0.0 }
 0x979   : > { %5792 = vst [vmem:[%s8992_s23 + $0x38] sm:$0xff] %v4213_v3 }
 0x992   : > { %v4291_v23 = vpop.f32.mrf.mxu1 }
 0x993   : > { %v9707_v63 = vadd.f32 %v4291_v23, %v9618_v54  ;;  %v11153_v54 = vld [vmem:[#allocation13_spill] sm:$0xff] }
 0x994   : > { %v4311_v43 = vpop.f32.mrf.mxu2 }
 0x995   : > { %11151 = vst [vmem:[#allocation19_spill] sm:$0xff] %v9707_v63  ;;  %v4334_v44 = vmul.f32 %v4311_v43, %v8982_v51  ;;  %4323 = vmatpush.msrb.mxu3 %v9707_v63 }
 0x997   : > { %v4336_v52 = vadd.f32 %v4334_v44, %v8986_v56  ;;  %4324 = vmatpush.msrb.mxu3 %v11108_v12 }
 0x999   : > { %v4338_v24 = vmax.f32 %v4336_v52, 0.0  ;;  %4325 = vmatpush.msrb.mxu3 %v8859_v13 }
 0x99b   : > { %5793 = vst [vmem:[%s8992_s23 + $0x40] sm:$0xff] %v4338_v24  ;;  %4326 = vmatpush.msrb.mxu3 %v11152_v45 }
 0x99d   : > { %4327 = vmatpush.msrb.mxu3 %v11109_v61 }
 0x99f   : > { %4328 = vmatpush.msrb.mxu3 %v8904_v21 }
 0x9a1   : > { %4329 = vmatpush.msrb.mxu3 %v11153_v54  ;;  %v11154_v54 = vld [vmem:[#allocation53_spill] sm:$0xff] }
 0x9a2   : > { %5764 = vmatmul.msk.f32.vlgmr.msrb.gmra.mxu3 %vm3614_vm1, %v9554_v36 }
 0x9a3   : > { %4413 = vmatpush.msra.mxu3 %v9463_v22 }
 0x9a4   : > { %v4377_v8 = vpop.f32.mrf.mxu1 }
 0x9a5   : > { %v4381_v14 = vmul.f32 %v4377_v8, %v8982_v51  ;;  %4414 = vmatpush.msra.mxu3 %v9620_v48  ;;  %v11155_v8 = vld [vmem:[#allocation46_spill] sm:$0xff] }
 0x9a6   : > { %v4403_v3 = vpop.f32.mrf.mxu2 }
 0x9a7   : > { %v4383_v23 = vadd.f32 %v4381_v14, %v8986_v56  ;;  %v4426_v43 = vmul.f32 %v4403_v3, %v8982_v51  ;;  %4415 = vmatpush.msra.mxu3 %v9465_v4  ;;  %v11156_v14 = vld [vmem:[#allocation79_spill] sm:$0xff]  ;;  %v11157_v3 = vld [vmem:[#allocation80_spill] sm:$0xff] }
 0x9a9   : > { %v4385_v44 = vmax.f32 %v4383_v23, 0.0  ;;  %v4428_v52 = vadd.f32 %v4426_v43, %v8986_v56  ;;  %4416 = vmatpush.msra.mxu3 %v11093_v33  ;;  %v4449_v23 = vpop.f32.mrf.mxu0 }
 0x9ab   : > { %5796 = vst [vmem:[%s8992_s23 + $0x58] sm:$0xff] %v4385_v44  ;;  %v4430_v24 = vmax.f32 %v4428_v52, 0.0  ;;  %4417 = vmatpush.msra.mxu3 %v11094_v26  ;;  %v11166_v52 = vld [vmem:[#allocation88_spill] sm:$0xff] }
 0x9ad   : > { %5797 = vst [vmem:[%s8992_s23 + $0x60] sm:$0xff] %v4430_v24  ;;  %4418 = vmatpush.msra.mxu3 %v11108_v12  ;;  %v11167_v24 = vld [vmem:[#allocation89_spill] sm:$0xff] }
 0x9af   : > { %4419 = vmatpush.msra.mxu3 %v11095_v39 }
 0x9b1   : > { %4420 = vmatpush.msra.mxu3 %v11096_v29 }
 0x9b3   : > { %4421 = vmatpush.msra.mxu3 %v11109_v61 }
 0x9b4   : > { %5768 = vmatmul.msk.f32.vlgmr.msra.gmra.mxu3 %vm3614_vm1, %v9554_v36 }
 0x9b5   : > { %4492 = vmatpush.msrb.mxu3 %v11154_v54  ;;  %v11168_v54 = vld [vmem:[#allocation92_spill] sm:$0xff] }
 0x9b7   : > { %4493 = vmatpush.msrb.mxu3 %v9308_v30  ;;  %v11159_v30 = vld [vmem:[#allocation81_spill] sm:$0xff] }
 0x9b9   : > { %4494 = vmatpush.msrb.mxu3 %v11155_v8  ;;  %v11169_v8 = vld [vmem:[#allocation90_spill] sm:$0xff] }
 0x9bb   : > { %4495 = vmatpush.msrb.mxu3 %v11156_v14  ;;  %v11170_v14 = vld [vmem:[#allocation94_spill] sm:$0xff] }
 0x9bd   : > { %4496 = vmatpush.msrb.mxu3 %v11157_v3  ;;  %v11171_v3 = vld [vmem:[#allocation91_spill] sm:$0xff] }
 0x9bf   : > { %4497 = vmatpush.msrb.mxu3 %v9320_v40  ;;  %v11160_v40 = vld [vmem:[#allocation82_spill] sm:$0xff] }
 0x9c1   : > { %4498 = vmatpush.msrb.mxu3 %v9323_v6  ;;  %v11161_v6 = vld [vmem:[#allocation83_spill] sm:$0xff] }
 0x9c3   : > { %4499 = vmatpush.msrb.mxu3 %v9326_v1  ;;  %v11162_v1 = vld [vmem:[#allocation84_spill] sm:$0xff] }
 0x9c4   : > { %v4469_v43 = vpop.f32.mrf.mxu1 }
 0x9c5   : > { %v9746_v44 = vadd.f32 %v4469_v43, %v4449_v23  ;;  %4500 = vmatpush.msrb.mxu3 %v9329_v37  ;;  %v11163_v37 = vld [vmem:[#allocation85_spill] sm:$0xff]  ;;  %v11172_v23 = vld [vmem:[#allocation96_spill] sm:$0xff]  ;;  %v11173_v43 = vld [vmem:[#allocation22_spill] sm:$0xff] }
 0x9c7   : > { %11158 = vst [vmem:[#allocation15_spill] sm:$0xff] %v9746_v44  ;;  %4501 = vmatpush.msrb.mxu3 %v9332_v59  ;;  %4519 = vmatpush.msrb.mxu0 %v9746_v44  ;;  %v11164_v59 = vld [vmem:[#allocation86_spill] sm:$0xff] }
 0x9c9   : > { %4502 = vmatpush.msrb.mxu3 %v11159_v30  ;;  %4520 = vmatpush.msrb.mxu0 %v9284_v7  ;;  %v11174_v30 = vld [vmem:[#allocation98_spill] sm:$0xff] }
 0x9cb   : > { %4503 = vmatpush.msrb.mxu3 %v9338_v17  ;;  %4521 = vmatpush.msrb.mxu0 %v9502_v42  ;;  %v11165_v17 = vld [vmem:[#allocation87_spill] sm:$0xff] }
 0x9cd   : > { %4504 = vmatpush.msrb.mxu3 %v11160_v40  ;;  %4522 = vmatpush.msrb.mxu0 %v9367_v31  ;;  %v11175_v40 = vld [vmem:[#allocation54_spill] sm:$0xff] }
 0x9cf   : > { %4505 = vmatpush.msrb.mxu3 %v11161_v6  ;;  %4523 = vmatpush.msrb.mxu0 %v8691_v2  ;;  %v11176_v6 = vld [vmem:[#allocation73_spill] sm:$0xff] }
 0x9d1   : > { %4506 = vmatpush.msrb.mxu3 %v11162_v1  ;;  %4524 = vmatpush.msrb.mxu0 %v8780_v27  ;;  %v11177_v1 = vld [vmem:[#allocation93_spill] sm:$0xff] }
 0x9d3   : > { %4507 = vmatpush.msrb.mxu3 %v11163_v37  ;;  %4525 = vmatpush.msrb.mxu0 %v11164_v59  ;;  %v11178_v37 = vld [vmem:[#allocation72_spill] sm:$0xff]  ;;  %v11179_v59 = vld [vmem:[#allocation95_spill] sm:$0xff] }
 0x9d4   : > { %4508 = vmatmul.f32.vlgmr.msrb.gmra.mxu3 %v9474_v58 }
 0x9d5   : > { %4578 = vmatpush.msra.mxu3 %v11165_v17  ;;  %4526 = vmatpush.msrb.mxu0 %v8645_v28  ;;  %v11180_v17 = vld [vmem:[#allocation101_spill] sm:$0xff] }
 0x9d7   : > { %4579 = vmatpush.msra.mxu3 %v11166_v52  ;;  %4527 = vmatpush.msrb.mxu0 %v8811_v62  ;;  %v11181_v52 = vld [vmem:[#allocation97_spill] sm:$0xff] }
 0x9d8   : > { %5769 = vmatmul.msk.f32.vlgmr.msrb.gmra.mxu0 %vm3614_vm1, %v9554_v36 }
 0x9d9   : > { %4580 = vmatpush.msra.mxu3 %v11167_v24  ;;  %4598 = vmatpush.msra.mxu0 %v11168_v54  ;;  %v11182_v24 = vld [vmem:[#allocation103_spill] sm:$0xff] }
 0x9da   : > { %v11183_v54 = vld [vmem:[#allocation99_spill] sm:$0xff] }
 0x9db   : > { %4581 = vmatpush.msra.mxu3 %v11169_v8  ;;  %4599 = vmatpush.msra.mxu0 %v11170_v14  ;;  %v11184_v8 = vld [vmem:[#allocation107_spill] sm:$0xff]  ;;  %v11185_v14 = vld [vmem:[#allocation74_spill] sm:$0xff] }
 0x9dd   : > { %4582 = vmatpush.msra.mxu3 %v11171_v3  ;;  %4600 = vmatpush.msra.mxu0 %v11172_v23  ;;  %v11186_v3 = vld [vmem:[#allocation110_spill] sm:$0xff]  ;;  %v11187_v23 = vld [vmem:[#allocation100_spill] sm:$0xff] }
 0x9df   : > { %4583 = vmatpush.msra.mxu3 %v11173_v43  ;;  %4601 = vmatpush.msra.mxu0 %v11174_v30  ;;  %v11188_v43 = vld [vmem:[#allocation111_spill] sm:$0xff]  ;;  %v11189_v30 = vld [vmem:[#allocation102_spill] sm:$0xff] }
 0x9e1   : > { %4584 = vmatpush.msra.mxu3 %v11175_v40  ;;  %4602 = vmatpush.msra.mxu0 %v11176_v6  ;;  %v11190_v40 = vld [vmem:[#allocation45_spill] sm:$0xff]  ;;  %v11191_v6 = vld [vmem:[#allocation104_spill] sm:$0xff] }
 0x9e3   : > { %4585 = vmatpush.msra.mxu3 %v11177_v1  ;;  %4603 = vmatpush.msra.mxu0 %v11178_v37  ;;  %v11192_v1 = vld [vmem:[#allocation108_spill] sm:$0xff]  ;;  %v11193_v37 = vld [vmem:[#allocation75_spill] sm:$0xff] }
 0x9e5   : > { %4586 = vmatpush.msra.mxu3 %v11179_v59  ;;  %4604 = vmatpush.msra.mxu0 %v11180_v17  ;;  %v11194_v59 = vld [vmem:[#allocation21_spill] sm:$0xff]  ;;  %v11195_v17 = vld [vmem:[#allocation78_spill] sm:$0xff] }
 0x9e7   : > { %4587 = vmatpush.msra.mxu3 %v11181_v52  ;;  %4605 = vmatpush.msra.mxu0 %v11182_v24  ;;  %v11196_v52 = vld [vmem:[#allocation10_spill] sm:$0xff]  ;;  %v6306_v24 = vld [vmem:[#allocation2 + $0xab0] sm:$0xff] }
 0x9e9   : > { %4588 = vmatpush.msra.mxu3 %v11183_v54  ;;  %4606 = vmatpush.msra.mxu0 %v11184_v8  ;;  %v6307_v54 = vld [vmem:[#allocation2 + $0xaa0] sm:$0xff]  ;;  %v6308_v8 = vld [vmem:[#allocation2 + $0xa90] sm:$0xff] }
 0x9eb   : > { %4589 = vmatpush.msra.mxu3 %v11185_v14  ;;  %4607 = vmatpush.msra.mxu0 %v11186_v3  ;;  %v6309_v14 = vld [vmem:[#allocation2 + $0xa80] sm:$0xff]  ;;  %v6310_v3 = vld [vmem:[#allocation2 + $0xa70] sm:$0xff] }
 0x9ed   : > { %4590 = vmatpush.msra.mxu3 %v11187_v23  ;;  %4608 = vmatpush.msra.mxu0 %v11188_v43  ;;  %v6311_v23 = vld [vmem:[#allocation2 + $0xa60] sm:$0xff]  ;;  %v6312_v43 = vld [vmem:[#allocation2 + $0xa50] sm:$0xff] }
 0x9ef   : > { %4591 = vmatpush.msra.mxu3 %v11189_v30  ;;  %4609 = vmatpush.msra.mxu0 %v11190_v40  ;;  %v6313_v30 = vld [vmem:[#allocation2 + $0xa40] sm:$0xff]  ;;  %v6314_v40 = vld [vmem:[#allocation2 + $0xa30] sm:$0xff] }
 0x9f1   : > { %4592 = vmatpush.msra.mxu3 %v11191_v6  ;;  %4610 = vmatpush.msra.mxu0 %v9491_v38  ;;  %v6303_v38 = vld [vmem:[#allocation2 + $0xae0] sm:$0xff] }
 0x9f2   : > { %v6315_v6 = vld [vmem:[#allocation2 + $0xa20] sm:$0xff] }
 0x9f3   : > { %4593 = vmatpush.msra.mxu3 %v11192_v1  ;;  %4611 = vmatpush.msra.mxu0 %v9495_v5  ;;  %v6302_v5 = vld [vmem:[#allocation2 + $0xaf0] sm:$0xff] }
 0x9f4   : > { %4594 = vmatmul.f32.vlgmr.msra.gmra.mxu3 %v11193_v37 }
 0x9f5   : > { %4665 = vmatpush.msrb.mxu3 %v11194_v59  ;;  %4612 = vmatpush.msra.mxu0 %v9499_v50  ;;  %v6305_v50 = vld [vmem:[#allocation2 + $0xac0] sm:$0xff] }
 0x9f7   : > { %4666 = vmatpush.msrb.mxu3 %v11195_v17  ;;  %4613 = vmatpush.msra.mxu0 %v9504_v41  ;;  %v6304_v41 = vld [vmem:[#allocation2 + $0xad0] sm:$0xff] }
 0x9f8   : > { %4614 = vmatmul.f32.vlgmr.msra.gmra.mxu0 %v11148_v11 }
 0x9f9   : > { %4691 = vmatpush.msrb.mxu0 %v11196_v52 }
 0x9fb   : > { %4692 = vmatpush.msrb.mxu0 %v11149_v46 }
 0x9fd   : > { %4693 = vmatpush.msrb.mxu0 %v11150_v15 }
 0x9ff   : > { %4694 = vmatpush.msrb.mxu0 %v9502_v42 }
 0xa01   : > { %4695 = vmatpush.msrb.mxu0 %v9287_v10 }
 0xa03   : > { %4696 = vmatpush.msrb.mxu0 %v9294_v25 }
 0xa05   : > { %4697 = vmatpush.msrb.mxu0 %v8780_v27 }
 0xa07   : > { %4698 = vmatpush.msrb.mxu0 %v11090_v60 }
 0xa09   : > { %4699 = vmatpush.msrb.mxu0 %v11019_v47 }
 0xa0a   : > { %5773 = vmatmul.msk.f32.vlgmr.msrb.gmra.mxu0 %vm3614_vm1, %v9554_v36 }
 0xa0b   : > { %4776 = vmatpush.msra.mxu0 %v6302_v5 }
 0xa0d   : > { %4777 = vmatpush.msra.mxu0 %v6303_v38  ;;  %v6316_v38 = vld [vmem:[#allocation2 + $0xa10] sm:$0xff] }
 0xa0f   : > { %4778 = vmatpush.msra.mxu0 %v6304_v41 }
 0xa11   : > { %4779 = vmatpush.msra.mxu0 %v6305_v50  ;;  %v6317_v50 = vld [vmem:[#allocation2 + $0xa00] sm:$0xff] }
 0xa13   : > { %4780 = vmatpush.msra.mxu0 %v6306_v24 }
 0xa15   : > { %4781 = vmatpush.msra.mxu0 %v6307_v54 }
 0xa17   : > { %4782 = vmatpush.msra.mxu0 %v6308_v8 }
 0xa19   : > { %4783 = vmatpush.msra.mxu0 %v6309_v14 }
 0xa1b   : > { %4784 = vmatpush.msra.mxu0 %v6310_v3 }
 0xa1d   : > { %4785 = vmatpush.msra.mxu0 %v6311_v23 }
 0xa1f   : > { %4786 = vmatpush.msra.mxu0 %v6312_v43 }
 0xa21   : > { %4787 = vmatpush.msra.mxu0 %v6313_v30  ;;  %v4489_v30 = vpop.f32.mrf.mxu2 }
 0xa23   : > { %4788 = vmatpush.msra.mxu0 %v6314_v40 }
 0xa25   : > { %4789 = vmatpush.msra.mxu0 %v6315_v6  ;;  %v4331_v1 = vpop.f32.mrf.mxu3 }
 0xa26   : > { %v4335_v5 = vmul.f32 %v4331_v1, %v8982_v51 }
 0xa27   : > { %4790 = vmatpush.msra.mxu0 %v6316_v38 }
 0xa28   : > { %v4337_v41 = vadd.f32 %v4335_v5, %v8986_v56 }
 0xa29   : > { %4791 = vmatpush.msra.mxu0 %v6317_v50  ;;  %v11199_v50 = vld [vmem:[#allocation47_spill] sm:$0xff] }
 0xa2a   : > { %v4339_v24 = vmax.f32 %v4337_v41, 0.0  ;;  %4792 = vmatmul.f32.vlgmr.msra.gmra.mxu0 %v11150_v15 }
 0xa2c   : > { %5794 = vst [vmem:[%s8992_s23 + $0x48] sm:$0xff] %v4339_v24 }
 0xa37   : > { %v4423_v54 = vpop.f32.mrf.mxu3 }
 0xa38   : > { %v4427_v8 = vmul.f32 %v4423_v54, %v8982_v51 }
 0xa3a   : > { %v4429_v14 = vadd.f32 %v4427_v8, %v8986_v56  ;;  %v6318_v8 = vld [vmem:[#allocation2 + $0xaf8] sm:$0xff] }
 0xa3c   : > { %v4431_v3 = vmax.f32 %v4429_v14, 0.0  ;;  %v6319_v14 = vld [vmem:[#allocation2 + $0xae8] sm:$0xff] }
 0xa3e   : > { %5798 = vst [vmem:[%s8992_s23 + $0x68] sm:$0xff] %v4431_v3  ;;  %v6320_v3 = vld [vmem:[#allocation2 + $0xbf0] sm:$0xff] }
 0xa55   : > { %v4529_v23 = vpop.f32.mrf.mxu0 }
 0xa56   : > { %v4552_v43 = vmul.f32 %v4529_v23, %v8982_v51  ;;  %v6321_v23 = vld [vmem:[#allocation2 + $0xad8] sm:$0xff] }
 0xa57   : > { %v4509_v40 = vpop.f32.mrf.mxu3 }
 0xa58   : > { %v4554_v6 = vadd.f32 %v4552_v43, %v8986_v56  ;;  %v9824_v1 = vadd.f32 %v4509_v40, %v4489_v30  ;;  %v6322_v43 = vld [vmem:[#allocation2 + $0xbe0] sm:$0xff]  ;;  %v6324_v30 = vld [vmem:[#allocation2 + $0xbd0] sm:$0xff]  ;;  %v6325_v40 = vld [vmem:[#allocation2 + $0xab8] sm:$0xff] }
 0xa5a   : > { %11197 = vst [vmem:[#allocation7_spill] sm:$0xff] %v9824_v1  ;;  %v4556_v5 = vmax.f32 %v4554_v6, 0.0  ;;  %4539 = vmatpush.msrb.mxu1 %v9824_v1  ;;  %v6326_v6 = vld [vmem:[#allocation2 + $0xbc0] sm:$0xff] }
 0xa5c   : > { %5799 = vst [vmem:[%s8992_s23 + $0x70] sm:$0xff] %v4556_v5  ;;  %4540 = vmatpush.msrb.mxu1 %v9463_v22  ;;  %v6327_v5 = vld [vmem:[#allocation2 + $0xaa8] sm:$0xff] }
 0xa5e   : > { %4541 = vmatpush.msrb.mxu1 %v9620_v48 }
 0xa60   : > { %4542 = vmatpush.msrb.mxu1 %v9536_v35 }
 0xa62   : > { %4543 = vmatpush.msrb.mxu1 %v11093_v33 }
 0xa64   : > { %4544 = vmatpush.msrb.mxu1 %v11094_v26 }
 0xa66   : > { %4545 = vmatpush.msrb.mxu1 %v9540_v57  ;;  %v4575_v57 = vpop.f32.mrf.mxu2 }
 0xa68   : > { %4546 = vmatpush.msrb.mxu1 %v11095_v39 }
 0xa6a   : > { %4547 = vmatpush.msrb.mxu1 %v11096_v29  ;;  %v10088_v29 = vld [vmem:[#allocation2 + $0xe48] sm:$0xff] }
 0xa6b   : > { %5770 = vmatmul.msk.f32.vlgmr.msrb.gmra.mxu1 %vm3614_vm1, %v9554_v36  ;;  %11225 = vst [vmem:[#allocation28_spill] sm:$0xff] %v10088_v29 }
 0xa6c   : > { %4618 = vmatpush.msra.mxu1 %v9558_v34  ;;  %v11200_v34 = vld [vmem:[#allocation44_spill] sm:$0xff] }
 0xa6e   : > { %4619 = vmatpush.msra.mxu1 %v9561_v55  ;;  %v11201_v55 = vld [vmem:[#allocation49_spill] sm:$0xff] }
 0xa70   : > { %4620 = vmatpush.msra.mxu1 %v9564_v53 }
 0xa72   : > { %4621 = vmatpush.msra.mxu1 %v9567_v32  ;;  %v11202_v32 = vld [vmem:[#allocation17_spill] sm:$0xff] }
 0xa74   : > { %4622 = vmatpush.msra.mxu1 %v9570_v9  ;;  %v11203_v9 = vld [vmem:[#allocation76_spill] sm:$0xff] }
 0xa75   : > { %v9853_v53 = vpop.f32.mrf.mxu0 }
 0xa76   : > { %4623 = vmatpush.msra.mxu1 %v9573_v16  ;;  %v11204_v16 = vld [vmem:[#allocation14_spill] sm:$0xff] }
 0xa77   : > { %v4595_v38 = vpop.f32.mrf.mxu3 }
 0xa78   : > { %v9844_v41 = vadd.f32 %v4595_v38, %v4575_v57  ;;  %4624 = vmatpush.msra.mxu1 %v9578_v49  ;;  %v6328_v57 = vld [vmem:[#allocation2 + $0xbb0] sm:$0xff]  ;;  %v6329_v38 = vld [vmem:[#allocation2 + $0xa98] sm:$0xff] }
 0xa7a   : > { %11198 = vst [vmem:[#allocation24_spill] sm:$0xff] %v9844_v41  ;;  %4625 = vmatpush.msra.mxu1 %v11199_v50  ;;  %4647 = vmatpush.msra.mxu2 %v9844_v41  ;;  %v6330_v50 = vld [vmem:[#allocation2 + $0xba0] sm:$0xff]  ;;  %v10100_v41 = vld [vmem:[#allocation2 + $0xe28] sm:$0xff] }
 0xa7b   : > { %11229 = vst [vmem:[#allocation35_spill] sm:$0xff] %v10100_v41 }
 0xa7c   : > { %4626 = vmatpush.msra.mxu1 %v11200_v34  ;;  %4648 = vmatpush.msra.mxu2 %v9287_v10  ;;  %v6331_v34 = vld [vmem:[#allocation2 + $0xa88] sm:$0xff] }
 0xa7e   : > { %4627 = vmatpush.msra.mxu1 %v11201_v55  ;;  %4649 = vmatpush.msra.mxu2 %v9294_v25  ;;  %v6332_v55 = vld [vmem:[#allocation2 + $0xb90] sm:$0xff]  ;;  %v10094_v25 = vld [vmem:[#allocation2 + $0xe38] sm:$0xff] }
 0xa7f   : > { %11227 = vst [vmem:[#allocation34_spill] sm:$0xff] %v10094_v25 }
 0xa80   : > { %4628 = vmatpush.msra.mxu1 %v11202_v32  ;;  %4650 = vmatpush.msra.mxu2 %v11203_v9  ;;  %v6333_v32 = vld [vmem:[#allocation2 + $0xa78] sm:$0xff]  ;;  %v10091_v9 = vld [vmem:[#allocation2 + $0xf10] sm:$0xff] }
 0xa81   : > { %11226 = vst [vmem:[#allocation33_spill] sm:$0xff] %v10091_v9 }
 0xa82   : > { %4629 = vmatpush.msra.mxu1 %v9599_v19  ;;  %4651 = vmatpush.msra.mxu2 %v11090_v60  ;;  %v11205_v19 = vld [vmem:[#allocation70_spill] sm:$0xff] }
 0xa84   : > { %4630 = vmatpush.msra.mxu1 %v9603_v0  ;;  %4652 = vmatpush.msra.mxu2 %v11019_v47  ;;  %v11206_v0 = vld [vmem:[#allocation113_spill] sm:$0xff] }
 0xa86   : > { %4631 = vmatpush.msra.mxu1 %v9608_v20  ;;  %4653 = vmatpush.msra.mxu2 %v11204_v16  ;;  %v11207_v20 = vld [vmem:[#allocation12_spill] sm:$0xff]  ;;  %v6334_v16 = vld [vmem:[#allocation2 + $0xb80] sm:$0xff] }
 0xa87   : > { %v4701_v49 = vpop.f32.mrf.mxu0  ;;  %5771 = vmatmul.msk.f32.vlgmr.msra.gmra.mxu2 %vm3614_vm1, %v9554_v36 }
 0xa88   : > { %v4724_v24 = vmul.f32 %v4701_v49, %v8982_v51  ;;  %4737 = vmatpush.msrb.mxu2 %v11148_v11  ;;  %4632 = vmatpush.msra.mxu1 %v11205_v19  ;;  %v6335_v49 = vld [vmem:[#allocation2 + $0xa68] sm:$0xff]  ;;  %v6337_v19 = vld [vmem:[#allocation2 + $0xa58] sm:$0xff] }
 0xa8a   : > { %v4726_v54 = vadd.f32 %v4724_v24, %v8986_v56  ;;  %4738 = vmatpush.msrb.mxu2 %v11196_v52  ;;  %4633 = vmatpush.msra.mxu1 %v11206_v0  ;;  %v6336_v24 = vld [vmem:[#allocation2 + $0xb70] sm:$0xff]  ;;  %v6339_v0 = vld [vmem:[#allocation2 + $0xa48] sm:$0xff] }
 0xa8b   : > { %4634 = vmatmul.f32.vlgmr.msra.gmra.mxu1 %v11193_v37 }
 0xa8c   : > { %v4728_v47 = vmax.f32 %v4726_v54, 0.0  ;;  %4711 = vmatpush.msrb.mxu1 %v11207_v20  ;;  %4739 = vmatpush.msrb.mxu2 %v11149_v46  ;;  %v6338_v54 = vld [vmem:[#allocation2 + $0xb60] sm:$0xff]  ;;  %v10109_v46 = vld [vmem:[#allocation2 + $0xe08] sm:$0xff] }
 0xa8d   : > { %11231 = vst [vmem:[#allocation36_spill] sm:$0xff] %v10109_v46 }
 0xa8e   : > { %5803 = vst [vmem:[%s8992_s23 + $0x90] sm:$0xff] %v4728_v47  ;;  %4712 = vmatpush.msrb.mxu1 %v11194_v59  ;;  %4740 = vmatpush.msrb.mxu2 %v9284_v7  ;;  %v6340_v47 = vld [vmem:[#allocation2 + $0xb50] sm:$0xff] }
 0xa90   : > { %4713 = vmatpush.msrb.mxu1 %v11195_v17  ;;  %4741 = vmatpush.msrb.mxu2 %v9502_v42 }
 0xa92   : > { %4714 = vmatpush.msrb.mxu1 %v9620_v48  ;;  %4742 = vmatpush.msrb.mxu2 %v9287_v10  ;;  %v10097_v10 = vld [vmem:[#allocation2 + $0xf00] sm:$0xff] }
 0xa93   : > { %11228 = vst [vmem:[#allocation30_spill] sm:$0xff] %v10097_v10 }
 0xa94   : > { %4715 = vmatpush.msrb.mxu1 %v9465_v4  ;;  %4743 = vmatpush.msrb.mxu2 %v8691_v2 }
 0xa96   : > { %4716 = vmatpush.msrb.mxu1 %v9474_v58  ;;  %4744 = vmatpush.msrb.mxu2 %v8780_v27 }
 0xa98   : > { %4717 = vmatpush.msrb.mxu1 %v11094_v26  ;;  %4745 = vmatpush.msrb.mxu2 %v11090_v60  ;;  %v6323_v60 = vld [vmem:[#allocation2 + $0xac8] sm:$0xff] }
 0xa99   : > { %5775 = vmatmul.msk.f32.vlgmr.msrb.gmra.mxu2 %vm3614_vm1, %v9554_v36 }
 0xa9a   : > { %4816 = vmatpush.msra.mxu2 %v6318_v8  ;;  %4718 = vmatpush.msrb.mxu1 %v11108_v12  ;;  %v6341_v8 = vld [vmem:[#allocation2 + $0xa38] sm:$0xff] }
 0xa9c   : > { %4817 = vmatpush.msra.mxu2 %v6319_v14  ;;  %4719 = vmatpush.msrb.mxu1 %v8859_v13  ;;  %v6342_v14 = vld [vmem:[#allocation2 + $0xb40] sm:$0xff] }
 0xa9d   : > { %5774 = vmatmul.msk.f32.vlgmr.msrb.gmra.mxu1 %vm3614_vm1, %v9554_v36 }
 0xa9e   : > { %4796 = vmatpush.msra.mxu1 %v6320_v3  ;;  %4818 = vmatpush.msra.mxu2 %v6321_v23  ;;  %v6343_v3 = vld [vmem:[#allocation2 + $0xa28] sm:$0xff]  ;;  %v6344_v23 = vld [vmem:[#allocation2 + $0xb30] sm:$0xff] }
 0xaa0   : > { %4797 = vmatpush.msra.mxu1 %v6322_v43  ;;  %4819 = vmatpush.msra.mxu2 %v6323_v60  ;;  %v6345_v43 = vld [vmem:[#allocation2 + $0xa18] sm:$0xff]  ;;  %v6346_v60 = vld [vmem:[#allocation2 + $0xb20] sm:$0xff] }
 0xaa2   : > { %4798 = vmatpush.msra.mxu1 %v6324_v30  ;;  %4820 = vmatpush.msra.mxu2 %v6325_v40  ;;  %v6347_v30 = vld [vmem:[#allocation2 + $0xa08] sm:$0xff]  ;;  %v6348_v40 = vld [vmem:[#allocation2 + $0xcf0] sm:$0xff] }
 0xaa4   : > { %4799 = vmatpush.msra.mxu1 %v6326_v6  ;;  %4821 = vmatpush.msra.mxu2 %v6327_v5  ;;  %v6349_v6 = vld [vmem:[#allocation2 + $0xb10] sm:$0xff]  ;;  %v6350_v5 = vld [vmem:[#allocation2 + $0xce0] sm:$0xff] }
 0xaa6   : > { %4800 = vmatpush.msra.mxu1 %v6328_v57  ;;  %4822 = vmatpush.msra.mxu2 %v6329_v38  ;;  %v6351_v57 = vld [vmem:[#allocation2 + $0xb00] sm:$0xff]  ;;  %v6352_v38 = vld [vmem:[#allocation2 + $0xcd0] sm:$0xff] }
 0xaa8   : > { %4801 = vmatpush.msra.mxu1 %v6330_v50  ;;  %4823 = vmatpush.msra.mxu2 %v6331_v34  ;;  %v6353_v50 = vld [vmem:[#allocation2 + $0xcc0] sm:$0xff]  ;;  %v6354_v34 = vld [vmem:[#allocation2 + $0xcb0] sm:$0xff] }
 0xaaa   : > { %4802 = vmatpush.msra.mxu1 %v6332_v55  ;;  %4824 = vmatpush.msra.mxu2 %v6333_v32  ;;  %v6355_v55 = vld [vmem:[#allocation2 + $0xca0] sm:$0xff]  ;;  %v6356_v32 = vld [vmem:[#allocation2 + $0xc90] sm:$0xff] }
 0xaac   : > { %4803 = vmatpush.msra.mxu1 %v6334_v16  ;;  %4825 = vmatpush.msra.mxu2 %v6335_v49  ;;  %v6357_v16 = vld [vmem:[#allocation2 + $0xc80] sm:$0xff]  ;;  %v6358_v49 = vld [vmem:[#allocation2 + $0xc70] sm:$0xff] }
 0xaae   : > { %4804 = vmatpush.msra.mxu1 %v6336_v24  ;;  %4826 = vmatpush.msra.mxu2 %v6337_v19  ;;  %v6359_v24 = vld [vmem:[#allocation2 + $0xc60] sm:$0xff]  ;;  %v6360_v19 = vld [vmem:[#allocation2 + $0xc50] sm:$0xff] }
 0xab0   : > { %4805 = vmatpush.msra.mxu1 %v6338_v54  ;;  %4827 = vmatpush.msra.mxu2 %v6339_v0  ;;  %v6361_v54 = vld [vmem:[#allocation2 + $0xc40] sm:$0xff]  ;;  %v6362_v0 = vld [vmem:[#allocation2 + $0xc30] sm:$0xff] }
 0xab2   : > { %4806 = vmatpush.msra.mxu1 %v6340_v47  ;;  %4828 = vmatpush.msra.mxu2 %v6341_v8  ;;  %v6363_v47 = vld [vmem:[#allocation2 + $0xc20] sm:$0xff]  ;;  %v6364_v8 = vld [vmem:[#allocation2 + $0xc10] sm:$0xff] }
 0xab4   : > { %4807 = vmatpush.msra.mxu1 %v6342_v14  ;;  %4829 = vmatpush.msra.mxu2 %v6343_v3  ;;  %v6365_v14 = vld [vmem:[#allocation2 + $0xc00] sm:$0xff]  ;;  %v9896_v3 = vld [vmem:[#allocation2 + $0xef0] sm:$0xff] }
 0xab6   : > { %4808 = vmatpush.msra.mxu1 %v6344_v23  ;;  %4830 = vmatpush.msra.mxu2 %v6345_v43  ;;  %v9899_v23 = vld [vmem:[#allocation2 + $0xee0] sm:$0xff]  ;;  %v9902_v43 = vld [vmem:[#allocation2 + $0xed0] sm:$0xff] }
 0xab8   : > { %4809 = vmatpush.msra.mxu1 %v6346_v60  ;;  %4831 = vmatpush.msra.mxu2 %v6347_v30  ;;  %v9905_v60 = vld [vmem:[#allocation2 + $0xec0] sm:$0xff]  ;;  %v9908_v30 = vld [vmem:[#allocation2 + $0xeb0] sm:$0xff] }
 0xab9   : > { %4832 = vmatmul.f32.vlgmr.msra.gmra.mxu2 %v11150_v15  ;;  %v10105_v15 = vld [vmem:[#allocation2 + $0xe18] sm:$0xff] }
 0xaba   : > { %4902 = vmatpush.msrb.mxu2 %v6348_v40  ;;  %4810 = vmatpush.msra.mxu1 %v6349_v6  ;;  %v9911_v40 = vld [vmem:[#allocation2 + $0xea0] sm:$0xff]  ;;  %v9914_v6 = vld [vmem:[#allocation2 + $0xe90] sm:$0xff]  ;;  %11230 = vst [vmem:[#allocation32_spill] sm:$0xff] %v10105_v15 }
 0xabb   : > { %11208 = vst [vmem:[#allocation23_spill] sm:$0xff] %v9914_v6 }
 0xabc   : > { %4903 = vmatpush.msrb.mxu2 %v6350_v5  ;;  %4811 = vmatpush.msra.mxu1 %v6351_v57  ;;  %v9917_v5 = vld [vmem:[#allocation2 + $0xe80] sm:$0xff] }
 0xabd   : > { %4812 = vmatmul.f32.vlgmr.msra.gmra.mxu1 %v11195_v17  ;;  %11209 = vst [vmem:[#allocation6_spill] sm:$0xff] %v9917_v5 }
 0xabe   : > { %4904 = vmatpush.msrb.mxu2 %v6352_v38 }
 0xac0   : > { %4905 = vmatpush.msrb.mxu2 %v6353_v50  ;;  %v9921_v50 = vld [vmem:[#allocation2 + $0xe70] sm:$0xff] }
 0xac1   : > { %11210 = vst [vmem:[#allocation5_spill] sm:$0xff] %v9921_v50 }
 0xac2   : > { %4906 = vmatpush.msrb.mxu2 %v6354_v34 }
 0xac4   : > { %4907 = vmatpush.msrb.mxu2 %v6355_v55  ;;  %v9925_v55 = vld [vmem:[#allocation2 + $0xe60] sm:$0xff] }
 0xac5   : > { %11211 = vst [vmem:[#allocation68_spill] sm:$0xff] %v9925_v55 }
 0xac6   : > { %4908 = vmatpush.msrb.mxu2 %v6356_v32 }
 0xac8   : > { %4909 = vmatpush.msrb.mxu2 %v6357_v16  ;;  %v9928_v16 = vld [vmem:[#allocation2 + $0xe50] sm:$0xff] }
 0xac9   : > { %11212 = vst [vmem:[#allocation41_spill] sm:$0xff] %v9928_v16 }
 0xaca   : > { %4910 = vmatpush.msrb.mxu2 %v6358_v49  ;;  %v9932_v49 = vld [vmem:[#allocation2 + $0xe40] sm:$0xff] }
 0xacb   : > { %11213 = vst [vmem:[#allocation42_spill] sm:$0xff] %v9932_v49 }
 0xacc   : > { %4911 = vmatpush.msrb.mxu2 %v6359_v24  ;;  %v9935_v24 = vld [vmem:[#allocation2 + $0xe30] sm:$0xff] }
 0xacd   : > { %11214 = vst [vmem:[#allocation43_spill] sm:$0xff] %v9935_v24 }
 0xace   : > { %4912 = vmatpush.msrb.mxu2 %v6360_v19  ;;  %v9938_v19 = vld [vmem:[#allocation2 + $0xe20] sm:$0xff] }
 0xacf   : > { %11215 = vst [vmem:[#allocation69_spill] sm:$0xff] %v9938_v19 }
 0xad0   : > { %4913 = vmatpush.msrb.mxu2 %v6361_v54  ;;  %v9941_v54 = vld [vmem:[#allocation2 + $0xe10] sm:$0xff] }
 0xad1   : > { %11216 = vst [vmem:[#allocation8_spill] sm:$0xff] %v9941_v54 }
 0xad2   : > { %4914 = vmatpush.msrb.mxu2 %v6362_v0  ;;  %v9944_v0 = vld [vmem:[#allocation2 + $0xe00] sm:$0xff] }
 0xad3   : > { %11217 = vst [vmem:[#allocation25_spill] sm:$0xff] %v9944_v0 }
 0xad4   : > { %4915 = vmatpush.msrb.mxu2 %v6363_v47  ;;  %v11218_v47 = vld [vmem:[#allocation20_spill] sm:$0xff] }
 0xad6   : > { %4916 = vmatpush.msrb.mxu2 %v6364_v8 }
 0xad8   : > { %4917 = vmatpush.msrb.mxu2 %v6365_v14 }
 0xad9   : > { %4918 = vmatmul.f32.vlgmr.msrb.gmra.mxu2 %v8645_v28 }
 0xada   : > { %4982 = vmatpush.msra.mxu2 %v9896_v3 }
 0xadc   : > { %4983 = vmatpush.msra.mxu2 %v9899_v23 }
 0xade   : > { %4984 = vmatpush.msra.mxu2 %v9902_v43 }
 0xae0   : > { %4985 = vmatpush.msra.mxu2 %v9905_v60 }
 0xae2   : > { %4986 = vmatpush.msra.mxu2 %v9908_v30 }
 0xae4   : > { %4987 = vmatpush.msra.mxu2 %v9911_v40 }
 0xae6   : > { %4988 = vmatpush.msra.mxu2 %v9914_v6 }
 0xae8   : > { %4989 = vmatpush.msra.mxu2 %v9917_v5  ;;  %v4549_v57 = vpop.f32.mrf.mxu1 }
 0xae9   : > { %v4553_v38 = vmul.f32 %v4549_v57, %v8982_v51 }
 0xaea   : > { %4990 = vmatpush.msra.mxu2 %v9921_v50 }
 0xaeb   : > { %v4555_v34 = vadd.f32 %v4553_v38, %v8986_v56 }
 0xaec   : > { %4991 = vmatpush.msra.mxu2 %v9925_v55 }
 0xaed   : > { %v4557_v32 = vmax.f32 %v4555_v34, 0.0 }
 0xaee   : > { %4992 = vmatpush.msra.mxu2 %v9928_v16 }
 0xaef   : > { %5800 = vst [vmem:[%s8992_s23 + $0x78] sm:$0xff] %v4557_v32 }
 0xaf0   : > { %4993 = vmatpush.msra.mxu2 %v9932_v49 }
 0xaf2   : > { %4994 = vmatpush.msra.mxu2 %v9935_v24 }
 0xaf4   : > { %4995 = vmatpush.msra.mxu2 %v9938_v19 }
 0xaf6   : > { %4996 = vmatpush.msra.mxu2 %v9941_v54 }
 0xaf8   : > { %4997 = vmatpush.msra.mxu2 %v9944_v0 }
 0xaf9   : > { %4998 = vmatmul.f32.vlgmr.msra.gmra.mxu2 %v11218_v47 }
 0xafa   : > { %5062 = vmatpush.msrb.mxu2 %v9896_v3 }
 0xafc   : > { %5063 = vmatpush.msrb.mxu2 %v9899_v23 }
 0xafe   : > { %5064 = vmatpush.msrb.mxu2 %v9902_v43 }
 0xb00   : > { %5065 = vmatpush.msrb.mxu2 %v9905_v60 }
 0xb02   : > { %5066 = vmatpush.msrb.mxu2 %v9908_v30 }
 0xb04   : > { %5067 = vmatpush.msrb.mxu2 %v9911_v40 }
 0xb06   : > { %5068 = vmatpush.msrb.mxu2 %v9914_v6 }
 0xb08   : > { %5069 = vmatpush.msrb.mxu2 %v9917_v5  ;;  %v4635_v8 = vpop.f32.mrf.mxu1 }
 0xb09   : > { %v9957_v14 = vadd.f32 %v4635_v8, %v9853_v53 }
 0xb0a   : > { %5070 = vmatpush.msrb.mxu2 %v9921_v50  ;;  %v4655_v57 = vpop.f32.mrf.mxu2 }
 0xb0b   : > { %11219 = vst [vmem:[#allocation64_spill] sm:$0xff] %v9957_v14  ;;  %v4678_v38 = vmul.f32 %v4655_v57, %v8982_v51  ;;  %4667 = vmatpush.msrb.mxu3 %v9957_v14  ;;  %v10076_v14 = vld [vmem:[#allocation2 + $0xe68] sm:$0xff] }
 0xb0c   : > { %5071 = vmatpush.msrb.mxu2 %v9925_v55 }
 0xb0d   : > { %v4680_v34 = vadd.f32 %v4678_v38, %v8986_v56  ;;  %4668 = vmatpush.msrb.mxu3 %v9465_v4 }
 0xb0e   : > { %5072 = vmatpush.msrb.mxu2 %v9928_v16 }
 0xb0f   : > { %v4682_v32 = vmax.f32 %v4680_v34, 0.0  ;;  %4669 = vmatpush.msrb.mxu3 %v9474_v58 }
 0xb10   : > { %5073 = vmatpush.msrb.mxu2 %v9932_v49 }
 0xb11   : > { %5801 = vst [vmem:[%s8992_s23 + $0x80] sm:$0xff] %v4682_v32  ;;  %4670 = vmatpush.msrb.mxu3 %v9707_v63 }
 0xb12   : > { %5074 = vmatpush.msrb.mxu2 %v9935_v24 }
 0xb13   : > { %4671 = vmatpush.msrb.mxu3 %v11108_v12 }
 0xb14   : > { %5075 = vmatpush.msrb.mxu2 %v9938_v19 }
 0xb15   : > { %4672 = vmatpush.msrb.mxu3 %v8859_v13 }
 0xb16   : > { %5076 = vmatpush.msrb.mxu2 %v9941_v54 }
 0xb17   : > { %4673 = vmatpush.msrb.mxu3 %v11152_v45 }
 0xb18   : > { %5077 = vmatpush.msrb.mxu2 %v9944_v0  ;;  %5772 = vmatmul.msk.f32.vlgmr.msrb.gmra.mxu3 %vm3614_vm1, %v9554_v36 }
 0xb19   : > { %5078 = vmatmul.f32.vlgmr.msrb.gmra.mxu2 %v11091_v18  ;;  %4757 = vmatpush.msra.mxu3 %v11193_v37 }
 0xb1a   : > { %v4721_v53 = vpop.f32.mrf.mxu1 }
 0xb1b   : > { %v4725_v8 = vmul.f32 %v4721_v53, %v8982_v51  ;;  %4758 = vmatpush.msra.mxu3 %v11207_v20  ;;  %v6382_v53 = vld [vmem:[#allocation2 + $0xbf8] sm:$0xff] }
 0xb1c   : > { %v4747_v13 = vpop.f32.mrf.mxu2 }
 0xb1d   : > { %v4727_v57 = vadd.f32 %v4725_v8, %v8986_v56  ;;  %v4770_v45 = vmul.f32 %v4747_v13, %v8982_v51  ;;  %4759 = vmatpush.msra.mxu3 %v11194_v59  ;;  %v6383_v8 = vld [vmem:[#allocation2 + $0xbe8] sm:$0xff]  ;;  %v6384_v13 = vld [vmem:[#allocation2 + $0xbd8] sm:$0xff] }
 0xb1e   : > { %v10082_v59 = vld [vmem:[#allocation2 + $0xe58] sm:$0xff] }
 0xb1f   : > { %v4729_v38 = vmax.f32 %v4727_v57, 0.0  ;;  %v4772_v34 = vadd.f32 %v4770_v45, %v8986_v56  ;;  %4760 = vmatpush.msra.mxu3 %v9463_v22  ;;  %v6385_v57 = vld [vmem:[#allocation2 + $0xbc8] sm:$0xff]  ;;  %v6386_v45 = vld [vmem:[#allocation2 + $0xbb8] sm:$0xff]  ;;  %11224 = vst [vmem:[#allocation31_spill] sm:$0xff] %v10082_v59 }
 0xb21   : > { %5804 = vst [vmem:[%s8992_s23 + $0x98] sm:$0xff] %v4729_v38  ;;  %v4774_v32 = vmax.f32 %v4772_v34, 0.0  ;;  %4761 = vmatpush.msra.mxu3 %v9620_v48  ;;  %v6387_v38 = vld [vmem:[#allocation2 + $0xba8] sm:$0xff]  ;;  %v6388_v34 = vld [vmem:[#allocation2 + $0xb98] sm:$0xff] }
 0xb23   : > { %5805 = vst [vmem:[%s8992_s23 + $0xa0] sm:$0xff] %v4774_v32  ;;  %4762 = vmatpush.msra.mxu3 %v9465_v4  ;;  %v6389_v32 = vld [vmem:[#allocation2 + $0xb88] sm:$0xff]  ;;  %v6390_v4 = vld [vmem:[#allocation2 + $0xb78] sm:$0xff] }
 0xb25   : > { %4763 = vmatpush.msra.mxu3 %v11093_v33 }
 0xb27   : > { %4764 = vmatpush.msra.mxu3 %v11094_v26 }
 0xb29   : > { %4765 = vmatpush.msra.mxu3 %v11108_v12  ;;  %v4793_v12 = vpop.f32.mrf.mxu0 }
 0xb2a   : > { %5776 = vmatmul.msk.f32.vlgmr.msra.gmra.mxu3 %vm3614_vm1, %v9554_v36 }
 0xb2b   : > { %4836 = vmatpush.msrb.mxu3 %v6382_v53  ;;  %v6391_v53 = vld [vmem:[#allocation2 + $0xb68] sm:$0xff] }
 0xb2d   : > { %4837 = vmatpush.msrb.mxu3 %v6383_v8  ;;  %v6392_v8 = vld [vmem:[#allocation2 + $0xb58] sm:$0xff] }
 0xb2f   : > { %4838 = vmatpush.msrb.mxu3 %v6384_v13  ;;  %v6393_v13 = vld [vmem:[#allocation2 + $0xb48] sm:$0xff] }
 0xb31   : > { %4839 = vmatpush.msrb.mxu3 %v6385_v57  ;;  %v6394_v57 = vld [vmem:[#allocation2 + $0xb38] sm:$0xff] }
 0xb33   : > { %4840 = vmatpush.msrb.mxu3 %v6386_v45  ;;  %v6397_v45 = vld [vmem:[#allocation2 + $0xb08] sm:$0xff] }
 0xb35   : > { %4841 = vmatpush.msrb.mxu3 %v6387_v38  ;;  %v6398_v38 = vld [vmem:[#allocation2 + $0xdf0] sm:$0xff] }
 0xb37   : > { %4842 = vmatpush.msrb.mxu3 %v6388_v34  ;;  %v6399_v34 = vld [vmem:[#allocation2 + $0xde0] sm:$0xff] }
 0xb39   : > { %4843 = vmatpush.msrb.mxu3 %v6389_v32  ;;  %v6400_v32 = vld [vmem:[#allocation2 + $0xdd0] sm:$0xff] }
 0xb3a   : > { %v4813_v63 = vpop.f32.mrf.mxu1 }
 0xb3b   : > { %v9997_v58 = vadd.f32 %v4813_v63, %v4793_v12  ;;  %4844 = vmatpush.msrb.mxu3 %v6390_v4  ;;  %v6395_v63 = vld [vmem:[#allocation2 + $0xb28] sm:$0xff]  ;;  %v6396_v4 = vld [vmem:[#allocation2 + $0xb18] sm:$0xff] }
 0xb3c   : > { %v6401_v12 = vld [vmem:[#allocation2 + $0xcf8] sm:$0xff] }
 0xb3d   : > { %11220 = vst [vmem:[#allocation27_spill] sm:$0xff] %v9997_v58  ;;  %4845 = vmatpush.msrb.mxu3 %v6391_v53  ;;  %4863 = vmatpush.msrb.mxu0 %v9997_v58  ;;  %v6402_v53 = vld [vmem:[#allocation2 + $0xdc0] sm:$0xff] }
 0xb3e   : > { %v10061_v58 = vld [vmem:[#allocation2 + $0xf60] sm:$0xff] }
 0xb3f   : > { %4846 = vmatpush.msrb.mxu3 %v6392_v8  ;;  %4864 = vmatpush.msrb.mxu0 %v11148_v11  ;;  %v6404_v8 = vld [vmem:[#allocation2 + $0xdb0] sm:$0xff] }
 0xb40   : > { %v10067_v11 = vld [vmem:[#allocation2 + $0xf50] sm:$0xff] }
 0xb41   : > { %4847 = vmatpush.msrb.mxu3 %v6393_v13  ;;  %4865 = vmatpush.msrb.mxu0 %v11196_v52  ;;  %v6405_v13 = vld [vmem:[#allocation2 + $0xcd8] sm:$0xff]  ;;  %v10073_v52 = vld [vmem:[#allocation2 + $0xf40] sm:$0xff] }
 0xb43   : > { %4848 = vmatpush.msrb.mxu3 %v6394_v57  ;;  %4866 = vmatpush.msrb.mxu0 %v9746_v44  ;;  %v6407_v57 = vld [vmem:[#allocation2 + $0xcc8] sm:$0xff]  ;;  %v10058_v44 = vld [vmem:[#allocation2 + $0xe98] sm:$0xff] }
 0xb45   : > { %4849 = vmatpush.msrb.mxu3 %v6395_v63  ;;  %4867 = vmatpush.msrb.mxu0 %v9284_v7  ;;  %v6409_v63 = vld [vmem:[#allocation2 + $0xcb8] sm:$0xff]  ;;  %v10064_v7 = vld [vmem:[#allocation2 + $0xe88] sm:$0xff] }
 0xb47   : > { %4850 = vmatpush.msrb.mxu3 %v6396_v4  ;;  %4868 = vmatpush.msrb.mxu0 %v9502_v42  ;;  %v6411_v4 = vld [vmem:[#allocation2 + $0xca8] sm:$0xff]  ;;  %v10070_v42 = vld [vmem:[#allocation2 + $0xe78] sm:$0xff] }
 0xb49   : > { %4851 = vmatpush.msrb.mxu3 %v6397_v45  ;;  %4869 = vmatpush.msrb.mxu0 %v9367_v31  ;;  %v6403_v31 = vld [vmem:[#allocation2 + $0xce8] sm:$0xff]  ;;  %v6412_v45 = vld [vmem:[#allocation2 + $0xd70] sm:$0xff] }
 0xb4a   : > { %4852 = vmatmul.f32.vlgmr.msrb.gmra.mxu3 %v11195_v17  ;;  %v10079_v17 = vld [vmem:[#allocation2 + $0xf30] sm:$0xff] }
 0xb4b   : > { %4922 = vmatpush.msra.mxu3 %v6398_v38  ;;  %4870 = vmatpush.msrb.mxu0 %v8691_v2  ;;  %v6406_v2 = vld [vmem:[#allocation2 + $0xda0] sm:$0xff]  ;;  %v6413_v38 = vld [vmem:[#allocation2 + $0xc98] sm:$0xff] }
 0xb4d   : > { %4923 = vmatpush.msra.mxu3 %v6399_v34  ;;  %4871 = vmatpush.msrb.mxu0 %v8780_v27  ;;  %v6408_v27 = vld [vmem:[#allocation2 + $0xd90] sm:$0xff]  ;;  %v6414_v34 = vld [vmem:[#allocation2 + $0xd60] sm:$0xff] }
 0xb4e   : > { %5777 = vmatmul.msk.f32.vlgmr.msrb.gmra.mxu0 %vm3614_vm1, %v9554_v36  ;;  %v6410_v36 = vld [vmem:[#allocation2 + $0xd80] sm:$0xff] }
 0xb4f   : > { %4924 = vmatpush.msra.mxu3 %v6400_v32  ;;  %4942 = vmatpush.msra.mxu0 %v6401_v12  ;;  %v6415_v32 = vld [vmem:[#allocation2 + $0xc88] sm:$0xff]  ;;  %v6416_v12 = vld [vmem:[#allocation2 + $0xd50] sm:$0xff] }
 0xb51   : > { %4925 = vmatpush.msra.mxu3 %v6402_v53  ;;  %4943 = vmatpush.msra.mxu0 %v6403_v31  ;;  %v6417_v53 = vld [vmem:[#allocation2 + $0xc78] sm:$0xff]  ;;  %v6418_v31 = vld [vmem:[#allocation2 + $0xd40] sm:$0xff] }
 0xb53   : > { %4926 = vmatpush.msra.mxu3 %v6404_v8  ;;  %4944 = vmatpush.msra.mxu0 %v6405_v13  ;;  %v6419_v8 = vld [vmem:[#allocation2 + $0xc68] sm:$0xff]  ;;  %v6420_v13 = vld [vmem:[#allocation2 + $0xd30] sm:$0xff] }
 0xb55   : > { %4927 = vmatpush.msra.mxu3 %v6406_v2  ;;  %4945 = vmatpush.msra.mxu0 %v6407_v57  ;;  %v6421_v2 = vld [vmem:[#allocation2 + $0xc58] sm:$0xff]  ;;  %v6422_v57 = vld [vmem:[#allocation2 + $0xd20] sm:$0xff] }
 0xb57   : > { %4928 = vmatpush.msra.mxu3 %v6408_v27  ;;  %4946 = vmatpush.msra.mxu0 %v6409_v63  ;;  %v6423_v27 = vld [vmem:[#allocation2 + $0xc48] sm:$0xff]  ;;  %v6424_v63 = vld [vmem:[#allocation2 + $0xd10] sm:$0xff] }
 0xb59   : > { %4929 = vmatpush.msra.mxu3 %v6410_v36  ;;  %4947 = vmatpush.msra.mxu0 %v6411_v4  ;;  %v6425_v36 = vld [vmem:[#allocation2 + $0xc38] sm:$0xff]  ;;  %v6426_v4 = vld [vmem:[#allocation2 + $0xd00] sm:$0xff] }
 0xb5b   : > { %4930 = vmatpush.msra.mxu3 %v6412_v45  ;;  %4948 = vmatpush.msra.mxu0 %v6413_v38  ;;  %v6427_v45 = vld [vmem:[#allocation2 + $0xc28] sm:$0xff]  ;;  %v10012_v38 = vld [vmem:[#allocation2 + $0xff0] sm:$0xff] }
 0xb5d   : > { %4931 = vmatpush.msra.mxu3 %v6414_v34  ;;  %4949 = vmatpush.msra.mxu0 %v6415_v32  ;;  %v6429_v34 = vld [vmem:[#allocation2 + $0xc18] sm:$0xff]  ;;  %v10015_v32 = vld [vmem:[#allocation2 + $0xfe0] sm:$0xff] }
 0xb5f   : > { %4932 = vmatpush.msra.mxu3 %v6416_v12  ;;  %4950 = vmatpush.msra.mxu0 %v6417_v53  ;;  %v6431_v12 = vld [vmem:[#allocation2 + $0xc08] sm:$0xff]  ;;  %v10019_v53 = vld [vmem:[#allocation2 + $0xfd0] sm:$0xff] }
 0xb61   : > { %4933 = vmatpush.msra.mxu3 %v6418_v31  ;;  %4951 = vmatpush.msra.mxu0 %v6419_v8  ;;  %v10022_v31 = vld [vmem:[#allocation2 + $0xef8] sm:$0xff]  ;;  %v10025_v8 = vld [vmem:[#allocation2 + $0xfc0] sm:$0xff] }
 0xb63   : > { %4934 = vmatpush.msra.mxu3 %v6420_v13  ;;  %4952 = vmatpush.msra.mxu0 %v6421_v2  ;;  %v10028_v13 = vld [vmem:[#allocation2 + $0xee8] sm:$0xff]  ;;  %v10031_v2 = vld [vmem:[#allocation2 + $0xfb0] sm:$0xff] }
 0xb64   : > { %11221 = vst [vmem:[#allocation67_spill] sm:$0xff] %v10031_v2 }
 0xb65   : > { %4935 = vmatpush.msra.mxu3 %v6422_v57  ;;  %4953 = vmatpush.msra.mxu0 %v6423_v27  ;;  %v10034_v57 = vld [vmem:[#allocation2 + $0xed8] sm:$0xff]  ;;  %v10037_v27 = vld [vmem:[#allocation2 + $0xfa0] sm:$0xff] }
 0xb67   : > { %4936 = vmatpush.msra.mxu3 %v6424_v63  ;;  %4954 = vmatpush.msra.mxu0 %v6425_v36  ;;  %v10040_v63 = vld [vmem:[#allocation2 + $0xec8] sm:$0xff]  ;;  %v10043_v36 = vld [vmem:[#allocation2 + $0xf90] sm:$0xff] }
 0xb68   : > { %11222 = vst [vmem:[#allocation29_spill] sm:$0xff] %v10043_v36 }
 0xb69   : > { %4937 = vmatpush.msra.mxu3 %v6426_v4  ;;  %4955 = vmatpush.msra.mxu0 %v6427_v45  ;;  %v10046_v4 = vld [vmem:[#allocation2 + $0xeb8] sm:$0xff]  ;;  %v10049_v45 = vld [vmem:[#allocation2 + $0xf80] sm:$0xff] }
 0xb6a   : > { %4938 = vmatmul.f32.vlgmr.msra.gmra.mxu3 %v11095_v39  ;;  %11223 = vst [vmem:[#allocation26_spill] sm:$0xff] %v10049_v45 }
 0xb6b   : > { %5002 = vmatpush.msrb.mxu3 %v10012_v38  ;;  %4956 = vmatpush.msra.mxu0 %v6429_v34  ;;  %v10052_v34 = vld [vmem:[#allocation2 + $0xea8] sm:$0xff] }
 0xb6d   : > { %5003 = vmatpush.msrb.mxu3 %v10015_v32  ;;  %4957 = vmatpush.msra.mxu0 %v6431_v12  ;;  %v10055_v12 = vld [vmem:[#allocation2 + $0xf70] sm:$0xff] }
 0xb6e   : > { %4958 = vmatmul.f32.vlgmr.msra.gmra.mxu0 %v8645_v28  ;;  %v10085_v28 = vld [vmem:[#allocation2 + $0xf20] sm:$0xff] }
 0xb6f   : > { %5004 = vmatpush.msrb.mxu3 %v10019_v53  ;;  %5022 = vmatpush.msrb.mxu0 %v10022_v31 }
 0xb71   : > { %5005 = vmatpush.msrb.mxu3 %v10025_v8  ;;  %5023 = vmatpush.msrb.mxu0 %v10028_v13 }
 0xb73   : > { %5006 = vmatpush.msrb.mxu3 %v10031_v2  ;;  %5024 = vmatpush.msrb.mxu0 %v10034_v57 }
 0xb75   : > { %5007 = vmatpush.msrb.mxu3 %v10037_v27  ;;  %5025 = vmatpush.msrb.mxu0 %v10040_v63 }
 0xb77   : > { %5008 = vmatpush.msrb.mxu3 %v10043_v36  ;;  %5026 = vmatpush.msrb.mxu0 %v10046_v4 }
 0xb79   : > { %5009 = vmatpush.msrb.mxu3 %v10049_v45  ;;  %5027 = vmatpush.msrb.mxu0 %v10052_v34 }
 0xb7b   : > { %5010 = vmatpush.msrb.mxu3 %v10055_v12  ;;  %5028 = vmatpush.msrb.mxu0 %v10058_v44 }
 0xb7d   : > { %5011 = vmatpush.msrb.mxu3 %v10061_v58  ;;  %5029 = vmatpush.msrb.mxu0 %v10064_v7 }
 0xb7f   : > { %5012 = vmatpush.msrb.mxu3 %v10067_v11  ;;  %5030 = vmatpush.msrb.mxu0 %v10070_v42 }
 0xb81   : > { %5013 = vmatpush.msrb.mxu3 %v10073_v52  ;;  %5031 = vmatpush.msrb.mxu0 %v10076_v14 }
 0xb83   : > { %5014 = vmatpush.msrb.mxu3 %v10079_v17  ;;  %5032 = vmatpush.msrb.mxu0 %v10082_v59 }
 0xb85   : > { %5015 = vmatpush.msrb.mxu3 %v10085_v28  ;;  %5033 = vmatpush.msrb.mxu0 %v10088_v29 }
 0xb87   : > { %5016 = vmatpush.msrb.mxu3 %v10091_v9  ;;  %5034 = vmatpush.msrb.mxu0 %v10094_v25 }
 0xb89   : > { %5017 = vmatpush.msrb.mxu3 %v10097_v10  ;;  %5035 = vmatpush.msrb.mxu0 %v10100_v41 }
 0xb8a   : > { %5018 = vmatmul.f32.vlgmr.msrb.gmra.mxu3 %v8904_v21 }
 0xb8b   : > { %5082 = vmatpush.msra.mxu3 %v10012_v38  ;;  %5036 = vmatpush.msrb.mxu0 %v10105_v15 }
 0xb8d   : > { %5083 = vmatpush.msra.mxu3 %v10015_v32  ;;  %5037 = vmatpush.msrb.mxu0 %v10109_v46 }
 0xb8e   : > { %5038 = vmatmul.f32.vlgmr.msrb.gmra.mxu0 %v11218_v47 }
 0xb8f   : > { %5084 = vmatpush.msra.mxu3 %v10019_v53  ;;  %5102 = vmatpush.msra.mxu0 %v10022_v31 }
 0xb91   : > { %5085 = vmatpush.msra.mxu3 %v10025_v8  ;;  %5103 = vmatpush.msra.mxu0 %v10028_v13 }
 0xb93   : > { %5086 = vmatpush.msra.mxu3 %v10031_v2  ;;  %5104 = vmatpush.msra.mxu0 %v10034_v57 }
 0xb95   : > { %5087 = vmatpush.msra.mxu3 %v10037_v27  ;;  %5105 = vmatpush.msra.mxu0 %v10040_v63 }
 0xb97   : > { %5088 = vmatpush.msra.mxu3 %v10043_v36  ;;  %5106 = vmatpush.msra.mxu0 %v10046_v4 }
 0xb99   : > { %5089 = vmatpush.msra.mxu3 %v10049_v45  ;;  %5107 = vmatpush.msra.mxu0 %v10052_v34 }
 0xb9b   : > { %5090 = vmatpush.msra.mxu3 %v10055_v12  ;;  %5108 = vmatpush.msra.mxu0 %v10058_v44  ;;  %v4675_v47 = vpop.f32.mrf.mxu3 }
 0xb9c   : > { %v4679_v2 = vmul.f32 %v4675_v47, %v8982_v51 }
 0xb9d   : > { %5091 = vmatpush.msra.mxu3 %v10061_v58  ;;  %5109 = vmatpush.msra.mxu0 %v10064_v7 }
 0xb9e   : > { %v4681_v36 = vadd.f32 %v4679_v2, %v8986_v56 }
 0xb9f   : > { %5092 = vmatpush.msra.mxu3 %v10067_v11  ;;  %5110 = vmatpush.msra.mxu0 %v10070_v42 }
 0xba0   : > { %v4683_v45 = vmax.f32 %v4681_v36, 0.0 }
 0xba1   : > { %5093 = vmatpush.msra.mxu3 %v10073_v52  ;;  %5111 = vmatpush.msra.mxu0 %v10076_v14 }
 0xba2   : > { %5802 = vst [vmem:[%s8992_s23 + $0x88] sm:$0xff] %v4683_v45 }
 0xba3   : > { %5094 = vmatpush.msra.mxu3 %v10079_v17  ;;  %5112 = vmatpush.msra.mxu0 %v10082_v59 }
 0xba5   : > { %5095 = vmatpush.msra.mxu3 %v10085_v28  ;;  %5113 = vmatpush.msra.mxu0 %v10088_v29 }
 0xba7   : > { %5096 = vmatpush.msra.mxu3 %v10091_v9  ;;  %5114 = vmatpush.msra.mxu0 %v10094_v25 }
 0xba9   : > { %5097 = vmatpush.msra.mxu3 %v10097_v10  ;;  %5115 = vmatpush.msra.mxu0 %v10100_v41 }
 0xbaa   : > { %5098 = vmatmul.f32.vlgmr.msra.gmra.mxu3 %v11109_v61 }
 0xbab   : > { %5116 = vmatpush.msra.mxu0 %v10105_v15 }
 0xbad   : > { %5117 = vmatpush.msra.mxu0 %v10109_v46  ;;  %v4767_v47 = vpop.f32.mrf.mxu3 }
 0xbae   : > { %5118 = vmatmul.f32.vlgmr.msra.gmra.mxu0 %v11091_v18  ;;  %v4771_v2 = vmul.f32 %v4767_v47, %v8982_v51 }
 0xbaf   : > { %5188 = vmatpush.msrb.mxu0 %v9896_v3 }
 0xbb0   : > { %v4773_v36 = vadd.f32 %v4771_v2, %v8986_v56  ;;  %v4833_v2 = vpop.f32.mrf.mxu2 }
 0xbb1   : > { %5189 = vmatpush.msrb.mxu0 %v9899_v23 }
 0xbb2   : > { %v4775_v45 = vmax.f32 %v4773_v36, 0.0 }
 0xbb3   : > { %5190 = vmatpush.msrb.mxu0 %v9902_v43 }
 0xbb4   : > { %5806 = vst [vmem:[%s8992_s23 + $0xa8] sm:$0xff] %v4775_v45 }
 0xbb5   : > { %5191 = vmatpush.msrb.mxu0 %v9905_v60 }
 0xbb7   : > { %5192 = vmatpush.msrb.mxu0 %v9908_v30 }
 0xbb9   : > { %5193 = vmatpush.msrb.mxu0 %v9911_v40 }
 0xbbb   : > { %5194 = vmatpush.msrb.mxu0 %v9914_v6 }
 0xbbd   : > { %5195 = vmatpush.msrb.mxu0 %v9917_v5 }
 0xbbf   : > { %5196 = vmatpush.msrb.mxu0 %v9921_v50 }
 0xbc1   : > { %5197 = vmatpush.msrb.mxu0 %v9925_v55 }
 0xbc3   : > { %5198 = vmatpush.msrb.mxu0 %v9928_v16 }
 0xbc5   : > { %5199 = vmatpush.msrb.mxu0 %v9932_v49 }
 0xbc7   : > { %5200 = vmatpush.msrb.mxu0 %v9935_v24 }
 0xbc9   : > { %5201 = vmatpush.msrb.mxu0 %v9938_v19  ;;  %v10235_v19 = vld [vmem:[#allocation2 + $0xf08] sm:$0xff] }
 0xbcb   : > { %5202 = vmatpush.msrb.mxu0 %v9941_v54  ;;  %v4873_v18 = vpop.f32.mrf.mxu0  ;;  %v10232_v54 = vld [vmem:[#allocation2 + $0xf18] sm:$0xff] }
 0xbcc   : > { %v4896_v47 = vmul.f32 %v4873_v18, %v8982_v51  ;;  %v6463_v18 = vld [vmem:[#allocation2 + $0xdf8] sm:$0xff] }
 0xbcd   : > { %5203 = vmatpush.msrb.mxu0 %v9944_v0  ;;  %v4853_v36 = vpop.f32.mrf.mxu3 }
 0xbce   : > { %5204 = vmatmul.f32.vlgmr.msrb.gmra.mxu0 %v8811_v62  ;;  %v4898_v45 = vadd.f32 %v4896_v47, %v8986_v56  ;;  %v10170_v16 = vadd.f32 %v4853_v36, %v4833_v2  ;;  %v6464_v47 = vld [vmem:[#allocation2 + $0xde8] sm:$0xff]  ;;  %v6465_v2 = vld [vmem:[#allocation2 + $0xdd8] sm:$0xff] }
 0xbcf   : > { %v6466_v36 = vld [vmem:[#allocation2 + $0xdc8] sm:$0xff] }
 0xbd0   : > { %11232 = vst [vmem:[#allocation37_spill] sm:$0xff] %v10170_v16  ;;  %v4900_v49 = vmax.f32 %v4898_v45, 0.0  ;;  %4883 = vmatpush.msrb.mxu1 %v10170_v16  ;;  %v6470_v45 = vld [vmem:[#allocation2 + $0xd88] sm:$0xff] }
 0xbd1   : > { %v6472_v16 = vld [vmem:[#allocation2 + $0xd68] sm:$0xff] }
 0xbd2   : > { %5807 = vst [vmem:[%s8992_s23 + $0xb0] sm:$0xff] %v4900_v49  ;;  %4884 = vmatpush.msrb.mxu1 %v11193_v37  ;;  %v10185_v49 = vld [vmem:[%s10520_s11] sm:$0xff]  ;;  %v10223_v37 = vld [vmem:[#allocation2 + $0xf48] sm:$0xff] }
 0xbd4   : > { %4885 = vmatpush.msrb.mxu1 %v11207_v20  ;;  %v10229_v20 = vld [vmem:[#allocation2 + $0xf28] sm:$0xff] }
 0xbd6   : > { %4886 = vmatpush.msrb.mxu1 %v9824_v1  ;;  %v6471_v1 = vld [vmem:[#allocation2 + $0xd78] sm:$0xff] }
 0xbd8   : > { %4887 = vmatpush.msrb.mxu1 %v9463_v22  ;;  %v6473_v22 = vld [vmem:[#allocation2 + $0xd58] sm:$0xff] }
 0xbda   : > { %4888 = vmatpush.msrb.mxu1 %v9620_v48  ;;  %v10226_v48 = vld [vmem:[#allocation2 + $0xf38] sm:$0xff] }
 0xbdc   : > { %4889 = vmatpush.msrb.mxu1 %v9536_v35  ;;  %v6467_v35 = vld [vmem:[#allocation2 + $0xdb8] sm:$0xff] }
 0xbde   : > { %4890 = vmatpush.msrb.mxu1 %v11093_v33  ;;  %v6468_v33 = vld [vmem:[#allocation2 + $0xda8] sm:$0xff] }
 0xbe0   : > { %4891 = vmatpush.msrb.mxu1 %v11094_v26  ;;  %v6469_v26 = vld [vmem:[#allocation2 + $0xd98] sm:$0xff] }
 0xbe1   : > { %5778 = vmatmul.msk.f32.vlgmr.msrb.gmra.mxu1 %vm3614_vm1, %v10185_v49 }
 0xbe2   : > { %4962 = vmatpush.msra.mxu1 %v6463_v18  ;;  %v6474_v18 = vld [vmem:[#allocation2 + $0xd48] sm:$0xff] }
 0xbe4   : > { %4963 = vmatpush.msra.mxu1 %v6464_v47  ;;  %v6475_v47 = vld [vmem:[#allocation2 + $0xd38] sm:$0xff] }
 0xbe6   : > { %4964 = vmatpush.msra.mxu1 %v6465_v2  ;;  %v6476_v2 = vld [vmem:[#allocation2 + $0xd28] sm:$0xff] }
 0xbe8   : > { %4965 = vmatpush.msra.mxu1 %v6466_v36  ;;  %v6477_v36 = vld [vmem:[#allocation2 + $0xd18] sm:$0xff] }
 0xbea   : > { %4966 = vmatpush.msra.mxu1 %v6467_v35  ;;  %v6478_v35 = vld [vmem:[#allocation2 + $0xd08] sm:$0xff] }
 0xbec   : > { %4967 = vmatpush.msra.mxu1 %v6468_v33  ;;  %v10190_v33 = vld [vmem:[#allocation2 + $0xff8] sm:$0xff] }
 0xbed   : > { %v4939_v0 = vpop.f32.mrf.mxu3 }
 0xbee   : > { %4968 = vmatpush.msra.mxu1 %v6469_v26  ;;  %v10202_v26 = vld [vmem:[#allocation2 + $0xfb8] sm:$0xff] }
 0xbf0   : > { %4969 = vmatpush.msra.mxu1 %v6470_v45  ;;  %v10205_v45 = vld [vmem:[#allocation2 + $0xfa8] sm:$0xff] }
 0xbf2   : > { %4970 = vmatpush.msra.mxu1 %v6471_v1  ;;  %v10193_v1 = vld [vmem:[#allocation2 + $0xfe8] sm:$0xff] }
 0xbf3   : > { %11233 = vst [vmem:[#allocation38_spill] sm:$0xff] %v10193_v1 }
 0xbf4   : > { %4971 = vmatpush.msra.mxu1 %v6472_v16  ;;  %v10199_v16 = vld [vmem:[#allocation2 + $0xfc8] sm:$0xff] }
 0xbf6   : > { %4972 = vmatpush.msra.mxu1 %v6473_v22  ;;  %v10196_v22 = vld [vmem:[#allocation2 + $0xfd8] sm:$0xff] }
 0xbf8   : > { %4973 = vmatpush.msra.mxu1 %v6474_v18  ;;  %v10208_v18 = vld [vmem:[#allocation2 + $0xf98] sm:$0xff] }
 0xbfa   : > { %4974 = vmatpush.msra.mxu1 %v6475_v47  ;;  %v10211_v47 = vld [vmem:[#allocation2 + $0xf88] sm:$0xff] }
 0xbfc   : > { %4975 = vmatpush.msra.mxu1 %v6476_v2  ;;  %v10214_v2 = vld [vmem:[#allocation2 + $0xf78] sm:$0xff] }
 0xbfe   : > { %4976 = vmatpush.msra.mxu1 %v6477_v36  ;;  %v10217_v36 = vld [vmem:[#allocation2 + $0xf68] sm:$0xff] }
 0xc00   : > { %4977 = vmatpush.msra.mxu1 %v6478_v35  ;;  %v10220_v35 = vld [vmem:[#allocation2 + $0xf58] sm:$0xff] }
 0xc01   : > { %4978 = vmatmul.f32.vlgmr.msra.gmra.mxu1 %v11095_v39  ;;  %v4919_v39 = vpop.f32.mrf.mxu2 }
 0xc02   : > { %5042 = vmatpush.msrb.mxu1 %v10190_v33 }
 0xc04   : > { %5043 = vmatpush.msrb.mxu1 %v10193_v1 }
 0xc06   : > { %5044 = vmatpush.msrb.mxu1 %v10196_v22 }
 0xc08   : > { %5045 = vmatpush.msrb.mxu1 %v10199_v16 }
 0xc09   : > { %v4999_v24 = vpop.f32.mrf.mxu2 }
 0xc0a   : > { %5046 = vmatpush.msrb.mxu1 %v10202_v26 }
 0xc0c   : > { %5047 = vmatpush.msrb.mxu1 %v10205_v45 }
 0xc0d   : > { %v5019_v55 = vpop.f32.mrf.mxu3 }
 0xc0e   : > { %5048 = vmatpush.msrb.mxu1 %v10208_v18 }
 0xc10   : > { %5049 = vmatpush.msrb.mxu1 %v10211_v47 }
 0xc11   : > { %v5079_v50 = vpop.f32.mrf.mxu2 }
 0xc12   : > { %5050 = vmatpush.msrb.mxu1 %v10214_v2 }
 0xc14   : > { %5051 = vmatpush.msrb.mxu1 %v10217_v36 }
 0xc16   : > { %5052 = vmatpush.msrb.mxu1 %v10220_v35 }
 0xc18   : > { %5053 = vmatpush.msrb.mxu1 %v10223_v37 }
 0xc1a   : > { %5054 = vmatpush.msrb.mxu1 %v10226_v48 }
 0xc1c   : > { %5055 = vmatpush.msrb.mxu1 %v10229_v20 }
 0xc1e   : > { %5056 = vmatpush.msrb.mxu1 %v10232_v54 }
 0xc20   : > { %5057 = vmatpush.msrb.mxu1 %v10235_v19 }
 0xc21   : > { %5058 = vmatmul.f32.vlgmr.msrb.gmra.mxu1 %v8904_v21  ;;  %v10248_v21 = vadd.f32 %v5019_v55, %v4999_v24  ;;  %v11236_v55 = vld [vmem:[#allocation24_spill] sm:$0xff] }
 0xc22   : > { %5122 = vmatpush.msra.mxu1 %v10190_v33  ;;  %v11238_v24 = vld [vmem:[#allocation48_spill] sm:$0xff] }
 0xc24   : > { %5123 = vmatpush.msra.mxu1 %v10193_v1  ;;  %v4940_v1 = vadd.f32 %v4939_v0, %v4919_v39  ;;  %v11237_v39 = vld [vmem:[#allocation58_spill] sm:$0xff]  ;;  %v11239_v0 = vld [vmem:[#allocation76_spill] sm:$0xff] }
 0xc26   : > { %5124 = vmatpush.msra.mxu1 %v10196_v22 }
 0xc28   : > { %5125 = vmatpush.msra.mxu1 %v10199_v16 }
 0xc2a   : > { %5126 = vmatpush.msra.mxu1 %v10202_v26 }
 0xc2c   : > { %5127 = vmatpush.msra.mxu1 %v10205_v45 }
 0xc2d   : > { %v5099_v5 = vpop.f32.mrf.mxu3 }
 0xc2e   : > { %v10245_v6 = vadd.f32 %v5099_v5, %v5079_v50  ;;  %5128 = vmatpush.msra.mxu1 %v10208_v18  ;;  %v11234_v5 = vld [vmem:[#allocation62_spill] sm:$0xff]  ;;  %v11235_v50 = vld [vmem:[#allocation60_spill] sm:$0xff] }
 0xc30   : > { %5129 = vmatpush.msra.mxu1 %v10211_v47  ;;  %5149 = vmatpush.msra.mxu2 %v10245_v6 }
 0xc32   : > { %5130 = vmatpush.msra.mxu1 %v10214_v2  ;;  %5150 = vmatpush.msra.mxu2 %v10248_v21 }
 0xc34   : > { %5131 = vmatpush.msra.mxu1 %v10217_v36  ;;  %5151 = vmatpush.msra.mxu2 %v4940_v1  ;;  %v11241_v1 = vld [vmem:[#allocation29_spill] sm:$0xff] }
 0xc36   : > { %5132 = vmatpush.msra.mxu1 %v10220_v35  ;;  %5152 = vmatpush.msra.mxu2 %v11234_v5 }
 0xc38   : > { %5133 = vmatpush.msra.mxu1 %v10223_v37  ;;  %5153 = vmatpush.msra.mxu2 %v11235_v50 }
 0xc3a   : > { %5134 = vmatpush.msra.mxu1 %v10226_v48  ;;  %5154 = vmatpush.msra.mxu2 %v11236_v55  ;;  %v11242_v55 = vld [vmem:[#allocation26_spill] sm:$0xff] }
 0xc3c   : > { %5135 = vmatpush.msra.mxu1 %v10229_v20  ;;  %5155 = vmatpush.msra.mxu2 %v11237_v39 }
 0xc3e   : > { %5136 = vmatpush.msra.mxu1 %v10232_v54  ;;  %5156 = vmatpush.msra.mxu2 %v11238_v24 }
 0xc40   : > { %5137 = vmatpush.msra.mxu1 %v10235_v19  ;;  %5157 = vmatpush.msra.mxu2 %v11239_v0 }
 0xc41   : > { %5138 = vmatmul.f32.vlgmr.msra.gmra.mxu1 %v11109_v61  ;;  %5779 = vmatmul.msk.f32.vlgmr.msra.gmra.mxu2 %vm3614_vm1, %v10185_v49  ;;  %v11240_v61 = vld [vmem:[#allocation67_spill] sm:$0xff] }
 0xc42   : > { %5208 = vmatpush.msrb.mxu1 %v10012_v38  ;;  %5228 = vmatpush.msrb.mxu2 %v10022_v31 }
 0xc44   : > { %5209 = vmatpush.msrb.mxu1 %v10015_v32  ;;  %5229 = vmatpush.msrb.mxu2 %v10028_v13 }
 0xc46   : > { %5210 = vmatpush.msrb.mxu1 %v10019_v53  ;;  %5230 = vmatpush.msrb.mxu2 %v10034_v57 }
 0xc48   : > { %5211 = vmatpush.msrb.mxu1 %v10025_v8  ;;  %5231 = vmatpush.msrb.mxu2 %v10040_v63 }
 0xc4a   : > { %5212 = vmatpush.msrb.mxu1 %v11240_v61  ;;  %5232 = vmatpush.msrb.mxu2 %v10046_v4 }
 0xc4c   : > { %5213 = vmatpush.msrb.mxu1 %v10037_v27  ;;  %5233 = vmatpush.msrb.mxu2 %v10052_v34 }
 0xc4e   : > { %5214 = vmatpush.msrb.mxu1 %v11241_v1  ;;  %5234 = vmatpush.msrb.mxu2 %v10058_v44 }
 0xc50   : > { %5215 = vmatpush.msrb.mxu1 %v11242_v55  ;;  %5235 = vmatpush.msrb.mxu2 %v10064_v7 }
 0xc52   : > { %5216 = vmatpush.msrb.mxu1 %v10055_v12  ;;  %5236 = vmatpush.msrb.mxu2 %v10070_v42 }
 0xc54   : > { %5217 = vmatpush.msrb.mxu1 %v10061_v58  ;;  %5237 = vmatpush.msrb.mxu2 %v10076_v14 }
 0xc56   : > { %5218 = vmatpush.msrb.mxu1 %v10067_v11  ;;  %5238 = vmatpush.msrb.mxu2 %v10082_v59 }
 0xc58   : > { %5219 = vmatpush.msrb.mxu1 %v10073_v52  ;;  %5239 = vmatpush.msrb.mxu2 %v10088_v29  ;;  %v11243_v29 = vld [vmem:[#allocation11_spill] sm:$0xff] }
 0xc5a   : > { %5220 = vmatpush.msrb.mxu1 %v10079_v17  ;;  %5240 = vmatpush.msrb.mxu2 %v10094_v25 }
 0xc5c   : > { %5221 = vmatpush.msrb.mxu1 %v10085_v28  ;;  %5241 = vmatpush.msrb.mxu2 %v10100_v41 }
 0xc5e   : > { %5222 = vmatpush.msrb.mxu1 %v10091_v9  ;;  %5242 = vmatpush.msrb.mxu2 %v10105_v15  ;;  %v4893_v0 = vpop.f32.mrf.mxu1  ;;  %v11256_v9 = vld [vmem:[#allocation78_spill] sm:$0xff] }
 0xc5f   : > { %v4897_v59 = vmul.f32 %v4893_v0, %v8982_v51  ;;  %v11244_v0 = vld [vmem:[#allocation23_spill] sm:$0xff] }
 0xc60   : > { %5223 = vmatpush.msrb.mxu1 %v10097_v10  ;;  %5243 = vmatpush.msrb.mxu2 %v10109_v46  ;;  %v11245_v46 = vld [vmem:[#allocation6_spill] sm:$0xff] }
 0xc61   : > { %5224 = vmatmul.f32.vlgmr.msrb.gmra.mxu1 %v11243_v29  ;;  %5244 = vmatmul.f32.vlgmr.msrb.gmra.mxu2 %v8811_v62  ;;  %v4899_v25 = vadd.f32 %v4897_v59, %v8986_v56  ;;  %v11246_v62 = vld [vmem:[#allocation5_spill] sm:$0xff]  ;;  %v11247_v59 = vld [vmem:[#allocation68_spill] sm:$0xff] }
 0xc62   : > { %5314 = vmatpush.msra.mxu2 %v9896_v3  ;;  %v11249_v3 = vld [vmem:[#allocation42_spill] sm:$0xff] }
 0xc63   : > { %v4901_v41 = vmax.f32 %v4899_v25, 0.0  ;;  %v11248_v25 = vld [vmem:[#allocation41_spill] sm:$0xff] }
 0xc64   : > { %5315 = vmatpush.msra.mxu2 %v9899_v23  ;;  %v11251_v23 = vld [vmem:[#allocation69_spill] sm:$0xff] }
 0xc65   : > { %5808 = vst [vmem:[%s8992_s23 + $0xb8] sm:$0xff] %v4901_v41  ;;  %v11250_v41 = vld [vmem:[#allocation43_spill] sm:$0xff] }
 0xc66   : > { %5316 = vmatpush.msra.mxu2 %v9902_v43  ;;  %v11252_v43 = vld [vmem:[#allocation8_spill] sm:$0xff] }
 0xc68   : > { %5317 = vmatpush.msra.mxu2 %v9905_v60  ;;  %v11253_v60 = vld [vmem:[#allocation25_spill] sm:$0xff] }
 0xc6a   : > { %5318 = vmatpush.msra.mxu2 %v9908_v30  ;;  %v11254_v30 = vld [vmem:[#allocation71_spill] sm:$0xff] }
 0xc6c   : > { %5319 = vmatpush.msra.mxu2 %v9911_v40  ;;  %v4959_v40 = vpop.f32.mrf.mxu0 }
 0xc6e   : > { %5320 = vmatpush.msra.mxu2 %v11244_v0 }
 0xc70   : > { %5321 = vmatpush.msra.mxu2 %v11245_v46 }
 0xc72   : > { %5322 = vmatpush.msra.mxu2 %v11246_v62 }
 0xc74   : > { %5323 = vmatpush.msra.mxu2 %v11247_v59  ;;  %v5039_v0 = vpop.f32.mrf.mxu0 }
 0xc76   : > { %5324 = vmatpush.msra.mxu2 %v11248_v25 }
 0xc78   : > { %5325 = vmatpush.msra.mxu2 %v11249_v3 }
 0xc7a   : > { %5326 = vmatpush.msra.mxu2 %v11250_v41 }
 0xc7c   : > { %5327 = vmatpush.msra.mxu2 %v11251_v23  ;;  %v5119_v59 = vpop.f32.mrf.mxu0 }
 0xc7e   : > { %5328 = vmatpush.msra.mxu2 %v11252_v43  ;;  %v4979_v46 = vpop.f32.mrf.mxu1 }
 0xc7f   : > { %v4980_v41 = vadd.f32 %v4979_v46, %v4959_v40  ;;  %v11260_v40 = vld [vmem:[#allocation19_spill] sm:$0xff]  ;;  %v11261_v46 = vld [vmem:[#allocation38_spill] sm:$0xff] }
 0xc80   : > { %5329 = vmatpush.msra.mxu2 %v11253_v60 }
 0xc81   : > { %5330 = vmatmul.f32.vlgmr.msra.gmra.mxu2 %v11254_v30  ;;  %v11255_v30 = vld [vmem:[#allocation21_spill] sm:$0xff] }
 0xc9e   : > { %v5059_v62 = vpop.f32.mrf.mxu1 }
 0xc9f   : > { %v10326_v3 = vadd.f32 %v5059_v62, %v5039_v0  ;;  %v11258_v0 = vld [vmem:[#allocation106_spill] sm:$0xff]  ;;  %v11259_v62 = vld [vmem:[#allocation109_spill] sm:$0xff] }
 0xcbe   : > { %v5139_v10 = vpop.f32.mrf.mxu1 }
 0xcbf   : > { %v10324_v25 = vadd.f32 %v5139_v10, %v5119_v59  ;;  %v11257_v10 = vld [vmem:[#allocation64_spill] sm:$0xff] }
 0xcc1   : > { %5169 = vmatpush.msrb.mxu3 %v10324_v25 }
 0xcc3   : > { %5170 = vmatpush.msrb.mxu3 %v10326_v3 }
 0xcc4   : > { %v5159_v23 = vpop.f32.mrf.mxu2 }
 0xcc5   : > { %v5182_v43 = vmul.f32 %v5159_v23, %v8982_v51  ;;  %5171 = vmatpush.msrb.mxu3 %v4980_v41  ;;  %v11262_v23 = vld [vmem:[#allocation10_spill] sm:$0xff] }
 0xcc7   : > { %v5184_v60 = vadd.f32 %v5182_v43, %v8986_v56  ;;  %5172 = vmatpush.msrb.mxu3 %v11255_v30  ;;  %v11263_v43 = vld [vmem:[#allocation112_spill] sm:$0xff] }
 0xcc9   : > { %v5186_v15 = vmax.f32 %v5184_v60, 0.0  ;;  %5173 = vmatpush.msrb.mxu3 %v11256_v9 }
 0xccb   : > { %5809 = vst [vmem:[%s8992_s23 + $0xc0] sm:$0xff] %v5186_v15  ;;  %5174 = vmatpush.msrb.mxu3 %v11257_v10  ;;  %v5205_v15 = vpop.f32.mrf.mxu0 }
 0xccd   : > { %5175 = vmatpush.msrb.mxu3 %v11258_v0 }
 0xccf   : > { %5176 = vmatpush.msrb.mxu3 %v11259_v62 }
 0xcd1   : > { %5177 = vmatpush.msrb.mxu3 %v11260_v40 }
 0xcd2   : > { %5780 = vmatmul.msk.f32.vlgmr.msrb.gmra.mxu3 %vm3614_vm1, %v10185_v49 }
 0xcd3   : > { %5248 = vmatpush.msra.mxu3 %v10190_v33 }
 0xcd5   : > { %5249 = vmatpush.msra.mxu3 %v11261_v46 }
 0xcd7   : > { %5250 = vmatpush.msra.mxu3 %v10196_v22 }
 0xcd9   : > { %5251 = vmatpush.msra.mxu3 %v10199_v16 }
 0xcdb   : > { %5252 = vmatpush.msra.mxu3 %v10202_v26 }
 0xcdd   : > { %5253 = vmatpush.msra.mxu3 %v10205_v45 }
 0xcde   : > { %v5225_v59 = vpop.f32.mrf.mxu1 }
 0xcdf   : > { %v10347_v41 = vadd.f32 %v5225_v59, %v5205_v15  ;;  %5254 = vmatpush.msra.mxu3 %v10208_v18 }
 0xce1   : > { %5255 = vmatpush.msra.mxu3 %v10211_v47  ;;  %5275 = vmatpush.msra.mxu0 %v10347_v41 }
 0xce3   : > { %5256 = vmatpush.msra.mxu3 %v10214_v2  ;;  %5276 = vmatpush.msra.mxu0 %v10245_v6 }
 0xce5   : > { %5257 = vmatpush.msra.mxu3 %v10217_v36  ;;  %5277 = vmatpush.msra.mxu0 %v10248_v21  ;;  %v11264_v21 = vld [vmem:[#allocation31_spill] sm:$0xff] }
 0xce7   : > { %5258 = vmatpush.msra.mxu3 %v10220_v35  ;;  %5278 = vmatpush.msra.mxu0 %v11262_v23 }
 0xce9   : > { %5259 = vmatpush.msra.mxu3 %v10223_v37  ;;  %5279 = vmatpush.msra.mxu0 %v11234_v5 }
 0xceb   : > { %5260 = vmatpush.msra.mxu3 %v10226_v48  ;;  %5280 = vmatpush.msra.mxu0 %v11235_v50  ;;  %v6508_v50 = vld [vmem:[#allocation2 + $0x1020] sm:$0xff] }
 0xced   : > { %5261 = vmatpush.msra.mxu3 %v10229_v20  ;;  %5281 = vmatpush.msra.mxu0 %v11263_v43 }
 0xcef   : > { %5262 = vmatpush.msra.mxu3 %v10232_v54  ;;  %5282 = vmatpush.msra.mxu0 %v11237_v39 }
 0xcf1   : > { %5263 = vmatpush.msra.mxu3 %v10235_v19  ;;  %5283 = vmatpush.msra.mxu0 %v11238_v24  ;;  %v6509_v24 = vld [vmem:[#allocation2 + $0x1010] sm:$0xff] }
 0xcf2   : > { %5264 = vmatmul.f32.vlgmr.msra.gmra.mxu3 %v11243_v29  ;;  %5781 = vmatmul.msk.f32.vlgmr.msra.gmra.mxu0 %vm3614_vm1, %v10185_v49  ;;  %v11265_v29 = vld [vmem:[#allocation28_spill] sm:$0xff] }
 0xcf3   : > { %5334 = vmatpush.msrb.mxu3 %v10012_v38  ;;  %5354 = vmatpush.msrb.mxu0 %v10022_v31  ;;  %v11272_v38 = vld [vmem:[#allocation9_spill] sm:$0xff]  ;;  %v6499_v31 = vld [vmem:[#allocation2 + $0x10b0] sm:$0xff] }
 0xcf5   : > { %5335 = vmatpush.msrb.mxu3 %v10015_v32  ;;  %5355 = vmatpush.msrb.mxu0 %v10028_v13  ;;  %v6495_v32 = vld [vmem:[#allocation2 + $0x10f0] sm:$0xff] }
 0xcf6   : > { %v6501_v13 = vld [vmem:[#allocation2 + $0x1090] sm:$0xff] }
 0xcf7   : > { %5336 = vmatpush.msrb.mxu3 %v10019_v53  ;;  %5356 = vmatpush.msrb.mxu0 %v10034_v57  ;;  %v6497_v53 = vld [vmem:[#allocation2 + $0x10d0] sm:$0xff]  ;;  %v6502_v57 = vld [vmem:[#allocation2 + $0x1080] sm:$0xff] }
 0xcf9   : > { %5337 = vmatpush.msrb.mxu3 %v10025_v8  ;;  %5357 = vmatpush.msrb.mxu0 %v10040_v63  ;;  %v6500_v8 = vld [vmem:[#allocation2 + $0x10a0] sm:$0xff] }
 0xcfa   : > { %v6504_v63 = vld [vmem:[#allocation2 + $0x1060] sm:$0xff] }
 0xcfb   : > { %5338 = vmatpush.msrb.mxu3 %v11240_v61  ;;  %5358 = vmatpush.msrb.mxu0 %v10046_v4  ;;  %v6505_v4 = vld [vmem:[#allocation2 + $0x1050] sm:$0xff]  ;;  %v6510_v61 = vld [vmem:[#allocation2 + $0x1000] sm:$0xff] }
 0xcfd   : > { %5339 = vmatpush.msrb.mxu3 %v10037_v27  ;;  %5359 = vmatpush.msrb.mxu0 %v10052_v34  ;;  %v6503_v27 = vld [vmem:[#allocation2 + $0x1070] sm:$0xff]  ;;  %v6506_v34 = vld [vmem:[#allocation2 + $0x1040] sm:$0xff] }
 0xcff   : > { %5340 = vmatpush.msrb.mxu3 %v11241_v1  ;;  %5360 = vmatpush.msrb.mxu0 %v10058_v44  ;;  %v11266_v44 = vld [vmem:[#allocation34_spill] sm:$0xff]  ;;  %v11274_v1 = vld [vmem:[#allocation20_spill] sm:$0xff] }
 0xd01   : > { %5341 = vmatpush.msrb.mxu3 %v11242_v55  ;;  %5361 = vmatpush.msrb.mxu0 %v10064_v7  ;;  %v11267_v7 = vld [vmem:[#allocation35_spill] sm:$0xff] }
 0xd03   : > { %5342 = vmatpush.msrb.mxu3 %v10055_v12  ;;  %5362 = vmatpush.msrb.mxu0 %v10070_v42  ;;  %v11268_v42 = vld [vmem:[#allocation33_spill] sm:$0xff]  ;;  %v6507_v12 = vld [vmem:[#allocation2 + $0x1030] sm:$0xff] }
 0xd05   : > { %5343 = vmatpush.msrb.mxu3 %v10061_v58  ;;  %5363 = vmatpush.msrb.mxu0 %v10076_v14  ;;  %v11269_v58 = vld [vmem:[#allocation32_spill] sm:$0xff]  ;;  %v11270_v14 = vld [vmem:[#allocation30_spill] sm:$0xff] }
 0xd07   : > { %5344 = vmatpush.msrb.mxu3 %v10067_v11  ;;  %5364 = vmatpush.msrb.mxu0 %v11264_v21  ;;  %v11271_v11 = vld [vmem:[#allocation36_spill] sm:$0xff] }
 0xd09   : > { %5345 = vmatpush.msrb.mxu3 %v10073_v52  ;;  %5365 = vmatpush.msrb.mxu0 %v11265_v29  ;;  %v11273_v52 = vld [vmem:[#allocation71_spill] sm:$0xff] }
 0xd0b   : > { %5346 = vmatpush.msrb.mxu3 %v10079_v17  ;;  %5366 = vmatpush.msrb.mxu0 %v11266_v44  ;;  %v6496_v17 = vld [vmem:[#allocation2 + $0x10e0] sm:$0xff]  ;;  %v5245_v44 = vpop.f32.mrf.mxu2 }
 0xd0d   : > { %5347 = vmatpush.msrb.mxu3 %v10085_v28  ;;  %5367 = vmatpush.msrb.mxu0 %v11267_v7  ;;  %v6498_v28 = vld [vmem:[#allocation2 + $0x10c0] sm:$0xff] }
 0xd0f   : > { %5348 = vmatpush.msrb.mxu3 %v11268_v42  ;;  %5368 = vmatpush.msrb.mxu0 %v11269_v58  ;;  %v11275_v58 = vld [vmem:[#allocation12_spill] sm:$0xff] }
 0xd11   : > { %5349 = vmatpush.msrb.mxu3 %v11270_v14  ;;  %5369 = vmatpush.msrb.mxu0 %v11271_v11  ;;  %v11276_v14 = vld [vmem:[#allocation16_spill] sm:$0xff] }
 0xd12   : > { %5350 = vmatmul.f32.vlgmr.msrb.gmra.mxu3 %v11272_v38  ;;  %5370 = vmatmul.f32.vlgmr.msrb.gmra.mxu0 %v11273_v52  ;;  %v6530_v52 = vld [vmem:[#allocation2 + $0x1068] sm:$0xff] }
 0xd13   : > { %5440 = vmatpush.msra.mxu0 %v6495_v32  ;;  %v6531_v32 = vld [vmem:[#allocation2 + $0x1150] sm:$0xff] }
 0xd15   : > { %5441 = vmatpush.msra.mxu0 %v6496_v17  ;;  %v6532_v17 = vld [vmem:[#allocation2 + $0x1058] sm:$0xff] }
 0xd17   : > { %5442 = vmatpush.msra.mxu0 %v6497_v53  ;;  %v6533_v53 = vld [vmem:[#allocation2 + $0x1140] sm:$0xff] }
 0xd19   : > { %5443 = vmatpush.msra.mxu0 %v6498_v28  ;;  %v6534_v28 = vld [vmem:[#allocation2 + $0x1048] sm:$0xff] }
 0xd1b   : > { %5444 = vmatpush.msra.mxu0 %v6499_v31  ;;  %v6535_v31 = vld [vmem:[#allocation2 + $0x1130] sm:$0xff] }
 0xd1d   : > { %5445 = vmatpush.msra.mxu0 %v6500_v8  ;;  %v6536_v8 = vld [vmem:[#allocation2 + $0x1038] sm:$0xff] }
 0xd1f   : > { %5446 = vmatpush.msra.mxu0 %v6501_v13  ;;  %v6537_v13 = vld [vmem:[#allocation2 + $0x1120] sm:$0xff] }
 0xd21   : > { %5447 = vmatpush.msra.mxu0 %v6502_v57  ;;  %v6538_v57 = vld [vmem:[#allocation2 + $0x1028] sm:$0xff] }
 0xd23   : > { %5448 = vmatpush.msra.mxu0 %v6503_v27  ;;  %v6539_v27 = vld [vmem:[#allocation2 + $0x1110] sm:$0xff] }
 0xd25   : > { %5449 = vmatpush.msra.mxu0 %v6504_v63  ;;  %v6540_v63 = vld [vmem:[#allocation2 + $0x1018] sm:$0xff] }
 0xd27   : > { %5450 = vmatpush.msra.mxu0 %v6505_v4  ;;  %v6541_v4 = vld [vmem:[#allocation2 + $0x1100] sm:$0xff] }
 0xd29   : > { %5451 = vmatpush.msra.mxu0 %v6506_v34  ;;  %v6542_v34 = vld [vmem:[#allocation2 + $0x1008] sm:$0xff] }
 0xd2b   : > { %5452 = vmatpush.msra.mxu0 %v6507_v12  ;;  %v11279_v12 = vld [vmem:[#allocation18_spill] sm:$0xff] }
 0xd2d   : > { %5453 = vmatpush.msra.mxu0 %v6508_v50 }
 0xd2f   : > { %5454 = vmatpush.msra.mxu0 %v6509_v24 }
 0xd31   : > { %5455 = vmatpush.msra.mxu0 %v6510_v61 }
 0xd32   : > { %5456 = vmatmul.f32.vlgmr.msra.gmra.mxu0 %v11274_v1 }
 0xd55   : > { %v5179_v55 = vpop.f32.mrf.mxu3 }
 0xd56   : > { %v5183_v60 = vmul.f32 %v5179_v55, %v8982_v51 }
 0xd58   : > { %v5185_v10 = vadd.f32 %v5183_v60, %v8986_v56 }
 0xd5a   : > { %v5187_v40 = vmax.f32 %v5185_v10, 0.0 }
 0xd5c   : > { %5810 = vst [vmem:[%s8992_s23 + $0xc8] sm:$0xff] %v5187_v40 }
 0xd6f   : > { %v5285_v15 = vpop.f32.mrf.mxu0 }
 0xd70   : > { %v5308_v59 = vmul.f32 %v5285_v15, %v8982_v51 }
 0xd72   : > { %v5310_v21 = vadd.f32 %v5308_v59, %v8986_v56 }
 0xd74   : > { %v5312_v29 = vmax.f32 %v5310_v21, 0.0  ;;  %v11280_v21 = vld [vmem:[#allocation75_spill] sm:$0xff] }
 0xd75   : > { %v5265_v7 = vpop.f32.mrf.mxu3 }
 0xd76   : > { %5811 = vst [vmem:[%s8992_s23 + $0xd0] sm:$0xff] %v5312_v29  ;;  %v10412_v42 = vadd.f32 %v5265_v7, %v5245_v44  ;;  %v11281_v44 = vld [vmem:[#allocation105_spill] sm:$0xff]  ;;  %v6544_v7 = vld [vmem:[#allocation2 + $0x11e8] sm:$0xff] }
 0xd78   : > { %5295 = vmatpush.msra.mxu1 %v10412_v42 }
 0xd7a   : > { %5296 = vmatpush.msra.mxu1 %v10324_v25 }
 0xd7c   : > { %5297 = vmatpush.msra.mxu1 %v10326_v3 }
 0xd7e   : > { %5298 = vmatpush.msra.mxu1 %v11275_v58 }
 0xd80   : > { %5299 = vmatpush.msra.mxu1 %v11255_v30 }
 0xd82   : > { %5300 = vmatpush.msra.mxu1 %v11256_v9  ;;  %v5331_v9 = vpop.f32.mrf.mxu2 }
 0xd84   : > { %5301 = vmatpush.msra.mxu1 %v11276_v14 }
 0xd86   : > { %5302 = vmatpush.msra.mxu1 %v11258_v0 }
 0xd88   : > { %5303 = vmatpush.msra.mxu1 %v11259_v62  ;;  %v6527_v62 = vld [vmem:[#allocation2 + $0x1170] sm:$0xff] }
 0xd89   : > { %5782 = vmatmul.msk.f32.vlgmr.msra.gmra.mxu1 %vm3614_vm1, %v10185_v49 }
 0xd8a   : > { %5374 = vmatpush.msrb.mxu1 %v10190_v33  ;;  %v11277_v33 = vld [vmem:[#allocation59_spill] sm:$0xff] }
 0xd8c   : > { %5375 = vmatpush.msrb.mxu1 %v11261_v46  ;;  %v6528_v46 = vld [vmem:[#allocation2 + $0x1078] sm:$0xff] }
 0xd8e   : > { %5376 = vmatpush.msrb.mxu1 %v10196_v22  ;;  %v11278_v22 = vld [vmem:[#allocation57_spill] sm:$0xff] }
 0xd8f   : > { %v5371_v60 = vpop.f32.mrf.mxu0 }
 0xd90   : > { %5377 = vmatpush.msrb.mxu1 %v10199_v16  ;;  %v6516_v16 = vld [vmem:[#allocation2 + $0x10d8] sm:$0xff] }
 0xd92   : > { %5378 = vmatpush.msrb.mxu1 %v10202_v26  ;;  %v6518_v26 = vld [vmem:[#allocation2 + $0x10c8] sm:$0xff] }
 0xd94   : > { %5379 = vmatpush.msrb.mxu1 %v10205_v45  ;;  %v6519_v45 = vld [vmem:[#allocation2 + $0x11b0] sm:$0xff] }
 0xd95   : > { %v5351_v3 = vpop.f32.mrf.mxu3 }
 0xd96   : > { %v10431_v11 = vadd.f32 %v5351_v3, %v5331_v9  ;;  %5380 = vmatpush.msrb.mxu1 %v10208_v18  ;;  %v6520_v18 = vld [vmem:[#allocation2 + $0x10b8] sm:$0xff]  ;;  %v6546_v3 = vld [vmem:[#allocation2 + $0x11c8] sm:$0xff] }
 0xd97   : > { %v6545_v9 = vld [vmem:[#allocation2 + $0x11d8] sm:$0xff] }
 0xd98   : > { %5381 = vmatpush.msrb.mxu1 %v10211_v47  ;;  %5401 = vmatpush.msrb.mxu2 %v10431_v11  ;;  %v6521_v47 = vld [vmem:[#allocation2 + $0x11a0] sm:$0xff] }
 0xd9a   : > { %5382 = vmatpush.msrb.mxu1 %v10214_v2  ;;  %5402 = vmatpush.msrb.mxu2 %v10347_v41  ;;  %v6522_v2 = vld [vmem:[#allocation2 + $0x10a8] sm:$0xff] }
 0xd9c   : > { %5383 = vmatpush.msrb.mxu1 %v10217_v36  ;;  %5403 = vmatpush.msrb.mxu2 %v10245_v6  ;;  %v6514_v6 = vld [vmem:[#allocation2 + $0x10e8] sm:$0xff]  ;;  %v6523_v36 = vld [vmem:[#allocation2 + $0x1190] sm:$0xff] }
 0xd9e   : > { %5384 = vmatpush.msrb.mxu1 %v10220_v35  ;;  %5404 = vmatpush.msrb.mxu2 %v11277_v33  ;;  %v6524_v35 = vld [vmem:[#allocation2 + $0x1098] sm:$0xff] }
 0xda0   : > { %5385 = vmatpush.msrb.mxu1 %v10223_v37  ;;  %5405 = vmatpush.msrb.mxu2 %v11262_v23  ;;  %v6512_v37 = vld [vmem:[#allocation2 + $0x10f8] sm:$0xff] }
 0xda2   : > { %5386 = vmatpush.msrb.mxu1 %v10226_v48  ;;  %5406 = vmatpush.msrb.mxu2 %v11234_v5  ;;  %v6511_v48 = vld [vmem:[#allocation2 + $0x11f0] sm:$0xff]  ;;  %v6525_v5 = vld [vmem:[#allocation2 + $0x1180] sm:$0xff] }
 0xda4   : > { %5387 = vmatpush.msrb.mxu1 %v10229_v20  ;;  %5407 = vmatpush.msrb.mxu2 %v11278_v22  ;;  %v6513_v20 = vld [vmem:[#allocation2 + $0x11e0] sm:$0xff] }
 0xda6   : > { %5388 = vmatpush.msrb.mxu1 %v10232_v54  ;;  %5408 = vmatpush.msrb.mxu2 %v11263_v43  ;;  %v6515_v54 = vld [vmem:[#allocation2 + $0x11d0] sm:$0xff] }
 0xda8   : > { %5389 = vmatpush.msrb.mxu1 %v10235_v19  ;;  %5409 = vmatpush.msrb.mxu2 %v11237_v39  ;;  %v6517_v19 = vld [vmem:[#allocation2 + $0x11c0] sm:$0xff]  ;;  %v6526_v39 = vld [vmem:[#allocation2 + $0x1088] sm:$0xff] }
 0xda9   : > { %5390 = vmatmul.f32.vlgmr.msrb.gmra.mxu1 %v11272_v38  ;;  %5783 = vmatmul.msk.f32.vlgmr.msrb.gmra.mxu2 %vm3614_vm1, %v10185_v49  ;;  %v6529_v38 = vld [vmem:[#allocation2 + $0x1160] sm:$0xff] }
 0xdaa   : > { %5460 = vmatpush.msra.mxu1 %v6511_v48  ;;  %5480 = vmatpush.msra.mxu2 %v6512_v37  ;;  %v6547_v48 = vld [vmem:[#allocation2 + $0x11b8] sm:$0xff] }
 0xdac   : > { %5461 = vmatpush.msra.mxu1 %v6513_v20  ;;  %5481 = vmatpush.msra.mxu2 %v6514_v6 }
 0xdae   : > { %5462 = vmatpush.msra.mxu1 %v6515_v54  ;;  %5482 = vmatpush.msra.mxu2 %v6516_v16  ;;  %v6549_v54 = vld [vmem:[#allocation2 + $0x1198] sm:$0xff] }
 0xdaf   : > { %v5457_v37 = vpop.f32.mrf.mxu0  ;;  %v6551_v16 = vld [vmem:[#allocation2 + $0x1178] sm:$0xff] }
 0xdb0   : > { %5463 = vmatpush.msra.mxu1 %v6517_v19  ;;  %5483 = vmatpush.msra.mxu2 %v6518_v26  ;;  %v6552_v19 = vld [vmem:[#allocation2 + $0x1168] sm:$0xff]  ;;  %v6553_v26 = vld [vmem:[#allocation2 + $0x1158] sm:$0xff] }
 0xdb2   : > { %5464 = vmatpush.msra.mxu1 %v6519_v45  ;;  %5484 = vmatpush.msra.mxu2 %v6520_v18  ;;  %v11282_v45 = vld [vmem:[#allocation27_spill] sm:$0xff]  ;;  %v6554_v18 = vld [vmem:[#allocation2 + $0x1148] sm:$0xff] }
 0xdb4   : > { %5465 = vmatpush.msra.mxu1 %v6521_v47  ;;  %5485 = vmatpush.msra.mxu2 %v6522_v2  ;;  %v6555_v47 = vld [vmem:[#allocation2 + $0x1138] sm:$0xff]  ;;  %v6556_v2 = vld [vmem:[#allocation2 + $0x1128] sm:$0xff] }
 0xdb6   : > { %5466 = vmatpush.msra.mxu1 %v6523_v36  ;;  %5486 = vmatpush.msra.mxu2 %v6524_v35  ;;  %v6557_v36 = vld [vmem:[#allocation2 + $0x1118] sm:$0xff] }
 0xdb8   : > { %5467 = vmatpush.msra.mxu1 %v6525_v5  ;;  %5487 = vmatpush.msra.mxu2 %v6526_v39 }
 0xdba   : > { %5468 = vmatpush.msra.mxu1 %v6527_v62  ;;  %5488 = vmatpush.msra.mxu2 %v6528_v46 }
 0xdbc   : > { %5469 = vmatpush.msra.mxu1 %v6529_v38  ;;  %5489 = vmatpush.msra.mxu2 %v6530_v52 }
 0xdbe   : > { %5470 = vmatpush.msra.mxu1 %v6531_v32  ;;  %5490 = vmatpush.msra.mxu2 %v6532_v17  ;;  %v11284_v32 = vld [vmem:[#allocation37_spill] sm:$0xff]  ;;  %v11285_v17 = vld [vmem:[#allocation7_spill] sm:$0xff] }
 0xdc0   : > { %5471 = vmatpush.msra.mxu1 %v6533_v53  ;;  %5491 = vmatpush.msra.mxu2 %v6534_v28 }
 0xdc2   : > { %5472 = vmatpush.msra.mxu1 %v6535_v31  ;;  %5492 = vmatpush.msra.mxu2 %v6536_v8 }
 0xdc4   : > { %5473 = vmatpush.msra.mxu1 %v6537_v13  ;;  %5493 = vmatpush.msra.mxu2 %v6538_v57 }
 0xdc6   : > { %5474 = vmatpush.msra.mxu1 %v6539_v27  ;;  %5494 = vmatpush.msra.mxu2 %v6540_v63 }
 0xdc8   : > { %5475 = vmatpush.msra.mxu1 %v6541_v4  ;;  %5495 = vmatpush.msra.mxu2 %v6542_v34 }
 0xdc9   : > { %5476 = vmatmul.f32.vlgmr.msra.gmra.mxu1 %v11279_v12  ;;  %5496 = vmatmul.f32.vlgmr.msra.gmra.mxu2 %v11274_v1 }
 0xe06   : > { %v5305_v50 = vpop.f32.mrf.mxu1 }
 0xe07   : > { %v5309_v24 = vmul.f32 %v5305_v50, %v8982_v51 }
 0xe09   : > { %v5311_v61 = vadd.f32 %v5309_v24, %v8986_v56 }
 0xe0b   : > { %v5313_v55 = vmax.f32 %v5311_v61, 0.0 }
 0xe0d   : > { %5812 = vst [vmem:[%s8992_s23 + $0xd8] sm:$0xff] %v5313_v55 }
 0xe26   : > { %v5391_v10 = vpop.f32.mrf.mxu1 }
 0xe27   : > { %v10460_v40 = vadd.f32 %v5391_v10, %v5371_v60 }
 0xe29   : > { %5421 = vmatpush.msra.mxu3 %v10460_v40 }
 0xe2b   : > { %5422 = vmatpush.msra.mxu3 %v10412_v42 }
 0xe2c   : > { %v5411_v15 = vpop.f32.mrf.mxu2 }
 0xe2d   : > { %v5434_v59 = vmul.f32 %v5411_v15, %v8982_v51  ;;  %5423 = vmatpush.msra.mxu3 %v10324_v25  ;;  %v6543_v25 = vld [vmem:[#allocation2 + $0x11f8] sm:$0xff] }
 0xe2f   : > { %v5436_v1 = vadd.f32 %v5434_v59, %v8986_v56  ;;  %5424 = vmatpush.msra.mxu3 %v11280_v21 }
 0xe31   : > { %v5438_v29 = vmax.f32 %v5436_v1, 0.0  ;;  %5425 = vmatpush.msra.mxu3 %v11275_v58 }
 0xe33   : > { %5813 = vst [vmem:[%s8992_s23 + $0xe0] sm:$0xff] %v5438_v29  ;;  %5426 = vmatpush.msra.mxu3 %v11255_v30  ;;  %v6548_v30 = vld [vmem:[#allocation2 + $0x11a8] sm:$0xff] }
 0xe35   : > { %5427 = vmatpush.msra.mxu3 %v11281_v44 }
 0xe37   : > { %5428 = vmatpush.msra.mxu3 %v11276_v14 }
 0xe39   : > { %5429 = vmatpush.msra.mxu3 %v11258_v0  ;;  %v6550_v0 = vld [vmem:[#allocation2 + $0x1188] sm:$0xff] }
 0xe3a   : > { %5784 = vmatmul.msk.f32.vlgmr.msra.gmra.mxu3 %vm3614_vm1, %v10185_v49 }
 0xe3b   : > { %5500 = vmatpush.msrb.mxu3 %v6543_v25 }
 0xe3d   : > { %5501 = vmatpush.msrb.mxu3 %v6544_v7 }
 0xe3f   : > { %5502 = vmatpush.msrb.mxu3 %v6545_v9 }
 0xe41   : > { %5503 = vmatpush.msrb.mxu3 %v6546_v3 }
 0xe43   : > { %5504 = vmatpush.msrb.mxu3 %v6547_v48 }
 0xe45   : > { %5505 = vmatpush.msrb.mxu3 %v6548_v30 }
 0xe46   : > { %v5477_v20 = vpop.f32.mrf.mxu1 }
 0xe47   : > { %v5478_v6 = vadd.f32 %v5477_v20, %v5457_v37  ;;  %5506 = vmatpush.msrb.mxu3 %v6549_v54 }
 0xe49   : > { %5507 = vmatpush.msrb.mxu3 %v6550_v0  ;;  %5527 = vmatpush.msrb.mxu0 %v5478_v6 }
 0xe4b   : > { %5508 = vmatpush.msrb.mxu3 %v6551_v16  ;;  %5528 = vmatpush.msrb.mxu0 %v10431_v11  ;;  %v11283_v11 = vld [vmem:[#allocation15_spill] sm:$0xff] }
 0xe4c   : > { %v5497_v38 = vpop.f32.mrf.mxu2 }
 0xe4d   : > { %5509 = vmatpush.msrb.mxu3 %v6552_v19  ;;  %5529 = vmatpush.msrb.mxu0 %v10347_v41  ;;  %v6558_v41 = vld [vmem:[#allocation2 + $0x1108] sm:$0xff] }
 0xe4f   : > { %5510 = vmatpush.msrb.mxu3 %v6553_v26  ;;  %5530 = vmatpush.msrb.mxu0 %v11282_v45 }
 0xe51   : > { %5511 = vmatpush.msrb.mxu3 %v6554_v18  ;;  %5531 = vmatpush.msrb.mxu0 %v11277_v33 }
 0xe53   : > { %5512 = vmatpush.msrb.mxu3 %v6555_v47  ;;  %5532 = vmatpush.msrb.mxu0 %v11262_v23 }
 0xe55   : > { %5513 = vmatpush.msrb.mxu3 %v6556_v2  ;;  %5533 = vmatpush.msrb.mxu0 %v11283_v11 }
 0xe57   : > { %5514 = vmatpush.msrb.mxu3 %v6557_v36  ;;  %5534 = vmatpush.msrb.mxu0 %v11278_v22 }
 0xe59   : > { %5515 = vmatpush.msrb.mxu3 %v6558_v41  ;;  %5535 = vmatpush.msrb.mxu0 %v11263_v43 }
 0xe5a   : > { %5516 = vmatmul.f32.vlgmr.msrb.gmra.mxu3 %v11279_v12  ;;  %5785 = vmatmul.msk.f32.vlgmr.msrb.gmra.mxu0 %vm3614_vm1, %v10185_v49 }
 0xebd   : > { %v5431_v23 = vpop.f32.mrf.mxu3 }
 0xebe   : > { %v5435_v33 = vmul.f32 %v5431_v23, %v8982_v51 }
 0xec0   : > { %v5437_v35 = vadd.f32 %v5435_v33, %v8986_v56 }
 0xec2   : > { %v5439_v5 = vmax.f32 %v5437_v35, 0.0 }
 0xec4   : > { %5814 = vst [vmem:[%s8992_s23 + $0xe8] sm:$0xff] %v5439_v5 }
 0xed7   : > { %v5537_v39 = vpop.f32.mrf.mxu0 }
 0xed8   : > { %v5560_v22 = vmul.f32 %v5537_v39, %v8982_v51 }
 0xeda   : > { %v5562_v62 = vadd.f32 %v5560_v22, %v8986_v56 }
 0xedc   : > { %v5564_v46 = vmax.f32 %v5562_v62, 0.0 }
 0xedd   : > { %v5517_v43 = vpop.f32.mrf.mxu3 }
 0xede   : > { %5815 = vst [vmem:[%s8992_s23 + $0xf0] sm:$0xff] %v5564_v46  ;;  %v5518_v52 = vadd.f32 %v5517_v43, %v5497_v38 }
 0xee0   : > { %5547 = vmatpush.msrb.mxu1 %v5518_v52 }
 0xee2   : > { %5548 = vmatpush.msrb.mxu1 %v10460_v40 }
 0xee4   : > { %5549 = vmatpush.msrb.mxu1 %v10412_v42 }
 0xee6   : > { %5550 = vmatpush.msrb.mxu1 %v11284_v32 }
 0xee8   : > { %5551 = vmatpush.msrb.mxu1 %v11280_v21 }
 0xeea   : > { %5552 = vmatpush.msrb.mxu1 %v11275_v58 }
 0xeec   : > { %5553 = vmatpush.msrb.mxu1 %v11285_v17 }
 0xeee   : > { %5554 = vmatpush.msrb.mxu1 %v11281_v44 }
 0xef0   : > { %5555 = vmatpush.msrb.mxu1 %v11276_v14 }
 0xef1   : > { %5786 = vmatmul.msk.f32.vlgmr.msrb.gmra.mxu1 %vm3614_vm1, %v10185_v49 }
 0xf6e   : > { %v5557_v53 = vpop.f32.mrf.mxu1 }
 0xf6f   : > { %v5561_v28 = vmul.f32 %v5557_v53, %v8982_v51 }
 0xf71   : > { %v5563_v42 = vadd.f32 %v5561_v28, %v8986_v56 }
 0xf73   : > { %v5565_v31 = vmax.f32 %v5563_v42, 0.0 }
 0xf75   : > { %5816 = vst [vmem:[%s8992_s23 + $0xf8] sm:$0xff] %v5565_v31 }
 0xf76 PF: > { %s25_s29 = sadd.s32 1, %s6599_s29  }
 0xf77   : > { %p22_p7 = scmp.ge.s32.totalorder %s25_s29, 4  }
 0xf79   :  { %24 = sbr.rel (!%p22_p7) target bundleno = 1 (0x1), region = 133 }
 0xf7e   :  { %5634 = vsyncpa [#allocation3], 1 }
 0xf7f   :  { %5636 = vsyncpa [#allocation3 + $0x1], 1 }

</bundles_post_ra>
